<compile_context>
chip_gen: v7x
topology: tpu7x:2x2x1
jax: 0.10.0
libtpu: 0.0.40
codegen_flags: <defaults>
</compile_context>

<pallas_src>
import functools

import jax
import jax.numpy as jnp
from jax.experimental import pallas as pl
from jax.experimental.pallas import tpu as pltpu


_TAPS = tuple((kh, kw) for kh in range(3) for kw in range(3))


# ------------------------------ fused kernel --------------------------------

def _refine_kernel(x_ref,
                   w_in_ref, b_in_ref,
                   w_p1_ref, b_p1_ref,
                   w_p2_ref, b_p2_ref,
                   w_du1_ref, b_du1_ref,
                   w_du2_ref, b_du2_ref,
                   w_last_ref, b_last_ref,
                   o_ref,
                   pad_ref, patch_ref,
                   *, H, W, C, Cout):
    # pad_ref   : VMEM (H+2, W+2, C) f32   -- zero-padded activation (reused per conv)
    # patch_ref : VMEM (H*W, 9*C)    f32   -- im2col patch matrix (reused per conv)

    # Zero the padded scratch once per grid step; every conv only rewrites the
    # interior, so the zero border provides the 'same' padding for all 4 convs.
    pad_ref[...] = jnp.zeros_like(pad_ref)

    def conv3x3(act_hwc, w_ref, b_ref, relu):
        """act_hwc: (H, W, C) f32 value -> (H*W, Cout_conv) f32 value."""
        # in-kernel padding: write interior of the pre-zeroed pad scratch.
        pad_ref[1:H + 1, 1:W + 1, :] = act_hwc
        # im2col: 9 shifted windows packed side-by-side along lanes -> K = 9*C.
        for t, (kh, kw) in enumerate(_TAPS):
            win = pad_ref[kh:kh + H, kw:kw + W, :]                 # (H, W, C)
            patch_ref[:, t * C:(t + 1) * C] = win.reshape(H * W, C)
        # Single MXU matmul, bf16 operands, f32 accumulation.
        out = jnp.dot(patch_ref[...].astype(jnp.bfloat16), w_ref[...],
                      preferred_element_type=jnp.float32)
        out = out + b_ref[...]                                     # (H*W, Cout_conv)
        if relu:
            out = jnp.maximum(out, 0.0)
        return out

    x = x_ref[0].astype(jnp.float32)                               # (H, W, C)

    # conv_in
    out1 = conv3x3(x, w_in_ref, b_in_ref, relu=False)              # (H*W, C)

    # ChannelAttention.process: conv3x3 -> ReLU -> conv3x3
    r = conv3x3(out1.reshape(H, W, C), w_p1_ref, b_p1_ref, relu=True)
    res = conv3x3(r.reshape(H, W, C), w_p2_ref, b_p2_ref, relu=False)

    # AdaptiveAvgPool2d(1) + conv_du (1x1 -> ReLU -> 1x1 -> Sigmoid), all on the
    # in-VMEM `res` value.
    y = jnp.mean(res, axis=0, keepdims=True)                       # (1, C)
    h = jnp.dot(y, w_du1_ref[...], preferred_element_type=jnp.float32)
    h = jnp.maximum(h + b_du1_ref[...], 0.0)                       # (1, C//r)
    z = jnp.dot(h, w_du2_ref[...], preferred_element_type=jnp.float32)
    z = jax.nn.sigmoid(z + b_du2_ref[...])                         # (1, C)

    # z * res + out1 (channel gate + residual)
    ca = z * res + out1                                            # (H*W, C)

    # conv_last
    out = conv3x3(ca.reshape(H, W, C), w_last_ref, b_last_ref, relu=False)
    o_ref[...] = out.reshape(1, H, W, Cout).astype(o_ref.dtype)


# --------------------------------- wrapper ----------------------------------

@jax.jit
def refine_forward(params, x):
    # x: (B, H, W, n_feat) NHWC
    B, H, W, C = x.shape
    Cout = params["w_last"].shape[-1]
    Cr = params["w_du1"].shape[-1]

    def w2d(w):
        # (3, 3, Cin, Cout) -> (9*Cin, Cout) bf16, row order = (kh*3 + kw)*Cin + cin
        kh, kw, cin, cout = w.shape
        return w.reshape(kh * kw * cin, cout).astype(jnp.bfloat16)

    def b2d(b):
        return b.reshape(1, -1).astype(jnp.float32)

    def full(shape):
        return pl.BlockSpec(shape, lambda b, _s=shape: (0,) * len(_s))

    kernel = functools.partial(_refine_kernel, H=H, W=W, C=C, Cout=Cout)

    return pl.pallas_call(
        kernel,
        out_shape=jax.ShapeDtypeStruct((B, H, W, Cout), x.dtype),
        grid=(B,),
        in_specs=[
            pl.BlockSpec((1, H, W, C), lambda b: (b, 0, 0, 0)),     # x (per-batch tile)
            full((9 * C, C)), full((1, C)),                          # conv_in
            full((9 * C, C)), full((1, C)),                          # process conv 1
            full((9 * C, C)), full((1, C)),                          # process conv 2
            full((C, Cr)), full((1, Cr)),                            # conv_du 1x1 #1
            full((Cr, C)), full((1, C)),                             # conv_du 1x1 #2
            full((9 * C, Cout)), full((1, Cout)),                    # conv_last
        ],
        out_specs=pl.BlockSpec((1, H, W, Cout), lambda b: (b, 0, 0, 0)),
        scratch_shapes=[
            pltpu.VMEM((H + 2, W + 2, C), jnp.float32),              # padded activation
            pltpu.VMEM((H * W, 9 * C), jnp.float32),                 # im2col patch matrix
        ],
        compiler_params=pltpu.CompilerParams(
            dimension_semantics=("parallel",),                       # shard batch over TCs
        ),
    )(
        x,
        w2d(params["w_in"]), b2d(params["b_in"]),
        w2d(params["w_p1"]), b2d(params["b_p1"]),
        w2d(params["w_p2"]), b2d(params["b_p2"]),
        params["w_du1"].astype(jnp.float32), b2d(params["b_du1"]),
        params["w_du2"].astype(jnp.float32), b2d(params["b_du2"]),
        w2d(params["w_last"]), b2d(params["b_last"]),
    )


# ------------------------------ initialization -------------------------------

def init_refine_params(key, n_feat, out_channel, reduction=4):
    ks = jax.random.split(key, 12)
    cr = n_feat // reduction

    def conv_w(k, cin, cout, kh=3, kw=3):
        scale = 1.0 / jnp.sqrt(cin * kh * kw)
        return jax.random.uniform(k, (kh, kw, cin, cout), jnp.float32, -scale, scale)

    def conv_b(k, cin, cout, kh=3, kw=3):
        scale = 1.0 / jnp.sqrt(cin * kh * kw)
        return jax.random.uniform(k, (cout,), jnp.float32, -scale, scale)

    return {
        # conv_in
        "w_in": conv_w(ks[0], n_feat, n_feat), "b_in": conv_b(ks[1], n_feat, n_feat),
        # ChannelAttention.process (two 3x3 convs)
        "w_p1": conv_w(ks[2], n_feat, n_feat), "b_p1": conv_b(ks[3], n_feat, n_feat),
        "w_p2": conv_w(ks[4], n_feat, n_feat), "b_p2": conv_b(ks[5], n_feat, n_feat),
        # ChannelAttention.conv_du (two 1x1 convs, stored as matmul weights)
        "w_du1": conv_w(ks[6], n_feat, cr, 1, 1)[0, 0],
        "b_du1": conv_b(ks[7], n_feat, cr, 1, 1),
        "w_du2": conv_w(ks[8], cr, n_feat, 1, 1)[0, 0],
        "b_du2": conv_b(ks[9], cr, n_feat, 1, 1),
        # conv_last
        "w_last": conv_w(ks[10], n_feat, out_channel),
        "b_last": conv_b(ks[11], n_feat, out_channel),
    }


if __name__ == "__main__":
    key = jax.random.PRNGKey(0)
    k_x, k_p = jax.random.split(key)

    B, H, W = 2, 16, 16
    n_feat, out_channel = 16, 8

    # layout: NHWC input (PyTorch reference would be NCHW (B, n_feat, H, W))
    x = jax.random.normal(k_x, (B, H, W, n_feat), jnp.float32)
    params = init_refine_params(k_p, n_feat, out_channel)

    out = refine_forward(params, x)
    jax.block_until_ready(out)
    assert out.shape == (B, H, W, out_channel)
    print("KERNEL_OK")
</pallas_src>

<mosaic_0001>
module attributes {stable_mosaic.version = 11 : i64} {
  func.func @_refine_kernel(%arg0: i32, %arg1: memref<1x16x16x16xf32, #tpu.memory_space<vmem>>, %arg2: memref<144x16xbf16, #tpu.memory_space<vmem>>, %arg3: memref<1x16xf32, #tpu.memory_space<vmem>>, %arg4: memref<144x16xbf16, #tpu.memory_space<vmem>>, %arg5: memref<1x16xf32, #tpu.memory_space<vmem>>, %arg6: memref<144x16xbf16, #tpu.memory_space<vmem>>, %arg7: memref<1x16xf32, #tpu.memory_space<vmem>>, %arg8: memref<16x4xf32, #tpu.memory_space<vmem>>, %arg9: memref<1x4xf32, #tpu.memory_space<vmem>>, %arg10: memref<4x16xf32, #tpu.memory_space<vmem>>, %arg11: memref<1x16xf32, #tpu.memory_space<vmem>>, %arg12: memref<144x8xbf16, #tpu.memory_space<vmem>>, %arg13: memref<1x8xf32, #tpu.memory_space<vmem>>, %arg14: memref<1x16x16x8xf32, #tpu.memory_space<vmem>>, %arg15: memref<18x18x16xf32, #tpu.memory_space<vmem>>, %arg16: memref<256x144xf32, #tpu.memory_space<vmem>>) attributes {dimension_semantics = [#tpu.dimension_semantics<parallel>], iteration_bounds = array<i64: 2>, scalar_prefetch = 0 : i64, scratch_operands = 2 : i64, tpu.core_type = #tpu.core_type<tc>, window_params = [{transform_indices = @transform_0, window_bounds = array<i64: 1, 16, 16, 16>}, {pipeline_mode = #tpu.pipeline_mode<synchronous>, transform_indices = @transform_1, window_bounds = array<i64: 144, 16>}, {pipeline_mode = #tpu.pipeline_mode<synchronous>, transform_indices = @transform_2, window_bounds = array<i64: 1, 16>}, {pipeline_mode = #tpu.pipeline_mode<synchronous>, transform_indices = @transform_3, window_bounds = array<i64: 144, 16>}, {pipeline_mode = #tpu.pipeline_mode<synchronous>, transform_indices = @transform_4, window_bounds = array<i64: 1, 16>}, {pipeline_mode = #tpu.pipeline_mode<synchronous>, transform_indices = @transform_5, window_bounds = array<i64: 144, 16>}, {pipeline_mode = #tpu.pipeline_mode<synchronous>, transform_indices = @transform_6, window_bounds = array<i64: 1, 16>}, {pipeline_mode = #tpu.pipeline_mode<synchronous>, transform_indices = @transform_7, window_bounds = array<i64: 16, 4>}, {pipeline_mode = #tpu.pipeline_mode<synchronous>, transform_indices = @transform_8, window_bounds = array<i64: 1, 4>}, {pipeline_mode = #tpu.pipeline_mode<synchronous>, transform_indices = @transform_9, window_bounds = array<i64: 4, 16>}, {pipeline_mode = #tpu.pipeline_mode<synchronous>, transform_indices = @transform_10, window_bounds = array<i64: 1, 16>}, {pipeline_mode = #tpu.pipeline_mode<synchronous>, transform_indices = @transform_11, window_bounds = array<i64: 144, 8>}, {pipeline_mode = #tpu.pipeline_mode<synchronous>, transform_indices = @transform_12, window_bounds = array<i64: 1, 8>}, {transform_indices = @transform_13, window_bounds = array<i64: 1, 16, 16, 8>}]} {
    %cst = arith.constant 0.000000e+00 : f32
    %0 = vector.broadcast %cst : f32 to vector<18x18x16xf32>
    %c0 = arith.constant 0 : index
    %c0_0 = arith.constant 0 : index
    %c0_1 = arith.constant 0 : index
    %1 = vector.load %arg15[%c0, %c0_0, %c0_1] : memref<18x18x16xf32, #tpu.memory_space<vmem>>, vector<18x18x16xf32>
    tpu.vector_store %arg15[%c0, %c0_0, %c0_1], %0 {strides = array<i32>} : memref<18x18x16xf32, #tpu.memory_space<vmem>>, vector<18x18x16xf32>,
    %c0_2 = arith.constant 0 : index
    %c0_3 = arith.constant 0 : index
    %c0_4 = arith.constant 0 : index
    %c0_5 = arith.constant 0 : index
    %2 = vector.load %arg1[%c0_2, %c0_3, %c0_4, %c0_5] : memref<1x16x16x16xf32, #tpu.memory_space<vmem>>, vector<1x16x16x16xf32>
    %3 = vector.shape_cast %2 : vector<1x16x16x16xf32> to vector<16x16x16xf32>
    %c1 = arith.constant 1 : index
    %c1_6 = arith.constant 1 : index
    %c0_7 = arith.constant 0 : index
    %4 = vector.load %arg15[%c1, %c1_6, %c0_7] : memref<18x18x16xf32, #tpu.memory_space<vmem>>, vector<16x16x16xf32>
    tpu.vector_store %arg15[%c1, %c1_6, %c0_7], %3 {strides = array<i32>} : memref<18x18x16xf32, #tpu.memory_space<vmem>>, vector<16x16x16xf32>,
    %c0_8 = arith.constant 0 : index
    %c0_9 = arith.constant 0 : index
    %c0_10 = arith.constant 0 : index
    %5 = vector.load %arg15[%c0_8, %c0_9, %c0_10] : memref<18x18x16xf32, #tpu.memory_space<vmem>>, vector<16x16x16xf32>
    %6 = vector.shape_cast %5 : vector<16x16x16xf32> to vector<256x16xf32>
    %c0_11 = arith.constant 0 : index
    %c0_12 = arith.constant 0 : index
    %7 = vector.load %arg16[%c0_11, %c0_12] : memref<256x144xf32, #tpu.memory_space<vmem>>, vector<256x16xf32>
    tpu.vector_store %arg16[%c0_11, %c0_12], %6 {strides = array<i32>} : memref<256x144xf32, #tpu.memory_space<vmem>>, vector<256x16xf32>,
    %c0_13 = arith.constant 0 : index
    %c1_14 = arith.constant 1 : index
    %c0_15 = arith.constant 0 : index
    %8 = vector.load %arg15[%c0_13, %c1_14, %c0_15] : memref<18x18x16xf32, #tpu.memory_space<vmem>>, vector<16x16x16xf32>
    %9 = vector.shape_cast %8 : vector<16x16x16xf32> to vector<256x16xf32>
    %c0_16 = arith.constant 0 : index
    %c16 = arith.constant 16 : index
    %10 = vector.load %arg16[%c0_16, %c16] : memref<256x144xf32, #tpu.memory_space<vmem>>, vector<256x16xf32>
    tpu.vector_store %arg16[%c0_16, %c16], %9 {strides = array<i32>} : memref<256x144xf32, #tpu.memory_space<vmem>>, vector<256x16xf32>,
    %c0_17 = arith.constant 0 : index
    %c2 = arith.constant 2 : index
    %c0_18 = arith.constant 0 : index
    %11 = vector.load %arg15[%c0_17, %c2, %c0_18] : memref<18x18x16xf32, #tpu.memory_space<vmem>>, vector<16x16x16xf32>
    %12 = vector.shape_cast %11 : vector<16x16x16xf32> to vector<256x16xf32>
    %c0_19 = arith.constant 0 : index
    %c32 = arith.constant 32 : index
    %13 = vector.load %arg16[%c0_19, %c32] : memref<256x144xf32, #tpu.memory_space<vmem>>, vector<256x16xf32>
    tpu.vector_store %arg16[%c0_19, %c32], %12 {strides = array<i32>} : memref<256x144xf32, #tpu.memory_space<vmem>>, vector<256x16xf32>,
    %c1_20 = arith.constant 1 : index
    %c0_21 = arith.constant 0 : index
    %c0_22 = arith.constant 0 : index
    %14 = vector.load %arg15[%c1_20, %c0_21, %c0_22] : memref<18x18x16xf32, #tpu.memory_space<vmem>>, vector<16x16x16xf32>
    %15 = vector.shape_cast %14 : vector<16x16x16xf32> to vector<256x16xf32>
    %c0_23 = arith.constant 0 : index
    %c48 = arith.constant 48 : index
    %16 = vector.load %arg16[%c0_23, %c48] : memref<256x144xf32, #tpu.memory_space<vmem>>, vector<256x16xf32>
    tpu.vector_store %arg16[%c0_23, %c48], %15 {strides = array<i32>} : memref<256x144xf32, #tpu.memory_space<vmem>>, vector<256x16xf32>,
    %c1_24 = arith.constant 1 : index
    %c1_25 = arith.constant 1 : index
    %c0_26 = arith.constant 0 : index
    %17 = vector.load %arg15[%c1_24, %c1_25, %c0_26] : memref<18x18x16xf32, #tpu.memory_space<vmem>>, vector<16x16x16xf32>
    %18 = vector.shape_cast %17 : vector<16x16x16xf32> to vector<256x16xf32>
    %c0_27 = arith.constant 0 : index
    %c64 = arith.constant 64 : index
    %19 = vector.load %arg16[%c0_27, %c64] : memref<256x144xf32, #tpu.memory_space<vmem>>, vector<256x16xf32>
    tpu.vector_store %arg16[%c0_27, %c64], %18 {strides = array<i32>} : memref<256x144xf32, #tpu.memory_space<vmem>>, vector<256x16xf32>,
    %c1_28 = arith.constant 1 : index
    %c2_29 = arith.constant 2 : index
    %c0_30 = arith.constant 0 : index
    %20 = vector.load %arg15[%c1_28, %c2_29, %c0_30] : memref<18x18x16xf32, #tpu.memory_space<vmem>>, vector<16x16x16xf32>
    %21 = vector.shape_cast %20 : vector<16x16x16xf32> to vector<256x16xf32>
    %c0_31 = arith.constant 0 : index
    %c80 = arith.constant 80 : index
    %22 = vector.load %arg16[%c0_31, %c80] : memref<256x144xf32, #tpu.memory_space<vmem>>, vector<256x16xf32>
    tpu.vector_store %arg16[%c0_31, %c80], %21 {strides = array<i32>} : memref<256x144xf32, #tpu.memory_space<vmem>>, vector<256x16xf32>,
    %c2_32 = arith.constant 2 : index
    %c0_33 = arith.constant 0 : index
    %c0_34 = arith.constant 0 : index
    %23 = vector.load %arg15[%c2_32, %c0_33, %c0_34] : memref<18x18x16xf32, #tpu.memory_space<vmem>>, vector<16x16x16xf32>
    %24 = vector.shape_cast %23 : vector<16x16x16xf32> to vector<256x16xf32>
    %c0_35 = arith.constant 0 : index
    %c96 = arith.constant 96 : index
    %25 = vector.load %arg16[%c0_35, %c96] : memref<256x144xf32, #tpu.memory_space<vmem>>, vector<256x16xf32>
    tpu.vector_store %arg16[%c0_35, %c96], %24 {strides = array<i32>} : memref<256x144xf32, #tpu.memory_space<vmem>>, vector<256x16xf32>,
    %c2_36 = arith.constant 2 : index
    %c1_37 = arith.constant 1 : index
    %c0_38 = arith.constant 0 : index
    %26 = vector.load %arg15[%c2_36, %c1_37, %c0_38] : memref<18x18x16xf32, #tpu.memory_space<vmem>>, vector<16x16x16xf32>
    %27 = vector.shape_cast %26 : vector<16x16x16xf32> to vector<256x16xf32>
    %c0_39 = arith.constant 0 : index
    %c112 = arith.constant 112 : index
    %28 = vector.load %arg16[%c0_39, %c112] : memref<256x144xf32, #tpu.memory_space<vmem>>, vector<256x16xf32>
    tpu.vector_store %arg16[%c0_39, %c112], %27 {strides = array<i32>} : memref<256x144xf32, #tpu.memory_space<vmem>>, vector<256x16xf32>,
    %c2_40 = arith.constant 2 : index
    %c2_41 = arith.constant 2 : index
    %c0_42 = arith.constant 0 : index
    %29 = vector.load %arg15[%c2_40, %c2_41, %c0_42] : memref<18x18x16xf32, #tpu.memory_space<vmem>>, vector<16x16x16xf32>
    %30 = vector.shape_cast %29 : vector<16x16x16xf32> to vector<256x16xf32>
    %c0_43 = arith.constant 0 : index
    %c128 = arith.constant 128 : index
    %31 = vector.load %arg16[%c0_43, %c128] : memref<256x144xf32, #tpu.memory_space<vmem>>, vector<256x16xf32>
    tpu.vector_store %arg16[%c0_43, %c128], %30 {strides = array<i32>} : memref<256x144xf32, #tpu.memory_space<vmem>>, vector<256x16xf32>,
    %c0_44 = arith.constant 0 : index
    %c0_45 = arith.constant 0 : index
    %32 = vector.load %arg16[%c0_44, %c0_45] : memref<256x144xf32, #tpu.memory_space<vmem>>, vector<256x144xf32>
    %33 = arith.truncf %32 : vector<256x144xf32> to vector<256x144xbf16>
    %c0_46 = arith.constant 0 : index
    %c0_47 = arith.constant 0 : index
    %34 = vector.load %arg2[%c0_46, %c0_47] : memref<144x16xbf16, #tpu.memory_space<vmem>>, vector<144x16xbf16>
    %cst_48 = arith.constant dense<0.000000e+00> : vector<256x16xf32>
    %35 = tpu.matmul %33, %34, %cst_48 {dimension_numbers = #tpu.dot_dimension_numbers<[1], [0], [0], [1], [0, 0, 1, 1], [], []>} : vector<256x144xbf16>, vector<144x16xbf16>, vector<256x16xf32> -> vector<256x16xf32>
    %c0_49 = arith.constant 0 : index
    %c0_50 = arith.constant 0 : index
    %36 = vector.load %arg3[%c0_49, %c0_50] : memref<1x16xf32, #tpu.memory_space<vmem>>, vector<1x16xf32>
    %37 = vector.broadcast %36 : vector<1x16xf32> to vector<256x16xf32>
    %38 = arith.addf %35, %37 : vector<256x16xf32>
    %39 = vector.shape_cast %38 : vector<256x16xf32> to vector<16x16x16xf32>
    %c1_51 = arith.constant 1 : index
    %c1_52 = arith.constant 1 : index
    %c0_53 = arith.constant 0 : index
    %40 = vector.load %arg15[%c1_51, %c1_52, %c0_53] : memref<18x18x16xf32, #tpu.memory_space<vmem>>, vector<16x16x16xf32>
    tpu.vector_store %arg15[%c1_51, %c1_52, %c0_53], %39 {strides = array<i32>} : memref<18x18x16xf32, #tpu.memory_space<vmem>>, vector<16x16x16xf32>,
    %c0_54 = arith.constant 0 : index
    %c0_55 = arith.constant 0 : index
    %c0_56 = arith.constant 0 : index
    %41 = vector.load %arg15[%c0_54, %c0_55, %c0_56] : memref<18x18x16xf32, #tpu.memory_space<vmem>>, vector<16x16x16xf32>
    %42 = vector.shape_cast %41 : vector<16x16x16xf32> to vector<256x16xf32>
    %c0_57 = arith.constant 0 : index
    %c0_58 = arith.constant 0 : index
    %43 = vector.load %arg16[%c0_57, %c0_58] : memref<256x144xf32, #tpu.memory_space<vmem>>, vector<256x16xf32>
    tpu.vector_store %arg16[%c0_57, %c0_58], %42 {strides = array<i32>} : memref<256x144xf32, #tpu.memory_space<vmem>>, vector<256x16xf32>,
    %c0_59 = arith.constant 0 : index
    %c1_60 = arith.constant 1 : index
    %c0_61 = arith.constant 0 : index
    %44 = vector.load %arg15[%c0_59, %c1_60, %c0_61] : memref<18x18x16xf32, #tpu.memory_space<vmem>>, vector<16x16x16xf32>
    %45 = vector.shape_cast %44 : vector<16x16x16xf32> to vector<256x16xf32>
    %c0_62 = arith.constant 0 : index
    %c16_63 = arith.constant 16 : index
    %46 = vector.load %arg16[%c0_62, %c16_63] : memref<256x144xf32, #tpu.memory_space<vmem>>, vector<256x16xf32>
    tpu.vector_store %arg16[%c0_62, %c16_63], %45 {strides = array<i32>} : memref<256x144xf32, #tpu.memory_space<vmem>>, vector<256x16xf32>,
    %c0_64 = arith.constant 0 : index
    %c2_65 = arith.constant 2 : index
    %c0_66 = arith.constant 0 : index
    %47 = vector.load %arg15[%c0_64, %c2_65, %c0_66] : memref<18x18x16xf32, #tpu.memory_space<vmem>>, vector<16x16x16xf32>
    %48 = vector.shape_cast %47 : vector<16x16x16xf32> to vector<256x16xf32>
    %c0_67 = arith.constant 0 : index
    %c32_68 = arith.constant 32 : index
    %49 = vector.load %arg16[%c0_67, %c32_68] : memref<256x144xf32, #tpu.memory_space<vmem>>, vector<256x16xf32>
    tpu.vector_store %arg16[%c0_67, %c32_68], %48 {strides = array<i32>} : memref<256x144xf32, #tpu.memory_space<vmem>>, vector<256x16xf32>,
    %c1_69 = arith.constant 1 : index
    %c0_70 = arith.constant 0 : index
    %c0_71 = arith.constant 0 : index
    %50 = vector.load %arg15[%c1_69, %c0_70, %c0_71] : memref<18x18x16xf32, #tpu.memory_space<vmem>>, vector<16x16x16xf32>
    %51 = vector.shape_cast %50 : vector<16x16x16xf32> to vector<256x16xf32>
    %c0_72 = arith.constant 0 : index
    %c48_73 = arith.constant 48 : index
    %52 = vector.load %arg16[%c0_72, %c48_73] : memref<256x144xf32, #tpu.memory_space<vmem>>, vector<256x16xf32>
    tpu.vector_store %arg16[%c0_72, %c48_73], %51 {strides = array<i32>} : memref<256x144xf32, #tpu.memory_space<vmem>>, vector<256x16xf32>,
    %c1_74 = arith.constant 1 : index
    %c1_75 = arith.constant 1 : index
    %c0_76 = arith.constant 0 : index
    %53 = vector.load %arg15[%c1_74, %c1_75, %c0_76] : memref<18x18x16xf32, #tpu.memory_space<vmem>>, vector<16x16x16xf32>
    %54 = vector.shape_cast %53 : vector<16x16x16xf32> to vector<256x16xf32>
    %c0_77 = arith.constant 0 : index
    %c64_78 = arith.constant 64 : index
    %55 = vector.load %arg16[%c0_77, %c64_78] : memref<256x144xf32, #tpu.memory_space<vmem>>, vector<256x16xf32>
    tpu.vector_store %arg16[%c0_77, %c64_78], %54 {strides = array<i32>} : memref<256x144xf32, #tpu.memory_space<vmem>>, vector<256x16xf32>,
    %c1_79 = arith.constant 1 : index
    %c2_80 = arith.constant 2 : index
    %c0_81 = arith.constant 0 : index
    %56 = vector.load %arg15[%c1_79, %c2_80, %c0_81] : memref<18x18x16xf32, #tpu.memory_space<vmem>>, vector<16x16x16xf32>
    %57 = vector.shape_cast %56 : vector<16x16x16xf32> to vector<256x16xf32>
    %c0_82 = arith.constant 0 : index
    %c80_83 = arith.constant 80 : index
    %58 = vector.load %arg16[%c0_82, %c80_83] : memref<256x144xf32, #tpu.memory_space<vmem>>, vector<256x16xf32>
    tpu.vector_store %arg16[%c0_82, %c80_83], %57 {strides = array<i32>} : memref<256x144xf32, #tpu.memory_space<vmem>>, vector<256x16xf32>,
    %c2_84 = arith.constant 2 : index
    %c0_85 = arith.constant 0 : index
    %c0_86 = arith.constant 0 : index
    %59 = vector.load %arg15[%c2_84, %c0_85, %c0_86] : memref<18x18x16xf32, #tpu.memory_space<vmem>>, vector<16x16x16xf32>
    %60 = vector.shape_cast %59 : vector<16x16x16xf32> to vector<256x16xf32>
    %c0_87 = arith.constant 0 : index
    %c96_88 = arith.constant 96 : index
    %61 = vector.load %arg16[%c0_87, %c96_88] : memref<256x144xf32, #tpu.memory_space<vmem>>, vector<256x16xf32>
    tpu.vector_store %arg16[%c0_87, %c96_88], %60 {strides = array<i32>} : memref<256x144xf32, #tpu.memory_space<vmem>>, vector<256x16xf32>,
    %c2_89 = arith.constant 2 : index
    %c1_90 = arith.constant 1 : index
    %c0_91 = arith.constant 0 : index
    %62 = vector.load %arg15[%c2_89, %c1_90, %c0_91] : memref<18x18x16xf32, #tpu.memory_space<vmem>>, vector<16x16x16xf32>
    %63 = vector.shape_cast %62 : vector<16x16x16xf32> to vector<256x16xf32>
    %c0_92 = arith.constant 0 : index
    %c112_93 = arith.constant 112 : index
    %64 = vector.load %arg16[%c0_92, %c112_93] : memref<256x144xf32, #tpu.memory_space<vmem>>, vector<256x16xf32>
    tpu.vector_store %arg16[%c0_92, %c112_93], %63 {strides = array<i32>} : memref<256x144xf32, #tpu.memory_space<vmem>>, vector<256x16xf32>,
    %c2_94 = arith.constant 2 : index
    %c2_95 = arith.constant 2 : index
    %c0_96 = arith.constant 0 : index
    %65 = vector.load %arg15[%c2_94, %c2_95, %c0_96] : memref<18x18x16xf32, #tpu.memory_space<vmem>>, vector<16x16x16xf32>
    %66 = vector.shape_cast %65 : vector<16x16x16xf32> to vector<256x16xf32>
    %c0_97 = arith.constant 0 : index
    %c128_98 = arith.constant 128 : index
    %67 = vector.load %arg16[%c0_97, %c128_98] : memref<256x144xf32, #tpu.memory_space<vmem>>, vector<256x16xf32>
    tpu.vector_store %arg16[%c0_97, %c128_98], %66 {strides = array<i32>} : memref<256x144xf32, #tpu.memory_space<vmem>>, vector<256x16xf32>,
    %c0_99 = arith.constant 0 : index
    %c0_100 = arith.constant 0 : index
    %68 = vector.load %arg16[%c0_99, %c0_100] : memref<256x144xf32, #tpu.memory_space<vmem>>, vector<256x144xf32>
    %69 = arith.truncf %68 : vector<256x144xf32> to vector<256x144xbf16>
    %c0_101 = arith.constant 0 : index
    %c0_102 = arith.constant 0 : index
    %70 = vector.load %arg4[%c0_101, %c0_102] : memref<144x16xbf16, #tpu.memory_space<vmem>>, vector<144x16xbf16>
    %cst_103 = arith.constant dense<0.000000e+00> : vector<256x16xf32>
    %71 = tpu.matmul %69, %70, %cst_103 {dimension_numbers = #tpu.dot_dimension_numbers<[1], [0], [0], [1], [0, 0, 1, 1], [], []>} : vector<256x144xbf16>, vector<144x16xbf16>, vector<256x16xf32> -> vector<256x16xf32>
    %c0_104 = arith.constant 0 : index
    %c0_105 = arith.constant 0 : index
    %72 = vector.load %arg5[%c0_104, %c0_105] : memref<1x16xf32, #tpu.memory_space<vmem>>, vector<1x16xf32>
    %73 = vector.broadcast %72 : vector<1x16xf32> to vector<256x16xf32>
    %74 = arith.addf %71, %73 : vector<256x16xf32>
    %cst_106 = arith.constant 0.000000e+00 : f32
    %75 = vector.broadcast %cst_106 : f32 to vector<256x16xf32>
    %76 = arith.maximumf %74, %75 : vector<256x16xf32>
    %77 = vector.shape_cast %76 : vector<256x16xf32> to vector<16x16x16xf32>
    %c1_107 = arith.constant 1 : index
    %c1_108 = arith.constant 1 : index
    %c0_109 = arith.constant 0 : index
    %78 = vector.load %arg15[%c1_107, %c1_108, %c0_109] : memref<18x18x16xf32, #tpu.memory_space<vmem>>, vector<16x16x16xf32>
    tpu.vector_store %arg15[%c1_107, %c1_108, %c0_109], %77 {strides = array<i32>} : memref<18x18x16xf32, #tpu.memory_space<vmem>>, vector<16x16x16xf32>,
    %c0_110 = arith.constant 0 : index
    %c0_111 = arith.constant 0 : index
    %c0_112 = arith.constant 0 : index
    %79 = vector.load %arg15[%c0_110, %c0_111, %c0_112] : memref<18x18x16xf32, #tpu.memory_space<vmem>>, vector<16x16x16xf32>
    %80 = vector.shape_cast %79 : vector<16x16x16xf32> to vector<256x16xf32>
    %c0_113 = arith.constant 0 : index
    %c0_114 = arith.constant 0 : index
    %81 = vector.load %arg16[%c0_113, %c0_114] : memref<256x144xf32, #tpu.memory_space<vmem>>, vector<256x16xf32>
    tpu.vector_store %arg16[%c0_113, %c0_114], %80 {strides = array<i32>} : memref<256x144xf32, #tpu.memory_space<vmem>>, vector<256x16xf32>,
    %c0_115 = arith.constant 0 : index
    %c1_116 = arith.constant 1 : index
    %c0_117 = arith.constant 0 : index
    %82 = vector.load %arg15[%c0_115, %c1_116, %c0_117] : memref<18x18x16xf32, #tpu.memory_space<vmem>>, vector<16x16x16xf32>
    %83 = vector.shape_cast %82 : vector<16x16x16xf32> to vector<256x16xf32>
    %c0_118 = arith.constant 0 : index
    %c16_119 = arith.constant 16 : index
    %84 = vector.load %arg16[%c0_118, %c16_119] : memref<256x144xf32, #tpu.memory_space<vmem>>, vector<256x16xf32>
    tpu.vector_store %arg16[%c0_118, %c16_119], %83 {strides = array<i32>} : memref<256x144xf32, #tpu.memory_space<vmem>>, vector<256x16xf32>,
    %c0_120 = arith.constant 0 : index
    %c2_121 = arith.constant 2 : index
    %c0_122 = arith.constant 0 : index
    %85 = vector.load %arg15[%c0_120, %c2_121, %c0_122] : memref<18x18x16xf32, #tpu.memory_space<vmem>>, vector<16x16x16xf32>
    %86 = vector.shape_cast %85 : vector<16x16x16xf32> to vector<256x16xf32>
    %c0_123 = arith.constant 0 : index
    %c32_124 = arith.constant 32 : index
    %87 = vector.load %arg16[%c0_123, %c32_124] : memref<256x144xf32, #tpu.memory_space<vmem>>, vector<256x16xf32>
    tpu.vector_store %arg16[%c0_123, %c32_124], %86 {strides = array<i32>} : memref<256x144xf32, #tpu.memory_space<vmem>>, vector<256x16xf32>,
    %c1_125 = arith.constant 1 : index
    %c0_126 = arith.constant 0 : index
    %c0_127 = arith.constant 0 : index
    %88 = vector.load %arg15[%c1_125, %c0_126, %c0_127] : memref<18x18x16xf32, #tpu.memory_space<vmem>>, vector<16x16x16xf32>
    %89 = vector.shape_cast %88 : vector<16x16x16xf32> to vector<256x16xf32>
    %c0_128 = arith.constant 0 : index
    %c48_129 = arith.constant 48 : index
    %90 = vector.load %arg16[%c0_128, %c48_129] : memref<256x144xf32, #tpu.memory_space<vmem>>, vector<256x16xf32>
    tpu.vector_store %arg16[%c0_128, %c48_129], %89 {strides = array<i32>} : memref<256x144xf32, #tpu.memory_space<vmem>>, vector<256x16xf32>,
    %c1_130 = arith.constant 1 : index
    %c1_131 = arith.constant 1 : index
    %c0_132 = arith.constant 0 : index
    %91 = vector.load %arg15[%c1_130, %c1_131, %c0_132] : memref<18x18x16xf32, #tpu.memory_space<vmem>>, vector<16x16x16xf32>
    %92 = vector.shape_cast %91 : vector<16x16x16xf32> to vector<256x16xf32>
    %c0_133 = arith.constant 0 : index
    %c64_134 = arith.constant 64 : index
    %93 = vector.load %arg16[%c0_133, %c64_134] : memref<256x144xf32, #tpu.memory_space<vmem>>, vector<256x16xf32>
    tpu.vector_store %arg16[%c0_133, %c64_134], %92 {strides = array<i32>} : memref<256x144xf32, #tpu.memory_space<vmem>>, vector<256x16xf32>,
    %c1_135 = arith.constant 1 : index
    %c2_136 = arith.constant 2 : index
    %c0_137 = arith.constant 0 : index
    %94 = vector.load %arg15[%c1_135, %c2_136, %c0_137] : memref<18x18x16xf32, #tpu.memory_space<vmem>>, vector<16x16x16xf32>
    %95 = vector.shape_cast %94 : vector<16x16x16xf32> to vector<256x16xf32>
    %c0_138 = arith.constant 0 : index
    %c80_139 = arith.constant 80 : index
    %96 = vector.load %arg16[%c0_138, %c80_139] : memref<256x144xf32, #tpu.memory_space<vmem>>, vector<256x16xf32>
    tpu.vector_store %arg16[%c0_138, %c80_139], %95 {strides = array<i32>} : memref<256x144xf32, #tpu.memory_space<vmem>>, vector<256x16xf32>,
    %c2_140 = arith.constant 2 : index
    %c0_141 = arith.constant 0 : index
    %c0_142 = arith.constant 0 : index
    %97 = vector.load %arg15[%c2_140, %c0_141, %c0_142] : memref<18x18x16xf32, #tpu.memory_space<vmem>>, vector<16x16x16xf32>
    %98 = vector.shape_cast %97 : vector<16x16x16xf32> to vector<256x16xf32>
    %c0_143 = arith.constant 0 : index
    %c96_144 = arith.constant 96 : index
    %99 = vector.load %arg16[%c0_143, %c96_144] : memref<256x144xf32, #tpu.memory_space<vmem>>, vector<256x16xf32>
    tpu.vector_store %arg16[%c0_143, %c96_144], %98 {strides = array<i32>} : memref<256x144xf32, #tpu.memory_space<vmem>>, vector<256x16xf32>,
    %c2_145 = arith.constant 2 : index
    %c1_146 = arith.constant 1 : index
    %c0_147 = arith.constant 0 : index
    %100 = vector.load %arg15[%c2_145, %c1_146, %c0_147] : memref<18x18x16xf32, #tpu.memory_space<vmem>>, vector<16x16x16xf32>
    %101 = vector.shape_cast %100 : vector<16x16x16xf32> to vector<256x16xf32>
    %c0_148 = arith.constant 0 : index
    %c112_149 = arith.constant 112 : index
    %102 = vector.load %arg16[%c0_148, %c112_149] : memref<256x144xf32, #tpu.memory_space<vmem>>, vector<256x16xf32>
    tpu.vector_store %arg16[%c0_148, %c112_149], %101 {strides = array<i32>} : memref<256x144xf32, #tpu.memory_space<vmem>>, vector<256x16xf32>,
    %c2_150 = arith.constant 2 : index
    %c2_151 = arith.constant 2 : index
    %c0_152 = arith.constant 0 : index
    %103 = vector.load %arg15[%c2_150, %c2_151, %c0_152] : memref<18x18x16xf32, #tpu.memory_space<vmem>>, vector<16x16x16xf32>
    %104 = vector.shape_cast %103 : vector<16x16x16xf32> to vector<256x16xf32>
    %c0_153 = arith.constant 0 : index
    %c128_154 = arith.constant 128 : index
    %105 = vector.load %arg16[%c0_153, %c128_154] : memref<256x144xf32, #tpu.memory_space<vmem>>, vector<256x16xf32>
    tpu.vector_store %arg16[%c0_153, %c128_154], %104 {strides = array<i32>} : memref<256x144xf32, #tpu.memory_space<vmem>>, vector<256x16xf32>,
    %c0_155 = arith.constant 0 : index
    %c0_156 = arith.constant 0 : index
    %106 = vector.load %arg16[%c0_155, %c0_156] : memref<256x144xf32, #tpu.memory_space<vmem>>, vector<256x144xf32>
    %107 = arith.truncf %106 : vector<256x144xf32> to vector<256x144xbf16>
    %c0_157 = arith.constant 0 : index
    %c0_158 = arith.constant 0 : index
    %108 = vector.load %arg6[%c0_157, %c0_158] : memref<144x16xbf16, #tpu.memory_space<vmem>>, vector<144x16xbf16>
    %cst_159 = arith.constant dense<0.000000e+00> : vector<256x16xf32>
    %109 = tpu.matmul %107, %108, %cst_159 {dimension_numbers = #tpu.dot_dimension_numbers<[1], [0], [0], [1], [0, 0, 1, 1], [], []>} : vector<256x144xbf16>, vector<144x16xbf16>, vector<256x16xf32> -> vector<256x16xf32>
    %c0_160 = arith.constant 0 : index
    %c0_161 = arith.constant 0 : index
    %110 = vector.load %arg7[%c0_160, %c0_161] : memref<1x16xf32, #tpu.memory_space<vmem>>, vector<1x16xf32>
    %111 = vector.broadcast %110 : vector<1x16xf32> to vector<256x16xf32>
    %112 = arith.addf %109, %111 : vector<256x16xf32>
    %cst_162 = arith.constant dense<0.000000e+00> : vector<16xf32>
    %113 = vector.multi_reduction <add>, %112, %cst_162 [0] : vector<256x16xf32> to vector<16xf32>
    %114 = vector.shape_cast %113 : vector<16xf32> to vector<1x16xf32>
    %cst_163 = arith.constant 2.560000e+02 : f32
    %115 = vector.broadcast %cst_163 : f32 to vector<1x16xf32>
    %116 = arith.divf %114, %115 : vector<1x16xf32>
    %c0_164 = arith.constant 0 : index
    %c0_165 = arith.constant 0 : index
    %117 = vector.load %arg8[%c0_164, %c0_165] : memref<16x4xf32, #tpu.memory_space<vmem>>, vector<16x4xf32>
    %cst_166 = arith.constant dense<0.000000e+00> : vector<1x4xf32>
    %118 = tpu.matmul %116, %117, %cst_166 {dimension_numbers = #tpu.dot_dimension_numbers<[1], [0], [0], [1], [0, 0, 1, 1], [], []>} : vector<1x16xf32>, vector<16x4xf32>, vector<1x4xf32> -> vector<1x4xf32>
    %c0_167 = arith.constant 0 : index
    %c0_168 = arith.constant 0 : index
    %119 = vector.load %arg9[%c0_167, %c0_168] : memref<1x4xf32, #tpu.memory_space<vmem>>, vector<1x4xf32>
    %120 = arith.addf %118, %119 : vector<1x4xf32>
    %cst_169 = arith.constant 0.000000e+00 : f32
    %121 = vector.broadcast %cst_169 : f32 to vector<1x4xf32>
    %122 = arith.maximumf %120, %121 : vector<1x4xf32>
    %c0_170 = arith.constant 0 : index
    %c0_171 = arith.constant 0 : index
    %123 = vector.load %arg10[%c0_170, %c0_171] : memref<4x16xf32, #tpu.memory_space<vmem>>, vector<4x16xf32>
    %cst_172 = arith.constant dense<0.000000e+00> : vector<1x16xf32>
    %124 = tpu.matmul %122, %123, %cst_172 {dimension_numbers = #tpu.dot_dimension_numbers<[1], [0], [0], [1], [0, 0, 1, 1], [], []>} : vector<1x4xf32>, vector<4x16xf32>, vector<1x16xf32> -> vector<1x16xf32>
    %c0_173 = arith.constant 0 : index
    %c0_174 = arith.constant 0 : index
    %125 = vector.load %arg11[%c0_173, %c0_174] : memref<1x16xf32, #tpu.memory_space<vmem>>, vector<1x16xf32>
    %126 = arith.addf %124, %125 : vector<1x16xf32>
    %127 = arith.negf %126 : vector<1x16xf32>
    %128 = math.exp %127 : vector<1x16xf32>
    %cst_175 = arith.constant 1.000000e+00 : f32
    %129 = vector.broadcast %cst_175 : f32 to vector<1x16xf32>
    %130 = arith.addf %129, %128 : vector<1x16xf32>
    %131 = arith.divf %129, %130 : vector<1x16xf32>
    %132 = vector.broadcast %131 : vector<1x16xf32> to vector<256x16xf32>
    %133 = arith.mulf %132, %112 : vector<256x16xf32>
    %134 = arith.addf %133, %38 : vector<256x16xf32>
    %135 = vector.shape_cast %134 : vector<256x16xf32> to vector<16x16x16xf32>
    %c1_176 = arith.constant 1 : index
    %c1_177 = arith.constant 1 : index
    %c0_178 = arith.constant 0 : index
    %136 = vector.load %arg15[%c1_176, %c1_177, %c0_178] : memref<18x18x16xf32, #tpu.memory_space<vmem>>, vector<16x16x16xf32>
    tpu.vector_store %arg15[%c1_176, %c1_177, %c0_178], %135 {strides = array<i32>} : memref<18x18x16xf32, #tpu.memory_space<vmem>>, vector<16x16x16xf32>,
    %c0_179 = arith.constant 0 : index
    %c0_180 = arith.constant 0 : index
    %c0_181 = arith.constant 0 : index
    %137 = vector.load %arg15[%c0_179, %c0_180, %c0_181] : memref<18x18x16xf32, #tpu.memory_space<vmem>>, vector<16x16x16xf32>
    %138 = vector.shape_cast %137 : vector<16x16x16xf32> to vector<256x16xf32>
    %c0_182 = arith.constant 0 : index
    %c0_183 = arith.constant 0 : index
    %139 = vector.load %arg16[%c0_182, %c0_183] : memref<256x144xf32, #tpu.memory_space<vmem>>, vector<256x16xf32>
    tpu.vector_store %arg16[%c0_182, %c0_183], %138 {strides = array<i32>} : memref<256x144xf32, #tpu.memory_space<vmem>>, vector<256x16xf32>,
    %c0_184 = arith.constant 0 : index
    %c1_185 = arith.constant 1 : index
    %c0_186 = arith.constant 0 : index
    %140 = vector.load %arg15[%c0_184, %c1_185, %c0_186] : memref<18x18x16xf32, #tpu.memory_space<vmem>>, vector<16x16x16xf32>
    %141 = vector.shape_cast %140 : vector<16x16x16xf32> to vector<256x16xf32>
    %c0_187 = arith.constant 0 : index
    %c16_188 = arith.constant 16 : index
    %142 = vector.load %arg16[%c0_187, %c16_188] : memref<256x144xf32, #tpu.memory_space<vmem>>, vector<256x16xf32>
    tpu.vector_store %arg16[%c0_187, %c16_188], %141 {strides = array<i32>} : memref<256x144xf32, #tpu.memory_space<vmem>>, vector<256x16xf32>,
    %c0_189 = arith.constant 0 : index
    %c2_190 = arith.constant 2 : index
    %c0_191 = arith.constant 0 : index
    %143 = vector.load %arg15[%c0_189, %c2_190, %c0_191] : memref<18x18x16xf32, #tpu.memory_space<vmem>>, vector<16x16x16xf32>
    %144 = vector.shape_cast %143 : vector<16x16x16xf32> to vector<256x16xf32>
    %c0_192 = arith.constant 0 : index
    %c32_193 = arith.constant 32 : index
    %145 = vector.load %arg16[%c0_192, %c32_193] : memref<256x144xf32, #tpu.memory_space<vmem>>, vector<256x16xf32>
    tpu.vector_store %arg16[%c0_192, %c32_193], %144 {strides = array<i32>} : memref<256x144xf32, #tpu.memory_space<vmem>>, vector<256x16xf32>,
    %c1_194 = arith.constant 1 : index
    %c0_195 = arith.constant 0 : index
    %c0_196 = arith.constant 0 : index
    %146 = vector.load %arg15[%c1_194, %c0_195, %c0_196] : memref<18x18x16xf32, #tpu.memory_space<vmem>>, vector<16x16x16xf32>
    %147 = vector.shape_cast %146 : vector<16x16x16xf32> to vector<256x16xf32>
    %c0_197 = arith.constant 0 : index
    %c48_198 = arith.constant 48 : index
    %148 = vector.load %arg16[%c0_197, %c48_198] : memref<256x144xf32, #tpu.memory_space<vmem>>, vector<256x16xf32>
    tpu.vector_store %arg16[%c0_197, %c48_198], %147 {strides = array<i32>} : memref<256x144xf32, #tpu.memory_space<vmem>>, vector<256x16xf32>,
    %c1_199 = arith.constant 1 : index
    %c1_200 = arith.constant 1 : index
    %c0_201 = arith.constant 0 : index
    %149 = vector.load %arg15[%c1_199, %c1_200, %c0_201] : memref<18x18x16xf32, #tpu.memory_space<vmem>>, vector<16x16x16xf32>
    %150 = vector.shape_cast %149 : vector<16x16x16xf32> to vector<256x16xf32>
    %c0_202 = arith.constant 0 : index
    %c64_203 = arith.constant 64 : index
    %151 = vector.load %arg16[%c0_202, %c64_203] : memref<256x144xf32, #tpu.memory_space<vmem>>, vector<256x16xf32>
    tpu.vector_store %arg16[%c0_202, %c64_203], %150 {strides = array<i32>} : memref<256x144xf32, #tpu.memory_space<vmem>>, vector<256x16xf32>,
    %c1_204 = arith.constant 1 : index
    %c2_205 = arith.constant 2 : index
    %c0_206 = arith.constant 0 : index
    %152 = vector.load %arg15[%c1_204, %c2_205, %c0_206] : memref<18x18x16xf32, #tpu.memory_space<vmem>>, vector<16x16x16xf32>
    %153 = vector.shape_cast %152 : vector<16x16x16xf32> to vector<256x16xf32>
    %c0_207 = arith.constant 0 : index
    %c80_208 = arith.constant 80 : index
    %154 = vector.load %arg16[%c0_207, %c80_208] : memref<256x144xf32, #tpu.memory_space<vmem>>, vector<256x16xf32>
    tpu.vector_store %arg16[%c0_207, %c80_208], %153 {strides = array<i32>} : memref<256x144xf32, #tpu.memory_space<vmem>>, vector<256x16xf32>,
    %c2_209 = arith.constant 2 : index
    %c0_210 = arith.constant 0 : index
    %c0_211 = arith.constant 0 : index
    %155 = vector.load %arg15[%c2_209, %c0_210, %c0_211] : memref<18x18x16xf32, #tpu.memory_space<vmem>>, vector<16x16x16xf32>
    %156 = vector.shape_cast %155 : vector<16x16x16xf32> to vector<256x16xf32>
    %c0_212 = arith.constant 0 : index
    %c96_213 = arith.constant 96 : index
    %157 = vector.load %arg16[%c0_212, %c96_213] : memref<256x144xf32, #tpu.memory_space<vmem>>, vector<256x16xf32>
    tpu.vector_store %arg16[%c0_212, %c96_213], %156 {strides = array<i32>} : memref<256x144xf32, #tpu.memory_space<vmem>>, vector<256x16xf32>,
    %c2_214 = arith.constant 2 : index
    %c1_215 = arith.constant 1 : index
    %c0_216 = arith.constant 0 : index
    %158 = vector.load %arg15[%c2_214, %c1_215, %c0_216] : memref<18x18x16xf32, #tpu.memory_space<vmem>>, vector<16x16x16xf32>
    %159 = vector.shape_cast %158 : vector<16x16x16xf32> to vector<256x16xf32>
    %c0_217 = arith.constant 0 : index
    %c112_218 = arith.constant 112 : index
    %160 = vector.load %arg16[%c0_217, %c112_218] : memref<256x144xf32, #tpu.memory_space<vmem>>, vector<256x16xf32>
    tpu.vector_store %arg16[%c0_217, %c112_218], %159 {strides = array<i32>} : memref<256x144xf32, #tpu.memory_space<vmem>>, vector<256x16xf32>,
    %c2_219 = arith.constant 2 : index
    %c2_220 = arith.constant 2 : index
    %c0_221 = arith.constant 0 : index
    %161 = vector.load %arg15[%c2_219, %c2_220, %c0_221] : memref<18x18x16xf32, #tpu.memory_space<vmem>>, vector<16x16x16xf32>
    %162 = vector.shape_cast %161 : vector<16x16x16xf32> to vector<256x16xf32>
    %c0_222 = arith.constant 0 : index
    %c128_223 = arith.constant 128 : index
    %163 = vector.load %arg16[%c0_222, %c128_223] : memref<256x144xf32, #tpu.memory_space<vmem>>, vector<256x16xf32>
    tpu.vector_store %arg16[%c0_222, %c128_223], %162 {strides = array<i32>} : memref<256x144xf32, #tpu.memory_space<vmem>>, vector<256x16xf32>,
    %c0_224 = arith.constant 0 : index
    %c0_225 = arith.constant 0 : index
    %164 = vector.load %arg16[%c0_224, %c0_225] : memref<256x144xf32, #tpu.memory_space<vmem>>, vector<256x144xf32>
    %165 = arith.truncf %164 : vector<256x144xf32> to vector<256x144xbf16>
    %c0_226 = arith.constant 0 : index
    %c0_227 = arith.constant 0 : index
    %166 = vector.load %arg12[%c0_226, %c0_227] : memref<144x8xbf16, #tpu.memory_space<vmem>>, vector<144x8xbf16>
    %cst_228 = arith.constant dense<0.000000e+00> : vector<256x8xf32>
    %167 = tpu.matmul %165, %166, %cst_228 {dimension_numbers = #tpu.dot_dimension_numbers<[1], [0], [0], [1], [0, 0, 1, 1], [], []>} : vector<256x144xbf16>, vector<144x8xbf16>, vector<256x8xf32> -> vector<256x8xf32>
    %c0_229 = arith.constant 0 : index
    %c0_230 = arith.constant 0 : index
    %168 = vector.load %arg13[%c0_229, %c0_230] : memref<1x8xf32, #tpu.memory_space<vmem>>, vector<1x8xf32>
    %169 = vector.broadcast %168 : vector<1x8xf32> to vector<256x8xf32>
    %170 = arith.addf %167, %169 : vector<256x8xf32>
    %171 = vector.shape_cast %170 : vector<256x8xf32> to vector<1x16x16x8xf32>
    %c0_231 = arith.constant 0 : index
    %c0_232 = arith.constant 0 : index
    %c0_233 = arith.constant 0 : index
    %c0_234 = arith.constant 0 : index
    %172 = vector.load %arg14[%c0_231, %c0_232, %c0_233, %c0_234] : memref<1x16x16x8xf32, #tpu.memory_space<vmem>>, vector<1x16x16x8xf32>
    tpu.vector_store %arg14[%c0_231, %c0_232, %c0_233, %c0_234], %171 {strides = array<i32>} : memref<1x16x16x8xf32, #tpu.memory_space<vmem>>, vector<1x16x16x8xf32>,
    return
  }
  func.func @transform_0(%arg0: i32) -> (i32, i32, i32, i32) {
    %c0_i32 = arith.constant 0 : i32
    %c0_i32_0 = arith.constant 0 : i32
    %c0_i32_1 = arith.constant 0 : i32
    %c0_i32_2 = arith.constant 0 : i32
    return %arg0, %c0_i32, %c0_i32_0, %c0_i32_1 : i32, i32, i32, i32
  }
  func.func @transform_1(%arg0: i32) -> (i32, i32) {
    %c0_i32 = arith.constant 0 : i32
    %c0_i32_0 = arith.constant 0 : i32
    %c0_i32_1 = arith.constant 0 : i32
    return %c0_i32, %c0_i32_0 : i32, i32
  }
  func.func @transform_2(%arg0: i32) -> (i32, i32) {
    %c0_i32 = arith.constant 0 : i32
    %c0_i32_0 = arith.constant 0 : i32
    %c0_i32_1 = arith.constant 0 : i32
    return %c0_i32, %c0_i32_0 : i32, i32
  }
  func.func @transform_3(%arg0: i32) -> (i32, i32) {
    %c0_i32 = arith.constant 0 : i32
    %c0_i32_0 = arith.constant 0 : i32
    %c0_i32_1 = arith.constant 0 : i32
    return %c0_i32, %c0_i32_0 : i32, i32
  }
  func.func @transform_4(%arg0: i32) -> (i32, i32) {
    %c0_i32 = arith.constant 0 : i32
    %c0_i32_0 = arith.constant 0 : i32
    %c0_i32_1 = arith.constant 0 : i32
    return %c0_i32, %c0_i32_0 : i32, i32
  }
  func.func @transform_5(%arg0: i32) -> (i32, i32) {
    %c0_i32 = arith.constant 0 : i32
    %c0_i32_0 = arith.constant 0 : i32
    %c0_i32_1 = arith.constant 0 : i32
    return %c0_i32, %c0_i32_0 : i32, i32
  }
  func.func @transform_6(%arg0: i32) -> (i32, i32) {
    %c0_i32 = arith.constant 0 : i32
    %c0_i32_0 = arith.constant 0 : i32
    %c0_i32_1 = arith.constant 0 : i32
    return %c0_i32, %c0_i32_0 : i32, i32
  }
  func.func @transform_7(%arg0: i32) -> (i32, i32) {
    %c0_i32 = arith.constant 0 : i32
    %c0_i32_0 = arith.constant 0 : i32
    %c0_i32_1 = arith.constant 0 : i32
    return %c0_i32, %c0_i32_0 : i32, i32
  }
  func.func @transform_8(%arg0: i32) -> (i32, i32) {
    %c0_i32 = arith.constant 0 : i32
    %c0_i32_0 = arith.constant 0 : i32
    %c0_i32_1 = arith.constant 0 : i32
    return %c0_i32, %c0_i32_0 : i32, i32
  }
  func.func @transform_9(%arg0: i32) -> (i32, i32) {
    %c0_i32 = arith.constant 0 : i32
    %c0_i32_0 = arith.constant 0 : i32
    %c0_i32_1 = arith.constant 0 : i32
    return %c0_i32, %c0_i32_0 : i32, i32
  }
  func.func @transform_10(%arg0: i32) -> (i32, i32) {
    %c0_i32 = arith.constant 0 : i32
    %c0_i32_0 = arith.constant 0 : i32
    %c0_i32_1 = arith.constant 0 : i32
    return %c0_i32, %c0_i32_0 : i32, i32
  }
  func.func @transform_11(%arg0: i32) -> (i32, i32) {
    %c0_i32 = arith.constant 0 : i32
    %c0_i32_0 = arith.constant 0 : i32
    %c0_i32_1 = arith.constant 0 : i32
    return %c0_i32, %c0_i32_0 : i32, i32
  }
  func.func @transform_12(%arg0: i32) -> (i32, i32) {
    %c0_i32 = arith.constant 0 : i32
    %c0_i32_0 = arith.constant 0 : i32
    %c0_i32_1 = arith.constant 0 : i32
    return %c0_i32, %c0_i32_0 : i32, i32
  }
  func.func @transform_13(%arg0: i32) -> (i32, i32, i32, i32) {
    %c0_i32 = arith.constant 0 : i32
    %c0_i32_0 = arith.constant 0 : i32
    %c0_i32_1 = arith.constant 0 : i32
    %c0_i32_2 = arith.constant 0 : i32
    return %arg0, %c0_i32, %c0_i32_0, %c0_i32_1 : i32, i32, i32, i32
  }
}

</mosaic_0001>

<bundles_post_ra>
// kernel: refine_forward.1
= control target key start
LH: loop header
LB: loop body
LE: loop exit
PB: predicated region body
PF: predicated region fallthrough
CT: control target
= control target key end

     0   :  { %s8824_s25 = smov 0   ;;  %s13683_s0 = inlined_call_operand.vmem [shape: f32[2,16,16,16], index: 0, kind: input, shape index: {}]   ;;  %s13684_s1 = inlined_call_operand.vmem [shape: bf16[144,16], index: 1, kind: input, shape index: {}]   ;;  %s13685_s2 = inlined_call_operand.vmem [shape: f32[1,16], index: 2, kind: input, shape index: {}]   ;;  %s13686_s3 = inlined_call_operand.vmem [shape: bf16[144,16], index: 3, kind: input, shape index: {}]   ;;  %s13687_s4 = inlined_call_operand.vmem [shape: f32[1,16], index: 4, kind: input, shape index: {}]   ;;  %s13688_s5 = inlined_call_operand.vmem [shape: bf16[144,16], index: 5, kind: input, shape index: {}]   ;;  %s13689_s6 = inlined_call_operand.vmem [shape: f32[1,16], index: 6, kind: input, shape index: {}]   ;;  %s13690_s7 = inlined_call_operand.vmem [shape: f32[16,4], index: 7, kind: input, shape index: {}]   ;;  %s13691_s8 = inlined_call_operand.vmem [shape: f32[1,4], index: 8, kind: input, shape index: {}]   ;;  %s13692_s9 = inlined_call_operand.vmem [shape: f32[4,16], index: 9, kind: input, shape index: {}]   ;;  %s13693_s10 = inlined_call_operand.vmem [shape: f32[1,16], index: 10, kind: input, shape index: {}]   ;;  %s13694_s11 = inlined_call_operand.vmem [shape: bf16[144,8], index: 11, kind: input, shape index: {}]   ;;  %s13695_s12 = inlined_call_operand.vmem [shape: f32[1,8], index: 12, kind: input, shape index: {}]   ;;  %s13696_s13 = inlined_call_operand.vmem [shape: f32[2,16,16,8], index: 13, kind: output, shape index: {}]  }
   0x1 LB: > { %s8513_s26 = sadd.s32 4294967295, %s8741_s25   ;;  %p8517_p0 = scmp.ge.s32.totalorder %s8741_s25, 1  ;;  %s8741_s25 = sphi %s8824_s25, %s23_s25  }
   0x2   : > { %p387_p1 = scmp.lt.s32.totalorder %s8741_s25, 3 }
   0x4   : > { %p388_p2 = pnand %p8517_p0, %p387_p1 }
   0x6   : > { %391 = sbr.rel (%p388_p2) target bundleno = 3002 (0xbba), region = 72 }
   0xd   : > { %vm442_vm0 = vcmask 130048   ;;  %vm445_vm1 = vcmask 123904   ;;  %v13699_v0 = vmov 0.0   ;;  %p431_p3 = scmp.lt.s32.totalorder %s8513_s26, 1  ;;  %v13697_v1 = vmov 0   ;;  %v8691_v2 = vld [vmem:[%s13684_s1] sm:$0xff]  }
   0xe   : > { %443 = vst.msk [vmem:[#allocation2] sm:$0xff] %vm442_vm0, %v13699_v0  ;;  %444 = vst.msk [vmem:[#allocation2 + $0x8] sm:$0xff] %vm442_vm0, %v13699_v0  ;;  %2266 = vmatprep.subr.bf16.mxu0 %v13697_v1  ;;  %4154 = vmatprep.subr.bf16.mxu1 %v13697_v1  ;;  %v8692_v3 = vld [vmem:[%s13684_s1 + $0x8] sm:$0xff]   ;;  %v8693_v4 = vld [vmem:[%s13684_s1 + $0x10] sm:$0xff]   ;;  %s8745_s20 = smov 32   ;;  %s8746_s21 = smov 16  }
   0xf   : > { %447 = vst.msk [vmem:[#allocation2 + $0x18] sm:$0xff] %vm442_vm0, %v13699_v0  ;;  %448 = vst.msk [vmem:[#allocation2 + $0x20] sm:$0xff] %vm442_vm0, %v13699_v0  ;;  %s13815_s26 = smov (!%p431_p3, %s8513_s26), 1  ;;  %2267 = vmatpush1.bf16.msra.mxu0 %v8691_v2  ;;  %v8694_v21 = vld [vmem:[%s13684_s1 + $0x18] sm:$0xff]   ;;  %v8695_v26 = vld [vmem:[%s13684_s1 + $0x20] sm:$0xff]   ;;  %s8747_s28 = smov 48  }
  0x10   : > { %450 = vst.msk [vmem:[#allocation2 + $0x30] sm:$0xff] %vm442_vm0, %v13699_v0  ;;  %451 = vst.msk [vmem:[#allocation2 + $0x38] sm:$0xff] %vm442_vm0, %v13699_v0  ;;  %s8632_s14 = sshll.u32 %s13815_s26, 8  ;;  %2268 = vmatprep.subr.bf16.mxu0 %v13697_v1  ;;  %v8696_v37 = vld [vmem:[%s13684_s1 + $0x28] sm:$0xff]   ;;  %s8748_s15 = smov 64   ;;  %v8697_v50 = vld [vmem:[%s13684_s1 + $0x30] sm:$0xff]  }
  0x11   : > { %453 = vst.msk [vmem:[#allocation2 + $0x48] sm:$0xff] %vm442_vm0, %v13699_v0  ;;  %454 = vst.msk [vmem:[#allocation2 + $0x50] sm:$0xff] %vm442_vm0, %v13699_v0  ;;  %s8961_s17 = scalar_lea.vmem %s13683_s0, %s8632_s14  ;;  %s8749_s16 = smov 80   ;;  %v8698_v53 = vld [vmem:[%s13684_s1 + $0x38] sm:$0xff]   ;;  %v8699_v56 = vld [vmem:[%s13684_s1 + $0x40] sm:$0xff]   ;;  %vm787_vm2 = vcmask 261248  }
  0x12   : > { %456 = vst.msk [vmem:[#allocation2 + $0x60] sm:$0xff] %vm442_vm0, %v13699_v0  ;;  %457 = vst.msk [vmem:[#allocation2 + $0x68] sm:$0xff] %vm442_vm0, %v13699_v0  ;;  %v498_v5 = vld [vmem:[%s8961_s17] sm:$0xff]  ;;  %v499_v6 = vld [vmem:[%s8961_s17 + $0x8] sm:$0xff]  ;;  %s8750_s24 = smov 96   ;;  %s8751_s30 = smov 112  }
  0x13   : > { %459 = vst.msk [vmem:[#allocation2 + $0x78] sm:$0xff] %vm442_vm0, %v13699_v0  ;;  %460 = vst.msk [vmem:[#allocation2 + $0x80] sm:$0xff] %vm442_vm0, %v13699_v0  ;;  %v500_v7 = vld [vmem:[%s8961_s17 + $0x10] sm:$0xff]  ;;  %2269 = vmatpush1.bf16.msra.mxu0 %v8692_v3  ;;  %v501_v12 = vld [vmem:[%s8961_s17 + $0x18] sm:$0xff]  ;;  %vm980_vm3 = vcmask 392448   ;;  %vm1173_vm4 = vcmask 523648   ;;  %s13481_s22 = scalar_lea.vmem %s13696_s13, %s8632_s14 }
  0x14   : > { %462 = vst.msk [vmem:[#allocation2 + $0x90] sm:$0xff] %vm442_vm0, %v13699_v0  ;;  %463 = vst.msk [vmem:[#allocation2 + $0x98] sm:$0xff] %vm442_vm0, %v13699_v0  ;;  %v502_v13 = vld [vmem:[%s8961_s17 + $0x20] sm:$0xff]  ;;  %v503_v14 = vld [vmem:[%s8961_s17 + $0x28] sm:$0xff]  ;;  %2270 = vmatprep.subr.bf16.mxu0 %v13697_v1  ;;  %vm1366_vm5 = vcmask 654848   ;;  %vm1559_vm6 = vcmask 786048  }
  0x15   : > { %465 = vst.msk [vmem:[#allocation2 + $0xa8] sm:$0xff] %vm442_vm0, %v13699_v0  ;;  %466 = vst.msk [vmem:[#allocation2 + $0xb0] sm:$0xff] %vm442_vm0, %v13699_v0  ;;  %v820_v8 = vld [vmem:[#allocation2 + $0x2] sm:$0xff]  ;;  %v504_v15 = vld [vmem:[%s8961_s17 + $0x30] sm:$0xff]  ;;  %vm1753_vm7 = vcmask 917248   ;;  %vm1946_vm8 = vcmask 1048448  }
  0x16   : > { %468 = vst.msk [vmem:[#allocation2 + $0xc0] sm:$0xff] %vm442_vm0, %v13699_v0  ;;  %469 = vst.msk [vmem:[#allocation2 + $0xc8] sm:$0xff] %vm442_vm0, %v13699_v0  ;;  %v627_v9 = vld [vmem:[#allocation2 + $0x1] sm:$0xff]  ;;  %884 = vrot.lane.b32.xlu1 %v820_v8, %s8745_s20  ;;  %v505_v16 = vld [vmem:[%s8961_s17 + $0x38] sm:$0xff]  ;;  %vm8753_vm9 = vmmov 0   ;;  %vm6389_vm10 = vcmask 1043456  }
  0x17   : > { %471 = vst.msk [vmem:[#allocation2 + $0xd8] sm:$0xff] %vm442_vm0, %v13699_v0  ;;  %472 = vst.msk [vmem:[#allocation2 + $0xe0] sm:$0xff] %vm442_vm0, %v13699_v0  ;;  %691 = vrot.lane.b32.xlu0 %v627_v9, %s8746_s21  ;;  %v506_v17 = vld [vmem:[%s8961_s17 + $0x40] sm:$0xff]  ;;  %v507_v18 = vld [vmem:[%s8961_s17 + $0x48] sm:$0xff]  ;;  %2271 = vmatpush1.bf16.msra.mxu0 %v8693_v4  ;;  %vm6385_vm11 = vcmask 31744   ;;  %vm8425_vm12 = vcmask 64512  }
  0x18   : > { %474 = vst.msk [vmem:[#allocation2 + $0xf0] sm:$0xff] %vm442_vm0, %v13699_v0  ;;  %475 = vst.msk [vmem:[#allocation2 + $0xf8] sm:$0xff] %vm442_vm0, %v13699_v0  ;;  %v563_v19 = vld [vmem:[#allocation2] sm:$0xff]  ;;  %v564_v20 = vld [vmem:[#allocation2 + $0x8] sm:$0xff]  ;;  %2272 = vmatprep.subr.bf16.mxu0 %v13697_v1 }
  0x19   : > { %477 = vst.msk [vmem:[#allocation2 + $0x108] sm:$0xff] %vm442_vm0, %v13699_v0  ;;  %478 = vst.msk [vmem:[#allocation2 + $0x110] sm:$0xff] %vm442_vm0, %v13699_v0  ;;  %v508_v22 = vld [vmem:[%s8961_s17 + $0x50] sm:$0xff]  ;;  %v509_v23 = vld [vmem:[%s8961_s17 + $0x58] sm:$0xff] }
  0x1a   : > { %480 = vst.msk [vmem:[#allocation2 + $0x120] sm:$0xff] %vm442_vm0, %v13699_v0  ;;  %481 = vst.msk [vmem:[#allocation2 + $0x128] sm:$0xff] %vm442_vm0, %v13699_v0  ;;  %v510_v58 = vld [vmem:[%s8961_s17 + $0x60] sm:$0xff]  ;;  %v511_v59 = vld [vmem:[%s8961_s17 + $0x68] sm:$0xff] }
  0x1b   : > { %483 = vst.msk [vmem:[#allocation2 + $0x138] sm:$0xff] %vm442_vm0, %v13699_v0  ;;  %484 = vst.msk [vmem:[#allocation2 + $0x140] sm:$0xff] %vm442_vm0, %v13699_v0  ;;  %2273 = vmatpush1.bf16.msra.mxu0 %v8694_v21  ;;  %v512_v4 = vld [vmem:[%s8961_s17 + $0x70] sm:$0xff]  ;;  %v517_v21 = vld [vmem:[%s8961_s17 + $0x98] sm:$0xff] }
  0x1c   : > { %486 = vst.msk [vmem:[#allocation2 + $0x150] sm:$0xff] %vm442_vm0, %v13699_v0  ;;  %487 = vst.msk [vmem:[#allocation2 + $0x158] sm:$0xff] %vm442_vm0, %v13699_v0  ;;  %2274 = vmatprep.subr.bf16.mxu0 %v13697_v1 }
  0x1d   : > { %489 = vst.msk [vmem:[#allocation2 + $0x168] sm:$0xff] %vm442_vm0, %v13699_v0  ;;  %490 = vst.msk [vmem:[#allocation2 + $0x170] sm:$0xff] %vm442_vm0, %v13699_v0 }
  0x1e   : > { %492 = vst.msk [vmem:[#allocation2 + $0x180] sm:$0xff] %vm442_vm0, %v13699_v0  ;;  %493 = vst.msk [vmem:[#allocation2 + $0x188] sm:$0xff] %vm442_vm0, %v13699_v0 }
  0x1f   : > { %495 = vst.msk [vmem:[#allocation2 + $0x198] sm:$0xff] %vm442_vm0, %v13699_v0  ;;  %496 = vst.msk [vmem:[#allocation2 + $0x1a0] sm:$0xff] %vm442_vm0, %v13699_v0  ;;  %2275 = vmatpush1.bf16.msra.mxu0 %v8695_v26 }
  0x20   : > { %446 = vst.msk [vmem:[#allocation2 + $0x10] sm:$0x3] %vm445_vm1, %v13699_v0  ;;  %449 = vst.msk [vmem:[#allocation2 + $0x28] sm:$0x3] %vm445_vm1, %v13699_v0  ;;  %2276 = vmatprep.subr.bf16.mxu0 %v13697_v1 }
  0x21   : > { %452 = vst.msk [vmem:[#allocation2 + $0x40] sm:$0x3] %vm445_vm1, %v13699_v0  ;;  %455 = vst.msk [vmem:[#allocation2 + $0x58] sm:$0x3] %vm445_vm1, %v13699_v0 }
  0x22   : > { %458 = vst.msk [vmem:[#allocation2 + $0x70] sm:$0x3] %vm445_vm1, %v13699_v0  ;;  %461 = vst.msk [vmem:[#allocation2 + $0x88] sm:$0x3] %vm445_vm1, %v13699_v0 }
  0x23   : > { %464 = vst.msk [vmem:[#allocation2 + $0xa0] sm:$0x3] %vm445_vm1, %v13699_v0  ;;  %467 = vst.msk [vmem:[#allocation2 + $0xb8] sm:$0x3] %vm445_vm1, %v13699_v0  ;;  %2277 = vmatpush1.bf16.msra.mxu0 %v8696_v37 }
  0x24   : > { %470 = vst.msk [vmem:[#allocation2 + $0xd0] sm:$0x3] %vm445_vm1, %v13699_v0  ;;  %473 = vst.msk [vmem:[#allocation2 + $0xe8] sm:$0x3] %vm445_vm1, %v13699_v0  ;;  %2278 = vmatprep.subr.bf16.mxu0 %v13697_v1 }
  0x25   : > { %476 = vst.msk [vmem:[#allocation2 + $0x100] sm:$0x3] %vm445_vm1, %v13699_v0  ;;  %479 = vst.msk [vmem:[#allocation2 + $0x118] sm:$0x3] %vm445_vm1, %v13699_v0 }
  0x26   : > { %482 = vst.msk [vmem:[#allocation2 + $0x130] sm:$0x3] %vm445_vm1, %v13699_v0  ;;  %485 = vst.msk [vmem:[#allocation2 + $0x148] sm:$0x3] %vm445_vm1, %v13699_v0 }
  0x27   : > { %488 = vst.msk [vmem:[#allocation2 + $0x160] sm:$0x3] %vm445_vm1, %v13699_v0  ;;  %491 = vst.msk [vmem:[#allocation2 + $0x178] sm:$0x3] %vm445_vm1, %v13699_v0  ;;  %v821_v10 = vld [vmem:[#allocation2 + $0xa] sm:$0xff]  ;;  %2279 = vmatpush1.bf16.msra.mxu0 %v8697_v50 }
  0x28   : > { %494 = vst.msk [vmem:[#allocation2 + $0x190] sm:$0x3] %vm445_vm1, %v13699_v0  ;;  %497 = vst.msk [vmem:[#allocation2 + $0x1a8] sm:$0x3] %vm445_vm1, %v13699_v0  ;;  %v628_v11 = vld [vmem:[#allocation2 + $0x9] sm:$0xff]  ;;  %886 = vrot.lane.b32.xlu1 %v821_v10, %s8745_s20  ;;  %2280 = vmatprep.subr.bf16.mxu0 %v13697_v1 }
  0x29   : > { %531 = vst.msk [vmem:[#allocation2 + $0x19] sm:$0xff] %vm442_vm0, %v498_v5  ;;  %532 = vst.msk [vmem:[#allocation2 + $0x21] sm:$0xff] %vm442_vm0, %v499_v6  ;;  %693 = vrot.lane.b32.xlu0 %v628_v11, %s8746_s21  ;;  %v513_v5 = vld [vmem:[%s8961_s17 + $0x78] sm:$0xff] }
  0x2a   : > { %533 = vst.msk [vmem:[#allocation2 + $0x31] sm:$0xff] %vm442_vm0, %v500_v7  ;;  %534 = vst.msk [vmem:[#allocation2 + $0x39] sm:$0xff] %vm442_vm0, %v501_v12  ;;  %v514_v12 = vld [vmem:[%s8961_s17 + $0x80] sm:$0xff] }
  0x2b   : > { %535 = vst.msk [vmem:[#allocation2 + $0x49] sm:$0xff] %vm442_vm0, %v502_v13  ;;  %536 = vst.msk [vmem:[#allocation2 + $0x51] sm:$0xff] %vm442_vm0, %v503_v14  ;;  %2281 = vmatpush1.bf16.msra.mxu0 %v8698_v53  ;;  %v515_v13 = vld [vmem:[%s8961_s17 + $0x88] sm:$0xff] }
  0x2c   : > { %537 = vst.msk [vmem:[#allocation2 + $0x61] sm:$0xff] %vm442_vm0, %v504_v15  ;;  %538 = vst.msk [vmem:[#allocation2 + $0x69] sm:$0xff] %vm442_vm0, %v505_v16  ;;  %2282 = vmatprep.subr.bf16.mxu0 %v13697_v1 }
  0x2d   : > { %539 = vst.msk [vmem:[#allocation2 + $0x79] sm:$0xff] %vm442_vm0, %v506_v17  ;;  %540 = vst.msk [vmem:[#allocation2 + $0x81] sm:$0xff] %vm442_vm0, %v507_v18 }
  0x2e   : > { %595 = vst.msk [vmem:[#allocation3] sm:$0xff] %vm442_vm0, %v563_v19  ;;  %596 = vst.msk [vmem:[#allocation3 + $0x10] sm:$0xff] %vm442_vm0, %v564_v20  ;;  %v516_v20 = vld [vmem:[%s8961_s17 + $0x90] sm:$0xff] }
  0x2f   : > { %541 = vst.msk [vmem:[#allocation2 + $0x91] sm:$0xff] %vm442_vm0, %v508_v22  ;;  %542 = vst.msk [vmem:[#allocation2 + $0x99] sm:$0xff] %vm442_vm0, %v509_v23  ;;  %2283 = vmatpush1.bf16.msra.mxu0 %v8699_v56 }
  0x30   : > { %v1014_v24 = vld [vmem:[#allocation2 + $0x20] sm:$0xff]  ;;  %v1013_v25 = vld [vmem:[#allocation2 + $0x18] sm:$0xff]  ;;  %543 = vst.msk [vmem:[#allocation2 + $0xa9] sm:$0xff] %vm442_vm0, %v510_v58  ;;  %544 = vst.msk [vmem:[#allocation2 + $0xb1] sm:$0xff] %vm442_vm0, %v511_v59  ;;  %6074 = vmatprep.subr.bf16.mxu0 %v13697_v1 }
  0x31   : > { %598 = vst.msk [vmem:[#allocation3 + $0x30] sm:$0xff] %vm442_vm0, %v1014_v24  ;;  %597 = vst.msk [vmem:[#allocation3 + $0x20] sm:$0xff] %vm442_vm0, %v1013_v25  ;;  %1079 = vrot.lane.b32.xlu1 %v1014_v24, %s8747_s28  ;;  %1077 = vrot.lane.b32.xlu0 %v1013_v25, %s8747_s28  ;;  %v9008_v27 = vld [vmem:[#allocation2 + $0x21] sm:$0xff]  ;;  %v9010_v28 = vld [vmem:[#allocation2 + $0x38] sm:$0xff] }
  0x32   : > { %v9012_v29 = vld [vmem:[#allocation2 + $0x30] sm:$0xff]  ;;  %v9014_v30 = vld [vmem:[#allocation2 + $0x19] sm:$0xff]  ;;  %600 = vst.msk [vmem:[#allocation3 + $0x50] sm:$0xff] %vm442_vm0, %v9010_v28  ;;  %v9027_v34 = vld [vmem:[#allocation2 + $0x48] sm:$0xff] }
  0x33   : > { %v9016_v31 = vld [vmem:[#allocation2 + $0x3a] sm:$0xff]  ;;  %v9018_v32 = vld [vmem:[#allocation2 + $0x32] sm:$0xff]  ;;  %599 = vst.msk [vmem:[#allocation3 + $0x40] sm:$0xff] %vm442_vm0, %v9012_v29  ;;  %v9035_v36 = vld [vmem:[#allocation2 + $0x4a] sm:$0xff] }
  0x34   : > { %v9025_v33 = vld [vmem:[#allocation2 + $0x50] sm:$0xff]  ;;  %2011 = vst.msk [vmem:[#allocation3 + $0x8] sm:$0xff] %vm442_vm0, %v9018_v32  ;;  %2012 = vst.msk [vmem:[#allocation3 + $0x18] sm:$0xff] %vm442_vm0, %v9016_v31  ;;  %v1400_v38 = vld [vmem:[#allocation2 + $0x22] sm:$0xff] }
  0x35   : > { %v9033_v35 = vld [vmem:[#allocation2 + $0x52] sm:$0xff]  ;;  %602 = vst.msk [vmem:[#allocation3 + $0x70] sm:$0xff] %vm442_vm0, %v9025_v33  ;;  %601 = vst.msk [vmem:[#allocation3 + $0x60] sm:$0xff] %vm442_vm0, %v9027_v34  ;;  %1272 = vrot.lane.b32.xlu1 %v9008_v27, %s8748_s15  ;;  %1270 = vrot.lane.b32.xlu0 %v9014_v30, %s8748_s15  ;;  %v9048_v39 = vld [vmem:[#allocation2 + $0x68] sm:$0xff] }
  0x36   : > { %v9050_v40 = vld [vmem:[#allocation2 + $0x60] sm:$0xff]  ;;  %2013 = vst.msk [vmem:[#allocation3 + $0x28] sm:$0xff] %vm442_vm0, %v9035_v36  ;;  %2014 = vst.msk [vmem:[#allocation3 + $0x38] sm:$0xff] %vm442_vm0, %v9033_v35  ;;  %v9056_v42 = vld [vmem:[#allocation2 + $0x6a] sm:$0xff] }
  0x37   : > { %v1399_v41 = vld [vmem:[#allocation2 + $0x1a] sm:$0xff]  ;;  %v9058_v43 = vld [vmem:[#allocation2 + $0x62] sm:$0xff]  ;;  %604 = vst.msk [vmem:[#allocation3 + $0x90] sm:$0xff] %vm442_vm0, %v9048_v39  ;;  %603 = vst.msk [vmem:[#allocation3 + $0x80] sm:$0xff] %vm442_vm0, %v9050_v40 }
  0x38   : > { %v9065_v44 = vld [vmem:[#allocation2 + $0x80] sm:$0xff]  ;;  %v9067_v45 = vld [vmem:[#allocation2 + $0x78] sm:$0xff]  ;;  %2015 = vst.msk [vmem:[#allocation3 + $0x48] sm:$0xff] %vm442_vm0, %v9058_v43  ;;  %2016 = vst.msk [vmem:[#allocation3 + $0x58] sm:$0xff] %vm442_vm0, %v9056_v42 }
  0x39   : > { %v9073_v46 = vld [vmem:[#allocation2 + $0x82] sm:$0xff]  ;;  %v9075_v47 = vld [vmem:[#allocation2 + $0x7a] sm:$0xff]  ;;  %606 = vst.msk [vmem:[#allocation3 + $0xb0] sm:$0xff] %vm442_vm0, %v9065_v44  ;;  %605 = vst.msk [vmem:[#allocation3 + $0xa0] sm:$0xff] %vm442_vm0, %v9067_v45  ;;  %1465 = vrot.lane.b32.xlu1 %v1400_v38, %s8749_s16  ;;  %1463 = vrot.lane.b32.xlu0 %v1399_v41, %s8749_s16 }
  0x3a   : > { %v9083_v48 = vld [vmem:[#allocation2 + $0x98] sm:$0xff]  ;;  %v9085_v49 = vld [vmem:[#allocation2 + $0x90] sm:$0xff]  ;;  %2017 = vst.msk [vmem:[#allocation3 + $0x68] sm:$0xff] %vm442_vm0, %v9075_v47  ;;  %2018 = vst.msk [vmem:[#allocation3 + $0x78] sm:$0xff] %vm442_vm0, %v9073_v46 }
  0x3b   : > { %608 = vst.msk [vmem:[#allocation3 + $0xd0] sm:$0xff] %vm442_vm0, %v9083_v48  ;;  %607 = vst.msk [vmem:[#allocation3 + $0xc0] sm:$0xff] %vm442_vm0, %v9085_v49  ;;  %v1787_v51 = vld [vmem:[#allocation2 + $0x39] sm:$0xff]  ;;  %v1786_v52 = vld [vmem:[#allocation2 + $0x31] sm:$0xff] }
  0x3c   : > { %v2044_v54 = vld [vmem:[#allocation3 + $0x8] sm:$0xff]  ;;  %v2046_v55 = vld [vmem:[#allocation3 + $0x18] sm:$0xff]  ;;  %v9131_v62 = vld [vmem:[#allocation2 + $0xb0] sm:$0xff]  ;;  %545 = vst.msk [vmem:[#allocation2 + $0xc1] sm:$0xff] %vm442_vm0, %v512_v4 }
  0x3d   : > { %1659 = vrot.lane.b32.xlu1 %v9010_v28, %s8750_s24  ;;  %1657 = vrot.lane.b32.xlu0 %v9012_v29, %s8750_s24  ;;  %v2108_v57 = vpack.c.bf16 %v2046_v55, %v2044_v54  ;;  %v9118_v60 = vld [vmem:[#allocation2 + $0x9a] sm:$0xff]  ;;  %v9120_v61 = vld [vmem:[#allocation2 + $0x92] sm:$0xff]  ;;  %v9133_v63 = vld [vmem:[#allocation2 + $0xa8] sm:$0xff]  ;;  %610 = vst.msk [vmem:[#allocation3 + $0xf0] sm:$0xff] %vm442_vm0, %v9131_v62 }
  0x3e   : > { %2019 = vst.msk [vmem:[#allocation3 + $0x88] sm:$0xff] %vm442_vm0, %v9120_v61  ;;  %2020 = vst.msk [vmem:[#allocation3 + $0x98] sm:$0xff] %vm442_vm0, %v9118_v60  ;;  %v1789_v2 = vld [vmem:[#allocation2 + $0x51] sm:$0xff]  ;;  %v1788_v3 = vld [vmem:[#allocation2 + $0x49] sm:$0xff] }
  0x3f   : > { %8532 = vmatprep.mubr.msk.bf16.mxu0 %vm442_vm0, %v2108_v57  ;;  %609 = vst.msk [vmem:[#allocation3 + $0xe0] sm:$0xff] %vm442_vm0, %v9133_v63  ;;  %546 = vst.msk [vmem:[#allocation2 + $0xc9] sm:$0xff] %vm442_vm0, %v513_v5  ;;  %v9161_v6 = vld [vmem:[#allocation2 + $0xb2] sm:$0xff]  ;;  %v9163_v7 = vld [vmem:[#allocation2 + $0xaa] sm:$0xff] }
  0x40   : > { %2021 = vst.msk [vmem:[#allocation3 + $0xa8] sm:$0xff] %vm442_vm0, %v9163_v7  ;;  %2022 = vst.msk [vmem:[#allocation3 + $0xb8] sm:$0xff] %vm442_vm0, %v9161_v6  ;;  %v1791_v10 = vld [vmem:[#allocation2 + $0x69] sm:$0xff]  ;;  %v1790_v11 = vld [vmem:[#allocation2 + $0x61] sm:$0xff] }
  0x41   : > { %1852 = vrot.lane.b32.xlu1 %v1787_v51, %s8751_s30  ;;  %1850 = vrot.lane.b32.xlu0 %v1786_v52, %s8751_s30  ;;  %547 = vst.msk [vmem:[#allocation2 + $0xd9] sm:$0xff] %vm442_vm0, %v514_v12  ;;  %548 = vst.msk [vmem:[#allocation2 + $0xe1] sm:$0xff] %vm442_vm0, %v515_v13  ;;  %v9239_v18 = vld [vmem:[#allocation2 + $0x81] sm:$0xff]  ;;  %v9241_v19 = vld [vmem:[#allocation2 + $0x79] sm:$0xff] }
  0x42   : > { %549 = vst.msk [vmem:[#allocation2 + $0xf1] sm:$0xff] %vm442_vm0, %v516_v20  ;;  %550 = vst.msk [vmem:[#allocation2 + $0xf9] sm:$0xff] %vm442_vm0, %v517_v21  ;;  %v9301_v37 = vld [vmem:[#allocation2 + $0x91] sm:$0xff]  ;;  %v2050_v53 = vld [vmem:[#allocation3 + $0x38] sm:$0xff] }
  0x43   : > { %v9173_v9 = vld [vmem:[#allocation2 + $0xc0] sm:$0xff] }
  0x44   : > { %611 = vst.msk [vmem:[#allocation3 + $0x100] sm:$0xff] %vm442_vm0, %v9173_v9 }
  0x45   : > { %697 = vrot.lane.b32.xlu1 %v9008_v27, %s8746_s21  ;;  %695 = vrot.lane.b32.xlu0 %v9014_v30, %s8746_s21 }
  0x46   : > { %v9171_v8 = vld [vmem:[#allocation2 + $0xc8] sm:$0xff] }
  0x47   : > { %612 = vst.msk [vmem:[#allocation3 + $0x110] sm:$0xff] %vm442_vm0, %v9171_v8  ;;  %v9203_v14 = vld [vmem:[#allocation2 + $0xca] sm:$0xff]  ;;  %v9205_v15 = vld [vmem:[#allocation2 + $0xc2] sm:$0xff] }
  0x48   : > { %2023 = vst.msk [vmem:[#allocation3 + $0xc8] sm:$0xff] %vm442_vm0, %v9205_v15  ;;  %2024 = vst.msk [vmem:[#allocation3 + $0xd8] sm:$0xff] %vm442_vm0, %v9203_v14  ;;  %v9213_v16 = vld [vmem:[#allocation2 + $0xe0] sm:$0xff]  ;;  %v9215_v17 = vld [vmem:[#allocation2 + $0xd8] sm:$0xff] }
  0x49   : > { %890 = vrot.lane.b32.xlu1 %v1400_v38, %s8745_s20  ;;  %888 = vrot.lane.b32.xlu0 %v1399_v41, %s8745_s20  ;;  %614 = vst.msk [vmem:[#allocation3 + $0x130] sm:$0xff] %vm442_vm0, %v9213_v16  ;;  %613 = vst.msk [vmem:[#allocation3 + $0x120] sm:$0xff] %vm442_vm0, %v9215_v17  ;;  %v9251_v22 = vld [vmem:[#allocation2 + $0xe2] sm:$0xff]  ;;  %v9253_v23 = vld [vmem:[#allocation2 + $0xda] sm:$0xff] }
  0x4a   : > { %2025 = vst.msk [vmem:[#allocation3 + $0xe8] sm:$0xff] %vm442_vm0, %v9253_v23  ;;  %2026 = vst.msk [vmem:[#allocation3 + $0xf8] sm:$0xff] %vm442_vm0, %v9251_v22  ;;  %v9262_v26 = vld [vmem:[#allocation2 + $0xf8] sm:$0xff]  ;;  %v9264_v27 = vld [vmem:[#allocation2 + $0xf0] sm:$0xff] }
  0x4b   : > { %616 = vst.msk [vmem:[#allocation3 + $0x150] sm:$0xff] %vm442_vm0, %v9262_v26  ;;  %615 = vst.msk [vmem:[#allocation3 + $0x140] sm:$0xff] %vm442_vm0, %v9264_v27  ;;  %v519_v41 = vld [vmem:[%s8961_s17 + $0xa8] sm:$0xff] }
  0x4c   : > { %552 = vst.msk [vmem:[#allocation2 + $0x111] sm:$0xff] %vm442_vm0, %v519_v41 }
  0x4d   : > { %1083 = vrot.lane.b32.xlu1 %v9010_v28, %s8747_s28  ;;  %1081 = vrot.lane.b32.xlu0 %v9012_v29, %s8747_s28 }
  0x51   : > { %1276 = vrot.lane.b32.xlu1 %v1787_v51, %s8748_s15  ;;  %1274 = vrot.lane.b32.xlu0 %v1786_v52, %s8748_s15 }
  0x55   : > { %1469 = vrot.lane.b32.xlu1 %v9016_v31, %s8749_s16  ;;  %1467 = vrot.lane.b32.xlu0 %v9018_v32, %s8749_s16 }
  0x59   : > { %1663 = vrot.lane.b32.xlu1 %v9025_v33, %s8750_s24  ;;  %1661 = vrot.lane.b32.xlu0 %v9027_v34, %s8750_s24 }
  0x5d   : > { %1856 = vrot.lane.b32.xlu1 %v1789_v2, %s8751_s30  ;;  %1854 = vrot.lane.b32.xlu0 %v1788_v3, %s8751_s30 }
  0x61   : > { %701 = vrot.lane.b32.xlu1 %v1787_v51, %s8746_s21  ;;  %699 = vrot.lane.b32.xlu0 %v1786_v52, %s8746_s21  ;;  %v2048_v52 = vld [vmem:[#allocation3 + $0x28] sm:$0xff] }
  0x65   : > { %894 = vrot.lane.b32.xlu1 %v9016_v31, %s8745_s20  ;;  %892 = vrot.lane.b32.xlu0 %v9018_v32, %s8745_s20 }
  0x69   : > { %1087 = vrot.lane.b32.xlu1 %v9025_v33, %s8747_s28  ;;  %1085 = vrot.lane.b32.xlu0 %v9027_v34, %s8747_s28 }
  0x6d   : > { %1280 = vrot.lane.b32.xlu1 %v1789_v2, %s8748_s15  ;;  %1278 = vrot.lane.b32.xlu0 %v1788_v3, %s8748_s15 }
  0x71   : > { %1473 = vrot.lane.b32.xlu1 %v9033_v35, %s8749_s16  ;;  %1471 = vrot.lane.b32.xlu0 %v9035_v36, %s8749_s16 }
  0x75   : > { %1667 = vrot.lane.b32.xlu1 %v9048_v39, %s8750_s24  ;;  %1665 = vrot.lane.b32.xlu0 %v9050_v40, %s8750_s24 }
  0x79   : > { %1860 = vrot.lane.b32.xlu1 %v1791_v10, %s8751_s30  ;;  %1858 = vrot.lane.b32.xlu0 %v1790_v11, %s8751_s30 }
  0x7d   : > { %705 = vrot.lane.b32.xlu1 %v1789_v2, %s8746_s21  ;;  %703 = vrot.lane.b32.xlu0 %v1788_v3, %s8746_s21  ;;  %v2110_v2 = vpack.c.bf16 %v2050_v53, %v2048_v52  ;;  %v522_v52 = vld [vmem:[%s8961_s17 + $0xc0] sm:$0xff]  ;;  %v523_v53 = vld [vmem:[%s8961_s17 + $0xc8] sm:$0xff] }
  0x7e   : > { %555 = vst.msk [vmem:[#allocation2 + $0x139] sm:$0xff] %vm442_vm0, %v522_v52  ;;  %556 = vst.msk [vmem:[#allocation2 + $0x141] sm:$0xff] %vm442_vm0, %v523_v53 }
  0x81   : > { %898 = vrot.lane.b32.xlu1 %v9033_v35, %s8745_s20  ;;  %896 = vrot.lane.b32.xlu0 %v9035_v36, %s8745_s20  ;;  %v9299_v36 = vld [vmem:[#allocation2 + $0x99] sm:$0xff] }
  0x85   : > { %1091 = vrot.lane.b32.xlu1 %v9048_v39, %s8747_s28  ;;  %1089 = vrot.lane.b32.xlu0 %v9050_v40, %s8747_s28  ;;  %v518_v40 = vld [vmem:[%s8961_s17 + $0xa0] sm:$0xff] }
  0x86   : > { %551 = vst.msk [vmem:[#allocation2 + $0x109] sm:$0xff] %vm442_vm0, %v518_v40 }
  0x88   : > { %v885_v24 = vpop.permute.xlu1 %884 }
  0x89   : > { %1284 = vrot.lane.b32.xlu1 %v1791_v10, %s8748_s15  ;;  %1282 = vrot.lane.b32.xlu0 %v1790_v11, %s8748_s15  ;;  %v692_v25 = vpop.permute.xlu0 %691 }
  0x8a   : > { %788 = vst.msk [vmem:[#allocation3] sm:$0xff] %vm787_vm2, %v692_v25 }
  0x8b   : > { %981 = vst.msk [vmem:[#allocation3] sm:$0xff] %vm980_vm3, %v885_v24  ;;  %v9382_v24 = vld [vmem:[#allocation2 + $0x112] sm:$0xff] }
  0x8c   : > { %2030 = vst.msk [vmem:[#allocation3 + $0x138] sm:$0xff] %vm442_vm0, %v9382_v24 }
  0x8d   : > { %1477 = vrot.lane.b32.xlu1 %v9056_v42, %s8749_s16  ;;  %1475 = vrot.lane.b32.xlu0 %v9058_v43, %s8749_s16  ;;  %v9329_v54 = vld [vmem:[#allocation2 + $0x110] sm:$0xff]  ;;  %v9331_v55 = vld [vmem:[#allocation2 + $0x108] sm:$0xff] }
  0x8e   : > { %618 = vst.msk [vmem:[#allocation3 + $0x170] sm:$0xff] %vm442_vm0, %v9329_v54  ;;  %617 = vst.msk [vmem:[#allocation3 + $0x160] sm:$0xff] %vm442_vm0, %v9331_v55  ;;  %v9384_v25 = vld [vmem:[#allocation2 + $0x10a] sm:$0xff] }
  0x8f   : > { %2029 = vst.msk [vmem:[#allocation3 + $0x128] sm:$0xff] %vm442_vm0, %v9384_v25 }
  0x91   : > { %1671 = vrot.lane.b32.xlu1 %v9065_v44, %s8750_s24  ;;  %1669 = vrot.lane.b32.xlu0 %v9067_v45, %s8750_s24 }
  0x95   : > { %1864 = vrot.lane.b32.xlu1 %v9239_v18, %s8751_s30  ;;  %1862 = vrot.lane.b32.xlu0 %v9241_v19, %s8751_s30 }
  0x99   : > { %709 = vrot.lane.b32.xlu1 %v1791_v10, %s8746_s21  ;;  %707 = vrot.lane.b32.xlu0 %v1790_v11, %s8746_s21  ;;  %v9366_v10 = vld [vmem:[#allocation2 + $0xb1] sm:$0xff]  ;;  %v9368_v11 = vld [vmem:[#allocation2 + $0xa9] sm:$0xff] }
  0x9a   : > { %v887_v28 = vpop.permute.xlu1 %886 }
  0x9b   : > { %v694_v29 = vpop.permute.xlu0 %693 }
  0x9c   : > { %789 = vst.msk [vmem:[#allocation3 + $0x10] sm:$0xff] %vm787_vm2, %v694_v29 }
  0x9d   : > { %902 = vrot.lane.b32.xlu1 %v9056_v42, %s8745_s20  ;;  %900 = vrot.lane.b32.xlu0 %v9058_v43, %s8745_s20  ;;  %982 = vst.msk [vmem:[#allocation3 + $0x10] sm:$0xff] %vm980_vm3, %v887_v28 }
  0xa1   : > { %1095 = vrot.lane.b32.xlu1 %v9065_v44, %s8747_s28  ;;  %1093 = vrot.lane.b32.xlu0 %v9067_v45, %s8747_s28  ;;  %v9315_v44 = vld [vmem:[#allocation2 + $0xfa] sm:$0xff]  ;;  %v9317_v45 = vld [vmem:[#allocation2 + $0xf2] sm:$0xff] }
  0xa2   : > { %2027 = vst.msk [vmem:[#allocation3 + $0x108] sm:$0xff] %vm442_vm0, %v9317_v45  ;;  %2028 = vst.msk [vmem:[#allocation3 + $0x118] sm:$0xff] %vm442_vm0, %v9315_v44 }
  0xa3   : > { %v1080_v30 = vpop.permute.xlu1 %1079  ;;  %v1078_v31 = vpop.permute.xlu0 %1077 }
  0xa4   : > { %1175 = vst.msk [vmem:[#allocation3 + $0x10] sm:$0xff] %vm1173_vm4, %v1080_v30  ;;  %1174 = vst.msk [vmem:[#allocation3] sm:$0xff] %vm1173_vm4, %v1078_v31  ;;  %v2052_v30 = vld [vmem:[#allocation3 + $0x48] sm:$0xff]  ;;  %v2054_v31 = vld [vmem:[#allocation3 + $0x58] sm:$0xff] }
  0xa5   : > { %1288 = vrot.lane.b32.xlu1 %v9239_v18, %s8748_s15  ;;  %1286 = vrot.lane.b32.xlu0 %v9241_v19, %s8748_s15 }
  0xa7   : > { %v1273_v32 = vpop.permute.xlu1 %1272  ;;  %v1271_v33 = vpop.permute.xlu0 %1270 }
  0xa8   : > { %1368 = vst.msk [vmem:[#allocation3 + $0x10] sm:$0xff] %vm1366_vm5, %v1273_v32  ;;  %1367 = vst.msk [vmem:[#allocation3] sm:$0xff] %vm1366_vm5, %v1271_v33 }
  0xa9   : > { %1481 = vrot.lane.b32.xlu1 %v9073_v46, %s8749_s16  ;;  %1479 = vrot.lane.b32.xlu0 %v9075_v47, %s8749_s16 }
  0xab   : > { %v1466_v34 = vpop.permute.xlu1 %1465  ;;  %v1464_v35 = vpop.permute.xlu0 %1463 }
  0xac   : > { %1561 = vst.msk [vmem:[#allocation3 + $0x10] sm:$0xff] %vm1559_vm6, %v1466_v34  ;;  %1560 = vst.msk [vmem:[#allocation3] sm:$0xff] %vm1559_vm6, %v1464_v35 }
  0xad   : > { %1675 = vrot.lane.b32.xlu1 %v9083_v48, %s8750_s24  ;;  %1673 = vrot.lane.b32.xlu0 %v9085_v49, %s8750_s24 }
  0xaf   : > { %v1660_v38 = vpop.permute.xlu1 %1659  ;;  %v1658_v39 = vpop.permute.xlu0 %1657 }
  0xb0   : > { %1755 = vst.msk [vmem:[#allocation3 + $0x10] sm:$0xff] %vm1753_vm7, %v1660_v38  ;;  %1754 = vst.msk [vmem:[#allocation3] sm:$0xff] %vm1753_vm7, %v1658_v39  ;;  %v2112_v38 = vpack.c.bf16 %v2054_v31, %v2052_v30  ;;  %v524_v30 = vld [vmem:[%s8961_s17 + $0xd0] sm:$0xff]  ;;  %v525_v31 = vld [vmem:[%s8961_s17 + $0xd8] sm:$0xff] }
  0xb1   : > { %1868 = vrot.lane.b32.xlu1 %v9299_v36, %s8751_s30  ;;  %1866 = vrot.lane.b32.xlu0 %v9301_v37, %s8751_s30  ;;  %557 = vst.msk [vmem:[#allocation2 + $0x151] sm:$0xff] %vm442_vm0, %v524_v30  ;;  %558 = vst.msk [vmem:[#allocation2 + $0x159] sm:$0xff] %vm442_vm0, %v525_v31 }
  0xb3   : > { %v1853_v42 = vpop.permute.xlu1 %1852  ;;  %v1851_v43 = vpop.permute.xlu0 %1850 }
  0xb4   : > { %1948 = vst.msk [vmem:[#allocation3 + $0x10] sm:$0xff] %vm1946_vm8, %v1853_v42  ;;  %1947 = vst.msk [vmem:[#allocation3] sm:$0xff] %vm1946_vm8, %v1851_v43  ;;  %v9433_v42 = vld [vmem:[#allocation2 + $0xc9] sm:$0xff]  ;;  %v9435_v43 = vld [vmem:[#allocation2 + $0xc1] sm:$0xff] }
  0xb5   : > { %713 = vrot.lane.b32.xlu1 %v9239_v18, %s8746_s21  ;;  %711 = vrot.lane.b32.xlu0 %v9241_v19, %s8746_s21  ;;  %v520_v18 = vld [vmem:[%s8961_s17 + $0xb0] sm:$0xff]  ;;  %v521_v19 = vld [vmem:[%s8961_s17 + $0xb8] sm:$0xff] }
  0xb6   : > { %553 = vst.msk [vmem:[#allocation2 + $0x121] sm:$0xff] %vm442_vm0, %v520_v18  ;;  %554 = vst.msk [vmem:[#allocation2 + $0x129] sm:$0xff] %vm442_vm0, %v521_v19 }
  0xb7   : > { %v698_v50 = vpop.permute.xlu1 %697  ;;  %v696_v51 = vpop.permute.xlu0 %695 }
  0xb8   : > { %791 = vst.msk [vmem:[#allocation3 + $0x30] sm:$0xff] %vm787_vm2, %v698_v50  ;;  %790 = vst.msk [vmem:[#allocation3 + $0x20] sm:$0xff] %vm787_vm2, %v696_v51 }
  0xb9   : > { %906 = vrot.lane.b32.xlu1 %v9073_v46, %s8745_s20  ;;  %904 = vrot.lane.b32.xlu0 %v9075_v47, %s8745_s20 }
  0xbb   : > { %v891_v56 = vpop.permute.xlu1 %890  ;;  %v889_v57 = vpop.permute.xlu0 %888  ;;  %v2043_v58 = vld [vmem:[#allocation3] sm:$0xff]  ;;  %v2045_v59 = vld [vmem:[#allocation3 + $0x10] sm:$0xff] }
  0xbc   : > { %984 = vst.msk [vmem:[#allocation3 + $0x30] sm:$0xff] %vm980_vm3, %v891_v56  ;;  %983 = vst.msk [vmem:[#allocation3 + $0x20] sm:$0xff] %vm980_vm3, %v889_v57  ;;  %v2107_v3 = vpack.c.bf16 %v2045_v59, %v2043_v58 }
  0xbd   : > { %1099 = vrot.lane.b32.xlu1 %v9083_v48, %s8747_s28  ;;  %1097 = vrot.lane.b32.xlu0 %v9085_v49, %s8747_s28  ;;  %v9396_v32 = vld [vmem:[#allocation2 + $0x128] sm:$0xff]  ;;  %v9398_v33 = vld [vmem:[#allocation2 + $0x120] sm:$0xff] }
  0xbe   : > { %2299 = vmatmul.mubr.bf16.vlgmr.msra.gmra.mrb[0].mxu0 %v2107_v3  ;;  %620 = vst.msk [vmem:[#allocation3 + $0x190] sm:$0xff] %vm442_vm0, %v9396_v32  ;;  %619 = vst.msk [vmem:[#allocation3 + $0x180] sm:$0xff] %vm442_vm0, %v9398_v33  ;;  %v9449_v58 = vld [vmem:[#allocation2 + $0x12a] sm:$0xff]  ;;  %v9451_v59 = vld [vmem:[#allocation2 + $0x122] sm:$0xff] }
  0xbf   : > { %v1084_v46 = vpop.permute.xlu1 %1083  ;;  %v1082_v47 = vpop.permute.xlu0 %1081  ;;  %8533 = vmatprep.mubr.msk.bf16.mxu0 %vm442_vm0, %v2110_v2  ;;  %2031 = vst.msk [vmem:[#allocation3 + $0x148] sm:$0xff] %vm442_vm0, %v9451_v59  ;;  %2032 = vst.msk [vmem:[#allocation3 + $0x158] sm:$0xff] %vm442_vm0, %v9449_v58 }
  0xc0   : > { %1177 = vst.msk [vmem:[#allocation3 + $0x30] sm:$0xff] %vm1173_vm4, %v1084_v46  ;;  %1176 = vst.msk [vmem:[#allocation3 + $0x20] sm:$0xff] %vm1173_vm4, %v1082_v47  ;;  %v2056_v46 = vld [vmem:[#allocation3 + $0x68] sm:$0xff]  ;;  %v2058_v47 = vld [vmem:[#allocation3 + $0x78] sm:$0xff] }
  0xc1   : > { %1292 = vrot.lane.b32.xlu1 %v9299_v36, %s8748_s15  ;;  %1290 = vrot.lane.b32.xlu0 %v9301_v37, %s8748_s15 }
  0xc3   : > { %v1277_v4 = vpop.permute.xlu1 %1276  ;;  %v1275_v48 = vpop.permute.xlu0 %1274 }
  0xc4   : > { %1370 = vst.msk [vmem:[#allocation3 + $0x30] sm:$0xff] %vm1366_vm5, %v1277_v4  ;;  %1369 = vst.msk [vmem:[#allocation3 + $0x20] sm:$0xff] %vm1366_vm5, %v1275_v48  ;;  %v9463_v4 = vld [vmem:[#allocation2 + $0x140] sm:$0xff]  ;;  %v9465_v48 = vld [vmem:[#allocation2 + $0x138] sm:$0xff] }
  0xc5   : > { %1485 = vrot.lane.b32.xlu1 %v9118_v60, %s8749_s16  ;;  %1483 = vrot.lane.b32.xlu0 %v9120_v61, %s8749_s16  ;;  %622 = vst.msk [vmem:[#allocation3 + $0x1b0] sm:$0xff] %vm442_vm0, %v9463_v4  ;;  %621 = vst.msk [vmem:[#allocation3 + $0x1a0] sm:$0xff] %vm442_vm0, %v9465_v48 }
  0xc7   : > { %v1470_v49 = vpop.permute.xlu1 %1469  ;;  %v1468_v5 = vpop.permute.xlu0 %1467 }
  0xc8   : > { %1563 = vst.msk [vmem:[#allocation3 + $0x30] sm:$0xff] %vm1559_vm6, %v1470_v49  ;;  %1562 = vst.msk [vmem:[#allocation3 + $0x20] sm:$0xff] %vm1559_vm6, %v1468_v5 }
  0xc9   : > { %1679 = vrot.lane.b32.xlu1 %v9131_v62, %s8750_s24  ;;  %1677 = vrot.lane.b32.xlu0 %v9133_v63, %s8750_s24 }
  0xcb   : > { %v1664_v12 = vpop.permute.xlu1 %1663  ;;  %v1662_v13 = vpop.permute.xlu0 %1661 }
  0xcc   : > { %1757 = vst.msk [vmem:[#allocation3 + $0x30] sm:$0xff] %vm1753_vm7, %v1664_v12  ;;  %1756 = vst.msk [vmem:[#allocation3 + $0x20] sm:$0xff] %vm1753_vm7, %v1662_v13  ;;  %v2114_v12 = vpack.c.bf16 %v2058_v47, %v2056_v46  ;;  %v526_v46 = vld [vmem:[%s8961_s17 + $0xe0] sm:$0xff]  ;;  %v527_v47 = vld [vmem:[%s8961_s17 + $0xe8] sm:$0xff] }
  0xcd   : > { %1872 = vrot.lane.b32.xlu1 %v9366_v10, %s8751_s30  ;;  %1870 = vrot.lane.b32.xlu0 %v9368_v11, %s8751_s30  ;;  %559 = vst.msk [vmem:[#allocation2 + $0x169] sm:$0xff] %vm442_vm0, %v526_v46  ;;  %560 = vst.msk [vmem:[#allocation2 + $0x171] sm:$0xff] %vm442_vm0, %v527_v47  ;;  %v9693_v46 = vld [vmem:[#allocation2 + $0x129] sm:$0xff]  ;;  %v9695_v47 = vld [vmem:[#allocation2 + $0x121] sm:$0xff] }
  0xcf   : > { %v1857_v20 = vpop.permute.xlu1 %1856  ;;  %v1855_v21 = vpop.permute.xlu0 %1854 }
  0xd0   : > { %1950 = vst.msk [vmem:[#allocation3 + $0x30] sm:$0xff] %vm1946_vm8, %v1857_v20  ;;  %1949 = vst.msk [vmem:[#allocation3 + $0x20] sm:$0xff] %vm1946_vm8, %v1855_v21  ;;  %v9500_v20 = vld [vmem:[#allocation2 + $0xe1] sm:$0xff]  ;;  %v9502_v21 = vld [vmem:[#allocation2 + $0xd9] sm:$0xff] }
  0xd1   : > { %717 = vrot.lane.b32.xlu1 %v9299_v36, %s8746_s21  ;;  %715 = vrot.lane.b32.xlu0 %v9301_v37, %s8746_s21 }
  0xd3   : > { %v702_v28 = vpop.permute.xlu1 %701  ;;  %v700_v29 = vpop.permute.xlu0 %699 }
  0xd4   : > { %793 = vst.msk [vmem:[#allocation3 + $0x50] sm:$0xff] %vm787_vm2, %v702_v28  ;;  %792 = vst.msk [vmem:[#allocation3 + $0x40] sm:$0xff] %vm787_vm2, %v700_v29 }
  0xd5   : > { %910 = vrot.lane.b32.xlu1 %v9118_v60, %s8745_s20  ;;  %908 = vrot.lane.b32.xlu0 %v9120_v61, %s8745_s20 }
  0xd7   : > { %v895_v34 = vpop.permute.xlu1 %894  ;;  %v893_v35 = vpop.permute.xlu0 %892  ;;  %v2047_v36 = vld [vmem:[#allocation3 + $0x20] sm:$0xff]  ;;  %v2049_v37 = vld [vmem:[#allocation3 + $0x30] sm:$0xff] }
  0xd8   : > { %986 = vst.msk [vmem:[#allocation3 + $0x50] sm:$0xff] %vm980_vm3, %v895_v34  ;;  %985 = vst.msk [vmem:[#allocation3 + $0x40] sm:$0xff] %vm980_vm3, %v893_v35  ;;  %v2109_v39 = vpack.c.bf16 %v2049_v37, %v2047_v36  ;;  %v9516_v36 = vld [vmem:[#allocation2 + $0x142] sm:$0xff]  ;;  %v9518_v37 = vld [vmem:[#allocation2 + $0x13a] sm:$0xff] }
  0xd9   : > { %1103 = vrot.lane.b32.xlu1 %v9131_v62, %s8747_s28  ;;  %1101 = vrot.lane.b32.xlu0 %v9133_v63, %s8747_s28  ;;  %2033 = vst.msk [vmem:[#allocation3 + $0x168] sm:$0xff] %vm442_vm0, %v9518_v37  ;;  %2034 = vst.msk [vmem:[#allocation3 + $0x178] sm:$0xff] %vm442_vm0, %v9516_v36 }
  0xda   : > { %2307 = vmatmul.mubr.bf16.gmra.mrb[4].mxu0 %v2109_v39 }
  0xdb   : > { %v1088_v60 = vpop.permute.xlu1 %1087  ;;  %v1086_v61 = vpop.permute.xlu0 %1085  ;;  %8534 = vmatprep.mubr.msk.bf16.mxu0 %vm442_vm0, %v2112_v38 }
  0xdc   : > { %1179 = vst.msk [vmem:[#allocation3 + $0x50] sm:$0xff] %vm1173_vm4, %v1088_v60  ;;  %1178 = vst.msk [vmem:[#allocation3 + $0x40] sm:$0xff] %vm1173_vm4, %v1086_v61  ;;  %v2060_v60 = vld [vmem:[#allocation3 + $0x88] sm:$0xff]  ;;  %v2062_v61 = vld [vmem:[#allocation3 + $0x98] sm:$0xff] }
  0xdd   : > { %1296 = vrot.lane.b32.xlu1 %v9366_v10, %s8748_s15  ;;  %1294 = vrot.lane.b32.xlu0 %v9368_v11, %s8748_s15 }
  0xdf   : > { %v1281_v40 = vpop.permute.xlu1 %1280  ;;  %v1279_v62 = vpop.permute.xlu0 %1278 }
  0xe0   : > { %1372 = vst.msk [vmem:[#allocation3 + $0x50] sm:$0xff] %vm1366_vm5, %v1281_v40  ;;  %1371 = vst.msk [vmem:[#allocation3 + $0x40] sm:$0xff] %vm1366_vm5, %v1279_v62  ;;  %v9530_v40 = vld [vmem:[#allocation2 + $0x158] sm:$0xff]  ;;  %v9532_v62 = vld [vmem:[#allocation2 + $0x150] sm:$0xff] }
  0xe1   : > { %1489 = vrot.lane.b32.xlu1 %v9161_v6, %s8749_s16  ;;  %1487 = vrot.lane.b32.xlu0 %v9163_v7, %s8749_s16  ;;  %624 = vst.msk [vmem:[#allocation3 + $0x1d0] sm:$0xff] %vm442_vm0, %v9530_v40  ;;  %623 = vst.msk [vmem:[#allocation3 + $0x1c0] sm:$0xff] %vm442_vm0, %v9532_v62 }
  0xe3   : > { %v1474_v63 = vpop.permute.xlu1 %1473  ;;  %v1472_v41 = vpop.permute.xlu0 %1471 }
  0xe4   : > { %1565 = vst.msk [vmem:[#allocation3 + $0x50] sm:$0xff] %vm1559_vm6, %v1474_v63  ;;  %1564 = vst.msk [vmem:[#allocation3 + $0x40] sm:$0xff] %vm1559_vm6, %v1472_v41 }
  0xe5   : > { %1683 = vrot.lane.b32.xlu1 %v9171_v8, %s8750_s24  ;;  %1681 = vrot.lane.b32.xlu0 %v9173_v9, %s8750_s24 }
  0xe7   : > { %v1668_v50 = vpop.permute.xlu1 %1667  ;;  %v1666_v51 = vpop.permute.xlu0 %1665 }
  0xe8   : > { %1759 = vst.msk [vmem:[#allocation3 + $0x50] sm:$0xff] %vm1753_vm7, %v1668_v50  ;;  %1758 = vst.msk [vmem:[#allocation3 + $0x40] sm:$0xff] %vm1753_vm7, %v1666_v51  ;;  %v2116_v50 = vpack.c.bf16 %v2062_v61, %v2060_v60  ;;  %v528_v60 = vld [vmem:[%s8961_s17 + $0xf0] sm:$0xff]  ;;  %v529_v61 = vld [vmem:[%s8961_s17 + $0xf8] sm:$0xff] }
  0xe9   : > { %1876 = vrot.lane.b32.xlu1 %v9433_v42, %s8751_s30  ;;  %1874 = vrot.lane.b32.xlu0 %v9435_v43, %s8751_s30  ;;  %561 = vst.msk [vmem:[#allocation2 + $0x181] sm:$0xff] %vm442_vm0, %v528_v60  ;;  %562 = vst.msk [vmem:[#allocation2 + $0x189] sm:$0xff] %vm442_vm0, %v529_v61 }
  0xeb   : > { %v1861_v56 = vpop.permute.xlu1 %1860  ;;  %v1859_v57 = vpop.permute.xlu0 %1858 }
  0xec   : > { %1952 = vst.msk [vmem:[#allocation3 + $0x50] sm:$0xff] %vm1946_vm8, %v1861_v56  ;;  %1951 = vst.msk [vmem:[#allocation3 + $0x40] sm:$0xff] %vm1946_vm8, %v1859_v57  ;;  %v9567_v56 = vld [vmem:[#allocation2 + $0xf9] sm:$0xff]  ;;  %v9569_v57 = vld [vmem:[#allocation2 + $0xf1] sm:$0xff] }
  0xed   : > { %721 = vrot.lane.b32.xlu1 %v9366_v10, %s8746_s21  ;;  %719 = vrot.lane.b32.xlu0 %v9368_v11, %s8746_s21 }
  0xef   : > { %v706_v2 = vpop.permute.xlu1 %705  ;;  %v704_v3 = vpop.permute.xlu0 %703 }
  0xf0   : > { %795 = vst.msk [vmem:[#allocation3 + $0x70] sm:$0xff] %vm787_vm2, %v706_v2  ;;  %794 = vst.msk [vmem:[#allocation3 + $0x60] sm:$0xff] %vm787_vm2, %v704_v3 }
  0xf1   : > { %914 = vrot.lane.b32.xlu1 %v9161_v6, %s8745_s20  ;;  %912 = vrot.lane.b32.xlu0 %v9163_v7, %s8745_s20 }
  0xf3   : > { %v899_v49 = vpop.permute.xlu1 %898  ;;  %v897_v5 = vpop.permute.xlu0 %896  ;;  %v2051_v10 = vld [vmem:[#allocation3 + $0x40] sm:$0xff]  ;;  %v2053_v11 = vld [vmem:[#allocation3 + $0x50] sm:$0xff] }
  0xf4   : > { %988 = vst.msk [vmem:[#allocation3 + $0x70] sm:$0xff] %vm980_vm3, %v899_v49  ;;  %987 = vst.msk [vmem:[#allocation3 + $0x60] sm:$0xff] %vm980_vm3, %v897_v5  ;;  %v2111_v13 = vpack.c.bf16 %v2053_v11, %v2051_v10  ;;  %v9587_v10 = vld [vmem:[#allocation2 + $0x15a] sm:$0xff]  ;;  %v9589_v11 = vld [vmem:[#allocation2 + $0x152] sm:$0xff] }
  0xf5   : > { %1107 = vrot.lane.b32.xlu1 %v9171_v8, %s8747_s28  ;;  %1105 = vrot.lane.b32.xlu0 %v9173_v9, %s8747_s28  ;;  %2035 = vst.msk [vmem:[#allocation3 + $0x188] sm:$0xff] %vm442_vm0, %v9589_v11  ;;  %2036 = vst.msk [vmem:[#allocation3 + $0x198] sm:$0xff] %vm442_vm0, %v9587_v10 }
  0xf6   : > { %2315 = vmatmul.mubr.bf16.gmra.mrb[8].mxu0 %v2111_v13 }
  0xf7   : > { %v1092_v6 = vpop.permute.xlu1 %1091  ;;  %v1090_v7 = vpop.permute.xlu0 %1089  ;;  %8535 = vmatprep.mubr.msk.bf16.mxu0 %vm442_vm0, %v2114_v12 }
  0xf8   : > { %1181 = vst.msk [vmem:[#allocation3 + $0x70] sm:$0xff] %vm1173_vm4, %v1092_v6  ;;  %1180 = vst.msk [vmem:[#allocation3 + $0x60] sm:$0xff] %vm1173_vm4, %v1090_v7  ;;  %v2064_v6 = vld [vmem:[#allocation3 + $0xa8] sm:$0xff]  ;;  %v2066_v7 = vld [vmem:[#allocation3 + $0xb8] sm:$0xff] }
  0xf9   : > { %1300 = vrot.lane.b32.xlu1 %v9433_v42, %s8748_s15  ;;  %1298 = vrot.lane.b32.xlu0 %v9435_v43, %s8748_s15 }
  0xfb   : > { %v1285_v18 = vpop.permute.xlu1 %1284  ;;  %v1283_v8 = vpop.permute.xlu0 %1282 }
  0xfc   : > { %1374 = vst.msk [vmem:[#allocation3 + $0x70] sm:$0xff] %vm1366_vm5, %v1285_v18  ;;  %1373 = vst.msk [vmem:[#allocation3 + $0x60] sm:$0xff] %vm1366_vm5, %v1283_v8  ;;  %v9601_v18 = vld [vmem:[#allocation2 + $0x170] sm:$0xff]  ;;  %v9603_v8 = vld [vmem:[#allocation2 + $0x168] sm:$0xff] }
  0xfd   : > { %1493 = vrot.lane.b32.xlu1 %v9203_v14, %s8749_s16  ;;  %1491 = vrot.lane.b32.xlu0 %v9205_v15, %s8749_s16  ;;  %626 = vst.msk [vmem:[#allocation3 + $0x1f0] sm:$0xff] %vm442_vm0, %v9601_v18  ;;  %625 = vst.msk [vmem:[#allocation3 + $0x1e0] sm:$0xff] %vm442_vm0, %v9603_v8 }
  0xff   : > { %v1478_v9 = vpop.permute.xlu1 %1477  ;;  %v1476_v19 = vpop.permute.xlu0 %1475 }
 0x100   : > { %1567 = vst.msk [vmem:[#allocation3 + $0x70] sm:$0xff] %vm1559_vm6, %v1478_v9  ;;  %1566 = vst.msk [vmem:[#allocation3 + $0x60] sm:$0xff] %vm1559_vm6, %v1476_v19 }
 0x101   : > { %1687 = vrot.lane.b32.xlu1 %v9213_v16, %s8750_s24  ;;  %1685 = vrot.lane.b32.xlu0 %v9215_v17, %s8750_s24 }
 0x103   : > { %v1672_v28 = vpop.permute.xlu1 %1671  ;;  %v1670_v29 = vpop.permute.xlu0 %1669 }
 0x104   : > { %1761 = vst.msk [vmem:[#allocation3 + $0x70] sm:$0xff] %vm1753_vm7, %v1672_v28  ;;  %1760 = vst.msk [vmem:[#allocation3 + $0x60] sm:$0xff] %vm1753_vm7, %v1670_v29  ;;  %v2118_v28 = vpack.c.bf16 %v2066_v7, %v2064_v6  ;;  %v9709_v6 = vld [vmem:[#allocation2 + $0x18a] sm:$0xff]  ;;  %v9711_v7 = vld [vmem:[#allocation2 + $0x182] sm:$0xff] }
 0x105   : > { %1880 = vrot.lane.b32.xlu1 %v9500_v20, %s8751_s30  ;;  %1878 = vrot.lane.b32.xlu0 %v9502_v21, %s8751_s30  ;;  %2039 = vst.msk [vmem:[#allocation3 + $0x1c8] sm:$0xff] %vm442_vm0, %v9711_v7  ;;  %2040 = vst.msk [vmem:[#allocation3 + $0x1d8] sm:$0xff] %vm442_vm0, %v9709_v6 }
 0x107   : > { %v1865_v34 = vpop.permute.xlu1 %1864  ;;  %v1863_v35 = vpop.permute.xlu0 %1862 }
 0x108   : > { %1954 = vst.msk [vmem:[#allocation3 + $0x70] sm:$0xff] %vm1946_vm8, %v1865_v34  ;;  %1953 = vst.msk [vmem:[#allocation3 + $0x60] sm:$0xff] %vm1946_vm8, %v1863_v35  ;;  %v9634_v34 = vld [vmem:[#allocation2 + $0x111] sm:$0xff]  ;;  %v9636_v35 = vld [vmem:[#allocation2 + $0x109] sm:$0xff] }
 0x109   : > { %725 = vrot.lane.b32.xlu1 %v9433_v42, %s8746_s21  ;;  %723 = vrot.lane.b32.xlu0 %v9435_v43, %s8746_s21 }
 0x10b   : > { %v710_v38 = vpop.permute.xlu1 %709  ;;  %v708_v39 = vpop.permute.xlu0 %707 }
 0x10c   : > { %797 = vst.msk [vmem:[#allocation3 + $0x90] sm:$0xff] %vm787_vm2, %v710_v38  ;;  %796 = vst.msk [vmem:[#allocation3 + $0x80] sm:$0xff] %vm787_vm2, %v708_v39 }
 0x10d   : > { %918 = vrot.lane.b32.xlu1 %v9203_v14, %s8745_s20  ;;  %916 = vrot.lane.b32.xlu0 %v9205_v15, %s8745_s20 }
 0x10f   : > { %v903_v63 = vpop.permute.xlu1 %902  ;;  %v901_v41 = vpop.permute.xlu0 %900  ;;  %v2055_v42 = vld [vmem:[#allocation3 + $0x60] sm:$0xff]  ;;  %v2057_v43 = vld [vmem:[#allocation3 + $0x70] sm:$0xff] }
 0x110   : > { %990 = vst.msk [vmem:[#allocation3 + $0x90] sm:$0xff] %vm980_vm3, %v903_v63  ;;  %989 = vst.msk [vmem:[#allocation3 + $0x80] sm:$0xff] %vm980_vm3, %v901_v41  ;;  %v2113_v51 = vpack.c.bf16 %v2057_v43, %v2055_v42  ;;  %v9654_v42 = vld [vmem:[#allocation2 + $0x172] sm:$0xff]  ;;  %v9656_v43 = vld [vmem:[#allocation2 + $0x16a] sm:$0xff] }
 0x111   : > { %1111 = vrot.lane.b32.xlu1 %v9213_v16, %s8747_s28  ;;  %1109 = vrot.lane.b32.xlu0 %v9215_v17, %s8747_s28  ;;  %2037 = vst.msk [vmem:[#allocation3 + $0x1a8] sm:$0xff] %vm442_vm0, %v9656_v43  ;;  %2038 = vst.msk [vmem:[#allocation3 + $0x1b8] sm:$0xff] %vm442_vm0, %v9654_v42 }
 0x112   : > { %2323 = vmatmul.mubr.bf16.gmra.mrb[12].mxu0 %v2113_v51 }
 0x113   : > { %v1096_v14 = vpop.permute.xlu1 %1095  ;;  %v1094_v15 = vpop.permute.xlu0 %1093  ;;  %8536 = vmatprep.mubr.msk.bf16.mxu0 %vm442_vm0, %v2116_v50 }
 0x114   : > { %1183 = vst.msk [vmem:[#allocation3 + $0x90] sm:$0xff] %vm1173_vm4, %v1096_v14  ;;  %1182 = vst.msk [vmem:[#allocation3 + $0x80] sm:$0xff] %vm1173_vm4, %v1094_v15  ;;  %v2068_v14 = vld [vmem:[#allocation3 + $0xc8] sm:$0xff]  ;;  %v2070_v15 = vld [vmem:[#allocation3 + $0xd8] sm:$0xff] }
 0x115   : > { %1304 = vrot.lane.b32.xlu1 %v9500_v20, %s8748_s15  ;;  %1302 = vrot.lane.b32.xlu0 %v9502_v21, %s8748_s15 }
 0x117   : > { %v1289_v52 = vpop.permute.xlu1 %1288  ;;  %v1287_v16 = vpop.permute.xlu0 %1286 }
 0x118   : > { %1376 = vst.msk [vmem:[#allocation3 + $0x90] sm:$0xff] %vm1366_vm5, %v1289_v52  ;;  %1375 = vst.msk [vmem:[#allocation3 + $0x80] sm:$0xff] %vm1366_vm5, %v1287_v16 }
 0x119   : > { %1497 = vrot.lane.b32.xlu1 %v9251_v22, %s8749_s16  ;;  %1495 = vrot.lane.b32.xlu0 %v9253_v23, %s8749_s16 }
 0x11b   : > { %v1482_v17 = vpop.permute.xlu1 %1481  ;;  %v1480_v53 = vpop.permute.xlu0 %1479 }
 0x11c   : > { %1569 = vst.msk [vmem:[#allocation3 + $0x90] sm:$0xff] %vm1559_vm6, %v1482_v17  ;;  %1568 = vst.msk [vmem:[#allocation3 + $0x80] sm:$0xff] %vm1559_vm6, %v1480_v53 }
 0x11d   : > { %1691 = vrot.lane.b32.xlu1 %v9262_v26, %s8750_s24  ;;  %1689 = vrot.lane.b32.xlu0 %v9264_v27, %s8750_s24 }
 0x11f   : > { %v1676_v2 = vpop.permute.xlu1 %1675  ;;  %v1674_v3 = vpop.permute.xlu0 %1673 }
 0x120   : > { %1763 = vst.msk [vmem:[#allocation3 + $0x90] sm:$0xff] %vm1753_vm7, %v1676_v2  ;;  %1762 = vst.msk [vmem:[#allocation3 + $0x80] sm:$0xff] %vm1753_vm7, %v1674_v3 }
 0x121   : > { %1884 = vrot.lane.b32.xlu1 %v9567_v56, %s8751_s30  ;;  %1882 = vrot.lane.b32.xlu0 %v9569_v57, %s8751_s30 }
 0x123   : > { %v1869_v49 = vpop.permute.xlu1 %1868  ;;  %v1867_v5 = vpop.permute.xlu0 %1866 }
 0x124   : > { %1956 = vst.msk [vmem:[#allocation3 + $0x90] sm:$0xff] %vm1946_vm8, %v1869_v49  ;;  %1955 = vst.msk [vmem:[#allocation3 + $0x80] sm:$0xff] %vm1946_vm8, %v1867_v5 }
 0x125   : > { %729 = vrot.lane.b32.xlu1 %v9500_v20, %s8746_s21  ;;  %727 = vrot.lane.b32.xlu0 %v9502_v21, %s8746_s21 }
 0x127   : > { %v714_v12 = vpop.permute.xlu1 %713  ;;  %v712_v13 = vpop.permute.xlu0 %711 }
 0x128   : > { %799 = vst.msk [vmem:[#allocation3 + $0xb0] sm:$0xff] %vm787_vm2, %v714_v12  ;;  %798 = vst.msk [vmem:[#allocation3 + $0xa0] sm:$0xff] %vm787_vm2, %v712_v13 }
 0x129   : > { %922 = vrot.lane.b32.xlu1 %v9251_v22, %s8745_s20  ;;  %920 = vrot.lane.b32.xlu0 %v9253_v23, %s8745_s20 }
 0x12b   : > { %v907_v9 = vpop.permute.xlu1 %906  ;;  %v905_v19 = vpop.permute.xlu0 %904  ;;  %v2059_v20 = vld [vmem:[#allocation3 + $0x80] sm:$0xff]  ;;  %v2061_v21 = vld [vmem:[#allocation3 + $0x90] sm:$0xff] }
 0x12c   : > { %992 = vst.msk [vmem:[#allocation3 + $0xb0] sm:$0xff] %vm980_vm3, %v907_v9  ;;  %991 = vst.msk [vmem:[#allocation3 + $0xa0] sm:$0xff] %vm980_vm3, %v905_v19  ;;  %v2115_v22 = vpack.c.bf16 %v2061_v21, %v2059_v20  ;;  %v2072_v20 = vld [vmem:[#allocation3 + $0xe8] sm:$0xff]  ;;  %v2074_v21 = vld [vmem:[#allocation3 + $0xf8] sm:$0xff] }
 0x12d   : > { %1115 = vrot.lane.b32.xlu1 %v9262_v26, %s8747_s28  ;;  %1113 = vrot.lane.b32.xlu0 %v9264_v27, %s8747_s28 }
 0x12e   : > { %2331 = vmatmul.mubr.bf16.gmra.mrb[16].mxu0 %v2115_v22 }
 0x12f   : > { %v1100_v23 = vpop.permute.xlu1 %1099  ;;  %v1098_v29 = vpop.permute.xlu0 %1097  ;;  %8537 = vmatprep.mubr.msk.bf16.mxu0 %vm442_vm0, %v2118_v28 }
 0x130   : > { %1185 = vst.msk [vmem:[#allocation3 + $0xb0] sm:$0xff] %vm1173_vm4, %v1100_v23  ;;  %1184 = vst.msk [vmem:[#allocation3 + $0xa0] sm:$0xff] %vm1173_vm4, %v1098_v29 }
 0x131   : > { %1308 = vrot.lane.b32.xlu1 %v9567_v56, %s8748_s15  ;;  %1306 = vrot.lane.b32.xlu0 %v9569_v57, %s8748_s15 }
 0x133   : > { %v1293_v30 = vpop.permute.xlu1 %1292  ;;  %v1291_v26 = vpop.permute.xlu0 %1290 }
 0x134   : > { %1378 = vst.msk [vmem:[#allocation3 + $0xb0] sm:$0xff] %vm1366_vm5, %v1293_v30  ;;  %1377 = vst.msk [vmem:[#allocation3 + $0xa0] sm:$0xff] %vm1366_vm5, %v1291_v26  ;;  %v2122_v30 = vpack.c.bf16 %v2074_v21, %v2072_v20  ;;  %v2080_v21 = vld [vmem:[#allocation3 + $0x128] sm:$0xff] }
 0x135   : > { %1501 = vrot.lane.b32.xlu1 %v9315_v44, %s8749_s16  ;;  %1499 = vrot.lane.b32.xlu0 %v9317_v45, %s8749_s16 }
 0x137   : > { %v1486_v27 = vpop.permute.xlu1 %1485  ;;  %v1484_v31 = vpop.permute.xlu0 %1483 }
 0x138   : > { %1571 = vst.msk [vmem:[#allocation3 + $0xb0] sm:$0xff] %vm1559_vm6, %v1486_v27  ;;  %1570 = vst.msk [vmem:[#allocation3 + $0xa0] sm:$0xff] %vm1559_vm6, %v1484_v31 }
 0x139   : > { %1695 = vrot.lane.b32.xlu1 %v9329_v54, %s8750_s24  ;;  %1693 = vrot.lane.b32.xlu0 %v9331_v55, %s8750_s24 }
 0x13b   : > { %v1680_v38 = vpop.permute.xlu1 %1679  ;;  %v1678_v39 = vpop.permute.xlu0 %1677 }
 0x13c   : > { %1765 = vst.msk [vmem:[#allocation3 + $0xb0] sm:$0xff] %vm1753_vm7, %v1680_v38  ;;  %1764 = vst.msk [vmem:[#allocation3 + $0xa0] sm:$0xff] %vm1753_vm7, %v1678_v39 }
 0x13d   : > { %1888 = vrot.lane.b32.xlu1 %v9634_v34, %s8751_s30  ;;  %1886 = vrot.lane.b32.xlu0 %v9636_v35, %s8751_s30 }
 0x13f   : > { %v1873_v63 = vpop.permute.xlu1 %1872  ;;  %v1871_v41 = vpop.permute.xlu0 %1870 }
 0x140   : > { %1958 = vst.msk [vmem:[#allocation3 + $0xb0] sm:$0xff] %vm1946_vm8, %v1873_v63  ;;  %1957 = vst.msk [vmem:[#allocation3 + $0xa0] sm:$0xff] %vm1946_vm8, %v1871_v41 }
 0x141   : > { %733 = vrot.lane.b32.xlu1 %v9567_v56, %s8746_s21  ;;  %731 = vrot.lane.b32.xlu0 %v9569_v57, %s8746_s21  ;;  %v2120_v56 = vpack.c.bf16 %v2070_v15, %v2068_v14 }
 0x143   : > { %v718_v50 = vpop.permute.xlu1 %717  ;;  %v716_v51 = vpop.permute.xlu0 %715 }
 0x144   : > { %801 = vst.msk [vmem:[#allocation3 + $0xd0] sm:$0xff] %vm787_vm2, %v718_v50  ;;  %800 = vst.msk [vmem:[#allocation3 + $0xc0] sm:$0xff] %vm787_vm2, %v716_v51  ;;  %v2076_v50 = vld [vmem:[#allocation3 + $0x108] sm:$0xff]  ;;  %v2078_v51 = vld [vmem:[#allocation3 + $0x118] sm:$0xff] }
 0x145   : > { %926 = vrot.lane.b32.xlu1 %v9315_v44, %s8745_s20  ;;  %924 = vrot.lane.b32.xlu0 %v9317_v45, %s8745_s20 }
 0x147   : > { %v911_v52 = vpop.permute.xlu1 %910  ;;  %v909_v16 = vpop.permute.xlu0 %908  ;;  %v2063_v17 = vld [vmem:[#allocation3 + $0xa0] sm:$0xff]  ;;  %v2065_v53 = vld [vmem:[#allocation3 + $0xb0] sm:$0xff] }
 0x148   : > { %994 = vst.msk [vmem:[#allocation3 + $0xd0] sm:$0xff] %vm980_vm3, %v911_v52  ;;  %993 = vst.msk [vmem:[#allocation3 + $0xc0] sm:$0xff] %vm980_vm3, %v909_v16  ;;  %v2117_v57 = vpack.c.bf16 %v2065_v53, %v2063_v17  ;;  %v2124_v17 = vpack.c.bf16 %v2078_v51, %v2076_v50 }
 0x149   : > { %1119 = vrot.lane.b32.xlu1 %v9329_v54, %s8747_s28  ;;  %1117 = vrot.lane.b32.xlu0 %v9331_v55, %s8747_s28 }
 0x14a   : > { %2339 = vmatmul.mubr.bf16.gmra.mrb[20].mxu0 %v2117_v57 }
 0x14b   : > { %v1104_v44 = vpop.permute.xlu1 %1103  ;;  %v1102_v2 = vpop.permute.xlu0 %1101  ;;  %8538 = vmatprep.mubr.msk.bf16.mxu0 %vm442_vm0, %v2120_v56 }
 0x14c   : > { %1187 = vst.msk [vmem:[#allocation3 + $0xd0] sm:$0xff] %vm1173_vm4, %v1104_v44  ;;  %1186 = vst.msk [vmem:[#allocation3 + $0xc0] sm:$0xff] %vm1173_vm4, %v1102_v2  ;;  %v9795_v44 = vld [vmem:[#allocation2 + $0x159] sm:$0xff]  ;;  %v9797_v2 = vld [vmem:[#allocation2 + $0x151] sm:$0xff] }
 0x14d   : > { %1312 = vrot.lane.b32.xlu1 %v9634_v34, %s8748_s15  ;;  %1310 = vrot.lane.b32.xlu0 %v9636_v35, %s8748_s15 }
 0x14f   : > { %v1297_v45 = vpop.permute.xlu1 %1296  ;;  %v1295_v54 = vpop.permute.xlu0 %1294 }
 0x150   : > { %1380 = vst.msk [vmem:[#allocation3 + $0xd0] sm:$0xff] %vm1366_vm5, %v1297_v45  ;;  %1379 = vst.msk [vmem:[#allocation3 + $0xc0] sm:$0xff] %vm1366_vm5, %v1295_v54 }
 0x151   : > { %1505 = vrot.lane.b32.xlu1 %v9382_v24, %s8749_s16  ;;  %1503 = vrot.lane.b32.xlu0 %v9384_v25, %s8749_s16 }
 0x153   : > { %v1490_v55 = vpop.permute.xlu1 %1489  ;;  %v1488_v3 = vpop.permute.xlu0 %1487 }
 0x154   : > { %1573 = vst.msk [vmem:[#allocation3 + $0xd0] sm:$0xff] %vm1559_vm6, %v1490_v55  ;;  %1572 = vst.msk [vmem:[#allocation3 + $0xc0] sm:$0xff] %vm1559_vm6, %v1488_v3  ;;  %v9802_v55 = vld [vmem:[%s13685_s2] ss:$0 sm:$0xff] }
 0x155   : > { %1699 = vrot.lane.b32.xlu1 %v9396_v32, %s8750_s24  ;;  %1697 = vrot.lane.b32.xlu0 %v9398_v33, %s8750_s24 }
 0x157   : > { %v1684_v49 = vpop.permute.xlu1 %1683  ;;  %v1682_v5 = vpop.permute.xlu0 %1681 }
 0x158   : > { %1767 = vst.msk [vmem:[#allocation3 + $0xd0] sm:$0xff] %vm1753_vm7, %v1684_v49  ;;  %1766 = vst.msk [vmem:[#allocation3 + $0xc0] sm:$0xff] %vm1753_vm7, %v1682_v5 }
 0x159   : > { %1892 = vrot.lane.b32.xlu1 %v9693_v46, %s8751_s30  ;;  %1890 = vrot.lane.b32.xlu0 %v9695_v47, %s8751_s30 }
 0x15b   : > { %v1877_v12 = vpop.permute.xlu1 %1876  ;;  %v1875_v13 = vpop.permute.xlu0 %1874 }
 0x15c   : > { %1960 = vst.msk [vmem:[#allocation3 + $0xd0] sm:$0xff] %vm1946_vm8, %v1877_v12  ;;  %1959 = vst.msk [vmem:[#allocation3 + $0xc0] sm:$0xff] %vm1946_vm8, %v1875_v13 }
 0x15d   : > { %737 = vrot.lane.b32.xlu1 %v9634_v34, %s8746_s21  ;;  %735 = vrot.lane.b32.xlu0 %v9636_v35, %s8746_s21  ;;  %v9748_v34 = vld [vmem:[#allocation2 + $0x141] sm:$0xff]  ;;  %v9750_v35 = vld [vmem:[#allocation2 + $0x139] sm:$0xff] }
 0x15f   : > { %v722_v9 = vpop.permute.xlu1 %721  ;;  %v720_v19 = vpop.permute.xlu0 %719 }
 0x160   : > { %803 = vst.msk [vmem:[#allocation3 + $0xf0] sm:$0xff] %vm787_vm2, %v722_v9  ;;  %802 = vst.msk [vmem:[#allocation3 + $0xe0] sm:$0xff] %vm787_vm2, %v720_v19 }
 0x161   : > { %930 = vrot.lane.b32.xlu1 %v9382_v24, %s8745_s20  ;;  %928 = vrot.lane.b32.xlu0 %v9384_v25, %s8745_s20 }
 0x163   : > { %v915_v28 = vpop.permute.xlu1 %914  ;;  %v913_v22 = vpop.permute.xlu0 %912  ;;  %v2067_v23 = vld [vmem:[#allocation3 + $0xc0] sm:$0xff]  ;;  %v2069_v29 = vld [vmem:[#allocation3 + $0xd0] sm:$0xff] }
 0x164   : > { %996 = vst.msk [vmem:[#allocation3 + $0xf0] sm:$0xff] %vm980_vm3, %v915_v28  ;;  %995 = vst.msk [vmem:[#allocation3 + $0xe0] sm:$0xff] %vm980_vm3, %v913_v22  ;;  %v2119_v26 = vpack.c.bf16 %v2069_v29, %v2067_v23  ;;  %v2082_v28 = vld [vmem:[#allocation3 + $0x138] sm:$0xff] }
 0x165   : > { %1123 = vrot.lane.b32.xlu1 %v9396_v32, %s8747_s28  ;;  %1121 = vrot.lane.b32.xlu0 %v9398_v33, %s8747_s28 }
 0x166   : > { %2347 = vmatmul.mubr.bf16.gmra.mrb[24].mxu0 %v2119_v26 }
 0x167   : > { %v1108_v24 = vpop.permute.xlu1 %1107  ;;  %v1106_v27 = vpop.permute.xlu0 %1105  ;;  %8539 = vmatprep.mubr.msk.bf16.mxu0 %vm442_vm0, %v2122_v30 }
 0x168   : > { %1189 = vst.msk [vmem:[#allocation3 + $0xf0] sm:$0xff] %vm1173_vm4, %v1108_v24  ;;  %1188 = vst.msk [vmem:[#allocation3 + $0xe0] sm:$0xff] %vm1173_vm4, %v1106_v27  ;;  %v2126_v24 = vpack.c.bf16 %v2082_v28, %v2080_v21 }
 0x169   : > { %1316 = vrot.lane.b32.xlu1 %v9693_v46, %s8748_s15  ;;  %1314 = vrot.lane.b32.xlu0 %v9695_v47, %s8748_s15 }
 0x16b   : > { %v1301_v25 = vpop.permute.xlu1 %1300  ;;  %v1299_v32 = vpop.permute.xlu0 %1298 }
 0x16c   : > { %1382 = vst.msk [vmem:[#allocation3 + $0xf0] sm:$0xff] %vm1366_vm5, %v1301_v25  ;;  %1381 = vst.msk [vmem:[#allocation3 + $0xe0] sm:$0xff] %vm1366_vm5, %v1299_v32 }
 0x16d   : > { %1509 = vrot.lane.b32.xlu1 %v9449_v58, %s8749_s16  ;;  %1507 = vrot.lane.b32.xlu0 %v9451_v59, %s8749_s16 }
 0x16f   : > { %v1494_v33 = vpop.permute.xlu1 %1493  ;;  %v1492_v31 = vpop.permute.xlu0 %1491 }
 0x170   : > { %1575 = vst.msk [vmem:[#allocation3 + $0xf0] sm:$0xff] %vm1559_vm6, %v1494_v33  ;;  %1574 = vst.msk [vmem:[#allocation3 + $0xe0] sm:$0xff] %vm1559_vm6, %v1492_v31  ;;  %v9865_v31 = vld [vmem:[#allocation2 + $0x171] sm:$0xff] }
 0x171   : > { %1703 = vrot.lane.b32.xlu1 %v9463_v4, %s8750_s24  ;;  %1701 = vrot.lane.b32.xlu0 %v9465_v48, %s8750_s24 }
 0x173   : > { %v1688_v38 = vpop.permute.xlu1 %1687  ;;  %v1686_v39 = vpop.permute.xlu0 %1685 }
 0x174   : > { %1769 = vst.msk [vmem:[#allocation3 + $0xf0] sm:$0xff] %vm1753_vm7, %v1688_v38  ;;  %1768 = vst.msk [vmem:[#allocation3 + $0xe0] sm:$0xff] %vm1753_vm7, %v1686_v39 }
 0x175   : > { %1896 = vrot.lane.b32.xlu1 %v9748_v34, %s8751_s30  ;;  %1894 = vrot.lane.b32.xlu0 %v9750_v35, %s8751_s30 }
 0x177   : > { %v1881_v60 = vpop.permute.xlu1 %1880  ;;  %v1879_v61 = vpop.permute.xlu0 %1878 }
 0x178   : > { %1962 = vst.msk [vmem:[#allocation3 + $0xf0] sm:$0xff] %vm1946_vm8, %v1881_v60  ;;  %1961 = vst.msk [vmem:[#allocation3 + $0xe0] sm:$0xff] %vm1946_vm8, %v1879_v61 }
 0x179   : > { %741 = vrot.lane.b32.xlu1 %v9693_v46, %s8746_s21  ;;  %739 = vrot.lane.b32.xlu0 %v9695_v47, %s8746_s21 }
 0x17b   : > { %v726_v63 = vpop.permute.xlu1 %725  ;;  %v724_v41 = vpop.permute.xlu0 %723 }
 0x17c   : > { %805 = vst.msk [vmem:[#allocation3 + $0x110] sm:$0xff] %vm787_vm2, %v726_v63  ;;  %804 = vst.msk [vmem:[#allocation3 + $0x100] sm:$0xff] %vm787_vm2, %v724_v41 }
 0x17d   : > { %934 = vrot.lane.b32.xlu1 %v9449_v58, %s8745_s20  ;;  %932 = vrot.lane.b32.xlu0 %v9451_v59, %s8745_s20 }
 0x17f   : > { %v919_v14 = vpop.permute.xlu1 %918  ;;  %v917_v15 = vpop.permute.xlu0 %916  ;;  %v2071_v52 = vld [vmem:[#allocation3 + $0xe0] sm:$0xff]  ;;  %v2073_v16 = vld [vmem:[#allocation3 + $0xf0] sm:$0xff] }
 0x180   : > { %998 = vst.msk [vmem:[#allocation3 + $0x110] sm:$0xff] %vm980_vm3, %v919_v14  ;;  %997 = vst.msk [vmem:[#allocation3 + $0x100] sm:$0xff] %vm980_vm3, %v917_v15  ;;  %v2121_v53 = vpack.c.bf16 %v2073_v16, %v2071_v52  ;;  %v2084_v16 = vld [vmem:[#allocation3 + $0x148] sm:$0xff] }
 0x181   : > { %1127 = vrot.lane.b32.xlu1 %v9463_v4, %s8747_s28  ;;  %1125 = vrot.lane.b32.xlu0 %v9465_v48, %s8747_s28 }
 0x182   : > { %2355 = vmatmul.mubr.bf16.gmra.mrb[28].mxu0 %v2121_v53 }
 0x183   : > { %v1112_v58 = vpop.permute.xlu1 %1111  ;;  %v1110_v56 = vpop.permute.xlu0 %1109  ;;  %8540 = vmatprep.mubr.msk.bf16.mxu0 %vm442_vm0, %v2124_v17  ;;  %v2086_v17 = vld [vmem:[#allocation3 + $0x158] sm:$0xff] }
 0x184   : > { %1191 = vst.msk [vmem:[#allocation3 + $0x110] sm:$0xff] %vm1173_vm4, %v1112_v58  ;;  %1190 = vst.msk [vmem:[#allocation3 + $0x100] sm:$0xff] %vm1173_vm4, %v1110_v56 }
 0x185   : > { %1320 = vrot.lane.b32.xlu1 %v9748_v34, %s8748_s15  ;;  %1318 = vrot.lane.b32.xlu0 %v9750_v35, %s8748_s15 }
 0x187   : > { %v1305_v59 = vpop.permute.xlu1 %1304  ;;  %v1303_v4 = vpop.permute.xlu0 %1302 }
 0x188   : > { %1384 = vst.msk [vmem:[#allocation3 + $0x110] sm:$0xff] %vm1366_vm5, %v1305_v59  ;;  %1383 = vst.msk [vmem:[#allocation3 + $0x100] sm:$0xff] %vm1366_vm5, %v1303_v4 }
 0x189   : > { %1513 = vrot.lane.b32.xlu1 %v9516_v36, %s8749_s16  ;;  %1511 = vrot.lane.b32.xlu0 %v9518_v37, %s8749_s16 }
 0x18b   : > { %v1498_v48 = vpop.permute.xlu1 %1497  ;;  %v1496_v57 = vpop.permute.xlu0 %1495 }
 0x18c   : > { %1577 = vst.msk [vmem:[#allocation3 + $0x110] sm:$0xff] %vm1559_vm6, %v1498_v48  ;;  %1576 = vst.msk [vmem:[#allocation3 + $0x100] sm:$0xff] %vm1559_vm6, %v1496_v57  ;;  %v2128_v48 = vpack.c.bf16 %v2086_v17, %v2084_v16  ;;  %v8700_v16 = vld [vmem:[%s13686_s3] sm:$0xff]   ;;  %v2460_v17 = vld [vmem:[#allocation2 + $0x8] sm:$0xff] }
 0x18d   : > { %1707 = vrot.lane.b32.xlu1 %v9530_v40, %s8750_s24  ;;  %1705 = vrot.lane.b32.xlu0 %v9532_v62, %s8750_s24  ;;  %2492 = vst.msk [vmem:[#allocation3 + $0x10] sm:$0xff] %vm442_vm0, %v2460_v17 }
 0x18e   : > { %4155 = vmatpush1.bf16.msra.mxu1 %v8700_v16 }
 0x18f   : > { %v1692_v45 = vpop.permute.xlu1 %1691  ;;  %v1690_v54 = vpop.permute.xlu0 %1689  ;;  %4156 = vmatprep.subr.bf16.mxu1 %v13697_v1 }
 0x190   : > { %1771 = vst.msk [vmem:[#allocation3 + $0x110] sm:$0xff] %vm1753_vm7, %v1692_v45  ;;  %1770 = vst.msk [vmem:[#allocation3 + $0x100] sm:$0xff] %vm1753_vm7, %v1690_v54 }
 0x191   : > { %1900 = vrot.lane.b32.xlu1 %v9795_v44, %s8751_s30  ;;  %v2300_v3 = vpop.f32.mrb[0].mxu0  ;;  %1898 = vrot.lane.b32.xlu0 %v9797_v2, %s8751_s30 }
 0x192   : > { %v9811_v46 = vadd.f32 %v9802_v55, %v2300_v3  ;;  %v2302_v47 = vpop.f32.mrb[1].mxu0 }
 0x193   : > { %v1885_v49 = vpop.permute.xlu1 %1884  ;;  %v2303_v5 = vpop.f32.mrb[2].mxu0 }
 0x194   : > { %2427 = vst.msk [vmem:[#allocation2 + $0x19] sm:$0xff] %vm442_vm0, %v9811_v46  ;;  %v9817_v12 = vadd.f32 %v9802_v55, %v2303_v5  ;;  %v1883_v13 = vpop.permute.xlu0 %1882  ;;  %v2305_v9 = vpop.f32.mrb[3].mxu0  ;;  %v1621_v5 = vld [vmem:[#allocation2 + $0x180] sm:$0xff] }
 0x195   : > { %1964 = vst.msk [vmem:[#allocation3 + $0x110] sm:$0xff] %vm1946_vm8, %v1885_v49  ;;  %1963 = vst.msk [vmem:[#allocation3 + $0x100] sm:$0xff] %vm1946_vm8, %v1883_v13  ;;  %745 = vrot.lane.b32.xlu1 %v9748_v34, %s8746_s21  ;;  %743 = vrot.lane.b32.xlu0 %v9750_v35, %s8746_s21  ;;  %v9867_v34 = vld [vmem:[#allocation2 + $0x169] sm:$0xff] }
 0x196   : > { %2428 = vst.msk [vmem:[#allocation2 + $0x21] sm:$0xff] %vm442_vm0, %v9817_v12  ;;  %v1622_v49 = vld [vmem:[#allocation2 + $0x188] sm:$0xff] }
 0x197   : > { %v730_v19 = vpop.permute.xlu1 %729 }
 0x198   : > { %807 = vst.msk [vmem:[#allocation3 + $0x130] sm:$0xff] %vm787_vm2, %v730_v19  ;;  %v728_v20 = vpop.permute.xlu0 %727  ;;  %v1815_v19 = vld [vmem:[#allocation2 + $0x189] sm:$0xff] }
 0x199   : > { %806 = vst.msk [vmem:[#allocation3 + $0x120] sm:$0xff] %vm787_vm2, %v728_v20  ;;  %938 = vrot.lane.b32.xlu1 %v9516_v36, %s8745_s20  ;;  %936 = vrot.lane.b32.xlu0 %v9518_v37, %s8745_s20  ;;  %v1814_v20 = vld [vmem:[#allocation2 + $0x181] sm:$0xff] }
 0x19b   : > { %v923_v22 = vpop.permute.xlu1 %922  ;;  %v9832_v29 = vld [vmem:[#allocation2 + $0x18] sm:$0xff] }
 0x19c   : > { %v2077_v23 = vld [vmem:[#allocation3 + $0x110] sm:$0xff]  ;;  %1000 = vst.msk [vmem:[#allocation3 + $0x130] sm:$0xff] %vm980_vm3, %v923_v22  ;;  %v921_v30 = vpop.permute.xlu0 %920  ;;  %v2075_v26 = vld [vmem:[#allocation3 + $0x100] sm:$0xff] }
 0x19d   : > { %2493 = vst.msk [vmem:[#allocation3 + $0x20] sm:$0xff] %vm442_vm0, %v9832_v29  ;;  %1131 = vrot.lane.b32.xlu1 %v9530_v40, %s8747_s28  ;;  %1129 = vrot.lane.b32.xlu0 %v9532_v62, %s8747_s28  ;;  %v2123_v36 = vpack.c.bf16 %v2077_v23, %v2075_v26  ;;  %v9842_v37 = vld [vmem:[#allocation2 + $0x20] sm:$0xff] }
 0x19e   : > { %999 = vst.msk [vmem:[#allocation3 + $0x120] sm:$0xff] %vm980_vm3, %v921_v30 }
 0x19f   : > { %2494 = vst.msk [vmem:[#allocation3 + $0x30] sm:$0xff] %vm442_vm0, %v9842_v37  ;;  %2363 = vmatmul.mubr.bf16.gmra.mrb[32].mxu0 %v2123_v36  ;;  %v1116_v27 = vpop.permute.xlu1 %1115 }
 0x1a0   : > { %1193 = vst.msk [vmem:[#allocation3 + $0x130] sm:$0xff] %vm1173_vm4, %v1116_v27  ;;  %v1114_v25 = vpop.permute.xlu0 %1113  ;;  %8541 = vmatprep.mubr.msk.bf16.mxu0 %vm442_vm0, %v2126_v24 }
 0x1a1   : > { %1192 = vst.msk [vmem:[#allocation3 + $0x120] sm:$0xff] %vm1173_vm4, %v1114_v25  ;;  %1324 = vrot.lane.b32.xlu1 %v9795_v44, %s8748_s15  ;;  %1322 = vrot.lane.b32.xlu0 %v9797_v2, %s8748_s15 }
 0x1a3   : > { %v1309_v40 = vpop.permute.xlu1 %1308 }
 0x1a4   : > { %1386 = vst.msk [vmem:[#allocation3 + $0x130] sm:$0xff] %vm1366_vm5, %v1309_v40  ;;  %v1307_v62 = vpop.permute.xlu0 %1306 }
 0x1a5   : > { %1385 = vst.msk [vmem:[#allocation3 + $0x120] sm:$0xff] %vm1366_vm5, %v1307_v62  ;;  %1517 = vrot.lane.b32.xlu1 %v9587_v10, %s8749_s16  ;;  %1515 = vrot.lane.b32.xlu0 %v9589_v11, %s8749_s16 }
 0x1a7   : > { %v1502_v32 = vpop.permute.xlu1 %1501 }
 0x1a8   : > { %1579 = vst.msk [vmem:[#allocation3 + $0x130] sm:$0xff] %vm1559_vm6, %v1502_v32  ;;  %v1500_v33 = vpop.permute.xlu0 %1499  ;;  %v2088_v32 = vld [vmem:[#allocation3 + $0x168] sm:$0xff] }
 0x1a9   : > { %1578 = vst.msk [vmem:[#allocation3 + $0x120] sm:$0xff] %vm1559_vm6, %v1500_v33  ;;  %1711 = vrot.lane.b32.xlu1 %v9601_v18, %s8750_s24  ;;  %1709 = vrot.lane.b32.xlu0 %v9603_v8, %s8750_s24  ;;  %v2090_v33 = vld [vmem:[#allocation3 + $0x178] sm:$0xff] }
 0x1ab   : > { %v1696_v35 = vpop.permute.xlu1 %1695 }
 0x1ac   : > { %1773 = vst.msk [vmem:[#allocation3 + $0x130] sm:$0xff] %vm1753_vm7, %v1696_v35  ;;  %v1694_v38 = vpop.permute.xlu0 %1693 }
 0x1ad   : > { %1772 = vst.msk [vmem:[#allocation3 + $0x120] sm:$0xff] %vm1753_vm7, %v1694_v38  ;;  %1904 = vrot.lane.b32.xlu1 %v9865_v31, %s8751_s30  ;;  %1902 = vrot.lane.b32.xlu0 %v9867_v34, %s8751_s30  ;;  %v2308_v39 = vpop.f32.mrb[4].mxu0 }
 0x1ae   : > { %v9876_v60 = vadd.f32 %v9802_v55, %v2308_v39  ;;  %v2310_v61 = vpop.f32.mrb[5].mxu0 }
 0x1af   : > { %v1889_v63 = vpop.permute.xlu1 %1888  ;;  %v2311_v41 = vpop.f32.mrb[6].mxu0  ;;  %v2130_v61 = vpack.c.bf16 %v2090_v33, %v2088_v32  ;;  %v2092_v33 = vld [vmem:[#allocation3 + $0x188] sm:$0xff] }
 0x1b0   : > { %2429 = vst.msk [vmem:[#allocation2 + $0x31] sm:$0xff] %vm442_vm0, %v9876_v60  ;;  %v1887_v50 = vpop.permute.xlu0 %1886  ;;  %v9882_v51 = vadd.f32 %v9802_v55, %v2311_v41  ;;  %v2313_v14 = vpop.f32.mrb[7].mxu0 }
 0x1b1   : > { %1966 = vst.msk [vmem:[#allocation3 + $0x130] sm:$0xff] %vm1946_vm8, %v1889_v63  ;;  %1965 = vst.msk [vmem:[#allocation3 + $0x120] sm:$0xff] %vm1946_vm8, %v1887_v50  ;;  %749 = vrot.lane.b32.xlu1 %v9795_v44, %s8746_s21  ;;  %747 = vrot.lane.b32.xlu0 %v9797_v2, %s8746_s21  ;;  %v2009_v14 = vld [vmem:[#allocation2 + $0x19a] sm:$0xff] }
 0x1b2   : > { %2430 = vst.msk [vmem:[#allocation2 + $0x39] sm:$0xff] %vm442_vm0, %v9882_v51  ;;  %2041 = vst.msk [vmem:[#allocation3 + $0x1e8] sm:$0xff] %vm442_vm0, %v2009_v14 }
 0x1b3   : > { %v734_v15 = vpop.permute.xlu1 %733 }
 0x1b4   : > { %809 = vst.msk [vmem:[#allocation3 + $0x150] sm:$0xff] %vm787_vm2, %v734_v15  ;;  %v732_v52 = vpop.permute.xlu0 %731  ;;  %v2010_v15 = vld [vmem:[#allocation2 + $0x1a2] sm:$0xff] }
 0x1b5   : > { %808 = vst.msk [vmem:[#allocation3 + $0x140] sm:$0xff] %vm787_vm2, %v732_v52  ;;  %942 = vrot.lane.b32.xlu1 %v9587_v10, %s8745_s20  ;;  %940 = vrot.lane.b32.xlu0 %v9589_v11, %s8745_s20 }
 0x1b6   : > { %2042 = vst.msk [vmem:[#allocation3 + $0x1f8] sm:$0xff] %vm442_vm0, %v2010_v15 }
 0x1b7   : > { %v927_v53 = vpop.permute.xlu1 %926  ;;  %v9897_v56 = vld [vmem:[#allocation2 + $0x30] sm:$0xff] }
 0x1b8   : > { %v2081_v58 = vld [vmem:[#allocation3 + $0x130] sm:$0xff]  ;;  %1002 = vst.msk [vmem:[#allocation3 + $0x150] sm:$0xff] %vm980_vm3, %v927_v53  ;;  %v925_v59 = vpop.permute.xlu0 %924  ;;  %v2079_v4 = vld [vmem:[#allocation3 + $0x120] sm:$0xff] }
 0x1b9   : > { %2495 = vst.msk [vmem:[#allocation3 + $0x40] sm:$0xff] %vm442_vm0, %v9897_v56  ;;  %1135 = vrot.lane.b32.xlu1 %v9601_v18, %s8747_s28  ;;  %1133 = vrot.lane.b32.xlu0 %v9603_v8, %s8747_s28  ;;  %v2125_v10 = vpack.c.bf16 %v2081_v58, %v2079_v4  ;;  %v9907_v11 = vld [vmem:[#allocation2 + $0x32] sm:$0xff]  ;;  %v9909_v57 = vld [vmem:[#allocation2 + $0x3a] sm:$0xff]  ;;  %v8701_v4 = vld [vmem:[%s13686_s3 + $0x8] sm:$0xff]  }
 0x1ba   : > { %1001 = vst.msk [vmem:[#allocation3 + $0x140] sm:$0xff] %vm980_vm3, %v925_v59  ;;  %v9911_v44 = vld [vmem:[#allocation2 + $0x38] sm:$0xff]  ;;  %v2459_v58 = vld [vmem:[#allocation2] sm:$0xff]  ;;  %4157 = vmatpush1.bf16.msra.mxu1 %v8701_v4 }
 0x1bb   : > { %3899 = vst.msk [vmem:[#allocation3 + $0x8] sm:$0xff] %vm442_vm0, %v9907_v11  ;;  %3900 = vst.msk [vmem:[#allocation3 + $0x18] sm:$0xff] %vm442_vm0, %v9909_v57  ;;  %2371 = vmatmul.mubr.bf16.gmra.mrb[36].mxu0 %v2125_v10  ;;  %v1120_v18 = vpop.permute.xlu1 %1119  ;;  %v1623_v10 = vld [vmem:[#allocation2 + $0x198] sm:$0xff]  ;;  %4158 = vmatprep.subr.bf16.mxu1 %v13697_v1 }
 0x1bc   : > { %2496 = vst.msk [vmem:[#allocation3 + $0x50] sm:$0xff] %vm442_vm0, %v9911_v44  ;;  %v1118_v8 = vpop.permute.xlu0 %1117  ;;  %8542 = vmatprep.mubr.msk.bf16.mxu0 %vm442_vm0, %v2128_v48  ;;  %2491 = vst.msk [vmem:[#allocation3] sm:$0xff] %vm442_vm0, %v2459_v58  ;;  %v1624_v48 = vld [vmem:[#allocation2 + $0x1a0] sm:$0xff]  ;;  %v8707_v4 = vld [vmem:[%s13686_s3 + $0x38] sm:$0xff]  }
 0x1bd   : > { %1195 = vst.msk [vmem:[#allocation3 + $0x150] sm:$0xff] %vm1173_vm4, %v1120_v18  ;;  %1194 = vst.msk [vmem:[#allocation3 + $0x140] sm:$0xff] %vm1173_vm4, %v1118_v8  ;;  %1328 = vrot.lane.b32.xlu1 %v9865_v31, %s8748_s15  ;;  %1326 = vrot.lane.b32.xlu0 %v9867_v34, %s8748_s15  ;;  %v10005_v8 = vld [vmem:[#allocation3 + $0x1e8] sm:$0xff]  ;;  %v3100_v58 = vld [vmem:[#allocation2 + $0x21] sm:$0xff] }
 0x1be   : > { %3929 = vst.msk [vmem:[#allocation3 + $0x1e8] sm:$0xff] %vm442_vm0, %v2009_v14 }
 0x1bf   : > { %v1313_v2 = vpop.permute.xlu1 %1312 }
 0x1c0   : > { %1388 = vst.msk [vmem:[#allocation3 + $0x150] sm:$0xff] %vm1366_vm5, %v1313_v2  ;;  %v1311_v45 = vpop.permute.xlu0 %1310  ;;  %v10007_v2 = vld [vmem:[#allocation3 + $0x1f8] sm:$0xff] }
 0x1c1   : > { %1387 = vst.msk [vmem:[#allocation3 + $0x140] sm:$0xff] %vm1366_vm5, %v1311_v45  ;;  %1521 = vrot.lane.b32.xlu1 %v9654_v42, %s8749_s16  ;;  %1519 = vrot.lane.b32.xlu0 %v9656_v43, %s8749_s16 }
 0x1c2   : > { %v3932_v54 = vld [vmem:[#allocation3 + $0x8] sm:$0xff]  ;;  %v3934_v3 = vld [vmem:[#allocation3 + $0x18] sm:$0xff]  ;;  %3930 = vst.msk [vmem:[#allocation3 + $0x1f8] sm:$0xff] %vm442_vm0, %v2010_v15 }
 0x1c3   : > { %v3996_v47 = vpack.c.bf16 %v3934_v3, %v3932_v54  ;;  %v1506_v13 = vpop.permute.xlu1 %1505  ;;  %v1816_v54 = vld [vmem:[#allocation2 + $0x199] sm:$0xff]  ;;  %v8702_v3 = vld [vmem:[%s13686_s3 + $0x10] sm:$0xff]  }
 0x1c4   : > { %1581 = vst.msk [vmem:[#allocation3 + $0x150] sm:$0xff] %vm1559_vm6, %v1506_v13  ;;  %v1504_v9 = vpop.permute.xlu0 %1503  ;;  %4159 = vmatpush1.bf16.msra.mxu1 %v8702_v3  ;;  %v8703_v13 = vld [vmem:[%s13686_s3 + $0x18] sm:$0xff]  }
 0x1c5   : > { %8558 = vmatprep.mubr.msk.bf16.mxu1 %vm442_vm0, %v3996_v47  ;;  %1580 = vst.msk [vmem:[#allocation3 + $0x140] sm:$0xff] %vm1559_vm6, %v1504_v9  ;;  %1715 = vrot.lane.b32.xlu1 %v1622_v49, %s8750_s24 }
 0x1c6   : > { %1713 = vrot.lane.b32.xlu0 %v1621_v5, %s8750_s24  ;;  %4160 = vmatprep.subr.bf16.mxu1 %v13697_v1 }
 0x1c7   : > { %v1700_v21 = vpop.permute.xlu1 %1699 }
 0x1c8   : > { %1775 = vst.msk [vmem:[#allocation3 + $0x150] sm:$0xff] %vm1753_vm7, %v1700_v21  ;;  %v1698_v28 = vpop.permute.xlu0 %1697  ;;  %v2523_v21 = vld [vmem:[#allocation2 + $0x1] sm:$0xff]  ;;  %4161 = vmatpush1.bf16.msra.mxu1 %v8703_v13  ;;  %v10107_v13 = vld [vmem:[#allocation2 + $0x31] sm:$0xff] }
 0x1c9   : > { %1774 = vst.msk [vmem:[#allocation3 + $0x140] sm:$0xff] %vm1753_vm7, %v1698_v28  ;;  %1908 = vrot.lane.b32.xlu1 %v1815_v19, %s8751_s30  ;;  %v2316_v22 = vpop.f32.mrb[8].mxu0  ;;  %4162 = vmatprep.subr.bf16.mxu1 %v13697_v1 }
 0x1ca   : > { %1906 = vrot.lane.b32.xlu0 %v1814_v20, %s8751_s30  ;;  %v9942_v23 = vadd.f32 %v9802_v55, %v2316_v22  ;;  %v2318_v30 = vpop.f32.mrb[9].mxu0 }
 0x1cb   : > { %v1893_v26 = vpop.permute.xlu1 %1892  ;;  %v2319_v24 = vpop.f32.mrb[10].mxu0 }
 0x1cc   : > { %2431 = vst.msk [vmem:[#allocation2 + $0x49] sm:$0xff] %vm442_vm0, %v9942_v23  ;;  %v1891_v36 = vpop.permute.xlu0 %1890  ;;  %v9948_v27 = vadd.f32 %v9802_v55, %v2319_v24  ;;  %v2321_v25 = vpop.f32.mrb[11].mxu0 }
 0x1cd   : > { %1968 = vst.msk [vmem:[#allocation3 + $0x150] sm:$0xff] %vm1946_vm8, %v1893_v26  ;;  %1967 = vst.msk [vmem:[#allocation3 + $0x140] sm:$0xff] %vm1946_vm8, %v1891_v36  ;;  %753 = vrot.lane.b32.xlu1 %v9865_v31, %s8746_s21  ;;  %v8704_v36 = vld [vmem:[%s13686_s3 + $0x20] sm:$0xff]   ;;  %v2716_v25 = vld [vmem:[#allocation2 + $0xa] sm:$0xff] }
 0x1ce   : > { %751 = vrot.lane.b32.xlu0 %v9867_v34, %s8746_s21  ;;  %2432 = vst.msk [vmem:[#allocation2 + $0x51] sm:$0xff] %vm442_vm0, %v9948_v27  ;;  %4163 = vmatpush1.bf16.msra.mxu1 %v8704_v36 }
 0x1cf   : > { %v738_v40 = vpop.permute.xlu1 %737  ;;  %4164 = vmatprep.subr.bf16.mxu1 %v13697_v1 }
 0x1d0   : > { %811 = vst.msk [vmem:[#allocation3 + $0x170] sm:$0xff] %vm787_vm2, %v738_v40  ;;  %v736_v62 = vpop.permute.xlu0 %735  ;;  %v2715_v40 = vld [vmem:[#allocation2 + $0x2] sm:$0xff] }
 0x1d1   : > { %810 = vst.msk [vmem:[#allocation3 + $0x160] sm:$0xff] %vm787_vm2, %v736_v62  ;;  %946 = vrot.lane.b32.xlu1 %v9654_v42, %s8745_s20 }
 0x1d2   : > { %944 = vrot.lane.b32.xlu0 %v9656_v43, %s8745_s20 }
 0x1d3   : > { %v931_v31 = vpop.permute.xlu1 %930  ;;  %v9963_v34 = vld [vmem:[#allocation2 + $0x48] sm:$0xff] }
 0x1d4   : > { %v2085_v35 = vld [vmem:[#allocation3 + $0x150] sm:$0xff]  ;;  %1004 = vst.msk [vmem:[#allocation3 + $0x170] sm:$0xff] %vm980_vm3, %v931_v31  ;;  %v929_v38 = vpop.permute.xlu0 %928  ;;  %v2083_v39 = vld [vmem:[#allocation3 + $0x140] sm:$0xff]  ;;  %v2094_v31 = vld [vmem:[#allocation3 + $0x198] sm:$0xff] }
 0x1d5   : > { %2497 = vst.msk [vmem:[#allocation3 + $0x60] sm:$0xff] %vm442_vm0, %v9963_v34  ;;  %1139 = vrot.lane.b32.xlu1 %v1622_v49, %s8747_s28  ;;  %v2127_v42 = vpack.c.bf16 %v2085_v35, %v2083_v39  ;;  %v9971_v43 = vld [vmem:[#allocation2 + $0x50] sm:$0xff]  ;;  %v8705_v35 = vld [vmem:[%s13686_s3 + $0x28] sm:$0xff]   ;;  %v2132_v14 = vpack.c.bf16 %v2094_v31, %v2092_v33 }
 0x1d6   : > { %1003 = vst.msk [vmem:[#allocation3 + $0x160] sm:$0xff] %vm980_vm3, %v929_v38  ;;  %1137 = vrot.lane.b32.xlu0 %v1621_v5, %s8747_s28  ;;  %v9973_v63 = vld [vmem:[#allocation2 + $0x52] sm:$0xff]  ;;  %v9975_v41 = vld [vmem:[#allocation2 + $0x4a] sm:$0xff]  ;;  %4165 = vmatpush1.bf16.msra.mxu1 %v8705_v35 }
 0x1d7   : > { %3902 = vst.msk [vmem:[#allocation3 + $0x38] sm:$0xff] %vm442_vm0, %v9973_v63  ;;  %2498 = vst.msk [vmem:[#allocation3 + $0x70] sm:$0xff] %vm442_vm0, %v9971_v43  ;;  %2379 = vmatmul.mubr.bf16.gmra.mrb[40].mxu0 %v2127_v42  ;;  %v1124_v50 = vpop.permute.xlu1 %1123  ;;  %4166 = vmatprep.subr.bf16.mxu1 %v13697_v1 }
 0x1d8   : > { %3901 = vst.msk [vmem:[#allocation3 + $0x28] sm:$0xff] %vm442_vm0, %v9975_v41  ;;  %v1122_v52 = vpop.permute.xlu0 %1121  ;;  %8543 = vmatprep.mubr.msk.bf16.mxu0 %vm442_vm0, %v2130_v61 }
 0x1d9   : > { %1197 = vst.msk [vmem:[#allocation3 + $0x170] sm:$0xff] %vm1173_vm4, %v1124_v50  ;;  %1196 = vst.msk [vmem:[#allocation3 + $0x160] sm:$0xff] %vm1173_vm4, %v1122_v52  ;;  %1332 = vrot.lane.b32.xlu1 %v1815_v19, %s8748_s15 }
 0x1da   : > { %1330 = vrot.lane.b32.xlu0 %v1814_v20, %s8748_s15  ;;  %v2524_v20 = vld [vmem:[#allocation2 + $0x9] sm:$0xff] }
 0x1db   : > { %v1317_v53 = vpop.permute.xlu1 %1316 }
 0x1dc   : > { %1390 = vst.msk [vmem:[#allocation3 + $0x170] sm:$0xff] %vm1366_vm5, %v1317_v53  ;;  %v1315_v59 = vpop.permute.xlu0 %1314  ;;  %v8706_v53 = vld [vmem:[%s13686_s3 + $0x30] sm:$0xff]  }
 0x1dd   : > { %1389 = vst.msk [vmem:[#allocation3 + $0x160] sm:$0xff] %vm1366_vm5, %v1315_v59  ;;  %1525 = vrot.lane.b32.xlu1 %v9709_v6, %s8749_s16  ;;  %v2138_v6 = vpack.c.bf16 %v10007_v2, %v10005_v8  ;;  %v3099_v59 = vld [vmem:[#allocation2 + $0x19] sm:$0xff]  ;;  %4167 = vmatpush1.bf16.msra.mxu1 %v8706_v53 }
 0x1de   : > { %1523 = vrot.lane.b32.xlu0 %v9711_v7, %s8749_s16  ;;  %v1817_v7 = vld [vmem:[#allocation2 + $0x1a1] sm:$0xff]  ;;  %4168 = vmatprep.subr.bf16.mxu1 %v13697_v1 }
 0x1df   : > { %v1510_v18 = vpop.permute.xlu1 %1509 }
 0x1e0   : > { %1583 = vst.msk [vmem:[#allocation3 + $0x170] sm:$0xff] %vm1559_vm6, %v1510_v18  ;;  %v1508_v45 = vpop.permute.xlu0 %1507  ;;  %v3292_v18 = vld [vmem:[#allocation2 + $0x22] sm:$0xff] }
 0x1e1   : > { %1582 = vst.msk [vmem:[#allocation3 + $0x160] sm:$0xff] %vm1559_vm6, %v1508_v45  ;;  %1719 = vrot.lane.b32.xlu1 %v1624_v48, %s8750_s24  ;;  %v3291_v45 = vld [vmem:[#allocation2 + $0x1a] sm:$0xff]  ;;  %4169 = vmatpush1.bf16.msra.mxu1 %v8707_v4 }
 0x1e2   : > { %1717 = vrot.lane.b32.xlu0 %v1623_v10, %s8750_s24  ;;  %4170 = vmatprep.subr.bf16.mxu1 %v13697_v1 }
 0x1e3   : > { %v1704_v47 = vpop.permute.xlu1 %1703 }
 0x1e4   : > { %1777 = vst.msk [vmem:[#allocation3 + $0x170] sm:$0xff] %vm1753_vm7, %v1704_v47  ;;  %v1702_v49 = vpop.permute.xlu0 %1701 }
 0x1e5   : > { %1776 = vst.msk [vmem:[#allocation3 + $0x160] sm:$0xff] %vm1753_vm7, %v1702_v49  ;;  %1912 = vrot.lane.b32.xlu1 %v1817_v7, %s8751_s30  ;;  %v2324_v5 = vpop.f32.mrb[12].mxu0  ;;  %v8708_v7 = vld [vmem:[%s13686_s3 + $0x40] sm:$0xff]  }
 0x1e6   : > { %1910 = vrot.lane.b32.xlu0 %v1816_v54, %s8751_s30  ;;  %v10029_v9 = vadd.f32 %v9802_v55, %v2324_v5  ;;  %v2326_v19 = vpop.f32.mrb[13].mxu0  ;;  %4171 = vmatpush1.bf16.msra.mxu1 %v8708_v7  ;;  %v10105_v5 = vld [vmem:[#allocation2 + $0x39] sm:$0xff] }
 0x1e7   : > { %v1897_v28 = vpop.permute.xlu1 %1896  ;;  %v2327_v22 = vpop.f32.mrb[14].mxu0 }
 0x1e8   : > { %2433 = vst.msk [vmem:[#allocation2 + $0x61] sm:$0xff] %vm442_vm0, %v10029_v9  ;;  %v1895_v30 = vpop.permute.xlu0 %1894  ;;  %v10036_v26 = vadd.f32 %v9802_v55, %v2327_v22  ;;  %v2329_v24 = vpop.f32.mrb[15].mxu0 }
 0x1e9   : > { %1970 = vst.msk [vmem:[#allocation3 + $0x170] sm:$0xff] %vm1946_vm8, %v1897_v28  ;;  %1969 = vst.msk [vmem:[#allocation3 + $0x160] sm:$0xff] %vm1946_vm8, %v1895_v30  ;;  %2589 = vrot.lane.b32.xlu1 %v2524_v20, %s8746_s21 }
 0x1ea   : > { %2587 = vrot.lane.b32.xlu0 %v2523_v21, %s8746_s21  ;;  %2434 = vst.msk [vmem:[#allocation2 + $0x69] sm:$0xff] %vm442_vm0, %v10036_v26 }
 0x1eb   : > { %v742_v62 = vpop.permute.xlu1 %741 }
 0x1ec   : > { %813 = vst.msk [vmem:[#allocation3 + $0x190] sm:$0xff] %vm787_vm2, %v742_v62  ;;  %v740_v32 = vpop.permute.xlu0 %739  ;;  %v2096_v62 = vld [vmem:[#allocation3 + $0x1a8] sm:$0xff] }
 0x1ed   : > { %812 = vst.msk [vmem:[#allocation3 + $0x180] sm:$0xff] %vm787_vm2, %v740_v32  ;;  %2781 = vrot.lane.b32.xlu1 %v2716_v25, %s8745_s20  ;;  %v2098_v32 = vld [vmem:[#allocation3 + $0x1b8] sm:$0xff] }
 0x1ee   : > { %2779 = vrot.lane.b32.xlu0 %v2715_v40, %s8745_s20 }
 0x1ef   : > { %v935_v38 = vpop.permute.xlu1 %934  ;;  %v10055_v61 = vld [vmem:[#allocation2 + $0x60] sm:$0xff] }
 0x1f0   : > { %v2089_v39 = vld [vmem:[#allocation3 + $0x170] sm:$0xff]  ;;  %1006 = vst.msk [vmem:[#allocation3 + $0x190] sm:$0xff] %vm980_vm3, %v935_v38  ;;  %v933_v42 = vpop.permute.xlu0 %932  ;;  %v2087_v50 = vld [vmem:[#allocation3 + $0x160] sm:$0xff] }
 0x1f1   : > { %2499 = vst.msk [vmem:[#allocation3 + $0x80] sm:$0xff] %vm442_vm0, %v10055_v61  ;;  %2973 = vrot.lane.b32.xlu1 %v9842_v37, %s8747_s28  ;;  %v2129_v15 = vpack.c.bf16 %v2089_v39, %v2087_v50  ;;  %v10065_v52 = vld [vmem:[#allocation2 + $0x68] sm:$0xff] }
 0x1f2   : > { %1005 = vst.msk [vmem:[#allocation3 + $0x180] sm:$0xff] %vm980_vm3, %v933_v42  ;;  %2971 = vrot.lane.b32.xlu0 %v9832_v29, %s8747_s28  ;;  %v10067_v16 = vld [vmem:[#allocation2 + $0x6a] sm:$0xff]  ;;  %v10069_v17 = vld [vmem:[#allocation2 + $0x62] sm:$0xff]  ;;  %v2134_v42 = vpack.c.bf16 %v2098_v32, %v2096_v62 }
 0x1f3   : > { %3904 = vst.msk [vmem:[#allocation3 + $0x58] sm:$0xff] %vm442_vm0, %v10067_v16  ;;  %2500 = vst.msk [vmem:[#allocation3 + $0x90] sm:$0xff] %vm442_vm0, %v10065_v52  ;;  %2387 = vmatmul.mubr.bf16.gmra.mrb[44].mxu0 %v2129_v15  ;;  %v1128_v29 = vpop.permute.xlu1 %1127 }
 0x1f4   : > { %3903 = vst.msk [vmem:[#allocation3 + $0x48] sm:$0xff] %vm442_vm0, %v10069_v17  ;;  %v1126_v37 = vpop.permute.xlu0 %1125  ;;  %8544 = vmatprep.mubr.msk.bf16.mxu0 %vm442_vm0, %v2132_v14 }
 0x1f5   : > { %1199 = vst.msk [vmem:[#allocation3 + $0x190] sm:$0xff] %vm1173_vm4, %v1128_v29  ;;  %1198 = vst.msk [vmem:[#allocation3 + $0x180] sm:$0xff] %vm1173_vm4, %v1126_v37  ;;  %3165 = vrot.lane.b32.xlu1 %v3100_v58, %s8748_s15 }
 0x1f6   : > { %3163 = vrot.lane.b32.xlu0 %v3099_v59, %s8748_s15 }
 0x1f7   : > { %v1321_v48 = vpop.permute.xlu1 %1320 }
 0x1f8   : > { %1392 = vst.msk [vmem:[#allocation3 + $0x190] sm:$0xff] %vm1366_vm5, %v1321_v48  ;;  %v1319_v10 = vpop.permute.xlu0 %1318 }
 0x1f9   : > { %1391 = vst.msk [vmem:[#allocation3 + $0x180] sm:$0xff] %vm1366_vm5, %v1319_v10  ;;  %3357 = vrot.lane.b32.xlu1 %v3292_v18, %s8749_s16  ;;  %v10174_v10 = vld [vmem:[#allocation2 + $0x51] sm:$0xff] }
 0x1fa   : > { %3355 = vrot.lane.b32.xlu0 %v3291_v45, %s8749_s16 }
 0x1fb   : > { %v1514_v54 = vpop.permute.xlu1 %1513 }
 0x1fc   : > { %1585 = vst.msk [vmem:[#allocation3 + $0x190] sm:$0xff] %vm1559_vm6, %v1514_v54  ;;  %v1512_v3 = vpop.permute.xlu0 %1511 }
 0x1fd   : > { %1584 = vst.msk [vmem:[#allocation3 + $0x180] sm:$0xff] %vm1559_vm6, %v1512_v3  ;;  %3549 = vrot.lane.b32.xlu1 %v9911_v44, %s8750_s24 }
 0x1fe   : > { %3547 = vrot.lane.b32.xlu0 %v9897_v56, %s8750_s24 }
 0x1ff   : > { %v1708_v47 = vpop.permute.xlu1 %1707 }
 0x200   : > { %1779 = vst.msk [vmem:[#allocation3 + $0x190] sm:$0xff] %vm1753_vm7, %v1708_v47  ;;  %v1706_v49 = vpop.permute.xlu0 %1705 }
 0x201   : > { %1778 = vst.msk [vmem:[#allocation3 + $0x180] sm:$0xff] %vm1753_vm7, %v1706_v49  ;;  %v2332_v19 = vpop.f32.mrb[16].mxu0  ;;  %3741 = vrot.lane.b32.xlu1 %v10105_v5, %s8751_s30 }
 0x202   : > { %3739 = vrot.lane.b32.xlu0 %v10107_v13, %s8751_s30  ;;  %v10115_v20 = vadd.f32 %v9802_v55, %v2332_v19  ;;  %v2334_v21 = vpop.f32.mrb[17].mxu0 }
 0x203   : > { %v1901_v28 = vpop.permute.xlu1 %1900  ;;  %v2335_v22 = vpop.f32.mrb[18].mxu0 }
 0x204   : > { %2435 = vst.msk [vmem:[#allocation2 + $0x79] sm:$0xff] %vm442_vm0, %v10115_v20  ;;  %v1899_v30 = vpop.permute.xlu0 %1898  ;;  %v10121_v24 = vadd.f32 %v9802_v55, %v2335_v22  ;;  %v2337_v36 = vpop.f32.mrb[19].mxu0 }
 0x205   : > { %1972 = vst.msk [vmem:[#allocation3 + $0x190] sm:$0xff] %vm1946_vm8, %v1901_v28  ;;  %1971 = vst.msk [vmem:[#allocation3 + $0x180] sm:$0xff] %vm1946_vm8, %v1899_v30  ;;  %2593 = vrot.lane.b32.xlu1 %v3100_v58, %s8746_s21  ;;  %v2100_v30 = vld [vmem:[#allocation3 + $0x1c8] sm:$0xff] }
 0x206   : > { %2591 = vrot.lane.b32.xlu0 %v3099_v59, %s8746_s21  ;;  %2436 = vst.msk [vmem:[#allocation2 + $0x81] sm:$0xff] %vm442_vm0, %v10121_v24 }
 0x207   : > { %v746_v25 = vpop.permute.xlu1 %745 }
 0x208   : > { %815 = vst.msk [vmem:[#allocation3 + $0x1b0] sm:$0xff] %vm787_vm2, %v746_v25  ;;  %v744_v40 = vpop.permute.xlu0 %743 }
 0x209   : > { %814 = vst.msk [vmem:[#allocation3 + $0x1a0] sm:$0xff] %vm787_vm2, %v744_v40  ;;  %2785 = vrot.lane.b32.xlu1 %v3292_v18, %s8745_s20  ;;  %v10176_v18 = vld [vmem:[#allocation2 + $0x49] sm:$0xff] }
 0x20a   : > { %2783 = vrot.lane.b32.xlu0 %v3291_v45, %s8745_s20 }
 0x20b   : > { %v939_v33 = vpop.permute.xlu1 %938  ;;  %v10132_v35 = vld [vmem:[#allocation2 + $0x78] sm:$0xff] }
 0x20c   : > { %v2093_v31 = vld [vmem:[#allocation3 + $0x190] sm:$0xff]  ;;  %1008 = vst.msk [vmem:[#allocation3 + $0x1b0] sm:$0xff] %vm980_vm3, %v939_v33  ;;  %v937_v38 = vpop.permute.xlu0 %936  ;;  %v2091_v39 = vld [vmem:[#allocation3 + $0x180] sm:$0xff] }
 0x20d   : > { %2501 = vst.msk [vmem:[#allocation3 + $0xa0] sm:$0xff] %vm442_vm0, %v10132_v35  ;;  %2977 = vrot.lane.b32.xlu1 %v9911_v44, %s8747_s28  ;;  %v2131_v50 = vpack.c.bf16 %v2093_v31, %v2091_v39  ;;  %v10142_v14 = vld [vmem:[#allocation2 + $0x80] sm:$0xff] }
 0x20e   : > { %1007 = vst.msk [vmem:[#allocation3 + $0x1a0] sm:$0xff] %vm980_vm3, %v937_v38  ;;  %2975 = vrot.lane.b32.xlu0 %v9897_v56, %s8747_s28  ;;  %v10144_v15 = vld [vmem:[#allocation2 + $0x82] sm:$0xff]  ;;  %v10146_v53 = vld [vmem:[#allocation2 + $0x7a] sm:$0xff] }
 0x20f   : > { %3906 = vst.msk [vmem:[#allocation3 + $0x78] sm:$0xff] %vm442_vm0, %v10144_v15  ;;  %2502 = vst.msk [vmem:[#allocation3 + $0xb0] sm:$0xff] %vm442_vm0, %v10142_v14  ;;  %2395 = vmatmul.mubr.bf16.gmra.mrb[48].mxu0 %v2131_v50  ;;  %v1132_v29 = vpop.permute.xlu1 %1131 }
 0x210   : > { %3905 = vst.msk [vmem:[#allocation3 + $0x68] sm:$0xff] %vm442_vm0, %v10146_v53  ;;  %v1130_v56 = vpop.permute.xlu0 %1129  ;;  %8545 = vmatprep.mubr.msk.bf16.mxu0 %vm442_vm0, %v2134_v42 }
 0x211   : > { %1201 = vst.msk [vmem:[#allocation3 + $0x1b0] sm:$0xff] %vm1173_vm4, %v1132_v29  ;;  %1200 = vst.msk [vmem:[#allocation3 + $0x1a0] sm:$0xff] %vm1173_vm4, %v1130_v56  ;;  %3169 = vrot.lane.b32.xlu1 %v10105_v5, %s8748_s15 }
 0x212   : > { %3167 = vrot.lane.b32.xlu0 %v10107_v13, %s8748_s15 }
 0x213   : > { %v1325_v44 = vpop.permute.xlu1 %1324 }
 0x214   : > { %1394 = vst.msk [vmem:[#allocation3 + $0x1b0] sm:$0xff] %vm1366_vm5, %v1325_v44  ;;  %v1323_v37 = vpop.permute.xlu0 %1322  ;;  %v10247_v44 = vld [vmem:[#allocation2 + $0x69] sm:$0xff] }
 0x215   : > { %1393 = vst.msk [vmem:[#allocation3 + $0x1a0] sm:$0xff] %vm1366_vm5, %v1323_v37  ;;  %3361 = vrot.lane.b32.xlu1 %v9909_v57, %s8749_s16  ;;  %v10249_v37 = vld [vmem:[#allocation2 + $0x61] sm:$0xff] }
 0x216   : > { %3359 = vrot.lane.b32.xlu0 %v9907_v11, %s8749_s16 }
 0x217   : > { %v1518_v58 = vpop.permute.xlu1 %1517 }
 0x218   : > { %1587 = vst.msk [vmem:[#allocation3 + $0x1b0] sm:$0xff] %vm1559_vm6, %v1518_v58  ;;  %v1516_v59 = vpop.permute.xlu0 %1515 }
 0x219   : > { %1586 = vst.msk [vmem:[#allocation3 + $0x1a0] sm:$0xff] %vm1559_vm6, %v1516_v59  ;;  %3553 = vrot.lane.b32.xlu1 %v9971_v43, %s8750_s24 }
 0x21a   : > { %3551 = vrot.lane.b32.xlu0 %v9963_v34, %s8750_s24 }
 0x21b   : > { %v1712_v4 = vpop.permute.xlu1 %1711 }
 0x21c   : > { %1781 = vst.msk [vmem:[#allocation3 + $0x1b0] sm:$0xff] %vm1753_vm7, %v1712_v4  ;;  %v1710_v48 = vpop.permute.xlu0 %1709 }
 0x21d   : > { %1780 = vst.msk [vmem:[#allocation3 + $0x1a0] sm:$0xff] %vm1753_vm7, %v1710_v48  ;;  %v2340_v45 = vpop.f32.mrb[20].mxu0  ;;  %3745 = vrot.lane.b32.xlu1 %v10174_v10, %s8751_s30 }
 0x21e   : > { %3743 = vrot.lane.b32.xlu0 %v10176_v18, %s8751_s30  ;;  %v10184_v7 = vadd.f32 %v9802_v55, %v2340_v45  ;;  %v2342_v54 = vpop.f32.mrb[21].mxu0 }
 0x21f   : > { %v1905_v3 = vpop.permute.xlu1 %1904  ;;  %v2343_v47 = vpop.f32.mrb[22].mxu0 }
 0x220   : > { %2437 = vst.msk [vmem:[#allocation2 + $0x91] sm:$0xff] %vm442_vm0, %v10184_v7  ;;  %v1903_v49 = vpop.permute.xlu0 %1902  ;;  %v10190_v19 = vadd.f32 %v9802_v55, %v2343_v47  ;;  %v2345_v21 = vpop.f32.mrb[23].mxu0 }
 0x221   : > { %1974 = vst.msk [vmem:[#allocation3 + $0x1b0] sm:$0xff] %vm1946_vm8, %v1905_v3  ;;  %1973 = vst.msk [vmem:[#allocation3 + $0x1a0] sm:$0xff] %vm1946_vm8, %v1903_v49  ;;  %2597 = vrot.lane.b32.xlu1 %v10105_v5, %s8746_s21  ;;  %v2102_v5 = vld [vmem:[#allocation3 + $0x1d8] sm:$0xff] }
 0x222   : > { %2595 = vrot.lane.b32.xlu0 %v10107_v13, %s8746_s21  ;;  %2438 = vst.msk [vmem:[#allocation2 + $0x99] sm:$0xff] %vm442_vm0, %v10190_v19  ;;  %v2136_v32 = vpack.c.bf16 %v2102_v5, %v2100_v30 }
 0x223   : > { %v750_v28 = vpop.permute.xlu1 %749 }
 0x224   : > { %817 = vst.msk [vmem:[#allocation3 + $0x1d0] sm:$0xff] %vm787_vm2, %v750_v28  ;;  %v748_v22 = vpop.permute.xlu0 %747 }
 0x225   : > { %816 = vst.msk [vmem:[#allocation3 + $0x1c0] sm:$0xff] %vm787_vm2, %v748_v22  ;;  %2789 = vrot.lane.b32.xlu1 %v9909_v57, %s8745_s20 }
 0x226   : > { %2787 = vrot.lane.b32.xlu0 %v9907_v11, %s8745_s20 }
 0x227   : > { %v943_v36 = vpop.permute.xlu1 %942  ;;  %v10205_v13 = vld [vmem:[#allocation2 + $0x90] sm:$0xff] }
 0x228   : > { %v2097_v25 = vld [vmem:[#allocation3 + $0x1b0] sm:$0xff]  ;;  %1010 = vst.msk [vmem:[#allocation3 + $0x1d0] sm:$0xff] %vm980_vm3, %v943_v36  ;;  %v941_v40 = vpop.permute.xlu0 %940  ;;  %v2095_v62 = vld [vmem:[#allocation3 + $0x1a0] sm:$0xff] }
 0x229   : > { %2503 = vst.msk [vmem:[#allocation3 + $0xc0] sm:$0xff] %vm442_vm0, %v10205_v13  ;;  %2981 = vrot.lane.b32.xlu1 %v9971_v43, %s8747_s28  ;;  %v2133_v11 = vpack.c.bf16 %v2097_v25, %v2095_v62  ;;  %v10215_v57 = vld [vmem:[#allocation2 + $0x98] sm:$0xff]  ;;  %v10323_v62 = vld [vmem:[#allocation2 + $0x81] sm:$0xff] }
 0x22a   : > { %1009 = vst.msk [vmem:[#allocation3 + $0x1c0] sm:$0xff] %vm980_vm3, %v941_v40  ;;  %2979 = vrot.lane.b32.xlu0 %v9963_v34, %s8747_s28  ;;  %v10217_v33 = vld [vmem:[#allocation2 + $0x9a] sm:$0xff]  ;;  %v10219_v31 = vld [vmem:[#allocation2 + $0x92] sm:$0xff] }
 0x22b   : > { %3908 = vst.msk [vmem:[#allocation3 + $0x98] sm:$0xff] %vm442_vm0, %v10217_v33  ;;  %2504 = vst.msk [vmem:[#allocation3 + $0xd0] sm:$0xff] %vm442_vm0, %v10215_v57  ;;  %2403 = vmatmul.mubr.bf16.gmra.mrb[52].mxu0 %v2133_v11  ;;  %v1136_v38 = vpop.permute.xlu1 %1135 }
 0x22c   : > { %3907 = vst.msk [vmem:[#allocation3 + $0x88] sm:$0xff] %vm442_vm0, %v10219_v31  ;;  %v1134_v34 = vpop.permute.xlu0 %1133  ;;  %8546 = vmatprep.mubr.msk.bf16.mxu0 %vm442_vm0, %v2136_v32  ;;  %v10325_v32 = vld [vmem:[#allocation2 + $0x79] sm:$0xff] }
 0x22d   : > { %1203 = vst.msk [vmem:[#allocation3 + $0x1d0] sm:$0xff] %vm1173_vm4, %v1136_v38  ;;  %1202 = vst.msk [vmem:[#allocation3 + $0x1c0] sm:$0xff] %vm1173_vm4, %v1134_v34  ;;  %3173 = vrot.lane.b32.xlu1 %v10174_v10, %s8748_s15  ;;  %v10335_v38 = vld [vmem:[%s13685_s2] ss:$0 sm:$0xff] }
 0x22e   : > { %3171 = vrot.lane.b32.xlu0 %v10176_v18, %s8748_s15 }
 0x22f   : > { %v1329_v43 = vpop.permute.xlu1 %1328 }
 0x230   : > { %1396 = vst.msk [vmem:[#allocation3 + $0x1d0] sm:$0xff] %vm1366_vm5, %v1329_v43  ;;  %v1327_v39 = vpop.permute.xlu0 %1326 }
 0x231   : > { %1395 = vst.msk [vmem:[#allocation3 + $0x1c0] sm:$0xff] %vm1366_vm5, %v1327_v39  ;;  %3365 = vrot.lane.b32.xlu1 %v9973_v63, %s8749_s16 }
 0x232   : > { %3363 = vrot.lane.b32.xlu0 %v9975_v41, %s8749_s16 }
 0x233   : > { %v1522_v42 = vpop.permute.xlu1 %1521 }
 0x234   : > { %1589 = vst.msk [vmem:[#allocation3 + $0x1d0] sm:$0xff] %vm1559_vm6, %v1522_v42  ;;  %v1520_v50 = vpop.permute.xlu0 %1519 }
 0x235   : > { %1588 = vst.msk [vmem:[#allocation3 + $0x1c0] sm:$0xff] %vm1559_vm6, %v1520_v50  ;;  %3557 = vrot.lane.b32.xlu1 %v10065_v52, %s8750_s24 }
 0x236   : > { %3555 = vrot.lane.b32.xlu0 %v10055_v61, %s8750_s24 }
 0x237   : > { %v1716_v29 = vpop.permute.xlu1 %1715 }
 0x238   : > { %1783 = vst.msk [vmem:[#allocation3 + $0x1d0] sm:$0xff] %vm1753_vm7, %v1716_v29  ;;  %v1714_v56 = vpop.permute.xlu0 %1713 }
 0x239   : > { %1782 = vst.msk [vmem:[#allocation3 + $0x1c0] sm:$0xff] %vm1753_vm7, %v1714_v56  ;;  %v2348_v58 = vpop.f32.mrb[24].mxu0  ;;  %3749 = vrot.lane.b32.xlu1 %v10247_v44, %s8751_s30 }
 0x23a   : > { %3747 = vrot.lane.b32.xlu0 %v10249_v37, %s8751_s30  ;;  %v10257_v59 = vadd.f32 %v9802_v55, %v2348_v58  ;;  %v2350_v4 = vpop.f32.mrb[25].mxu0 }
 0x23b   : > { %v1909_v48 = vpop.permute.xlu1 %1908  ;;  %v2351_v45 = vpop.f32.mrb[26].mxu0 }
 0x23c   : > { %2439 = vst.msk [vmem:[#allocation2 + $0xa9] sm:$0xff] %vm442_vm0, %v10257_v59  ;;  %v1907_v54 = vpop.permute.xlu0 %1906  ;;  %v10263_v3 = vadd.f32 %v9802_v55, %v2351_v45  ;;  %v2353_v47 = vpop.f32.mrb[27].mxu0 }
 0x23d   : > { %1976 = vst.msk [vmem:[#allocation3 + $0x1d0] sm:$0xff] %vm1946_vm8, %v1909_v48  ;;  %1975 = vst.msk [vmem:[#allocation3 + $0x1c0] sm:$0xff] %vm1946_vm8, %v1907_v54  ;;  %2601 = vrot.lane.b32.xlu1 %v10174_v10, %s8746_s21 }
 0x23e   : > { %2599 = vrot.lane.b32.xlu0 %v10176_v18, %s8746_s21  ;;  %2440 = vst.msk [vmem:[#allocation2 + $0xb1] sm:$0xff] %vm442_vm0, %v10263_v3 }
 0x23f   : > { %v754_v49 = vpop.permute.xlu1 %753 }
 0x240   : > { %819 = vst.msk [vmem:[#allocation3 + $0x1f0] sm:$0xff] %vm787_vm2, %v754_v49  ;;  %v752_v21 = vpop.permute.xlu0 %751 }
 0x241   : > { %818 = vst.msk [vmem:[#allocation3 + $0x1e0] sm:$0xff] %vm787_vm2, %v752_v21  ;;  %2793 = vrot.lane.b32.xlu1 %v9973_v63, %s8745_s20 }
 0x242   : > { %2791 = vrot.lane.b32.xlu0 %v9975_v41, %s8745_s20 }
 0x243   : > { %v947_v55 = vpop.permute.xlu1 %946  ;;  %v10278_v28 = vld [vmem:[#allocation2 + $0xa8] sm:$0xff] }
 0x244   : > { %v2101_v10 = vld [vmem:[#allocation3 + $0x1d0] sm:$0xff]  ;;  %1012 = vst.msk [vmem:[#allocation3 + $0x1f0] sm:$0xff] %vm980_vm3, %v947_v55  ;;  %v945_v18 = vpop.permute.xlu0 %944  ;;  %v2099_v22 = vld [vmem:[#allocation3 + $0x1c0] sm:$0xff] }
 0x245   : > { %2505 = vst.msk [vmem:[#allocation3 + $0xe0] sm:$0xff] %vm442_vm0, %v10278_v28  ;;  %2985 = vrot.lane.b32.xlu1 %v10065_v52, %s8747_s28  ;;  %v2135_v63 = vpack.c.bf16 %v2101_v10, %v2099_v22  ;;  %v10288_v41 = vld [vmem:[#allocation2 + $0xb0] sm:$0xff] }
 0x246   : > { %1011 = vst.msk [vmem:[#allocation3 + $0x1e0] sm:$0xff] %vm980_vm3, %v945_v18  ;;  %2983 = vrot.lane.b32.xlu0 %v10055_v61, %s8747_s28  ;;  %v10290_v30 = vld [vmem:[#allocation2 + $0xb2] sm:$0xff]  ;;  %v10292_v5 = vld [vmem:[#allocation2 + $0xaa] sm:$0xff] }
 0x247   : > { %3910 = vst.msk [vmem:[#allocation3 + $0xb8] sm:$0xff] %vm442_vm0, %v10290_v30  ;;  %2506 = vst.msk [vmem:[#allocation3 + $0xf0] sm:$0xff] %vm442_vm0, %v10288_v41  ;;  %2411 = vmatmul.mubr.bf16.gmra.mrb[56].mxu0 %v2135_v63  ;;  %v1140_v36 = vpop.permute.xlu1 %1139 }
 0x248   : > { %3909 = vst.msk [vmem:[#allocation3 + $0xa8] sm:$0xff] %vm442_vm0, %v10292_v5  ;;  %v1138_v61 = vpop.permute.xlu0 %1137  ;;  %8547 = vmatprep.mubr.msk.bf16.mxu0 %vm442_vm0, %v2138_v6 }
 0x249   : > { %1205 = vst.msk [vmem:[#allocation3 + $0x1f0] sm:$0xff] %vm1173_vm4, %v1140_v36  ;;  %1204 = vst.msk [vmem:[#allocation3 + $0x1e0] sm:$0xff] %vm1173_vm4, %v1138_v61  ;;  %3177 = vrot.lane.b32.xlu1 %v10247_v44, %s8748_s15  ;;  %v10400_v36 = vld [vmem:[#allocation2 + $0x99] sm:$0xff]  ;;  %v10402_v61 = vld [vmem:[#allocation2 + $0x91] sm:$0xff] }
 0x24a   : > { %3175 = vrot.lane.b32.xlu0 %v10249_v37, %s8748_s15 }
 0x24b   : > { %v1333_v52 = vpop.permute.xlu1 %1332 }
 0x24c   : > { %1398 = vst.msk [vmem:[#allocation3 + $0x1f0] sm:$0xff] %vm1366_vm5, %v1333_v52  ;;  %v1331_v25 = vpop.permute.xlu0 %1330 }
 0x24d   : > { %1397 = vst.msk [vmem:[#allocation3 + $0x1e0] sm:$0xff] %vm1366_vm5, %v1331_v25  ;;  %3369 = vrot.lane.b32.xlu1 %v10067_v16, %s8749_s16 }
 0x24e   : > { %3367 = vrot.lane.b32.xlu0 %v10069_v17, %s8749_s16 }
 0x24f   : > { %v1526_v8 = vpop.permute.xlu1 %1525 }
 0x250   : > { %1591 = vst.msk [vmem:[#allocation3 + $0x1f0] sm:$0xff] %vm1559_vm6, %v1526_v8  ;;  %v1524_v2 = vpop.permute.xlu0 %1523 }
 0x251   : > { %1590 = vst.msk [vmem:[#allocation3 + $0x1e0] sm:$0xff] %vm1559_vm6, %v1524_v2  ;;  %3561 = vrot.lane.b32.xlu1 %v10142_v14, %s8750_s24 }
 0x252   : > { %3559 = vrot.lane.b32.xlu0 %v10132_v35, %s8750_s24 }
 0x253   : > { %v1720_v6 = vpop.permute.xlu1 %1719 }
 0x254   : > { %1785 = vst.msk [vmem:[#allocation3 + $0x1f0] sm:$0xff] %vm1753_vm7, %v1720_v6  ;;  %v1718_v40 = vpop.permute.xlu0 %1717 }
 0x255   : > { %1784 = vst.msk [vmem:[#allocation3 + $0x1e0] sm:$0xff] %vm1753_vm7, %v1718_v40  ;;  %v2356_v11 = vpop.f32.mrb[28].mxu0  ;;  %3753 = vrot.lane.b32.xlu1 %v10323_v62, %s8751_s30 }
 0x256   : > { %3751 = vrot.lane.b32.xlu0 %v10325_v32, %s8751_s30  ;;  %v10338_v34 = vadd.f32 %v10335_v38, %v2356_v11  ;;  %v2358_v43 = vpop.f32.mrb[29].mxu0 }
 0x257   : > { %v1913_v39 = vpop.permute.xlu1 %1912  ;;  %v2359_v42 = vpop.f32.mrb[30].mxu0 }
 0x258   : > { %2441 = vst.msk [vmem:[#allocation2 + $0xc1] sm:$0xff] %vm442_vm0, %v10338_v34  ;;  %v1911_v50 = vpop.permute.xlu0 %1910  ;;  %v10344_v29 = vadd.f32 %v10335_v38, %v2359_v42  ;;  %v2361_v56 = vpop.f32.mrb[31].mxu0 }
 0x259   : > { %1978 = vst.msk [vmem:[#allocation3 + $0x1f0] sm:$0xff] %vm1946_vm8, %v1913_v39  ;;  %1977 = vst.msk [vmem:[#allocation3 + $0x1e0] sm:$0xff] %vm1946_vm8, %v1911_v50  ;;  %2605 = vrot.lane.b32.xlu1 %v10247_v44, %s8746_s21  ;;  %v3936_v56 = vld [vmem:[#allocation3 + $0x28] sm:$0xff] }
 0x25a   : > { %13747 = vst [vmem:[#allocation4_spill] sm:$0xff] %v10344_v29  ;;  %2603 = vrot.lane.b32.xlu0 %v10249_v37, %s8746_s21  ;;  %2442 = vst.msk [vmem:[#allocation2 + $0xc9] sm:$0xff] %vm442_vm0, %v10344_v29 }
 0x25b   : > { %v2590_v58 = vpop.permute.xlu1 %2589 }
 0x25c   : > { %2684 = vst.msk [vmem:[#allocation3 + $0x10] sm:$0xff] %vm787_vm2, %v2590_v58  ;;  %v2588_v4 = vpop.permute.xlu0 %2587  ;;  %v3938_v58 = vld [vmem:[#allocation3 + $0x38] sm:$0xff] }
 0x25d   : > { %2683 = vst.msk [vmem:[#allocation3] sm:$0xff] %vm787_vm2, %v2588_v4  ;;  %2797 = vrot.lane.b32.xlu1 %v10067_v16, %s8745_s20 }
 0x25e   : > { %2795 = vrot.lane.b32.xlu0 %v10069_v17, %s8745_s20 }
 0x25f   : > { %v2782_v48 = vpop.permute.xlu1 %2781  ;;  %v10359_v45 = vld [vmem:[#allocation2 + $0xc0] sm:$0xff] }
 0x260   : > { %v2105_v44 = vld [vmem:[#allocation3 + $0x1f0] sm:$0xff]  ;;  %2876 = vst.msk [vmem:[#allocation3 + $0x10] sm:$0xff] %vm980_vm3, %v2782_v48  ;;  %v2780_v37 = vpop.permute.xlu0 %2779  ;;  %v2103_v54 = vld [vmem:[#allocation3 + $0x1e0] sm:$0xff] }
 0x261   : > { %2507 = vst.msk [vmem:[#allocation3 + $0x100] sm:$0xff] %vm442_vm0, %v10359_v45  ;;  %2989 = vrot.lane.b32.xlu1 %v10142_v14, %s8747_s28  ;;  %v2137_v16 = vpack.c.bf16 %v2105_v44, %v2103_v54  ;;  %v10369_v17 = vld [vmem:[#allocation2 + $0xc8] sm:$0xff] }
 0x262   : > { %2875 = vst.msk [vmem:[#allocation3] sm:$0xff] %vm980_vm3, %v2780_v37  ;;  %2987 = vrot.lane.b32.xlu0 %v10132_v35, %s8747_s28  ;;  %v10371_v47 = vld [vmem:[#allocation2 + $0xca] sm:$0xff]  ;;  %v10373_v49 = vld [vmem:[#allocation2 + $0xc2] sm:$0xff] }
 0x263   : > { %3912 = vst.msk [vmem:[#allocation3 + $0xd8] sm:$0xff] %vm442_vm0, %v10371_v47  ;;  %2508 = vst.msk [vmem:[#allocation3 + $0x110] sm:$0xff] %vm442_vm0, %v10369_v17  ;;  %2419 = vmatmul.mubr.bf16.gmra.mrb[60].mxu0 %v2137_v16  ;;  %v2974_v21 = vpop.permute.xlu1 %2973 }
 0x264   : > { %3911 = vst.msk [vmem:[#allocation3 + $0xc8] sm:$0xff] %vm442_vm0, %v10373_v49  ;;  %v2972_v35 = vpop.permute.xlu0 %2971 }
 0x265   : > { %3068 = vst.msk [vmem:[#allocation3 + $0x10] sm:$0xff] %vm1173_vm4, %v2974_v21  ;;  %3067 = vst.msk [vmem:[#allocation3] sm:$0xff] %vm1173_vm4, %v2972_v35  ;;  %3181 = vrot.lane.b32.xlu1 %v10323_v62, %s8748_s15 }
 0x266   : > { %3179 = vrot.lane.b32.xlu0 %v10325_v32, %s8748_s15 }
 0x267   : > { %v3166_v14 = vpop.permute.xlu1 %3165 }
 0x268   : > { %3260 = vst.msk [vmem:[#allocation3 + $0x10] sm:$0xff] %vm1366_vm5, %v3166_v14  ;;  %v3164_v55 = vpop.permute.xlu0 %3163 }
 0x269   : > { %3259 = vst.msk [vmem:[#allocation3] sm:$0xff] %vm1366_vm5, %v3164_v55  ;;  %3373 = vrot.lane.b32.xlu1 %v10144_v15, %s8749_s16 }
 0x26a   : > { %3371 = vrot.lane.b32.xlu0 %v10146_v53, %s8749_s16 }
 0x26b   : > { %v3358_v10 = vpop.permute.xlu1 %3357 }
 0x26c   : > { %3452 = vst.msk [vmem:[#allocation3 + $0x10] sm:$0xff] %vm1559_vm6, %v3358_v10  ;;  %v3356_v18 = vpop.permute.xlu0 %3355 }
 0x26d   : > { %3451 = vst.msk [vmem:[#allocation3] sm:$0xff] %vm1559_vm6, %v3356_v18  ;;  %3565 = vrot.lane.b32.xlu1 %v10215_v57, %s8750_s24  ;;  %v10473_v18 = vld [vmem:[#allocation2 + $0xb1] sm:$0xff] }
 0x26e   : > { %3563 = vrot.lane.b32.xlu0 %v10205_v13, %s8750_s24 }
 0x26f   : > { %v3550_v22 = vpop.permute.xlu1 %3549 }
 0x270   : > { %3644 = vst.msk [vmem:[#allocation3 + $0x10] sm:$0xff] %vm1753_vm7, %v3550_v22  ;;  %v3548_v63 = vpop.permute.xlu0 %3547  ;;  %v10475_v22 = vld [vmem:[#allocation2 + $0xa9] sm:$0xff] }
 0x271   : > { %3643 = vst.msk [vmem:[#allocation3] sm:$0xff] %vm1753_vm7, %v3548_v63  ;;  %3757 = vrot.lane.b32.xlu1 %v10400_v36, %s8751_s30 }
 0x272   : > { %3755 = vrot.lane.b32.xlu0 %v10402_v61, %s8751_s30  ;;  %v2364_v52 = vpop.f32.mrb[32].mxu0 }
 0x273   : > { %v10410_v25 = vadd.f32 %v10335_v38, %v2364_v52  ;;  %v2366_v8 = vpop.f32.mrb[33].mxu0  ;;  %v3742_v2 = vpop.permute.xlu1 %3741 }
 0x274   : > { %v2367_v6 = vpop.f32.mrb[34].mxu0  ;;  %3836 = vst.msk [vmem:[#allocation3 + $0x10] sm:$0xff] %vm1946_vm8, %v3742_v2  ;;  %v3740_v40 = vpop.permute.xlu0 %3739 }
 0x275   : > { %13748 = vst [vmem:[#allocation5_spill] sm:$0xff] %v10410_v25  ;;  %2443 = vst.msk [vmem:[#allocation2 + $0xd9] sm:$0xff] %vm442_vm0, %v10410_v25  ;;  %v10416_v11 = vadd.f32 %v10335_v38, %v2367_v6  ;;  %v2369_v43 = vpop.f32.mrb[35].mxu0  ;;  %2609 = vrot.lane.b32.xlu1 %v10323_v62, %s8746_s21 }
 0x276   : > { %3835 = vst.msk [vmem:[#allocation3] sm:$0xff] %vm1946_vm8, %v3740_v40  ;;  %2607 = vrot.lane.b32.xlu0 %v10325_v32, %s8746_s21 }
 0x277   : > { %13749 = vst [vmem:[#allocation6_spill] sm:$0xff] %v10416_v11  ;;  %2444 = vst.msk [vmem:[#allocation2 + $0xe1] sm:$0xff] %vm442_vm0, %v10416_v11  ;;  %v2594_v39 = vpop.permute.xlu1 %2593 }
 0x278   : > { %2686 = vst.msk [vmem:[#allocation3 + $0x30] sm:$0xff] %vm787_vm2, %v2594_v39  ;;  %v2592_v42 = vpop.permute.xlu0 %2591 }
 0x279   : > { %2685 = vst.msk [vmem:[#allocation3 + $0x20] sm:$0xff] %vm787_vm2, %v2592_v42  ;;  %2801 = vrot.lane.b32.xlu1 %v10144_v15, %s8745_s20 }
 0x27a   : > { %2799 = vrot.lane.b32.xlu0 %v10146_v53, %s8745_s20  ;;  %v3998_v53 = vpack.c.bf16 %v3938_v58, %v3936_v56  ;;  %v3940_v56 = vld [vmem:[#allocation3 + $0x48] sm:$0xff]  ;;  %v3942_v58 = vld [vmem:[#allocation3 + $0x58] sm:$0xff] }
 0x27b   : > { %v2786_v50 = vpop.permute.xlu1 %2785  ;;  %v3933_v62 = vld [vmem:[#allocation3 + $0x10] sm:$0xff] }
 0x27c   : > { %2878 = vst.msk [vmem:[#allocation3 + $0x30] sm:$0xff] %vm980_vm3, %v2786_v50  ;;  %v2784_v32 = vpop.permute.xlu0 %2783  ;;  %v10432_v48 = vld [vmem:[#allocation2 + $0xd8] sm:$0xff] }
 0x27d   : > { %v3931_v4 = vld [vmem:[#allocation3] sm:$0xff]  ;;  %2877 = vst.msk [vmem:[#allocation3 + $0x20] sm:$0xff] %vm980_vm3, %v2784_v32  ;;  %2993 = vrot.lane.b32.xlu1 %v10215_v57, %s8747_s28 }
 0x27e   : > { %2991 = vrot.lane.b32.xlu0 %v10205_v13, %s8747_s28  ;;  %v3995_v15 = vpack.c.bf16 %v3933_v62, %v3931_v4  ;;  %2509 = vst.msk [vmem:[#allocation3 + $0x120] sm:$0xff] %vm442_vm0, %v10432_v48  ;;  %v10441_v44 = vld [vmem:[#allocation2 + $0xe0] sm:$0xff] }
 0x27f   : > { %v10443_v37 = vld [vmem:[#allocation2 + $0xe2] sm:$0xff]  ;;  %v2978_v54 = vpop.permute.xlu1 %2977  ;;  %v10445_v16 = vld [vmem:[#allocation2 + $0xda] sm:$0xff]  ;;  %2510 = vst.msk [vmem:[#allocation3 + $0x130] sm:$0xff] %vm442_vm0, %v10441_v44 }
 0x280   : > { %4187 = vmatmul.mubr.bf16.vlgmr.msra.gmra.mrb[0].mxu1 %v3995_v15  ;;  %3914 = vst.msk [vmem:[#allocation3 + $0xf8] sm:$0xff] %vm442_vm0, %v10443_v37  ;;  %v2976_v13 = vpop.permute.xlu0 %2975  ;;  %3913 = vst.msk [vmem:[#allocation3 + $0xe8] sm:$0xff] %vm442_vm0, %v10445_v16 }
 0x281   : > { %8559 = vmatprep.mubr.msk.bf16.mxu1 %vm442_vm0, %v3998_v53  ;;  %3070 = vst.msk [vmem:[#allocation3 + $0x30] sm:$0xff] %vm1173_vm4, %v2978_v54  ;;  %3069 = vst.msk [vmem:[#allocation3 + $0x20] sm:$0xff] %vm1173_vm4, %v2976_v13  ;;  %3185 = vrot.lane.b32.xlu1 %v10400_v36, %s8748_s15 }
 0x282   : > { %3183 = vrot.lane.b32.xlu0 %v10402_v61, %s8748_s15 }
 0x283   : > { %v3170_v57 = vpop.permute.xlu1 %3169 }
 0x284   : > { %3262 = vst.msk [vmem:[#allocation3 + $0x30] sm:$0xff] %vm1366_vm5, %v3170_v57  ;;  %v3168_v21 = vpop.permute.xlu0 %3167 }
 0x285   : > { %3261 = vst.msk [vmem:[#allocation3 + $0x20] sm:$0xff] %vm1366_vm5, %v3168_v21  ;;  %3377 = vrot.lane.b32.xlu1 %v10217_v33, %s8749_s16 }
 0x286   : > { %3375 = vrot.lane.b32.xlu0 %v10219_v31, %s8749_s16 }
 0x287   : > { %v3362_v35 = vpop.permute.xlu1 %3361 }
 0x288   : > { %3454 = vst.msk [vmem:[#allocation3 + $0x30] sm:$0xff] %vm1559_vm6, %v3362_v35  ;;  %v3360_v14 = vpop.permute.xlu0 %3359 }
 0x289   : > { %3453 = vst.msk [vmem:[#allocation3 + $0x20] sm:$0xff] %vm1559_vm6, %v3360_v14  ;;  %3569 = vrot.lane.b32.xlu1 %v10288_v41, %s8750_s24 }
 0x28a   : > { %3567 = vrot.lane.b32.xlu0 %v10278_v28, %s8750_s24 }
 0x28b   : > { %v3554_v55 = vpop.permute.xlu1 %3553 }
 0x28c   : > { %3646 = vst.msk [vmem:[#allocation3 + $0x30] sm:$0xff] %vm1753_vm7, %v3554_v55  ;;  %v3552_v10 = vpop.permute.xlu0 %3551 }
 0x28d   : > { %3645 = vst.msk [vmem:[#allocation3 + $0x20] sm:$0xff] %vm1753_vm7, %v3552_v10  ;;  %3761 = vrot.lane.b32.xlu1 %v10473_v18, %s8751_s30  ;;  %v10546_v10 = vld [vmem:[#allocation2 + $0xc9] sm:$0xff] }
 0x28e   : > { %3759 = vrot.lane.b32.xlu0 %v10475_v22, %s8751_s30  ;;  %v2372_v63 = vpop.f32.mrb[36].mxu0 }
 0x28f   : > { %v10483_v52 = vadd.f32 %v10335_v38, %v2372_v63  ;;  %v2374_v8 = vpop.f32.mrb[37].mxu0  ;;  %v3746_v2 = vpop.permute.xlu1 %3745  ;;  %v10548_v63 = vld [vmem:[#allocation2 + $0xc1] sm:$0xff] }
 0x290   : > { %v2375_v6 = vpop.f32.mrb[38].mxu0  ;;  %3838 = vst.msk [vmem:[#allocation3 + $0x30] sm:$0xff] %vm1946_vm8, %v3746_v2  ;;  %v3744_v40 = vpop.permute.xlu0 %3743 }
 0x291   : > { %13750 = vst [vmem:[#allocation7_spill] sm:$0xff] %v10483_v52  ;;  %2445 = vst.msk [vmem:[#allocation2 + $0xf1] sm:$0xff] %vm442_vm0, %v10483_v52  ;;  %v10489_v43 = vadd.f32 %v10335_v38, %v2375_v6  ;;  %v2377_v39 = vpop.f32.mrb[39].mxu0  ;;  %2613 = vrot.lane.b32.xlu1 %v10400_v36, %s8746_s21 }
 0x292   : > { %3837 = vst.msk [vmem:[#allocation3 + $0x20] sm:$0xff] %vm1946_vm8, %v3744_v40  ;;  %2611 = vrot.lane.b32.xlu0 %v10402_v61, %s8746_s21 }
 0x293   : > { %13751 = vst [vmem:[#allocation8_spill] sm:$0xff] %v10489_v43  ;;  %2446 = vst.msk [vmem:[#allocation2 + $0xf9] sm:$0xff] %vm442_vm0, %v10489_v43  ;;  %v2598_v42 = vpop.permute.xlu1 %2597 }
 0x294   : > { %2688 = vst.msk [vmem:[#allocation3 + $0x50] sm:$0xff] %vm787_vm2, %v2598_v42  ;;  %v2596_v50 = vpop.permute.xlu0 %2595 }
 0x295   : > { %2687 = vst.msk [vmem:[#allocation3 + $0x40] sm:$0xff] %vm787_vm2, %v2596_v50  ;;  %2805 = vrot.lane.b32.xlu1 %v10217_v33, %s8745_s20 }
 0x296   : > { %2803 = vrot.lane.b32.xlu0 %v10219_v31, %s8745_s20  ;;  %v4000_v31 = vpack.c.bf16 %v3942_v58, %v3940_v56 }
 0x297   : > { %v2790_v62 = vpop.permute.xlu1 %2789  ;;  %v3937_v36 = vld [vmem:[#allocation3 + $0x30] sm:$0xff] }
 0x298   : > { %2880 = vst.msk [vmem:[#allocation3 + $0x50] sm:$0xff] %vm980_vm3, %v2790_v62  ;;  %v2788_v61 = vpop.permute.xlu0 %2787  ;;  %v10505_v4 = vld [vmem:[#allocation2 + $0xf0] sm:$0xff] }
 0x299   : > { %v3935_v32 = vld [vmem:[#allocation3 + $0x20] sm:$0xff]  ;;  %2879 = vst.msk [vmem:[#allocation3 + $0x40] sm:$0xff] %vm980_vm3, %v2788_v61  ;;  %2997 = vrot.lane.b32.xlu1 %v10288_v41, %s8747_s28  ;;  %v3944_v61 = vld [vmem:[#allocation3 + $0x68] sm:$0xff] }
 0x29a   : > { %2995 = vrot.lane.b32.xlu0 %v10278_v28, %s8747_s28  ;;  %v3997_v33 = vpack.c.bf16 %v3937_v36, %v3935_v32  ;;  %2511 = vst.msk [vmem:[#allocation3 + $0x140] sm:$0xff] %vm442_vm0, %v10505_v4  ;;  %v10514_v15 = vld [vmem:[#allocation2 + $0xf8] sm:$0xff]  ;;  %v3946_v32 = vld [vmem:[#allocation3 + $0x78] sm:$0xff] }
 0x29b   : > { %v10516_v53 = vld [vmem:[#allocation2 + $0xfa] sm:$0xff]  ;;  %v2982_v54 = vpop.permute.xlu1 %2981  ;;  %v10518_v13 = vld [vmem:[#allocation2 + $0xf2] sm:$0xff]  ;;  %2512 = vst.msk [vmem:[#allocation3 + $0x150] sm:$0xff] %vm442_vm0, %v10514_v15 }
 0x29c   : > { %4195 = vmatmul.mubr.bf16.gmra.mrb[4].mxu1 %v3997_v33  ;;  %3916 = vst.msk [vmem:[#allocation3 + $0x118] sm:$0xff] %vm442_vm0, %v10516_v53  ;;  %v2980_v28 = vpop.permute.xlu0 %2979  ;;  %3915 = vst.msk [vmem:[#allocation3 + $0x108] sm:$0xff] %vm442_vm0, %v10518_v13 }
 0x29d   : > { %3072 = vst.msk [vmem:[#allocation3 + $0x50] sm:$0xff] %vm1173_vm4, %v2982_v54  ;;  %8560 = vmatprep.mubr.msk.bf16.mxu1 %vm442_vm0, %v4000_v31  ;;  %3071 = vst.msk [vmem:[#allocation3 + $0x40] sm:$0xff] %vm1173_vm4, %v2980_v28  ;;  %3189 = vrot.lane.b32.xlu1 %v10473_v18, %s8748_s15 }
 0x29e   : > { %3187 = vrot.lane.b32.xlu0 %v10475_v22, %s8748_s15 }
 0x29f   : > { %v3174_v41 = vpop.permute.xlu1 %3173 }
 0x2a0   : > { %3264 = vst.msk [vmem:[#allocation3 + $0x50] sm:$0xff] %vm1366_vm5, %v3174_v41  ;;  %v3172_v57 = vpop.permute.xlu0 %3171 }
 0x2a1   : > { %3263 = vst.msk [vmem:[#allocation3 + $0x40] sm:$0xff] %vm1366_vm5, %v3172_v57  ;;  %3381 = vrot.lane.b32.xlu1 %v10290_v30, %s8749_s16 }
 0x2a2   : > { %3379 = vrot.lane.b32.xlu0 %v10292_v5, %s8749_s16 }
 0x2a3   : > { %v3366_v21 = vpop.permute.xlu1 %3365 }
 0x2a4   : > { %3456 = vst.msk [vmem:[#allocation3 + $0x50] sm:$0xff] %vm1559_vm6, %v3366_v21  ;;  %v3364_v35 = vpop.permute.xlu0 %3363 }
 0x2a5   : > { %3455 = vst.msk [vmem:[#allocation3 + $0x40] sm:$0xff] %vm1559_vm6, %v3364_v35  ;;  %3573 = vrot.lane.b32.xlu1 %v10369_v17, %s8750_s24 }
 0x2a6   : > { %3571 = vrot.lane.b32.xlu0 %v10359_v45, %s8750_s24 }
 0x2a7   : > { %v3558_v14 = vpop.permute.xlu1 %3557 }
 0x2a8   : > { %3648 = vst.msk [vmem:[#allocation3 + $0x50] sm:$0xff] %vm1753_vm7, %v3558_v14  ;;  %v3556_v55 = vpop.permute.xlu0 %3555 }
 0x2a9   : > { %3647 = vst.msk [vmem:[#allocation3 + $0x40] sm:$0xff] %vm1753_vm7, %v3556_v55  ;;  %3765 = vrot.lane.b32.xlu1 %v10546_v10, %s8751_s30 }
 0x2aa   : > { %3763 = vrot.lane.b32.xlu0 %v10548_v63, %s8751_s30  ;;  %v2380_v8 = vpop.f32.mrb[40].mxu0 }
 0x2ab   : > { %v10556_v2 = vadd.f32 %v10335_v38, %v2380_v8  ;;  %v2382_v6 = vpop.f32.mrb[41].mxu0  ;;  %v3750_v40 = vpop.permute.xlu1 %3749 }
 0x2ac   : > { %v2383_v39 = vpop.f32.mrb[42].mxu0  ;;  %3840 = vst.msk [vmem:[#allocation3 + $0x50] sm:$0xff] %vm1946_vm8, %v3750_v40  ;;  %v3748_v42 = vpop.permute.xlu0 %3747  ;;  %v10619_v6 = vld [vmem:[#allocation2 + $0xe1] sm:$0xff]  ;;  %v10621_v40 = vld [vmem:[#allocation2 + $0xd9] sm:$0xff] }
 0x2ad   : > { %13752 = vst [vmem:[#allocation9_spill] sm:$0xff] %v10556_v2  ;;  %2447 = vst.msk [vmem:[#allocation2 + $0x109] sm:$0xff] %vm442_vm0, %v10556_v2  ;;  %v10562_v50 = vadd.f32 %v10335_v38, %v2383_v39  ;;  %v2385_v62 = vpop.f32.mrb[43].mxu0  ;;  %2617 = vrot.lane.b32.xlu1 %v10473_v18, %s8746_s21 }
 0x2ae   : > { %3839 = vst.msk [vmem:[#allocation3 + $0x40] sm:$0xff] %vm1946_vm8, %v3748_v42  ;;  %2615 = vrot.lane.b32.xlu0 %v10475_v22, %s8746_s21 }
 0x2af   : > { %13753 = vst [vmem:[#allocation10_spill] sm:$0xff] %v10562_v50  ;;  %2448 = vst.msk [vmem:[#allocation2 + $0x111] sm:$0xff] %vm442_vm0, %v10562_v50  ;;  %v2602_v36 = vpop.permute.xlu1 %2601 }
 0x2b0   : > { %2690 = vst.msk [vmem:[#allocation3 + $0x70] sm:$0xff] %vm787_vm2, %v2602_v36  ;;  %v2600_v56 = vpop.permute.xlu0 %2599 }
 0x2b1   : > { %2689 = vst.msk [vmem:[#allocation3 + $0x60] sm:$0xff] %vm787_vm2, %v2600_v56  ;;  %2809 = vrot.lane.b32.xlu1 %v10290_v30, %s8745_s20 }
 0x2b2   : > { %2807 = vrot.lane.b32.xlu0 %v10292_v5, %s8745_s20  ;;  %v4002_v5 = vpack.c.bf16 %v3946_v32, %v3944_v61 }
 0x2b3   : > { %v2794_v58 = vpop.permute.xlu1 %2793  ;;  %v3941_v18 = vld [vmem:[#allocation3 + $0x50] sm:$0xff] }
 0x2b4   : > { %2882 = vst.msk [vmem:[#allocation3 + $0x70] sm:$0xff] %vm980_vm3, %v2794_v58  ;;  %v2792_v22 = vpop.permute.xlu0 %2791  ;;  %v10578_v31 = vld [vmem:[#allocation2 + $0x108] sm:$0xff] }
 0x2b5   : > { %v3939_v33 = vld [vmem:[#allocation3 + $0x40] sm:$0xff]  ;;  %2881 = vst.msk [vmem:[#allocation3 + $0x60] sm:$0xff] %vm980_vm3, %v2792_v22  ;;  %3001 = vrot.lane.b32.xlu1 %v10369_v17, %s8747_s28 }
 0x2b6   : > { %2999 = vrot.lane.b32.xlu0 %v10359_v45, %s8747_s28  ;;  %v3999_v30 = vpack.c.bf16 %v3941_v18, %v3939_v33  ;;  %2513 = vst.msk [vmem:[#allocation3 + $0x160] sm:$0xff] %vm442_vm0, %v10578_v31  ;;  %v10587_v54 = vld [vmem:[#allocation2 + $0x110] sm:$0xff] }
 0x2b7   : > { %v10589_v28 = vld [vmem:[#allocation2 + $0x112] sm:$0xff]  ;;  %v2986_v41 = vpop.permute.xlu1 %2985  ;;  %v10591_v57 = vld [vmem:[#allocation2 + $0x10a] sm:$0xff]  ;;  %2514 = vst.msk [vmem:[#allocation3 + $0x170] sm:$0xff] %vm442_vm0, %v10587_v54 }
 0x2b8   : > { %4203 = vmatmul.mubr.bf16.gmra.mrb[8].mxu1 %v3999_v30  ;;  %3918 = vst.msk [vmem:[#allocation3 + $0x138] sm:$0xff] %vm442_vm0, %v10589_v28  ;;  %v2984_v45 = vpop.permute.xlu0 %2983  ;;  %3917 = vst.msk [vmem:[#allocation3 + $0x128] sm:$0xff] %vm442_vm0, %v10591_v57  ;;  %v3948_v30 = vld [vmem:[#allocation3 + $0x88] sm:$0xff] }
 0x2b9   : > { %3074 = vst.msk [vmem:[#allocation3 + $0x70] sm:$0xff] %vm1173_vm4, %v2986_v41  ;;  %8561 = vmatprep.mubr.msk.bf16.mxu1 %vm442_vm0, %v4002_v5  ;;  %3073 = vst.msk [vmem:[#allocation3 + $0x60] sm:$0xff] %vm1173_vm4, %v2984_v45  ;;  %3193 = vrot.lane.b32.xlu1 %v10546_v10, %s8748_s15  ;;  %v3950_v5 = vld [vmem:[#allocation3 + $0x98] sm:$0xff] }
 0x2ba   : > { %3191 = vrot.lane.b32.xlu0 %v10548_v63, %s8748_s15 }
 0x2bb   : > { %v3178_v17 = vpop.permute.xlu1 %3177 }
 0x2bc   : > { %3266 = vst.msk [vmem:[#allocation3 + $0x70] sm:$0xff] %vm1366_vm5, %v3178_v17  ;;  %v3176_v21 = vpop.permute.xlu0 %3175 }
 0x2bd   : > { %3265 = vst.msk [vmem:[#allocation3 + $0x60] sm:$0xff] %vm1366_vm5, %v3176_v21  ;;  %3385 = vrot.lane.b32.xlu1 %v10371_v47, %s8749_s16 }
 0x2be   : > { %3383 = vrot.lane.b32.xlu0 %v10373_v49, %s8749_s16 }
 0x2bf   : > { %v3370_v35 = vpop.permute.xlu1 %3369 }
 0x2c0   : > { %3458 = vst.msk [vmem:[#allocation3 + $0x70] sm:$0xff] %vm1559_vm6, %v3370_v35  ;;  %v3368_v14 = vpop.permute.xlu0 %3367 }
 0x2c1   : > { %3457 = vst.msk [vmem:[#allocation3 + $0x60] sm:$0xff] %vm1559_vm6, %v3368_v14  ;;  %3577 = vrot.lane.b32.xlu1 %v10441_v44, %s8750_s24 }
 0x2c2   : > { %3575 = vrot.lane.b32.xlu0 %v10432_v48, %s8750_s24 }
 0x2c3   : > { %v3562_v55 = vpop.permute.xlu1 %3561 }
 0x2c4   : > { %3650 = vst.msk [vmem:[#allocation3 + $0x70] sm:$0xff] %vm1753_vm7, %v3562_v55  ;;  %v3560_v8 = vpop.permute.xlu0 %3559 }
 0x2c5   : > { %3649 = vst.msk [vmem:[#allocation3 + $0x60] sm:$0xff] %vm1753_vm7, %v3560_v8  ;;  %3769 = vrot.lane.b32.xlu1 %v10619_v6, %s8751_s30 }
 0x2c6   : > { %3767 = vrot.lane.b32.xlu0 %v10621_v40, %s8751_s30  ;;  %v2388_v39 = vpop.f32.mrb[44].mxu0 }
 0x2c7   : > { %v10629_v42 = vadd.f32 %v10335_v38, %v2388_v39  ;;  %v2390_v62 = vpop.f32.mrb[45].mxu0  ;;  %v3754_v36 = vpop.permute.xlu1 %3753 }
 0x2c8   : > { %v2391_v56 = vpop.f32.mrb[46].mxu0  ;;  %3842 = vst.msk [vmem:[#allocation3 + $0x70] sm:$0xff] %vm1946_vm8, %v3754_v36  ;;  %v3752_v58 = vpop.permute.xlu0 %3751 }
 0x2c9   : > { %13754 = vst [vmem:[#allocation11_spill] sm:$0xff] %v10629_v42  ;;  %2449 = vst.msk [vmem:[#allocation2 + $0x121] sm:$0xff] %vm442_vm0, %v10629_v42  ;;  %v10635_v18 = vadd.f32 %v10335_v38, %v2391_v56  ;;  %v2393_v61 = vpop.f32.mrb[47].mxu0  ;;  %2621 = vrot.lane.b32.xlu1 %v10546_v10, %s8746_s21  ;;  %v10692_v56 = vld [vmem:[#allocation2 + $0xf9] sm:$0xff] }
 0x2ca   : > { %3841 = vst.msk [vmem:[#allocation3 + $0x60] sm:$0xff] %vm1946_vm8, %v3752_v58  ;;  %2619 = vrot.lane.b32.xlu0 %v10548_v63, %s8746_s21  ;;  %v10694_v58 = vld [vmem:[#allocation2 + $0xf1] sm:$0xff] }
 0x2cb   : > { %13755 = vst [vmem:[#allocation12_spill] sm:$0xff] %v10635_v18  ;;  %2450 = vst.msk [vmem:[#allocation2 + $0x129] sm:$0xff] %vm442_vm0, %v10635_v18  ;;  %v2606_v32 = vpop.permute.xlu1 %2605 }
 0x2cc   : > { %2692 = vst.msk [vmem:[#allocation3 + $0x90] sm:$0xff] %vm787_vm2, %v2606_v32  ;;  %v2604_v22 = vpop.permute.xlu0 %2603 }
 0x2cd   : > { %2691 = vst.msk [vmem:[#allocation3 + $0x80] sm:$0xff] %vm787_vm2, %v2604_v22  ;;  %2813 = vrot.lane.b32.xlu1 %v10371_v47, %s8745_s20 }
 0x2ce   : > { %2811 = vrot.lane.b32.xlu0 %v10373_v49, %s8745_s20  ;;  %v4004_v49 = vpack.c.bf16 %v3950_v5, %v3948_v30 }
 0x2cf   : > { %v2798_v33 = vpop.permute.xlu1 %2797  ;;  %v3945_v10 = vld [vmem:[#allocation3 + $0x70] sm:$0xff] }
 0x2d0   : > { %2884 = vst.msk [vmem:[#allocation3 + $0x90] sm:$0xff] %vm980_vm3, %v2798_v33  ;;  %v2796_v63 = vpop.permute.xlu0 %2795  ;;  %v10651_v45 = vld [vmem:[#allocation2 + $0x120] sm:$0xff] }
 0x2d1   : > { %v3943_v41 = vld [vmem:[#allocation3 + $0x60] sm:$0xff]  ;;  %2883 = vst.msk [vmem:[#allocation3 + $0x80] sm:$0xff] %vm980_vm3, %v2796_v63  ;;  %3005 = vrot.lane.b32.xlu1 %v10441_v44, %s8747_s28 }
 0x2d2   : > { %3003 = vrot.lane.b32.xlu0 %v10432_v48, %s8747_s28  ;;  %v4001_v47 = vpack.c.bf16 %v3945_v10, %v3943_v41  ;;  %2515 = vst.msk [vmem:[#allocation3 + $0x180] sm:$0xff] %vm442_vm0, %v10651_v45  ;;  %v10660_v17 = vld [vmem:[#allocation2 + $0x128] sm:$0xff] }
 0x2d3   : > { %v10662_v21 = vld [vmem:[#allocation2 + $0x12a] sm:$0xff]  ;;  %v2990_v35 = vpop.permute.xlu1 %2989  ;;  %v10664_v14 = vld [vmem:[#allocation2 + $0x122] sm:$0xff]  ;;  %2516 = vst.msk [vmem:[#allocation3 + $0x190] sm:$0xff] %vm442_vm0, %v10660_v17 }
 0x2d4   : > { %4211 = vmatmul.mubr.bf16.gmra.mrb[12].mxu1 %v4001_v47  ;;  %3920 = vst.msk [vmem:[#allocation3 + $0x158] sm:$0xff] %vm442_vm0, %v10662_v21  ;;  %v2988_v48 = vpop.permute.xlu0 %2987  ;;  %3919 = vst.msk [vmem:[#allocation3 + $0x148] sm:$0xff] %vm442_vm0, %v10664_v14 }
 0x2d5   : > { %3076 = vst.msk [vmem:[#allocation3 + $0x90] sm:$0xff] %vm1173_vm4, %v2990_v35  ;;  %8562 = vmatprep.mubr.msk.bf16.mxu1 %vm442_vm0, %v4004_v49  ;;  %3075 = vst.msk [vmem:[#allocation3 + $0x80] sm:$0xff] %vm1173_vm4, %v2988_v48  ;;  %3197 = vrot.lane.b32.xlu1 %v10619_v6, %s8748_s15  ;;  %v3952_v35 = vld [vmem:[#allocation3 + $0xa8] sm:$0xff]  ;;  %v3954_v48 = vld [vmem:[#allocation3 + $0xb8] sm:$0xff] }
 0x2d6   : > { %3195 = vrot.lane.b32.xlu0 %v10621_v40, %s8748_s15 }
 0x2d7   : > { %v3182_v44 = vpop.permute.xlu1 %3181 }
 0x2d8   : > { %3268 = vst.msk [vmem:[#allocation3 + $0x90] sm:$0xff] %vm1366_vm5, %v3182_v44  ;;  %v3180_v55 = vpop.permute.xlu0 %3179 }
 0x2d9   : > { %3267 = vst.msk [vmem:[#allocation3 + $0x80] sm:$0xff] %vm1366_vm5, %v3180_v55  ;;  %3389 = vrot.lane.b32.xlu1 %v10443_v37, %s8749_s16 }
 0x2da   : > { %3387 = vrot.lane.b32.xlu0 %v10445_v16, %s8749_s16 }
 0x2db   : > { %v3374_v8 = vpop.permute.xlu1 %3373 }
 0x2dc   : > { %3460 = vst.msk [vmem:[#allocation3 + $0x90] sm:$0xff] %vm1559_vm6, %v3374_v8  ;;  %v3372_v39 = vpop.permute.xlu0 %3371 }
 0x2dd   : > { %3459 = vst.msk [vmem:[#allocation3 + $0x80] sm:$0xff] %vm1559_vm6, %v3372_v39  ;;  %3581 = vrot.lane.b32.xlu1 %v10514_v15, %s8750_s24 }
 0x2de   : > { %3579 = vrot.lane.b32.xlu0 %v10505_v4, %s8750_s24 }
 0x2df   : > { %v3566_v62 = vpop.permute.xlu1 %3565 }
 0x2e0   : > { %3652 = vst.msk [vmem:[#allocation3 + $0x90] sm:$0xff] %vm1753_vm7, %v3566_v62  ;;  %v3564_v36 = vpop.permute.xlu0 %3563 }
 0x2e1   : > { %3651 = vst.msk [vmem:[#allocation3 + $0x80] sm:$0xff] %vm1753_vm7, %v3564_v36  ;;  %3773 = vrot.lane.b32.xlu1 %v10692_v56, %s8751_s30 }
 0x2e2   : > { %3771 = vrot.lane.b32.xlu0 %v10694_v58, %s8751_s30  ;;  %v2396_v61 = vpop.f32.mrb[48].mxu0 }
 0x2e3   : > { %v10702_v32 = vadd.f32 %v10335_v38, %v2396_v61  ;;  %v2398_v22 = vpop.f32.mrb[49].mxu0  ;;  %v3758_v33 = vpop.permute.xlu1 %3757 }
 0x2e4   : > { %v2399_v10 = vpop.f32.mrb[50].mxu0  ;;  %3844 = vst.msk [vmem:[#allocation3 + $0x90] sm:$0xff] %vm1946_vm8, %v3758_v33  ;;  %v3756_v30 = vpop.permute.xlu0 %3755 }
 0x2e5   : > { %13756 = vst [vmem:[#allocation13_spill] sm:$0xff] %v10702_v32  ;;  %2451 = vst.msk [vmem:[#allocation2 + $0x139] sm:$0xff] %vm442_vm0, %v10702_v32  ;;  %v10708_v5 = vadd.f32 %v10335_v38, %v2399_v10  ;;  %v2401_v63 = vpop.f32.mrb[51].mxu0  ;;  %2625 = vrot.lane.b32.xlu1 %v10619_v6, %s8746_s21 }
 0x2e6   : > { %3843 = vst.msk [vmem:[#allocation3 + $0x80] sm:$0xff] %vm1946_vm8, %v3756_v30  ;;  %2623 = vrot.lane.b32.xlu0 %v10621_v40, %s8746_s21  ;;  %v10765_v63 = vld [vmem:[#allocation2 + $0x111] sm:$0xff] }
 0x2e7   : > { %13757 = vst [vmem:[#allocation14_spill] sm:$0xff] %v10708_v5  ;;  %2452 = vst.msk [vmem:[#allocation2 + $0x141] sm:$0xff] %vm442_vm0, %v10708_v5  ;;  %v2610_v41 = vpop.permute.xlu1 %2609 }
 0x2e8   : > { %2694 = vst.msk [vmem:[#allocation3 + $0xb0] sm:$0xff] %vm787_vm2, %v2610_v41  ;;  %v2608_v47 = vpop.permute.xlu0 %2607  ;;  %v10767_v41 = vld [vmem:[#allocation2 + $0x109] sm:$0xff] }
 0x2e9   : > { %2693 = vst.msk [vmem:[#allocation3 + $0xa0] sm:$0xff] %vm787_vm2, %v2608_v47  ;;  %2817 = vrot.lane.b32.xlu1 %v10443_v37, %s8745_s20 }
 0x2ea   : > { %2815 = vrot.lane.b32.xlu0 %v10445_v16, %s8745_s20  ;;  %v4006_v16 = vpack.c.bf16 %v3954_v48, %v3952_v35 }
 0x2eb   : > { %v2802_v49 = vpop.permute.xlu1 %2801  ;;  %v3949_v6 = vld [vmem:[#allocation3 + $0x90] sm:$0xff] }
 0x2ec   : > { %2886 = vst.msk [vmem:[#allocation3 + $0xb0] sm:$0xff] %vm980_vm3, %v2802_v49  ;;  %v2800_v40 = vpop.permute.xlu0 %2799  ;;  %v10724_v55 = vld [vmem:[#allocation2 + $0x138] sm:$0xff] }
 0x2ed   : > { %v3947_v44 = vld [vmem:[#allocation3 + $0x80] sm:$0xff]  ;;  %2885 = vst.msk [vmem:[#allocation3 + $0xa0] sm:$0xff] %vm980_vm3, %v2800_v40  ;;  %3009 = vrot.lane.b32.xlu1 %v10514_v15, %s8747_s28 }
 0x2ee   : > { %3007 = vrot.lane.b32.xlu0 %v10505_v4, %s8747_s28  ;;  %v4003_v37 = vpack.c.bf16 %v3949_v6, %v3947_v44  ;;  %2517 = vst.msk [vmem:[#allocation3 + $0x1a0] sm:$0xff] %vm442_vm0, %v10724_v55  ;;  %v10733_v8 = vld [vmem:[#allocation2 + $0x140] sm:$0xff] }
 0x2ef   : > { %v10735_v39 = vld [vmem:[#allocation2 + $0x142] sm:$0xff]  ;;  %v2994_v62 = vpop.permute.xlu1 %2993  ;;  %v10737_v36 = vld [vmem:[#allocation2 + $0x13a] sm:$0xff]  ;;  %2518 = vst.msk [vmem:[#allocation3 + $0x1b0] sm:$0xff] %vm442_vm0, %v10733_v8 }
 0x2f0   : > { %4219 = vmatmul.mubr.bf16.gmra.mrb[16].mxu1 %v4003_v37  ;;  %3922 = vst.msk [vmem:[#allocation3 + $0x178] sm:$0xff] %vm442_vm0, %v10735_v39  ;;  %v2992_v4 = vpop.permute.xlu0 %2991  ;;  %3921 = vst.msk [vmem:[#allocation3 + $0x168] sm:$0xff] %vm442_vm0, %v10737_v36 }
 0x2f1   : > { %3078 = vst.msk [vmem:[#allocation3 + $0xb0] sm:$0xff] %vm1173_vm4, %v2994_v62  ;;  %8563 = vmatprep.mubr.msk.bf16.mxu1 %vm442_vm0, %v4006_v16  ;;  %3077 = vst.msk [vmem:[#allocation3 + $0xa0] sm:$0xff] %vm1173_vm4, %v2992_v4  ;;  %3201 = vrot.lane.b32.xlu1 %v10692_v56, %s8748_s15 }
 0x2f2   : > { %3199 = vrot.lane.b32.xlu0 %v10694_v58, %s8748_s15 }
 0x2f3   : > { %v3186_v15 = vpop.permute.xlu1 %3185 }
 0x2f4   : > { %3270 = vst.msk [vmem:[#allocation3 + $0xb0] sm:$0xff] %vm1366_vm5, %v3186_v15  ;;  %v3184_v61 = vpop.permute.xlu0 %3183  ;;  %v3956_v15 = vld [vmem:[#allocation3 + $0xc8] sm:$0xff] }
 0x2f5   : > { %3269 = vst.msk [vmem:[#allocation3 + $0xa0] sm:$0xff] %vm1366_vm5, %v3184_v61  ;;  %3393 = vrot.lane.b32.xlu1 %v10516_v53, %s8749_s16  ;;  %v3958_v61 = vld [vmem:[#allocation3 + $0xd8] sm:$0xff] }
 0x2f6   : > { %3391 = vrot.lane.b32.xlu0 %v10518_v13, %s8749_s16 }
 0x2f7   : > { %v3378_v22 = vpop.permute.xlu1 %3377 }
 0x2f8   : > { %3462 = vst.msk [vmem:[#allocation3 + $0xb0] sm:$0xff] %vm1559_vm6, %v3378_v22  ;;  %v3376_v33 = vpop.permute.xlu0 %3375 }
 0x2f9   : > { %3461 = vst.msk [vmem:[#allocation3 + $0xa0] sm:$0xff] %vm1559_vm6, %v3376_v33  ;;  %3585 = vrot.lane.b32.xlu1 %v10587_v54, %s8750_s24 }
 0x2fa   : > { %3583 = vrot.lane.b32.xlu0 %v10578_v31, %s8750_s24 }
 0x2fb   : > { %v3570_v10 = vpop.permute.xlu1 %3569 }
 0x2fc   : > { %3654 = vst.msk [vmem:[#allocation3 + $0xb0] sm:$0xff] %vm1753_vm7, %v3570_v10  ;;  %v3568_v30 = vpop.permute.xlu0 %3567 }
 0x2fd   : > { %3653 = vst.msk [vmem:[#allocation3 + $0xa0] sm:$0xff] %vm1753_vm7, %v3568_v30  ;;  %3777 = vrot.lane.b32.xlu1 %v10765_v63, %s8751_s30 }
 0x2fe   : > { %3775 = vrot.lane.b32.xlu0 %v10767_v41, %s8751_s30  ;;  %v2404_v47 = vpop.f32.mrb[52].mxu0 }
 0x2ff   : > { %v10775_v49 = vadd.f32 %v10335_v38, %v2404_v47  ;;  %v2406_v6 = vpop.f32.mrb[53].mxu0  ;;  %v3762_v35 = vpop.permute.xlu1 %3761 }
 0x300   : > { %v2407_v48 = vpop.f32.mrb[54].mxu0  ;;  %3846 = vst.msk [vmem:[#allocation3 + $0xb0] sm:$0xff] %vm1946_vm8, %v3762_v35  ;;  %v3760_v40 = vpop.permute.xlu0 %3759 }
 0x301   : > { %13758 = vst [vmem:[#allocation15_spill] sm:$0xff] %v10775_v49  ;;  %2453 = vst.msk [vmem:[#allocation2 + $0x151] sm:$0xff] %vm442_vm0, %v10775_v49  ;;  %v10781_v44 = vadd.f32 %v10335_v38, %v2407_v48  ;;  %v2409_v37 = vpop.f32.mrb[55].mxu0  ;;  %2629 = vrot.lane.b32.xlu1 %v10692_v56, %s8746_s21 }
 0x302   : > { %3845 = vst.msk [vmem:[#allocation3 + $0xa0] sm:$0xff] %vm1946_vm8, %v3760_v40  ;;  %2627 = vrot.lane.b32.xlu0 %v10694_v58, %s8746_s21 }
 0x303   : > { %13759 = vst [vmem:[#allocation16_spill] sm:$0xff] %v10781_v44  ;;  %2454 = vst.msk [vmem:[#allocation2 + $0x159] sm:$0xff] %vm442_vm0, %v10781_v44  ;;  %v2614_v16 = vpop.permute.xlu1 %2613 }
 0x304   : > { %2696 = vst.msk [vmem:[#allocation3 + $0xd0] sm:$0xff] %vm787_vm2, %v2614_v16  ;;  %v2612_v62 = vpop.permute.xlu0 %2611 }
 0x305   : > { %2695 = vst.msk [vmem:[#allocation3 + $0xc0] sm:$0xff] %vm787_vm2, %v2612_v62  ;;  %2821 = vrot.lane.b32.xlu1 %v10516_v53, %s8745_s20  ;;  %v10838_v62 = vld [vmem:[#allocation2 + $0x129] sm:$0xff] }
 0x306   : > { %2819 = vrot.lane.b32.xlu0 %v10518_v13, %s8745_s20  ;;  %v4008_v13 = vpack.c.bf16 %v3958_v61, %v3956_v15 }
 0x307   : > { %v2806_v4 = vpop.permute.xlu1 %2805  ;;  %v3953_v56 = vld [vmem:[#allocation3 + $0xb0] sm:$0xff] }
 0x308   : > { %2888 = vst.msk [vmem:[#allocation3 + $0xd0] sm:$0xff] %vm980_vm3, %v2806_v4  ;;  %v2804_v58 = vpop.permute.xlu0 %2803  ;;  %v10797_v33 = vld [vmem:[#allocation2 + $0x150] sm:$0xff]  ;;  %v10840_v4 = vld [vmem:[#allocation2 + $0x121] sm:$0xff] }
 0x309   : > { %v3951_v22 = vld [vmem:[#allocation3 + $0xa0] sm:$0xff]  ;;  %2887 = vst.msk [vmem:[#allocation3 + $0xc0] sm:$0xff] %vm980_vm3, %v2804_v58  ;;  %3013 = vrot.lane.b32.xlu1 %v10587_v54, %s8747_s28 }
 0x30a   : > { %3011 = vrot.lane.b32.xlu0 %v10578_v31, %s8747_s28  ;;  %v4005_v53 = vpack.c.bf16 %v3953_v56, %v3951_v22  ;;  %2519 = vst.msk [vmem:[#allocation3 + $0x1c0] sm:$0xff] %vm442_vm0, %v10797_v33  ;;  %v10806_v10 = vld [vmem:[#allocation2 + $0x158] sm:$0xff] }
 0x30b   : > { %v10808_v30 = vld [vmem:[#allocation2 + $0x15a] sm:$0xff]  ;;  %v2998_v47 = vpop.permute.xlu1 %2997  ;;  %v10810_v6 = vld [vmem:[#allocation2 + $0x152] sm:$0xff]  ;;  %2520 = vst.msk [vmem:[#allocation3 + $0x1d0] sm:$0xff] %vm442_vm0, %v10806_v10 }
 0x30c   : > { %4227 = vmatmul.mubr.bf16.gmra.mrb[20].mxu1 %v4005_v53  ;;  %3924 = vst.msk [vmem:[#allocation3 + $0x198] sm:$0xff] %vm442_vm0, %v10808_v30  ;;  %v2996_v31 = vpop.permute.xlu0 %2995  ;;  %3923 = vst.msk [vmem:[#allocation3 + $0x188] sm:$0xff] %vm442_vm0, %v10810_v6 }
 0x30d   : > { %3080 = vst.msk [vmem:[#allocation3 + $0xd0] sm:$0xff] %vm1173_vm4, %v2998_v47  ;;  %8564 = vmatprep.mubr.msk.bf16.mxu1 %vm442_vm0, %v4008_v13  ;;  %3079 = vst.msk [vmem:[#allocation3 + $0xc0] sm:$0xff] %vm1173_vm4, %v2996_v31  ;;  %3205 = vrot.lane.b32.xlu1 %v10765_v63, %s8748_s15 }
 0x30e   : > { %3203 = vrot.lane.b32.xlu0 %v10767_v41, %s8748_s15 }
 0x30f   : > { %v3190_v54 = vpop.permute.xlu1 %3189 }
 0x310   : > { %3272 = vst.msk [vmem:[#allocation3 + $0xd0] sm:$0xff] %vm1366_vm5, %v3190_v54  ;;  %v3188_v35 = vpop.permute.xlu0 %3187 }
 0x311   : > { %3271 = vst.msk [vmem:[#allocation3 + $0xc0] sm:$0xff] %vm1366_vm5, %v3188_v35  ;;  %3397 = vrot.lane.b32.xlu1 %v10589_v28, %s8749_s16  ;;  %v3960_v35 = vld [vmem:[#allocation3 + $0xe8] sm:$0xff] }
 0x312   : > { %3395 = vrot.lane.b32.xlu0 %v10591_v57, %s8749_s16 }
 0x313   : > { %v3382_v48 = vpop.permute.xlu1 %3381 }
 0x314   : > { %3464 = vst.msk [vmem:[#allocation3 + $0xd0] sm:$0xff] %vm1559_vm6, %v3382_v48  ;;  %v3380_v40 = vpop.permute.xlu0 %3379  ;;  %v3962_v48 = vld [vmem:[#allocation3 + $0xf8] sm:$0xff] }
 0x315   : > { %3463 = vst.msk [vmem:[#allocation3 + $0xc0] sm:$0xff] %vm1559_vm6, %v3380_v40  ;;  %3589 = vrot.lane.b32.xlu1 %v10660_v17, %s8750_s24 }
 0x316   : > { %3587 = vrot.lane.b32.xlu0 %v10651_v45, %s8750_s24 }
 0x317   : > { %v3574_v37 = vpop.permute.xlu1 %3573 }
 0x318   : > { %3656 = vst.msk [vmem:[#allocation3 + $0xd0] sm:$0xff] %vm1753_vm7, %v3574_v37  ;;  %v3572_v16 = vpop.permute.xlu0 %3571 }
 0x319   : > { %3655 = vst.msk [vmem:[#allocation3 + $0xc0] sm:$0xff] %vm1753_vm7, %v3572_v16  ;;  %3781 = vrot.lane.b32.xlu1 %v10838_v62, %s8751_s30 }
 0x31a   : > { %3779 = vrot.lane.b32.xlu0 %v10840_v4, %s8751_s30  ;;  %v2412_v56 = vpop.f32.mrb[56].mxu0 }
 0x31b   : > { %v10848_v15 = vadd.f32 %v10335_v38, %v2412_v56  ;;  %v2414_v61 = vpop.f32.mrb[57].mxu0  ;;  %v3766_v58 = vpop.permute.xlu1 %3765 }
 0x31c   : > { %v2415_v22 = vpop.f32.mrb[58].mxu0  ;;  %3848 = vst.msk [vmem:[#allocation3 + $0xd0] sm:$0xff] %vm1946_vm8, %v3766_v58  ;;  %v3764_v53 = vpop.permute.xlu0 %3763 }
 0x31d   : > { %13760 = vst [vmem:[#allocation17_spill] sm:$0xff] %v10848_v15  ;;  %2455 = vst.msk [vmem:[#allocation2 + $0x169] sm:$0xff] %vm442_vm0, %v10848_v15  ;;  %v10854_v13 = vadd.f32 %v10335_v38, %v2415_v22  ;;  %v2417_v47 = vpop.f32.mrb[59].mxu0  ;;  %2633 = vrot.lane.b32.xlu1 %v10765_v63, %s8746_s21 }
 0x31e   : > { %3847 = vst.msk [vmem:[#allocation3 + $0xc0] sm:$0xff] %vm1946_vm8, %v3764_v53  ;;  %2631 = vrot.lane.b32.xlu0 %v10767_v41, %s8746_s21 }
 0x31f   : > { %13761 = vst [vmem:[#allocation18_spill] sm:$0xff] %v10854_v13  ;;  %2456 = vst.msk [vmem:[#allocation2 + $0x171] sm:$0xff] %vm442_vm0, %v10854_v13  ;;  %v2618_v31 = vpop.permute.xlu1 %2617 }
 0x320   : > { %2698 = vst.msk [vmem:[#allocation3 + $0xf0] sm:$0xff] %vm787_vm2, %v2618_v31  ;;  %v2616_v54 = vpop.permute.xlu0 %2615 }
 0x321   : > { %2697 = vst.msk [vmem:[#allocation3 + $0xe0] sm:$0xff] %vm787_vm2, %v2616_v54  ;;  %2825 = vrot.lane.b32.xlu1 %v10589_v28, %s8745_s20 }
 0x322   : > { %2823 = vrot.lane.b32.xlu0 %v10591_v57, %s8745_s20  ;;  %v4010_v57 = vpack.c.bf16 %v3962_v48, %v3960_v35  ;;  %v8732_v48 = vld [vmem:[%s13685_s2] ss:$0 sm:$0xff] }
 0x323   : > { %v2810_v38 = vpop.permute.xlu1 %2809  ;;  %v3957_v63 = vld [vmem:[#allocation3 + $0xd0] sm:$0xff] }
 0x324   : > { %2890 = vst.msk [vmem:[#allocation3 + $0xf0] sm:$0xff] %vm980_vm3, %v2810_v38  ;;  %v2808_v41 = vpop.permute.xlu0 %2807  ;;  %v10870_v37 = vld [vmem:[#allocation2 + $0x168] sm:$0xff] }
 0x325   : > { %v3955_v40 = vld [vmem:[#allocation3 + $0xc0] sm:$0xff]  ;;  %2889 = vst.msk [vmem:[#allocation3 + $0xe0] sm:$0xff] %vm980_vm3, %v2808_v41  ;;  %3017 = vrot.lane.b32.xlu1 %v10660_v17, %s8747_s28  ;;  %v10911_v38 = vld [vmem:[#allocation2 + $0x141] sm:$0xff] }
 0x326   : > { %3015 = vrot.lane.b32.xlu0 %v10651_v45, %s8747_s28  ;;  %v4007_v28 = vpack.c.bf16 %v3957_v63, %v3955_v40  ;;  %2521 = vst.msk [vmem:[#allocation3 + $0x1e0] sm:$0xff] %vm442_vm0, %v10870_v37  ;;  %v10879_v16 = vld [vmem:[#allocation2 + $0x170] sm:$0xff]  ;;  %v10913_v63 = vld [vmem:[#allocation2 + $0x139] sm:$0xff] }
 0x327   : > { %v10881_v56 = vld [vmem:[#allocation2 + $0x172] sm:$0xff]  ;;  %v3002_v61 = vpop.permute.xlu1 %3001  ;;  %v10883_v58 = vld [vmem:[#allocation2 + $0x16a] sm:$0xff]  ;;  %2522 = vst.msk [vmem:[#allocation3 + $0x1f0] sm:$0xff] %vm442_vm0, %v10879_v16 }
 0x328   : > { %4235 = vmatmul.mubr.bf16.gmra.mrb[24].mxu1 %v4007_v28  ;;  %3926 = vst.msk [vmem:[#allocation3 + $0x1b8] sm:$0xff] %vm442_vm0, %v10881_v56  ;;  %v3000_v45 = vpop.permute.xlu0 %2999  ;;  %3925 = vst.msk [vmem:[#allocation3 + $0x1a8] sm:$0xff] %vm442_vm0, %v10883_v58 }
 0x329   : > { %3082 = vst.msk [vmem:[#allocation3 + $0xf0] sm:$0xff] %vm1173_vm4, %v3002_v61  ;;  %8565 = vmatprep.mubr.msk.bf16.mxu1 %vm442_vm0, %v4010_v57  ;;  %3081 = vst.msk [vmem:[#allocation3 + $0xe0] sm:$0xff] %vm1173_vm4, %v3000_v45  ;;  %3209 = vrot.lane.b32.xlu1 %v10838_v62, %s8748_s15 }
 0x32a   : > { %3207 = vrot.lane.b32.xlu0 %v10840_v4, %s8748_s15 }
 0x32b   : > { %v3194_v17 = vpop.permute.xlu1 %3193 }
 0x32c   : > { %3274 = vst.msk [vmem:[#allocation3 + $0xf0] sm:$0xff] %vm1366_vm5, %v3194_v17  ;;  %v3192_v22 = vpop.permute.xlu0 %3191 }
 0x32d   : > { %3273 = vst.msk [vmem:[#allocation3 + $0xe0] sm:$0xff] %vm1366_vm5, %v3192_v22  ;;  %3401 = vrot.lane.b32.xlu1 %v10662_v21, %s8749_s16 }
 0x32e   : > { %3399 = vrot.lane.b32.xlu0 %v10664_v14, %s8749_s16 }
 0x32f   : > { %v3386_v53 = vpop.permute.xlu1 %3385 }
 0x330   : > { %3466 = vst.msk [vmem:[#allocation3 + $0xf0] sm:$0xff] %vm1559_vm6, %v3386_v53  ;;  %v3384_v47 = vpop.permute.xlu0 %3383 }
 0x331   : > { %3465 = vst.msk [vmem:[#allocation3 + $0xe0] sm:$0xff] %vm1559_vm6, %v3384_v47  ;;  %3593 = vrot.lane.b32.xlu1 %v10733_v8, %s8750_s24 }
 0x332   : > { %3591 = vrot.lane.b32.xlu0 %v10724_v55, %s8750_s24 }
 0x333   : > { %v3578_v31 = vpop.permute.xlu1 %3577 }
 0x334   : > { %3658 = vst.msk [vmem:[#allocation3 + $0xf0] sm:$0xff] %vm1753_vm7, %v3578_v31  ;;  %v3576_v54 = vpop.permute.xlu0 %3575  ;;  %v3964_v31 = vld [vmem:[#allocation3 + $0x108] sm:$0xff] }
 0x335   : > { %3657 = vst.msk [vmem:[#allocation3 + $0xe0] sm:$0xff] %vm1753_vm7, %v3576_v54  ;;  %3785 = vrot.lane.b32.xlu1 %v10911_v38, %s8751_s30  ;;  %v3966_v54 = vld [vmem:[#allocation3 + $0x118] sm:$0xff] }
 0x336   : > { %3783 = vrot.lane.b32.xlu0 %v10913_v63, %s8751_s30  ;;  %v2420_v35 = vpop.f32.mrb[60].mxu0 }
 0x337   : > { %v10923_v41 = vadd.f32 %v8732_v48, %v2420_v35  ;;  %v2422_v40 = vpop.f32.mrb[61].mxu0  ;;  %v3770_v28 = vpop.permute.xlu1 %3769 }
 0x338   : > { %v2423_v57 = vpop.f32.mrb[62].mxu0  ;;  %3850 = vst.msk [vmem:[#allocation3 + $0xf0] sm:$0xff] %vm1946_vm8, %v3770_v28  ;;  %v3768_v61 = vpop.permute.xlu0 %3767 }
 0x339   : > { %13762 = vst [vmem:[#allocation19_spill] sm:$0xff] %v10923_v41  ;;  %2457 = vst.msk [vmem:[#allocation2 + $0x181] sm:$0xff] %vm442_vm0, %v10923_v41  ;;  %v10928_v45 = vadd.f32 %v8732_v48, %v2423_v57  ;;  %v2425_v17 = vpop.f32.mrb[63].mxu0  ;;  %2637 = vrot.lane.b32.xlu1 %v10838_v62, %s8746_s21  ;;  %v4012_v48 = vpack.c.bf16 %v3966_v54, %v3964_v31  ;;  %v10984_v31 = vld [vmem:[#allocation2 + $0x151] sm:$0xff] }
 0x33a   : > { %3849 = vst.msk [vmem:[#allocation3 + $0xe0] sm:$0xff] %vm1946_vm8, %v3768_v61  ;;  %2635 = vrot.lane.b32.xlu0 %v10840_v4, %s8746_s21 }
 0x33b   : > { %13763 = vst [vmem:[#allocation20_spill] sm:$0xff] %v10928_v45  ;;  %2458 = vst.msk [vmem:[#allocation2 + $0x189] sm:$0xff] %vm442_vm0, %v10928_v45  ;;  %v2622_v22 = vpop.permute.xlu1 %2621 }
 0x33c   : > { %2700 = vst.msk [vmem:[#allocation3 + $0x110] sm:$0xff] %vm787_vm2, %v2622_v22  ;;  %v2620_v53 = vpop.permute.xlu0 %2619 }
 0x33d   : > { %2699 = vst.msk [vmem:[#allocation3 + $0x100] sm:$0xff] %vm787_vm2, %v2620_v53  ;;  %2829 = vrot.lane.b32.xlu1 %v10662_v21, %s8745_s20 }
 0x33e   : > { %2827 = vrot.lane.b32.xlu0 %v10664_v14, %s8745_s20 }
 0x33f   : > { %v2814_v47 = vpop.permute.xlu1 %2813  ;;  %v3961_v62 = vld [vmem:[#allocation3 + $0xf0] sm:$0xff] }
 0x340   : > { %2892 = vst.msk [vmem:[#allocation3 + $0x110] sm:$0xff] %vm980_vm3, %v2814_v47  ;;  %v2812_v4 = vpop.permute.xlu0 %2811  ;;  %v10980_v47 = vld [vmem:[%s13687_s4] ss:$0 sm:$0xff] }
 0x341   : > { %v3959_v35 = vld [vmem:[#allocation3 + $0xe0] sm:$0xff]  ;;  %2891 = vst.msk [vmem:[#allocation3 + $0x100] sm:$0xff] %vm980_vm3, %v2812_v4  ;;  %3021 = vrot.lane.b32.xlu1 %v10733_v8, %s8747_s28 }
 0x342   : > { %3019 = vrot.lane.b32.xlu0 %v10724_v55, %s8747_s28  ;;  %v4009_v21 = vpack.c.bf16 %v3961_v62, %v3959_v35  ;;  %v10949_v40 = vld [vmem:[#allocation2 + $0x18a] sm:$0xff]  ;;  %v10951_v28 = vld [vmem:[#allocation2 + $0x182] sm:$0xff]  ;;  %v10982_v62 = vld [vmem:[#allocation2 + $0x159] sm:$0xff] }
 0x343   : > { %v3006_v14 = vpop.permute.xlu1 %3005  ;;  %3928 = vst.msk [vmem:[#allocation3 + $0x1d8] sm:$0xff] %vm442_vm0, %v10949_v40  ;;  %3927 = vst.msk [vmem:[#allocation3 + $0x1c8] sm:$0xff] %vm442_vm0, %v10951_v28 }
 0x344   : > { %4243 = vmatmul.mubr.bf16.gmra.mrb[28].mxu1 %v4009_v21  ;;  %3084 = vst.msk [vmem:[#allocation3 + $0x110] sm:$0xff] %vm1173_vm4, %v3006_v14  ;;  %v3004_v57 = vpop.permute.xlu0 %3003 }
 0x345   : > { %8566 = vmatprep.mubr.msk.bf16.mxu1 %vm442_vm0, %v4012_v48  ;;  %3083 = vst.msk [vmem:[#allocation3 + $0x100] sm:$0xff] %vm1173_vm4, %v3004_v57  ;;  %3213 = vrot.lane.b32.xlu1 %v10911_v38, %s8748_s15 }
 0x346   : > { %3211 = vrot.lane.b32.xlu0 %v10913_v63, %s8748_s15 }
 0x347   : > { %v3198_v55 = vpop.permute.xlu1 %3197 }
 0x348   : > { %3276 = vst.msk [vmem:[#allocation3 + $0x110] sm:$0xff] %vm1366_vm5, %v3198_v55  ;;  %v3196_v8 = vpop.permute.xlu0 %3195 }
 0x349   : > { %3275 = vst.msk [vmem:[#allocation3 + $0x100] sm:$0xff] %vm1366_vm5, %v3196_v8  ;;  %3405 = vrot.lane.b32.xlu1 %v10735_v39, %s8749_s16 }
 0x34a   : > { %3403 = vrot.lane.b32.xlu0 %v10737_v36, %s8749_s16 }
 0x34b   : > { %v3390_v61 = vpop.permute.xlu1 %3389 }
 0x34c   : > { %3468 = vst.msk [vmem:[#allocation3 + $0x110] sm:$0xff] %vm1559_vm6, %v3390_v61  ;;  %v3388_v17 = vpop.permute.xlu0 %3387 }
 0x34d   : > { %3467 = vst.msk [vmem:[#allocation3 + $0x100] sm:$0xff] %vm1559_vm6, %v3388_v17  ;;  %3597 = vrot.lane.b32.xlu1 %v10806_v10, %s8750_s24 }
 0x34e   : > { %3595 = vrot.lane.b32.xlu0 %v10797_v33, %s8750_s24 }
 0x34f   : > { %v3582_v22 = vpop.permute.xlu1 %3581 }
 0x350   : > { %3660 = vst.msk [vmem:[#allocation3 + $0x110] sm:$0xff] %vm1753_vm7, %v3582_v22  ;;  %v3580_v53 = vpop.permute.xlu0 %3579 }
 0x351   : > { %3659 = vst.msk [vmem:[#allocation3 + $0x100] sm:$0xff] %vm1753_vm7, %v3580_v53  ;;  %3789 = vrot.lane.b32.xlu1 %v10982_v62, %s8751_s30 }
 0x352   : > { %3787 = vrot.lane.b32.xlu0 %v10984_v31, %s8751_s30 }
 0x353   : > { %v4188_v54 = vpop.f32.mrb[0].mxu1  ;;  %v3774_v21 = vpop.permute.xlu1 %3773 }
 0x354   : > { %v4189_v4 = vadd.f32 %v10980_v47, %v4188_v54  ;;  %v4190_v35 = vpop.f32.mrb[1].mxu1  ;;  %3852 = vst.msk [vmem:[#allocation3 + $0x110] sm:$0xff] %vm1946_vm8, %v3774_v21  ;;  %v3772_v14 = vpop.permute.xlu0 %3771  ;;  %v3970_v54 = vld [vmem:[#allocation3 + $0x138] sm:$0xff] }
 0x355   : > { %v4191_v48 = vpop.f32.mrb[2].mxu1  ;;  %3851 = vst.msk [vmem:[#allocation3 + $0x100] sm:$0xff] %vm1946_vm8, %v3772_v14  ;;  %2641 = vrot.lane.b32.xlu1 %v10911_v38, %s8746_s21 }
 0x356   : > { %v4315_v57 = vmax.f32 %v4189_v4, 0.0  ;;  %v4192_v55 = vadd.f32 %v10980_v47, %v4191_v48  ;;  %v4193_v8 = vpop.f32.mrb[3].mxu1  ;;  %2639 = vrot.lane.b32.xlu0 %v10913_v63, %s8746_s21  ;;  %v3968_v63 = vld [vmem:[#allocation3 + $0x128] sm:$0xff] }
 0x357   : > { %v2626_v17 = vpop.permute.xlu1 %2625  ;;  %v4014_v21 = vpack.c.bf16 %v3970_v54, %v3968_v63 }
 0x358   : > { %4347 = vst.msk [vmem:[#allocation2 + $0x19] sm:$0xff] %vm442_vm0, %v4315_v57  ;;  %v4316_v61 = vmax.f32 %v4192_v55, 0.0  ;;  %v2624_v22 = vpop.permute.xlu0 %2623 }
 0x359   : > { %2702 = vst.msk [vmem:[#allocation3 + $0x130] sm:$0xff] %vm787_vm2, %v2626_v17  ;;  %2701 = vst.msk [vmem:[#allocation3 + $0x120] sm:$0xff] %vm787_vm2, %v2624_v22  ;;  %2833 = vrot.lane.b32.xlu1 %v10735_v39, %s8745_s20  ;;  %v11041_v22 = vld [vmem:[#allocation2 + $0x171] sm:$0xff] }
 0x35a   : > { %4348 = vst.msk [vmem:[#allocation2 + $0x21] sm:$0xff] %vm442_vm0, %v4316_v61  ;;  %2831 = vrot.lane.b32.xlu0 %v10737_v36, %s8745_s20 }
 0x35b   : > { %v2818_v38 = vpop.permute.xlu1 %2817  ;;  %v3965_v53 = vld [vmem:[#allocation3 + $0x110] sm:$0xff] }
 0x35c   : > { %2894 = vst.msk [vmem:[#allocation3 + $0x130] sm:$0xff] %vm980_vm3, %v2818_v38  ;;  %v2816_v4 = vpop.permute.xlu0 %2815  ;;  %v3963_v35 = vld [vmem:[#allocation3 + $0x100] sm:$0xff] }
 0x35d   : > { %2893 = vst.msk [vmem:[#allocation3 + $0x120] sm:$0xff] %vm980_vm3, %v2816_v4  ;;  %3025 = vrot.lane.b32.xlu1 %v10806_v10, %s8747_s28  ;;  %v4011_v39 = vpack.c.bf16 %v3965_v53, %v3963_v35  ;;  %v11043_v38 = vld [vmem:[#allocation2 + $0x169] sm:$0xff] }
 0x35e   : > { %3023 = vrot.lane.b32.xlu0 %v10797_v33, %s8747_s28 }
 0x35f   : > { %v11013_v48 = vld [vmem:[#allocation2 + $0x18] sm:$0xff]  ;;  %4251 = vmatmul.mubr.bf16.gmra.mrb[32].mxu1 %v4011_v39  ;;  %v3010_v36 = vpop.permute.xlu1 %3009 }
 0x360   : > { %4413 = vst.msk [vmem:[#allocation3 + $0x20] sm:$0xff] %vm442_vm0, %v11013_v48  ;;  %v3008_v14 = vpop.permute.xlu0 %3007  ;;  %8567 = vmatprep.mubr.msk.bf16.mxu1 %vm442_vm0, %v4014_v21 }
 0x361   : > { %3086 = vst.msk [vmem:[#allocation3 + $0x130] sm:$0xff] %vm1173_vm4, %v3010_v36  ;;  %v11019_v57 = vld [vmem:[#allocation2 + $0x20] sm:$0xff]  ;;  %3085 = vst.msk [vmem:[#allocation3 + $0x120] sm:$0xff] %vm1173_vm4, %v3008_v14  ;;  %3217 = vrot.lane.b32.xlu1 %v10982_v62, %s8748_s15 }
 0x362   : > { %3215 = vrot.lane.b32.xlu0 %v10984_v31, %s8748_s15  ;;  %4414 = vst.msk [vmem:[#allocation3 + $0x30] sm:$0xff] %vm442_vm0, %v11019_v57 }
 0x363   : > { %v3202_v33 = vpop.permute.xlu1 %3201 }
 0x364   : > { %3278 = vst.msk [vmem:[#allocation3 + $0x130] sm:$0xff] %vm1366_vm5, %v3202_v33  ;;  %v3200_v10 = vpop.permute.xlu0 %3199 }
 0x365   : > { %3277 = vst.msk [vmem:[#allocation3 + $0x120] sm:$0xff] %vm1366_vm5, %v3200_v10  ;;  %3409 = vrot.lane.b32.xlu1 %v10808_v30, %s8749_s16 }
 0x366   : > { %3407 = vrot.lane.b32.xlu0 %v10810_v6, %s8749_s16 }
 0x367   : > { %v3394_v55 = vpop.permute.xlu1 %3393 }
 0x368   : > { %3470 = vst.msk [vmem:[#allocation3 + $0x130] sm:$0xff] %vm1559_vm6, %v3394_v55  ;;  %v3392_v8 = vpop.permute.xlu0 %3391 }
 0x369   : > { %3469 = vst.msk [vmem:[#allocation3 + $0x120] sm:$0xff] %vm1559_vm6, %v3392_v8  ;;  %3601 = vrot.lane.b32.xlu1 %v10879_v16, %s8750_s24 }
 0x36a   : > { %3599 = vrot.lane.b32.xlu0 %v10870_v37, %s8750_s24 }
 0x36b   : > { %v3586_v61 = vpop.permute.xlu1 %3585 }
 0x36c   : > { %3662 = vst.msk [vmem:[#allocation3 + $0x130] sm:$0xff] %vm1753_vm7, %v3586_v61  ;;  %v3584_v17 = vpop.permute.xlu0 %3583  ;;  %v3974_v61 = vld [vmem:[#allocation3 + $0x158] sm:$0xff] }
 0x36d   : > { %3661 = vst.msk [vmem:[#allocation3 + $0x120] sm:$0xff] %vm1753_vm7, %v3584_v17  ;;  %3793 = vrot.lane.b32.xlu1 %v11041_v22, %s8751_s30 }
 0x36e   : > { %3791 = vrot.lane.b32.xlu0 %v11043_v38, %s8751_s30 }
 0x36f   : > { %v4196_v53 = vpop.f32.mrb[4].mxu1  ;;  %v3778_v4 = vpop.permute.xlu1 %3777 }
 0x370   : > { %v4197_v63 = vadd.f32 %v10980_v47, %v4196_v53  ;;  %v4198_v54 = vpop.f32.mrb[5].mxu1  ;;  %3854 = vst.msk [vmem:[#allocation3 + $0x130] sm:$0xff] %vm1946_vm8, %v3778_v4  ;;  %v3776_v39 = vpop.permute.xlu0 %3775 }
 0x371   : > { %v4199_v35 = vpop.f32.mrb[6].mxu1  ;;  %3853 = vst.msk [vmem:[#allocation3 + $0x120] sm:$0xff] %vm1946_vm8, %v3776_v39  ;;  %2645 = vrot.lane.b32.xlu1 %v10982_v62, %s8746_s21 }
 0x372   : > { %v4317_v21 = vmax.f32 %v4197_v63, 0.0  ;;  %v4200_v36 = vadd.f32 %v10980_v47, %v4199_v35  ;;  %v4201_v14 = vpop.f32.mrb[7].mxu1  ;;  %2643 = vrot.lane.b32.xlu0 %v10984_v31, %s8746_s21  ;;  %v3972_v31 = vld [vmem:[#allocation3 + $0x148] sm:$0xff] }
 0x373   : > { %v2630_v10 = vpop.permute.xlu1 %2629  ;;  %v4016_v63 = vpack.c.bf16 %v3974_v61, %v3972_v31  ;;  %v3511_v14 = vld [vmem:[#allocation2 + $0x180] sm:$0xff] }
 0x374   : > { %4349 = vst.msk [vmem:[#allocation2 + $0x31] sm:$0xff] %vm442_vm0, %v4317_v21  ;;  %v4318_v33 = vmax.f32 %v4200_v36, 0.0  ;;  %v2628_v55 = vpop.permute.xlu0 %2627 }
 0x375   : > { %2704 = vst.msk [vmem:[#allocation3 + $0x150] sm:$0xff] %vm787_vm2, %v2630_v10  ;;  %2703 = vst.msk [vmem:[#allocation3 + $0x140] sm:$0xff] %vm787_vm2, %v2628_v55  ;;  %2837 = vrot.lane.b32.xlu1 %v10808_v30, %s8745_s20  ;;  %v3512_v10 = vld [vmem:[#allocation2 + $0x188] sm:$0xff] }
 0x376   : > { %4350 = vst.msk [vmem:[#allocation2 + $0x39] sm:$0xff] %vm442_vm0, %v4318_v33  ;;  %2835 = vrot.lane.b32.xlu0 %v10810_v6, %s8745_s20 }
 0x377   : > { %v2822_v62 = vpop.permute.xlu1 %2821  ;;  %v3969_v8 = vld [vmem:[#allocation3 + $0x130] sm:$0xff] }
 0x378   : > { %2896 = vst.msk [vmem:[#allocation3 + $0x150] sm:$0xff] %vm980_vm3, %v2822_v62  ;;  %v2820_v17 = vpop.permute.xlu0 %2819  ;;  %v3967_v53 = vld [vmem:[#allocation3 + $0x120] sm:$0xff] }
 0x379   : > { %2895 = vst.msk [vmem:[#allocation3 + $0x140] sm:$0xff] %vm980_vm3, %v2820_v17  ;;  %3029 = vrot.lane.b32.xlu1 %v10879_v16, %s8747_s28  ;;  %v4013_v30 = vpack.c.bf16 %v3969_v8, %v3967_v53  ;;  %v3704_v17 = vld [vmem:[#allocation2 + $0x189] sm:$0xff]  ;;  %v3703_v53 = vld [vmem:[#allocation2 + $0x181] sm:$0xff] }
 0x37a   : > { %3027 = vrot.lane.b32.xlu0 %v10870_v37, %s8747_s28 }
 0x37b   : > { %v11072_v54 = vld [vmem:[#allocation2 + $0x30] sm:$0xff]  ;;  %4259 = vmatmul.mubr.bf16.gmra.mrb[36].mxu1 %v4013_v30  ;;  %v3014_v6 = vpop.permute.xlu1 %3013 }
 0x37c   : > { %4415 = vst.msk [vmem:[#allocation3 + $0x40] sm:$0xff] %vm442_vm0, %v11072_v54  ;;  %v3012_v4 = vpop.permute.xlu0 %3011  ;;  %8568 = vmatprep.mubr.msk.bf16.mxu1 %vm442_vm0, %v4016_v63 }
 0x37d   : > { %3088 = vst.msk [vmem:[#allocation3 + $0x150] sm:$0xff] %vm1173_vm4, %v3014_v6  ;;  %v11078_v35 = vld [vmem:[#allocation2 + $0x32] sm:$0xff]  ;;  %v11080_v16 = vld [vmem:[#allocation2 + $0x3a] sm:$0xff]  ;;  %3087 = vst.msk [vmem:[#allocation3 + $0x140] sm:$0xff] %vm1173_vm4, %v3012_v4  ;;  %3221 = vrot.lane.b32.xlu1 %v11041_v22, %s8748_s15 }
 0x37e   : > { %v11082_v39 = vld [vmem:[#allocation2 + $0x38] sm:$0xff]  ;;  %3219 = vrot.lane.b32.xlu0 %v11043_v38, %s8748_s15  ;;  %5819 = vst.msk [vmem:[#allocation3 + $0x8] sm:$0xff] %vm442_vm0, %v11078_v35  ;;  %5820 = vst.msk [vmem:[#allocation3 + $0x18] sm:$0xff] %vm442_vm0, %v11080_v16 }
 0x37f   : > { %4416 = vst.msk [vmem:[#allocation3 + $0x50] sm:$0xff] %vm442_vm0, %v11082_v39  ;;  %v3206_v37 = vpop.permute.xlu1 %3205 }
 0x380   : > { %3280 = vst.msk [vmem:[#allocation3 + $0x150] sm:$0xff] %vm1366_vm5, %v3206_v37  ;;  %v3204_v21 = vpop.permute.xlu0 %3203 }
 0x381   : > { %3279 = vst.msk [vmem:[#allocation3 + $0x140] sm:$0xff] %vm1366_vm5, %v3204_v21  ;;  %3413 = vrot.lane.b32.xlu1 %v10881_v56, %s8749_s16 }
 0x382   : > { %3411 = vrot.lane.b32.xlu0 %v10883_v58, %s8749_s16 }
 0x383   : > { %v3398_v36 = vpop.permute.xlu1 %3397 }
 0x384   : > { %3472 = vst.msk [vmem:[#allocation3 + $0x150] sm:$0xff] %vm1559_vm6, %v3398_v36  ;;  %v3396_v33 = vpop.permute.xlu0 %3395 }
 0x385   : > { %v5852_v55 = vld [vmem:[#allocation3 + $0x8] sm:$0xff]  ;;  %v5854_v62 = vld [vmem:[#allocation3 + $0x18] sm:$0xff]  ;;  %3471 = vst.msk [vmem:[#allocation3 + $0x140] sm:$0xff] %vm1559_vm6, %v3396_v33  ;;  %3605 = vrot.lane.b32.xlu1 %v3512_v10, %s8750_s24 }
 0x386   : > { %3603 = vrot.lane.b32.xlu0 %v3511_v14, %s8750_s24  ;;  %v5916_v8 = vpack.c.bf16 %v5854_v62, %v5852_v55 }
 0x387   : > { %v3590_v31 = vpop.permute.xlu1 %3589 }
 0x388   : > { %8584 = vmatprep.mubr.msk.bf16.mxu0 %vm442_vm0, %v5916_v8  ;;  %3664 = vst.msk [vmem:[#allocation3 + $0x150] sm:$0xff] %vm1753_vm7, %v3590_v31  ;;  %v3588_v61 = vpop.permute.xlu0 %3587 }
 0x389   : > { %3663 = vst.msk [vmem:[#allocation3 + $0x140] sm:$0xff] %vm1753_vm7, %v3588_v61  ;;  %3797 = vrot.lane.b32.xlu1 %v3704_v17, %s8751_s30 }
 0x38a   : > { %3795 = vrot.lane.b32.xlu0 %v3703_v53, %s8751_s30 }
 0x38b   : > { %v4204_v30 = vpop.f32.mrb[8].mxu1  ;;  %v3782_v4 = vpop.permute.xlu1 %3781 }
 0x38c   : > { %v4205_v63 = vadd.f32 %v10980_v47, %v4204_v30  ;;  %v4206_v6 = vpop.f32.mrb[9].mxu1  ;;  %3856 = vst.msk [vmem:[#allocation3 + $0x150] sm:$0xff] %vm1946_vm8, %v3782_v4  ;;  %v3780_v37 = vpop.permute.xlu0 %3779  ;;  %v3978_v30 = vld [vmem:[#allocation3 + $0x178] sm:$0xff] }
 0x38d   : > { %v4207_v21 = vpop.f32.mrb[10].mxu1  ;;  %3855 = vst.msk [vmem:[#allocation3 + $0x140] sm:$0xff] %vm1946_vm8, %v3780_v37  ;;  %2649 = vrot.lane.b32.xlu1 %v11041_v22, %s8746_s21 }
 0x38e   : > { %v4319_v36 = vmax.f32 %v4205_v63, 0.0  ;;  %v4208_v33 = vadd.f32 %v10980_v47, %v4207_v21  ;;  %v4209_v55 = vpop.f32.mrb[11].mxu1  ;;  %2647 = vrot.lane.b32.xlu0 %v11043_v38, %s8746_s21  ;;  %v3976_v38 = vld [vmem:[#allocation3 + $0x168] sm:$0xff] }
 0x38f   : > { %v2634_v8 = vpop.permute.xlu1 %2633  ;;  %v4018_v37 = vpack.c.bf16 %v3978_v30, %v3976_v38  ;;  %v8709_v55 = vld [vmem:[%s13688_s5] sm:$0xff]   ;;  %v11167_v38 = vld [vmem:[#allocation3 + $0x1e8] sm:$0xff] }
 0x390   : > { %4351 = vst.msk [vmem:[#allocation2 + $0x49] sm:$0xff] %vm442_vm0, %v4319_v36  ;;  %v4320_v62 = vmax.f32 %v4208_v33, 0.0  ;;  %v2632_v31 = vpop.permute.xlu0 %2631  ;;  %6075 = vmatpush1.bf16.msra.mxu0 %v8709_v55 }
 0x391   : > { %2706 = vst.msk [vmem:[#allocation3 + $0x170] sm:$0xff] %vm787_vm2, %v2634_v8  ;;  %2705 = vst.msk [vmem:[#allocation3 + $0x160] sm:$0xff] %vm787_vm2, %v2632_v31  ;;  %2841 = vrot.lane.b32.xlu1 %v10881_v56, %s8745_s20  ;;  %v3514_v8 = vld [vmem:[#allocation2 + $0x1a0] sm:$0xff]  ;;  %v3513_v31 = vld [vmem:[#allocation2 + $0x198] sm:$0xff]  ;;  %6076 = vmatprep.subr.bf16.mxu0 %v13697_v1 }
 0x392   : > { %4352 = vst.msk [vmem:[#allocation2 + $0x51] sm:$0xff] %vm442_vm0, %v4320_v62  ;;  %2839 = vrot.lane.b32.xlu0 %v10883_v58, %s8745_s20  ;;  %v4379_v62 = vld [vmem:[#allocation2] sm:$0xff] }
 0x393   : > { %v2826_v22 = vpop.permute.xlu1 %2825  ;;  %v3973_v61 = vld [vmem:[#allocation3 + $0x150] sm:$0xff]  ;;  %4411 = vst.msk [vmem:[#allocation3] sm:$0xff] %vm442_vm0, %v4379_v62  ;;  %v8712_v62 = vld [vmem:[%s13688_s5 + $0x18] sm:$0xff]  }
 0x394   : > { %2898 = vst.msk [vmem:[#allocation3 + $0x170] sm:$0xff] %vm980_vm3, %v2826_v22  ;;  %v2824_v63 = vpop.permute.xlu0 %2823  ;;  %v3971_v6 = vld [vmem:[#allocation3 + $0x140] sm:$0xff]  ;;  %v8710_v22 = vld [vmem:[%s13688_s5 + $0x8] sm:$0xff]  }
 0x395   : > { %2897 = vst.msk [vmem:[#allocation3 + $0x160] sm:$0xff] %vm980_vm3, %v2824_v63  ;;  %3033 = vrot.lane.b32.xlu1 %v3512_v10, %s8747_s28  ;;  %v4015_v4 = vpack.c.bf16 %v3973_v61, %v3971_v6  ;;  %v5817_v63 = vld [vmem:[#allocation2 + $0x19a] sm:$0xff]  ;;  %v5818_v6 = vld [vmem:[#allocation2 + $0x1a2] sm:$0xff]  ;;  %6077 = vmatpush1.bf16.msra.mxu0 %v8710_v22 }
 0x396   : > { %3031 = vrot.lane.b32.xlu0 %v3511_v14, %s8747_s28  ;;  %5849 = vst.msk [vmem:[#allocation3 + $0x1e8] sm:$0xff] %vm442_vm0, %v5817_v63  ;;  %6078 = vmatprep.subr.bf16.mxu0 %v13697_v1 }
 0x397   : > { %v11130_v56 = vld [vmem:[#allocation2 + $0x48] sm:$0xff]  ;;  %4267 = vmatmul.mubr.bf16.gmra.mrb[40].mxu1 %v4015_v4  ;;  %v3018_v58 = vpop.permute.xlu1 %3017 }
 0x398   : > { %4417 = vst.msk [vmem:[#allocation3 + $0x60] sm:$0xff] %vm442_vm0, %v11130_v56  ;;  %v3016_v21 = vpop.permute.xlu0 %3015  ;;  %8569 = vmatprep.mubr.msk.bf16.mxu1 %vm442_vm0, %v4018_v37  ;;  %v3706_v4 = vld [vmem:[#allocation2 + $0x1a1] sm:$0xff]  ;;  %v3705_v37 = vld [vmem:[#allocation2 + $0x199] sm:$0xff] }
 0x399   : > { %3090 = vst.msk [vmem:[#allocation3 + $0x170] sm:$0xff] %vm1173_vm4, %v3018_v58  ;;  %v11136_v36 = vld [vmem:[#allocation2 + $0x50] sm:$0xff]  ;;  %3089 = vst.msk [vmem:[#allocation3 + $0x160] sm:$0xff] %vm1173_vm4, %v3016_v21  ;;  %3225 = vrot.lane.b32.xlu1 %v3704_v17, %s8748_s15 }
 0x39a   : > { %v11138_v33 = vld [vmem:[#allocation2 + $0x52] sm:$0xff]  ;;  %3223 = vrot.lane.b32.xlu0 %v3703_v53, %s8748_s15  ;;  %v11143_v14 = vld [vmem:[#allocation2 + $0x4a] sm:$0xff]  ;;  %4418 = vst.msk [vmem:[#allocation3 + $0x70] sm:$0xff] %vm442_vm0, %v11136_v36 }
 0x39b   : > { %5822 = vst.msk [vmem:[#allocation3 + $0x38] sm:$0xff] %vm442_vm0, %v11138_v33  ;;  %5821 = vst.msk [vmem:[#allocation3 + $0x28] sm:$0xff] %vm442_vm0, %v11143_v14  ;;  %v3210_v10 = vpop.permute.xlu1 %3209  ;;  %v4380_v53 = vld [vmem:[#allocation2 + $0x8] sm:$0xff]  ;;  %v8711_v21 = vld [vmem:[%s13688_s5 + $0x10] sm:$0xff]  }
 0x39c   : > { %3282 = vst.msk [vmem:[#allocation3 + $0x170] sm:$0xff] %vm1366_vm5, %v3210_v10  ;;  %v3208_v17 = vpop.permute.xlu0 %3207  ;;  %6079 = vmatpush1.bf16.msra.mxu0 %v8711_v21  ;;  %v8713_v21 = vld [vmem:[%s13688_s5 + $0x20] sm:$0xff]  }
 0x39d   : > { %3281 = vst.msk [vmem:[#allocation3 + $0x160] sm:$0xff] %vm1366_vm5, %v3208_v17  ;;  %3417 = vrot.lane.b32.xlu1 %v10949_v40, %s8749_s16  ;;  %v4444_v17 = vld [vmem:[#allocation2 + $0x9] sm:$0xff]  ;;  %6080 = vmatprep.subr.bf16.mxu0 %v13697_v1 }
 0x39e   : > { %3415 = vrot.lane.b32.xlu0 %v10951_v28, %s8749_s16  ;;  %4412 = vst.msk [vmem:[#allocation3 + $0x10] sm:$0xff] %vm442_vm0, %v4380_v53  ;;  %v11169_v28 = vld [vmem:[#allocation3 + $0x1f8] sm:$0xff] }
 0x39f   : > { %v3402_v61 = vpop.permute.xlu1 %3401  ;;  %v4026_v30 = vpack.c.bf16 %v11169_v28, %v11167_v38  ;;  %5850 = vst.msk [vmem:[#allocation3 + $0x1f8] sm:$0xff] %vm442_vm0, %v5818_v6  ;;  %v4443_v53 = vld [vmem:[#allocation2 + $0x1] sm:$0xff] }
 0x3a0   : > { %3474 = vst.msk [vmem:[#allocation3 + $0x170] sm:$0xff] %vm1559_vm6, %v3402_v61  ;;  %v3400_v40 = vpop.permute.xlu0 %3399  ;;  %6081 = vmatpush1.bf16.msra.mxu0 %v8712_v62 }
 0x3a1   : > { %3473 = vst.msk [vmem:[#allocation3 + $0x160] sm:$0xff] %vm1559_vm6, %v3400_v40  ;;  %3609 = vrot.lane.b32.xlu1 %v3514_v8, %s8750_s24  ;;  %6082 = vmatprep.subr.bf16.mxu0 %v13697_v1 }
 0x3a2   : > { %3607 = vrot.lane.b32.xlu0 %v3513_v31, %s8750_s24 }
 0x3a3   : > { %v3594_v58 = vpop.permute.xlu1 %3593 }
 0x3a4   : > { %3666 = vst.msk [vmem:[#allocation3 + $0x170] sm:$0xff] %vm1753_vm7, %v3594_v58  ;;  %v3592_v10 = vpop.permute.xlu0 %3591  ;;  %v4635_v58 = vld [vmem:[#allocation2 + $0x2] sm:$0xff]  ;;  %6083 = vmatpush1.bf16.msra.mxu0 %v8713_v21  ;;  %v8715_v21 = vld [vmem:[%s13688_s5 + $0x30] sm:$0xff]  }
 0x3a5   : > { %3665 = vst.msk [vmem:[#allocation3 + $0x160] sm:$0xff] %vm1753_vm7, %v3592_v10  ;;  %3801 = vrot.lane.b32.xlu1 %v3706_v4, %s8751_s30  ;;  %6084 = vmatprep.subr.bf16.mxu0 %v13697_v1 }
 0x3a6   : > { %3799 = vrot.lane.b32.xlu0 %v3705_v37, %s8751_s30  ;;  %v4636_v37 = vld [vmem:[#allocation2 + $0xa] sm:$0xff] }
 0x3a7   : > { %v4212_v55 = vpop.f32.mrb[12].mxu1  ;;  %v3786_v22 = vpop.permute.xlu1 %3785 }
 0x3a8   : > { %v4213_v8 = vadd.f32 %v10980_v47, %v4212_v55  ;;  %v4214_v31 = vpop.f32.mrb[13].mxu1  ;;  %3858 = vst.msk [vmem:[#allocation3 + $0x170] sm:$0xff] %vm1946_vm8, %v3786_v22  ;;  %v3784_v61 = vpop.permute.xlu0 %3783  ;;  %v3982_v22 = vld [vmem:[#allocation3 + $0x198] sm:$0xff] }
 0x3a9   : > { %v4215_v40 = vpop.f32.mrb[14].mxu1  ;;  %3857 = vst.msk [vmem:[#allocation3 + $0x160] sm:$0xff] %vm1946_vm8, %v3784_v61  ;;  %4509 = vrot.lane.b32.xlu1 %v4444_v17, %s8746_s21  ;;  %v8714_v17 = vld [vmem:[%s13688_s5 + $0x28] sm:$0xff]   ;;  %v3980_v31 = vld [vmem:[#allocation3 + $0x188] sm:$0xff] }
 0x3aa   : > { %v4321_v63 = vmax.f32 %v4213_v8, 0.0  ;;  %v4216_v6 = vadd.f32 %v10980_v47, %v4215_v40  ;;  %v4217_v4 = vpop.f32.mrb[15].mxu1  ;;  %4507 = vrot.lane.b32.xlu0 %v4443_v53, %s8746_s21  ;;  %6085 = vmatpush1.bf16.msra.mxu0 %v8714_v17 }
 0x3ab   : > { %v2638_v55 = vpop.permute.xlu1 %2637  ;;  %6086 = vmatprep.subr.bf16.mxu0 %v13697_v1 }
 0x3ac   : > { %4353 = vst.msk [vmem:[#allocation2 + $0x61] sm:$0xff] %vm442_vm0, %v4321_v63  ;;  %v4322_v10 = vmax.f32 %v4216_v6, 0.0  ;;  %v2636_v8 = vpop.permute.xlu0 %2635  ;;  %v4020_v6 = vpack.c.bf16 %v3982_v22, %v3980_v31  ;;  %v5212_v31 = vld [vmem:[#allocation2 + $0x22] sm:$0xff]  ;;  %v5211_v22 = vld [vmem:[#allocation2 + $0x1a] sm:$0xff] }
 0x3ad   : > { %2708 = vst.msk [vmem:[#allocation3 + $0x190] sm:$0xff] %vm787_vm2, %v2638_v55  ;;  %2707 = vst.msk [vmem:[#allocation3 + $0x180] sm:$0xff] %vm787_vm2, %v2636_v8  ;;  %4701 = vrot.lane.b32.xlu1 %v4636_v37, %s8745_s20 }
 0x3ae   : > { %4354 = vst.msk [vmem:[#allocation2 + $0x69] sm:$0xff] %vm442_vm0, %v4322_v10  ;;  %4699 = vrot.lane.b32.xlu0 %v4635_v58, %s8745_s20  ;;  %v5019_v58 = vld [vmem:[#allocation2 + $0x19] sm:$0xff]  ;;  %6087 = vmatpush1.bf16.msra.mxu0 %v8715_v21 }
 0x3af   : > { %v2830_v53 = vpop.permute.xlu1 %2829  ;;  %v3977_v62 = vld [vmem:[#allocation3 + $0x170] sm:$0xff]  ;;  %6088 = vmatprep.subr.bf16.mxu0 %v13697_v1 }
 0x3b0   : > { %2900 = vst.msk [vmem:[#allocation3 + $0x190] sm:$0xff] %vm980_vm3, %v2830_v53  ;;  %v2828_v61 = vpop.permute.xlu0 %2827  ;;  %v3975_v40 = vld [vmem:[#allocation3 + $0x160] sm:$0xff]  ;;  %v8716_v53 = vld [vmem:[%s13688_s5 + $0x38] sm:$0xff]  }
 0x3b1   : > { %2899 = vst.msk [vmem:[#allocation3 + $0x180] sm:$0xff] %vm980_vm3, %v2828_v61  ;;  %4893 = vrot.lane.b32.xlu1 %v11019_v57, %s8747_s28  ;;  %v4017_v63 = vpack.c.bf16 %v3977_v62, %v3975_v40  ;;  %v5020_v57 = vld [vmem:[#allocation2 + $0x21] sm:$0xff]  ;;  %v11261_v21 = vld [vmem:[#allocation2 + $0x39] sm:$0xff] }
 0x3b2   : > { %4891 = vrot.lane.b32.xlu0 %v11013_v48, %s8747_s28  ;;  %6089 = vmatpush1.bf16.msra.mxu0 %v8716_v53  ;;  %v8717_v61 = vld [vmem:[%s13688_s5 + $0x40] sm:$0xff]  }
 0x3b3   : > { %v11216_v4 = vld [vmem:[#allocation2 + $0x60] sm:$0xff]  ;;  %4275 = vmatmul.mubr.bf16.gmra.mrb[44].mxu1 %v4017_v63  ;;  %v3022_v37 = vpop.permute.xlu1 %3021  ;;  %6090 = vmatprep.subr.bf16.mxu0 %v13697_v1 }
 0x3b4   : > { %4419 = vst.msk [vmem:[#allocation3 + $0x80] sm:$0xff] %vm442_vm0, %v11216_v4  ;;  %v3020_v48 = vpop.permute.xlu0 %3019  ;;  %8570 = vmatprep.mubr.msk.bf16.mxu1 %vm442_vm0, %v4020_v6 }
 0x3b5   : > { %3092 = vst.msk [vmem:[#allocation3 + $0x190] sm:$0xff] %vm1173_vm4, %v3022_v37  ;;  %v11226_v10 = vld [vmem:[#allocation2 + $0x68] sm:$0xff]  ;;  %3091 = vst.msk [vmem:[#allocation3 + $0x180] sm:$0xff] %vm1173_vm4, %v3020_v48  ;;  %5085 = vrot.lane.b32.xlu1 %v5020_v57, %s8748_s15  ;;  %v11263_v48 = vld [vmem:[#allocation2 + $0x31] sm:$0xff] }
 0x3b6   : > { %v11228_v55 = vld [vmem:[#allocation2 + $0x6a] sm:$0xff]  ;;  %5083 = vrot.lane.b32.xlu0 %v5019_v58, %s8748_s15  ;;  %v11233_v8 = vld [vmem:[#allocation2 + $0x62] sm:$0xff]  ;;  %4420 = vst.msk [vmem:[#allocation3 + $0x90] sm:$0xff] %vm442_vm0, %v11226_v10  ;;  %6091 = vmatpush1.bf16.msra.mxu0 %v8717_v61 }
 0x3b7   : > { %5824 = vst.msk [vmem:[#allocation3 + $0x58] sm:$0xff] %vm442_vm0, %v11228_v55  ;;  %5823 = vst.msk [vmem:[#allocation3 + $0x48] sm:$0xff] %vm442_vm0, %v11233_v8  ;;  %v3214_v17 = vpop.permute.xlu1 %3213  ;;  %8264 = vmatprep.subr.bf16.mxu0 %v13697_v1 }
 0x3b8   : > { %3284 = vst.msk [vmem:[#allocation3 + $0x190] sm:$0xff] %vm1366_vm5, %v3214_v17  ;;  %v3212_v62 = vpop.permute.xlu0 %3211 }
 0x3b9   : > { %3283 = vst.msk [vmem:[#allocation3 + $0x180] sm:$0xff] %vm1366_vm5, %v3212_v62  ;;  %5277 = vrot.lane.b32.xlu1 %v5212_v31, %s8749_s16 }
 0x3ba   : > { %5275 = vrot.lane.b32.xlu0 %v5211_v22, %s8749_s16 }
 0x3bb   : > { %v3406_v40 = vpop.permute.xlu1 %3405 }
 0x3bc   : > { %3476 = vst.msk [vmem:[#allocation3 + $0x190] sm:$0xff] %vm1559_vm6, %v3406_v40  ;;  %v3404_v63 = vpop.permute.xlu0 %3403 }
 0x3bd   : > { %3475 = vst.msk [vmem:[#allocation3 + $0x180] sm:$0xff] %vm1559_vm6, %v3404_v63  ;;  %5469 = vrot.lane.b32.xlu1 %v11082_v39, %s8750_s24 }
 0x3be   : > { %5467 = vrot.lane.b32.xlu0 %v11072_v54, %s8750_s24 }
 0x3bf   : > { %v3598_v6 = vpop.permute.xlu1 %3597 }
 0x3c0   : > { %3668 = vst.msk [vmem:[#allocation3 + $0x190] sm:$0xff] %vm1753_vm7, %v3598_v6  ;;  %v3596_v37 = vpop.permute.xlu0 %3595 }
 0x3c1   : > { %3667 = vst.msk [vmem:[#allocation3 + $0x180] sm:$0xff] %vm1753_vm7, %v3596_v37  ;;  %5661 = vrot.lane.b32.xlu1 %v11261_v21, %s8751_s30 }
 0x3c2   : > { %5659 = vrot.lane.b32.xlu0 %v11263_v48, %s8751_s30 }
 0x3c3   : > { %v4220_v17 = vpop.f32.mrb[16].mxu1  ;;  %v3790_v61 = vpop.permute.xlu1 %3789 }
 0x3c4   : > { %v4221_v53 = vadd.f32 %v10980_v47, %v4220_v17  ;;  %v4222_v62 = vpop.f32.mrb[17].mxu1  ;;  %3860 = vst.msk [vmem:[#allocation3 + $0x190] sm:$0xff] %vm1946_vm8, %v3790_v61  ;;  %v3788_v40 = vpop.permute.xlu0 %3787  ;;  %v3986_v61 = vld [vmem:[#allocation3 + $0x1b8] sm:$0xff] }
 0x3c5   : > { %v4223_v63 = vpop.f32.mrb[18].mxu1  ;;  %3859 = vst.msk [vmem:[#allocation3 + $0x180] sm:$0xff] %vm1946_vm8, %v3788_v40  ;;  %4513 = vrot.lane.b32.xlu1 %v5020_v57, %s8746_s21  ;;  %v3984_v57 = vld [vmem:[#allocation3 + $0x1a8] sm:$0xff] }
 0x3c6   : > { %v4323_v6 = vmax.f32 %v4221_v53, 0.0  ;;  %v4224_v37 = vadd.f32 %v10980_v47, %v4223_v63  ;;  %v4225_v1 = vpop.f32.mrb[19].mxu1  ;;  %4511 = vrot.lane.b32.xlu0 %v5019_v58, %s8746_s21 }
 0x3c7   : > { %v2642_v17 = vpop.permute.xlu1 %2641 }
 0x3c8   : > { %4355 = vst.msk [vmem:[#allocation2 + $0x79] sm:$0xff] %vm442_vm0, %v4323_v6  ;;  %v4324_v0 = vmax.f32 %v4224_v37, 0.0  ;;  %v2640_v62 = vpop.permute.xlu0 %2639 }
 0x3c9   : > { %2710 = vst.msk [vmem:[#allocation3 + $0x1b0] sm:$0xff] %vm787_vm2, %v2642_v17  ;;  %2709 = vst.msk [vmem:[#allocation3 + $0x1a0] sm:$0xff] %vm787_vm2, %v2640_v62  ;;  %4705 = vrot.lane.b32.xlu1 %v5212_v31, %s8745_s20  ;;  %v4022_v31 = vpack.c.bf16 %v3986_v61, %v3984_v57 }
 0x3ca   : > { %4356 = vst.msk [vmem:[#allocation2 + $0x81] sm:$0xff] %vm442_vm0, %v4324_v0  ;;  %4703 = vrot.lane.b32.xlu0 %v5211_v22, %s8745_s20 }
 0x3cb   : > { %v2834_v1 = vpop.permute.xlu1 %2833  ;;  %v3981_v53 = vld [vmem:[#allocation3 + $0x190] sm:$0xff] }
 0x3cc   : > { %2902 = vst.msk [vmem:[#allocation3 + $0x1b0] sm:$0xff] %vm980_vm3, %v2834_v1  ;;  %v2832_v58 = vpop.permute.xlu0 %2831  ;;  %v3979_v40 = vld [vmem:[#allocation3 + $0x180] sm:$0xff] }
 0x3cd   : > { %2901 = vst.msk [vmem:[#allocation3 + $0x1a0] sm:$0xff] %vm980_vm3, %v2832_v58  ;;  %4897 = vrot.lane.b32.xlu1 %v11082_v39, %s8747_s28  ;;  %v4019_v0 = vpack.c.bf16 %v3981_v53, %v3979_v40  ;;  %v11324_v58 = vld [vmem:[#allocation2 + $0x51] sm:$0xff]  ;;  %v11326_v40 = vld [vmem:[#allocation2 + $0x49] sm:$0xff] }
 0x3ce   : > { %4895 = vrot.lane.b32.xlu0 %v11072_v54, %s8747_s28 }
 0x3cf   : > { %v11288_v63 = vld [vmem:[#allocation2 + $0x78] sm:$0xff]  ;;  %4283 = vmatmul.mubr.bf16.gmra.mrb[48].mxu1 %v4019_v0  ;;  %v3026_v22 = vpop.permute.xlu1 %3025 }
 0x3d0   : > { %4421 = vst.msk [vmem:[#allocation3 + $0xa0] sm:$0xff] %vm442_vm0, %v11288_v63  ;;  %v3024_v6 = vpop.permute.xlu0 %3023  ;;  %8571 = vmatprep.mubr.msk.bf16.mxu1 %vm442_vm0, %v4022_v31 }
 0x3d1   : > { %3094 = vst.msk [vmem:[#allocation3 + $0x1b0] sm:$0xff] %vm1173_vm4, %v3026_v22  ;;  %v11294_v37 = vld [vmem:[#allocation2 + $0x80] sm:$0xff]  ;;  %3093 = vst.msk [vmem:[#allocation3 + $0x1a0] sm:$0xff] %vm1173_vm4, %v3024_v6  ;;  %5089 = vrot.lane.b32.xlu1 %v11261_v21, %s8748_s15 }
 0x3d2   : > { %v11296_v39 = vld [vmem:[#allocation2 + $0x82] sm:$0xff]  ;;  %5087 = vrot.lane.b32.xlu0 %v11263_v48, %s8748_s15  ;;  %v11303_v54 = vld [vmem:[#allocation2 + $0x7a] sm:$0xff]  ;;  %4422 = vst.msk [vmem:[#allocation3 + $0xb0] sm:$0xff] %vm442_vm0, %v11294_v37 }
 0x3d3   : > { %5826 = vst.msk [vmem:[#allocation3 + $0x78] sm:$0xff] %vm442_vm0, %v11296_v39  ;;  %5825 = vst.msk [vmem:[#allocation3 + $0x68] sm:$0xff] %vm442_vm0, %v11303_v54  ;;  %v3218_v17 = vpop.permute.xlu1 %3217 }
 0x3d4   : > { %3286 = vst.msk [vmem:[#allocation3 + $0x1b0] sm:$0xff] %vm1366_vm5, %v3218_v17  ;;  %v3216_v62 = vpop.permute.xlu0 %3215 }
 0x3d5   : > { %3285 = vst.msk [vmem:[#allocation3 + $0x1a0] sm:$0xff] %vm1366_vm5, %v3216_v62  ;;  %5281 = vrot.lane.b32.xlu1 %v11080_v16, %s8749_s16 }
 0x3d6   : > { %5279 = vrot.lane.b32.xlu0 %v11078_v35, %s8749_s16 }
 0x3d7   : > { %v3410_v1 = vpop.permute.xlu1 %3409 }
 0x3d8   : > { %3478 = vst.msk [vmem:[#allocation3 + $0x1b0] sm:$0xff] %vm1559_vm6, %v3410_v1  ;;  %v3408_v53 = vpop.permute.xlu0 %3407 }
 0x3d9   : > { %3477 = vst.msk [vmem:[#allocation3 + $0x1a0] sm:$0xff] %vm1559_vm6, %v3408_v53  ;;  %5473 = vrot.lane.b32.xlu1 %v11136_v36, %s8750_s24 }
 0x3da   : > { %5471 = vrot.lane.b32.xlu0 %v11130_v56, %s8750_s24 }
 0x3db   : > { %v3602_v57 = vpop.permute.xlu1 %3601 }
 0x3dc   : > { %3670 = vst.msk [vmem:[#allocation3 + $0x1b0] sm:$0xff] %vm1753_vm7, %v3602_v57  ;;  %v3600_v61 = vpop.permute.xlu0 %3599 }
 0x3dd   : > { %3669 = vst.msk [vmem:[#allocation3 + $0x1a0] sm:$0xff] %vm1753_vm7, %v3600_v61  ;;  %5665 = vrot.lane.b32.xlu1 %v11324_v58, %s8751_s30 }
 0x3de   : > { %5663 = vrot.lane.b32.xlu0 %v11326_v40, %s8751_s30 }
 0x3df   : > { %v4228_v0 = vpop.f32.mrb[20].mxu1  ;;  %v3794_v6 = vpop.permute.xlu1 %3793 }
 0x3e0   : > { %v4229_v31 = vadd.f32 %v10980_v47, %v4228_v0  ;;  %v4230_v22 = vpop.f32.mrb[21].mxu1  ;;  %3862 = vst.msk [vmem:[#allocation3 + $0x1b0] sm:$0xff] %vm1946_vm8, %v3794_v6  ;;  %v3792_v17 = vpop.permute.xlu0 %3791  ;;  %v3990_v6 = vld [vmem:[#allocation3 + $0x1d8] sm:$0xff] }
 0x3e1   : > { %v4231_v62 = vpop.f32.mrb[22].mxu1  ;;  %3861 = vst.msk [vmem:[#allocation3 + $0x1a0] sm:$0xff] %vm1946_vm8, %v3792_v17  ;;  %4517 = vrot.lane.b32.xlu1 %v11261_v21, %s8746_s21 }
 0x3e2   : > { %v4325_v1 = vmax.f32 %v4229_v31, 0.0  ;;  %v4232_v53 = vadd.f32 %v10980_v47, %v4231_v62  ;;  %v4233_v57 = vpop.f32.mrb[23].mxu1  ;;  %4515 = vrot.lane.b32.xlu0 %v11263_v48, %s8746_s21  ;;  %v3988_v48 = vld [vmem:[#allocation3 + $0x1c8] sm:$0xff] }
 0x3e3   : > { %v2646_v0 = vpop.permute.xlu1 %2645 }
 0x3e4   : > { %4357 = vst.msk [vmem:[#allocation2 + $0x91] sm:$0xff] %vm442_vm0, %v4325_v1  ;;  %v4326_v61 = vmax.f32 %v4232_v53, 0.0  ;;  %v2644_v22 = vpop.permute.xlu0 %2643  ;;  %v4024_v1 = vpack.c.bf16 %v3990_v6, %v3988_v48 }
 0x3e5   : > { %2712 = vst.msk [vmem:[#allocation3 + $0x1d0] sm:$0xff] %vm787_vm2, %v2646_v0  ;;  %2711 = vst.msk [vmem:[#allocation3 + $0x1c0] sm:$0xff] %vm787_vm2, %v2644_v22  ;;  %4709 = vrot.lane.b32.xlu1 %v11080_v16, %s8745_s20 }
 0x3e6   : > { %4358 = vst.msk [vmem:[#allocation2 + $0x99] sm:$0xff] %vm442_vm0, %v4326_v61  ;;  %4707 = vrot.lane.b32.xlu0 %v11078_v35, %s8745_s20 }
 0x3e7   : > { %v2838_v21 = vpop.permute.xlu1 %2837  ;;  %v3985_v31 = vld [vmem:[#allocation3 + $0x1b0] sm:$0xff] }
 0x3e8   : > { %2904 = vst.msk [vmem:[#allocation3 + $0x1d0] sm:$0xff] %vm980_vm3, %v2838_v21  ;;  %v2836_v17 = vpop.permute.xlu0 %2835  ;;  %v3983_v62 = vld [vmem:[#allocation3 + $0x1a0] sm:$0xff] }
 0x3e9   : > { %2903 = vst.msk [vmem:[#allocation3 + $0x1c0] sm:$0xff] %vm980_vm3, %v2836_v17  ;;  %4901 = vrot.lane.b32.xlu1 %v11136_v36, %s8747_s28  ;;  %v4021_v16 = vpack.c.bf16 %v3985_v31, %v3983_v62  ;;  %v11391_v17 = vld [vmem:[#allocation2 + $0x69] sm:$0xff]  ;;  %v11393_v62 = vld [vmem:[#allocation2 + $0x61] sm:$0xff] }
 0x3ea   : > { %4899 = vrot.lane.b32.xlu0 %v11130_v56, %s8747_s28 }
 0x3eb   : > { %v11355_v53 = vld [vmem:[#allocation2 + $0x90] sm:$0xff]  ;;  %4291 = vmatmul.mubr.bf16.gmra.mrb[52].mxu1 %v4021_v16  ;;  %v3030_v35 = vpop.permute.xlu1 %3029 }
 0x3ec   : > { %4423 = vst.msk [vmem:[#allocation3 + $0xc0] sm:$0xff] %vm442_vm0, %v11355_v53  ;;  %v3028_v57 = vpop.permute.xlu0 %3027  ;;  %8572 = vmatprep.mubr.msk.bf16.mxu1 %vm442_vm0, %v4024_v1 }
 0x3ed   : > { %3096 = vst.msk [vmem:[#allocation3 + $0x1d0] sm:$0xff] %vm1173_vm4, %v3030_v35  ;;  %v11361_v61 = vld [vmem:[#allocation2 + $0x98] sm:$0xff]  ;;  %3095 = vst.msk [vmem:[#allocation3 + $0x1c0] sm:$0xff] %vm1173_vm4, %v3028_v57  ;;  %5093 = vrot.lane.b32.xlu1 %v11324_v58, %s8748_s15 }
 0x3ee   : > { %v11363_v36 = vld [vmem:[#allocation2 + $0x9a] sm:$0xff]  ;;  %5091 = vrot.lane.b32.xlu0 %v11326_v40, %s8748_s15  ;;  %v11370_v56 = vld [vmem:[#allocation2 + $0x92] sm:$0xff]  ;;  %4424 = vst.msk [vmem:[#allocation3 + $0xd0] sm:$0xff] %vm442_vm0, %v11361_v61 }
 0x3ef   : > { %5828 = vst.msk [vmem:[#allocation3 + $0x98] sm:$0xff] %vm442_vm0, %v11363_v36  ;;  %5827 = vst.msk [vmem:[#allocation3 + $0x88] sm:$0xff] %vm442_vm0, %v11370_v56  ;;  %v3222_v0 = vpop.permute.xlu1 %3221 }
 0x3f0   : > { %3288 = vst.msk [vmem:[#allocation3 + $0x1d0] sm:$0xff] %vm1366_vm5, %v3222_v0  ;;  %v3220_v22 = vpop.permute.xlu0 %3219 }
 0x3f1   : > { %3287 = vst.msk [vmem:[#allocation3 + $0x1c0] sm:$0xff] %vm1366_vm5, %v3220_v22  ;;  %5285 = vrot.lane.b32.xlu1 %v11138_v33, %s8749_s16 }
 0x3f2   : > { %5283 = vrot.lane.b32.xlu0 %v11143_v14, %s8749_s16 }
 0x3f3   : > { %v3414_v21 = vpop.permute.xlu1 %3413 }
 0x3f4   : > { %3480 = vst.msk [vmem:[#allocation3 + $0x1d0] sm:$0xff] %vm1559_vm6, %v3414_v21  ;;  %v3412_v31 = vpop.permute.xlu0 %3411 }
 0x3f5   : > { %3479 = vst.msk [vmem:[#allocation3 + $0x1c0] sm:$0xff] %vm1559_vm6, %v3412_v31  ;;  %5477 = vrot.lane.b32.xlu1 %v11226_v10, %s8750_s24 }
 0x3f6   : > { %5475 = vrot.lane.b32.xlu0 %v11216_v4, %s8750_s24 }
 0x3f7   : > { %v3606_v48 = vpop.permute.xlu1 %3605 }
 0x3f8   : > { %3672 = vst.msk [vmem:[#allocation3 + $0x1d0] sm:$0xff] %vm1753_vm7, %v3606_v48  ;;  %v3604_v6 = vpop.permute.xlu0 %3603 }
 0x3f9   : > { %3671 = vst.msk [vmem:[#allocation3 + $0x1c0] sm:$0xff] %vm1753_vm7, %v3604_v6  ;;  %5669 = vrot.lane.b32.xlu1 %v11391_v17, %s8751_s30 }
 0x3fa   : > { %5667 = vrot.lane.b32.xlu0 %v11393_v62, %s8751_s30 }
 0x3fb   : > { %v4236_v16 = vpop.f32.mrb[24].mxu1  ;;  %v3798_v57 = vpop.permute.xlu1 %3797 }
 0x3fc   : > { %v4237_v1 = vadd.f32 %v10980_v47, %v4236_v16  ;;  %v4238_v35 = vpop.f32.mrb[25].mxu1  ;;  %3864 = vst.msk [vmem:[#allocation3 + $0x1d0] sm:$0xff] %vm1946_vm8, %v3798_v57  ;;  %v3796_v0 = vpop.permute.xlu0 %3795 }
 0x3fd   : > { %v4239_v22 = vpop.f32.mrb[26].mxu1  ;;  %3863 = vst.msk [vmem:[#allocation3 + $0x1c0] sm:$0xff] %vm1946_vm8, %v3796_v0  ;;  %4521 = vrot.lane.b32.xlu1 %v11324_v58, %s8746_s21 }
 0x3fe   : > { %v4327_v21 = vmax.f32 %v4237_v1, 0.0  ;;  %v4240_v31 = vadd.f32 %v10980_v47, %v4239_v22  ;;  %v4241_v48 = vpop.f32.mrb[27].mxu1  ;;  %4519 = vrot.lane.b32.xlu0 %v11326_v40, %s8746_s21 }
 0x3ff   : > { %v2650_v16 = vpop.permute.xlu1 %2649 }
 0x400   : > { %4359 = vst.msk [vmem:[#allocation2 + $0xa9] sm:$0xff] %vm442_vm0, %v4327_v21  ;;  %v4328_v6 = vmax.f32 %v4240_v31, 0.0  ;;  %v2648_v35 = vpop.permute.xlu0 %2647 }
 0x401   : > { %2714 = vst.msk [vmem:[#allocation3 + $0x1f0] sm:$0xff] %vm787_vm2, %v2650_v16  ;;  %2713 = vst.msk [vmem:[#allocation3 + $0x1e0] sm:$0xff] %vm787_vm2, %v2648_v35  ;;  %4713 = vrot.lane.b32.xlu1 %v11138_v33, %s8745_s20  ;;  %v11463_v16 = vld [vmem:[#allocation2 + $0x79] sm:$0xff] }
 0x402   : > { %4360 = vst.msk [vmem:[#allocation2 + $0xb1] sm:$0xff] %vm442_vm0, %v4328_v6  ;;  %4711 = vrot.lane.b32.xlu0 %v11143_v14, %s8745_s20  ;;  %v11461_v6 = vld [vmem:[#allocation2 + $0x81] sm:$0xff] }
 0x403   : > { %v2842_v47 = vpop.permute.xlu1 %2841  ;;  %v3989_v58 = vld [vmem:[#allocation3 + $0x1d0] sm:$0xff] }
 0x404   : > { %2906 = vst.msk [vmem:[#allocation3 + $0x1f0] sm:$0xff] %vm980_vm3, %v2842_v47  ;;  %v2840_v40 = vpop.permute.xlu0 %2839  ;;  %v3987_v1 = vld [vmem:[#allocation3 + $0x1c0] sm:$0xff]  ;;  %v11473_v47 = vld [vmem:[%s13687_s4] ss:$0 sm:$0xff] }
 0x405   : > { %2905 = vst.msk [vmem:[#allocation3 + $0x1e0] sm:$0xff] %vm980_vm3, %v2840_v40  ;;  %4905 = vrot.lane.b32.xlu1 %v11226_v10, %s8747_s28  ;;  %v4023_v57 = vpack.c.bf16 %v3989_v58, %v3987_v1 }
 0x406   : > { %4903 = vrot.lane.b32.xlu0 %v11216_v4, %s8747_s28 }
 0x407   : > { %v11422_v0 = vld [vmem:[#allocation2 + $0xa8] sm:$0xff]  ;;  %4299 = vmatmul.mubr.bf16.gmra.mrb[56].mxu1 %v4023_v57  ;;  %v3034_v33 = vpop.permute.xlu1 %3033 }
 0x408   : > { %4425 = vst.msk [vmem:[#allocation3 + $0xe0] sm:$0xff] %vm442_vm0, %v11422_v0  ;;  %v3032_v14 = vpop.permute.xlu0 %3031  ;;  %8573 = vmatprep.mubr.msk.bf16.mxu1 %vm442_vm0, %v4026_v30 }
 0x409   : > { %3098 = vst.msk [vmem:[#allocation3 + $0x1f0] sm:$0xff] %vm1173_vm4, %v3034_v33  ;;  %v11431_v10 = vld [vmem:[#allocation2 + $0xb0] sm:$0xff]  ;;  %3097 = vst.msk [vmem:[#allocation3 + $0x1e0] sm:$0xff] %vm1173_vm4, %v3032_v14  ;;  %5097 = vrot.lane.b32.xlu1 %v11391_v17, %s8748_s15 }
 0x40a   : > { %v11433_v22 = vld [vmem:[#allocation2 + $0xb2] sm:$0xff]  ;;  %5095 = vrot.lane.b32.xlu0 %v11393_v62, %s8748_s15  ;;  %v11440_v4 = vld [vmem:[#allocation2 + $0xaa] sm:$0xff]  ;;  %4426 = vst.msk [vmem:[#allocation3 + $0xf0] sm:$0xff] %vm442_vm0, %v11431_v10 }
 0x40b   : > { %5830 = vst.msk [vmem:[#allocation3 + $0xb8] sm:$0xff] %vm442_vm0, %v11433_v22  ;;  %5829 = vst.msk [vmem:[#allocation3 + $0xa8] sm:$0xff] %vm442_vm0, %v11440_v4  ;;  %v3226_v38 = vpop.permute.xlu1 %3225 }
 0x40c   : > { %3290 = vst.msk [vmem:[#allocation3 + $0x1f0] sm:$0xff] %vm1366_vm5, %v3226_v38  ;;  %v3224_v28 = vpop.permute.xlu0 %3223 }
 0x40d   : > { %3289 = vst.msk [vmem:[#allocation3 + $0x1e0] sm:$0xff] %vm1366_vm5, %v3224_v28  ;;  %5289 = vrot.lane.b32.xlu1 %v11228_v55, %s8749_s16 }
 0x40e   : > { %5287 = vrot.lane.b32.xlu0 %v11233_v8, %s8749_s16 }
 0x40f   : > { %v3418_v30 = vpop.permute.xlu1 %3417 }
 0x410   : > { %3482 = vst.msk [vmem:[#allocation3 + $0x1f0] sm:$0xff] %vm1559_vm6, %v3418_v30  ;;  %v3416_v21 = vpop.permute.xlu0 %3415 }
 0x411   : > { %3481 = vst.msk [vmem:[#allocation3 + $0x1e0] sm:$0xff] %vm1559_vm6, %v3416_v21  ;;  %5481 = vrot.lane.b32.xlu1 %v11294_v37, %s8750_s24 }
 0x412   : > { %5479 = vrot.lane.b32.xlu0 %v11288_v63, %s8750_s24 }
 0x413   : > { %v3610_v31 = vpop.permute.xlu1 %3609 }
 0x414   : > { %3674 = vst.msk [vmem:[#allocation3 + $0x1f0] sm:$0xff] %vm1753_vm7, %v3610_v31  ;;  %v3608_v48 = vpop.permute.xlu0 %3607 }
 0x415   : > { %3673 = vst.msk [vmem:[#allocation3 + $0x1e0] sm:$0xff] %vm1753_vm7, %v3608_v48  ;;  %5673 = vrot.lane.b32.xlu1 %v11461_v6, %s8751_s30 }
 0x416   : > { %5671 = vrot.lane.b32.xlu0 %v11463_v16, %s8751_s30 }
 0x417   : > { %v4244_v35 = vpop.f32.mrb[28].mxu1  ;;  %v3802_v1 = vpop.permute.xlu1 %3801 }
 0x418   : > { %v4245_v58 = vadd.f32 %v11473_v47, %v4244_v35  ;;  %v4246_v40 = vpop.f32.mrb[29].mxu1  ;;  %3866 = vst.msk [vmem:[#allocation3 + $0x1f0] sm:$0xff] %vm1946_vm8, %v3802_v1  ;;  %v3800_v57 = vpop.permute.xlu0 %3799 }
 0x419   : > { %v4247_v33 = vpop.f32.mrb[30].mxu1  ;;  %3865 = vst.msk [vmem:[#allocation3 + $0x1e0] sm:$0xff] %vm1946_vm8, %v3800_v57  ;;  %4525 = vrot.lane.b32.xlu1 %v11391_v17, %s8746_s21 }
 0x41a   : > { %v4329_v14 = vmax.f32 %v4245_v58, 0.0  ;;  %v4248_v38 = vadd.f32 %v11473_v47, %v4247_v33  ;;  %v4249_v28 = vpop.f32.mrb[31].mxu1  ;;  %4523 = vrot.lane.b32.xlu0 %v11393_v62, %s8746_s21 }
 0x41b   : > { %v4510_v21 = vpop.permute.xlu1 %4509 }
 0x41c   : > { %4361 = vst.msk [vmem:[#allocation2 + $0xc1] sm:$0xff] %vm442_vm0, %v4329_v14  ;;  %v4330_v30 = vmax.f32 %v4248_v38, 0.0  ;;  %v4508_v31 = vpop.permute.xlu0 %4507 }
 0x41d   : > { %4604 = vst.msk [vmem:[#allocation3 + $0x10] sm:$0xff] %vm787_vm2, %v4510_v21  ;;  %4603 = vst.msk [vmem:[#allocation3] sm:$0xff] %vm787_vm2, %v4508_v31  ;;  %4717 = vrot.lane.b32.xlu1 %v11228_v55, %s8745_s20  ;;  %v11532_v21 = vld [vmem:[#allocation2 + $0x99] sm:$0xff]  ;;  %v11534_v31 = vld [vmem:[#allocation2 + $0x91] sm:$0xff] }
 0x41e   : > { %4362 = vst.msk [vmem:[#allocation2 + $0xc9] sm:$0xff] %vm442_vm0, %v4330_v30  ;;  %4715 = vrot.lane.b32.xlu0 %v11233_v8, %s8745_s20 }
 0x41f   : > { %v4702_v17 = vpop.permute.xlu1 %4701  ;;  %v3993_v48 = vld [vmem:[#allocation3 + $0x1f0] sm:$0xff] }
 0x420   : > { %4796 = vst.msk [vmem:[#allocation3 + $0x10] sm:$0xff] %vm980_vm3, %v4702_v17  ;;  %v4700_v62 = vpop.permute.xlu0 %4699  ;;  %v3991_v35 = vld [vmem:[#allocation3 + $0x1e0] sm:$0xff] }
 0x421   : > { %4795 = vst.msk [vmem:[#allocation3] sm:$0xff] %vm980_vm3, %v4700_v62  ;;  %4909 = vrot.lane.b32.xlu1 %v11294_v37, %s8747_s28  ;;  %v4025_v58 = vpack.c.bf16 %v3993_v48, %v3991_v35 }
 0x422   : > { %4907 = vrot.lane.b32.xlu0 %v11288_v63, %s8747_s28 }
 0x423   : > { %v11497_v40 = vld [vmem:[#allocation2 + $0xc0] sm:$0xff]  ;;  %4307 = vmatmul.mubr.bf16.gmra.mrb[60].mxu1 %v4025_v58  ;;  %v4894_v55 = vpop.permute.xlu1 %4893 }
 0x424   : > { %4427 = vst.msk [vmem:[#allocation3 + $0x100] sm:$0xff] %vm442_vm0, %v11497_v40  ;;  %v4892_v8 = vpop.permute.xlu0 %4891 }
 0x425   : > { %4988 = vst.msk [vmem:[#allocation3 + $0x10] sm:$0xff] %vm1173_vm4, %v4894_v55  ;;  %v11502_v1 = vld [vmem:[#allocation2 + $0xc8] sm:$0xff]  ;;  %4987 = vst.msk [vmem:[#allocation3] sm:$0xff] %vm1173_vm4, %v4892_v8  ;;  %5101 = vrot.lane.b32.xlu1 %v11461_v6, %s8748_s15 }
 0x426   : > { %v11504_v57 = vld [vmem:[#allocation2 + $0xca] sm:$0xff]  ;;  %5099 = vrot.lane.b32.xlu0 %v11463_v16, %s8748_s15  ;;  %v11511_v63 = vld [vmem:[#allocation2 + $0xc2] sm:$0xff]  ;;  %4428 = vst.msk [vmem:[#allocation3 + $0x110] sm:$0xff] %vm442_vm0, %v11502_v1 }
 0x427   : > { %5832 = vst.msk [vmem:[#allocation3 + $0xd8] sm:$0xff] %vm442_vm0, %v11504_v57  ;;  %5831 = vst.msk [vmem:[#allocation3 + $0xc8] sm:$0xff] %vm442_vm0, %v11511_v63  ;;  %v5086_v37 = vpop.permute.xlu1 %5085 }
 0x428   : > { %5180 = vst.msk [vmem:[#allocation3 + $0x10] sm:$0xff] %vm1366_vm5, %v5086_v37  ;;  %v5084_v33 = vpop.permute.xlu0 %5083 }
 0x429   : > { %5179 = vst.msk [vmem:[#allocation3] sm:$0xff] %vm1366_vm5, %v5084_v33  ;;  %5293 = vrot.lane.b32.xlu1 %v11296_v39, %s8749_s16 }
 0x42a   : > { %5291 = vrot.lane.b32.xlu0 %v11303_v54, %s8749_s16 }
 0x42b   : > { %v5278_v14 = vpop.permute.xlu1 %5277 }
 0x42c   : > { %5372 = vst.msk [vmem:[#allocation3 + $0x10] sm:$0xff] %vm1559_vm6, %v5278_v14  ;;  %v5276_v38 = vpop.permute.xlu0 %5275 }
 0x42d   : > { %5371 = vst.msk [vmem:[#allocation3] sm:$0xff] %vm1559_vm6, %v5276_v38  ;;  %5485 = vrot.lane.b32.xlu1 %v11361_v61, %s8750_s24 }
 0x42e   : > { %5483 = vrot.lane.b32.xlu0 %v11355_v53, %s8750_s24 }
 0x42f   : > { %v5470_v28 = vpop.permute.xlu1 %5469 }
 0x430   : > { %5564 = vst.msk [vmem:[#allocation3 + $0x10] sm:$0xff] %vm1753_vm7, %v5470_v28  ;;  %v5468_v30 = vpop.permute.xlu0 %5467 }
 0x431   : > { %5563 = vst.msk [vmem:[#allocation3] sm:$0xff] %vm1753_vm7, %v5468_v30  ;;  %5677 = vrot.lane.b32.xlu1 %v11532_v21, %s8751_s30 }
 0x432   : > { %5675 = vrot.lane.b32.xlu0 %v11534_v31, %s8751_s30  ;;  %v4252_v17 = vpop.f32.mrb[32].mxu1 }
 0x433   : > { %v4253_v48 = vadd.f32 %v11473_v47, %v4252_v17  ;;  %v4254_v62 = vpop.f32.mrb[33].mxu1  ;;  %v5662_v35 = vpop.permute.xlu1 %5661  ;;  %v5858_v17 = vld [vmem:[#allocation3 + $0x38] sm:$0xff] }
 0x434   : > { %5756 = vst.msk [vmem:[#allocation3 + $0x10] sm:$0xff] %vm1946_vm8, %v5662_v35  ;;  %v5660_v58 = vpop.permute.xlu0 %5659  ;;  %v4255_v55 = vpop.f32.mrb[34].mxu1 }
 0x435   : > { %v4331_v8 = vmax.f32 %v4253_v48, 0.0  ;;  %5755 = vst.msk [vmem:[#allocation3] sm:$0xff] %vm1946_vm8, %v5660_v58  ;;  %v4256_v37 = vadd.f32 %v11473_v47, %v4255_v55  ;;  %v4257_v33 = vpop.f32.mrb[35].mxu1  ;;  %4529 = vrot.lane.b32.xlu1 %v11461_v6, %s8746_s21 }
 0x436   : > { %4527 = vrot.lane.b32.xlu0 %v11463_v16, %s8746_s21  ;;  %v5856_v16 = vld [vmem:[#allocation3 + $0x28] sm:$0xff] }
 0x437   : > { %4363 = vst.msk [vmem:[#allocation2 + $0xd9] sm:$0xff] %vm442_vm0, %v4331_v8  ;;  %v4332_v14 = vmax.f32 %v4256_v37, 0.0  ;;  %v4514_v38 = vpop.permute.xlu1 %4513  ;;  %v5918_v35 = vpack.c.bf16 %v5858_v17, %v5856_v16  ;;  %v11601_v16 = vld [vmem:[#allocation2 + $0xa9] sm:$0xff] }
 0x438   : > { %4606 = vst.msk [vmem:[#allocation3 + $0x30] sm:$0xff] %vm787_vm2, %v4514_v38  ;;  %v4512_v28 = vpop.permute.xlu0 %4511 }
 0x439   : > { %4364 = vst.msk [vmem:[#allocation2 + $0xe1] sm:$0xff] %vm442_vm0, %v4332_v14  ;;  %4721 = vrot.lane.b32.xlu1 %v11296_v39, %s8745_s20 }
 0x43a   : > { %4605 = vst.msk [vmem:[#allocation3 + $0x20] sm:$0xff] %vm787_vm2, %v4512_v28  ;;  %4719 = vrot.lane.b32.xlu0 %v11303_v54, %s8745_s20 }
 0x43b   : > { %v4706_v6 = vpop.permute.xlu1 %4705  ;;  %v5853_v30 = vld [vmem:[#allocation3 + $0x10] sm:$0xff] }
 0x43c   : > { %4798 = vst.msk [vmem:[#allocation3 + $0x30] sm:$0xff] %vm980_vm3, %v4706_v6  ;;  %v4704_v48 = vpop.permute.xlu0 %4703  ;;  %v5851_v62 = vld [vmem:[#allocation3] sm:$0xff] }
 0x43d   : > { %4797 = vst.msk [vmem:[#allocation3 + $0x20] sm:$0xff] %vm980_vm3, %v4704_v48  ;;  %4913 = vrot.lane.b32.xlu1 %v11361_v61, %s8747_s28  ;;  %v5915_v39 = vpack.c.bf16 %v5853_v30, %v5851_v62  ;;  %v11599_v30 = vld [vmem:[#allocation2 + $0xb1] sm:$0xff] }
 0x43e   : > { %4911 = vrot.lane.b32.xlu0 %v11355_v53, %s8747_s28  ;;  %v11563_v58 = vld [vmem:[#allocation2 + $0xd8] sm:$0xff] }
 0x43f   : > { %6107 = vmatmul.mubr.bf16.vlgmr.msra.gmra.mrb[64].mxu0 %v5915_v39  ;;  %v4898_v54 = vpop.permute.xlu1 %4897  ;;  %4429 = vst.msk [vmem:[#allocation3 + $0x120] sm:$0xff] %vm442_vm0, %v11563_v58 }
 0x440   : > { %4990 = vst.msk [vmem:[#allocation3 + $0x30] sm:$0xff] %vm1173_vm4, %v4898_v54  ;;  %v4896_v55 = vpop.permute.xlu0 %4895  ;;  %8585 = vmatprep.mubr.msk.bf16.mxu0 %vm442_vm0, %v5918_v35  ;;  %v11569_v8 = vld [vmem:[#allocation2 + $0xe0] sm:$0xff] }
 0x441   : > { %v11571_v61 = vld [vmem:[#allocation2 + $0xe2] sm:$0xff]  ;;  %4989 = vst.msk [vmem:[#allocation3 + $0x20] sm:$0xff] %vm1173_vm4, %v4896_v55  ;;  %5105 = vrot.lane.b32.xlu1 %v11532_v21, %s8748_s15  ;;  %v11578_v53 = vld [vmem:[#allocation2 + $0xda] sm:$0xff] }
 0x442   : > { %5103 = vrot.lane.b32.xlu0 %v11534_v31, %s8748_s15  ;;  %5834 = vst.msk [vmem:[#allocation3 + $0xf8] sm:$0xff] %vm442_vm0, %v11571_v61  ;;  %4430 = vst.msk [vmem:[#allocation3 + $0x130] sm:$0xff] %vm442_vm0, %v11569_v8 }
 0x443   : > { %5833 = vst.msk [vmem:[#allocation3 + $0xe8] sm:$0xff] %vm442_vm0, %v11578_v53  ;;  %v5090_v37 = vpop.permute.xlu1 %5089 }
 0x444   : > { %5182 = vst.msk [vmem:[#allocation3 + $0x30] sm:$0xff] %vm1366_vm5, %v5090_v37  ;;  %v5088_v33 = vpop.permute.xlu0 %5087 }
 0x445   : > { %5181 = vst.msk [vmem:[#allocation3 + $0x20] sm:$0xff] %vm1366_vm5, %v5088_v33  ;;  %5297 = vrot.lane.b32.xlu1 %v11363_v36, %s8749_s16 }
 0x446   : > { %5295 = vrot.lane.b32.xlu0 %v11370_v56, %s8749_s16 }
 0x447   : > { %v5282_v14 = vpop.permute.xlu1 %5281 }
 0x448   : > { %5374 = vst.msk [vmem:[#allocation3 + $0x30] sm:$0xff] %vm1559_vm6, %v5282_v14  ;;  %v5280_v38 = vpop.permute.xlu0 %5279 }
 0x449   : > { %5373 = vst.msk [vmem:[#allocation3 + $0x20] sm:$0xff] %vm1559_vm6, %v5280_v38  ;;  %5489 = vrot.lane.b32.xlu1 %v11431_v10, %s8750_s24 }
 0x44a   : > { %5487 = vrot.lane.b32.xlu0 %v11422_v0, %s8750_s24 }
 0x44b   : > { %v5474_v28 = vpop.permute.xlu1 %5473 }
 0x44c   : > { %5566 = vst.msk [vmem:[#allocation3 + $0x30] sm:$0xff] %vm1753_vm7, %v5474_v28  ;;  %v5472_v6 = vpop.permute.xlu0 %5471 }
 0x44d   : > { %5565 = vst.msk [vmem:[#allocation3 + $0x20] sm:$0xff] %vm1753_vm7, %v5472_v6  ;;  %5681 = vrot.lane.b32.xlu1 %v11599_v30, %s8751_s30 }
 0x44e   : > { %5679 = vrot.lane.b32.xlu0 %v11601_v16, %s8751_s30  ;;  %v4260_v17 = vpop.f32.mrb[36].mxu1 }
 0x44f   : > { %v4261_v48 = vadd.f32 %v11473_v47, %v4260_v17  ;;  %v4262_v62 = vpop.f32.mrb[37].mxu1  ;;  %v5666_v39 = vpop.permute.xlu1 %5665  ;;  %v5862_v17 = vld [vmem:[#allocation3 + $0x58] sm:$0xff] }
 0x450   : > { %v4263_v35 = vpop.f32.mrb[38].mxu1  ;;  %5758 = vst.msk [vmem:[#allocation3 + $0x30] sm:$0xff] %vm1946_vm8, %v5666_v39  ;;  %v5664_v54 = vpop.permute.xlu0 %5663 }
 0x451   : > { %v4333_v55 = vmax.f32 %v4261_v48, 0.0  ;;  %v4264_v37 = vadd.f32 %v11473_v47, %v4263_v35  ;;  %5757 = vst.msk [vmem:[#allocation3 + $0x20] sm:$0xff] %vm1946_vm8, %v5664_v54  ;;  %v4265_v33 = vpop.f32.mrb[39].mxu1  ;;  %4533 = vrot.lane.b32.xlu1 %v11532_v21, %s8746_s21 }
 0x452   : > { %4531 = vrot.lane.b32.xlu0 %v11534_v31, %s8746_s21  ;;  %v5860_v31 = vld [vmem:[#allocation3 + $0x48] sm:$0xff] }
 0x453   : > { %4365 = vst.msk [vmem:[#allocation2 + $0xf1] sm:$0xff] %vm442_vm0, %v4333_v55  ;;  %v4334_v14 = vmax.f32 %v4264_v37, 0.0  ;;  %v4518_v38 = vpop.permute.xlu1 %4517  ;;  %v5920_v39 = vpack.c.bf16 %v5862_v17, %v5860_v31  ;;  %v11668_v31 = vld [vmem:[#allocation2 + $0xc1] sm:$0xff] }
 0x454   : > { %4608 = vst.msk [vmem:[#allocation3 + $0x50] sm:$0xff] %vm787_vm2, %v4518_v38  ;;  %v4516_v28 = vpop.permute.xlu0 %4515 }
 0x455   : > { %4366 = vst.msk [vmem:[#allocation2 + $0xf9] sm:$0xff] %vm442_vm0, %v4334_v14  ;;  %4725 = vrot.lane.b32.xlu1 %v11363_v36, %s8745_s20 }
 0x456   : > { %4607 = vst.msk [vmem:[#allocation3 + $0x40] sm:$0xff] %vm787_vm2, %v4516_v28  ;;  %4723 = vrot.lane.b32.xlu0 %v11370_v56, %s8745_s20 }
 0x457   : > { %v4710_v21 = vpop.permute.xlu1 %4709  ;;  %v5857_v6 = vld [vmem:[#allocation3 + $0x30] sm:$0xff] }
 0x458   : > { %4800 = vst.msk [vmem:[#allocation3 + $0x50] sm:$0xff] %vm980_vm3, %v4710_v21  ;;  %v4708_v48 = vpop.permute.xlu0 %4707  ;;  %v5855_v62 = vld [vmem:[#allocation3 + $0x20] sm:$0xff] }
 0x459   : > { %4799 = vst.msk [vmem:[#allocation3 + $0x40] sm:$0xff] %vm980_vm3, %v4708_v48  ;;  %4917 = vrot.lane.b32.xlu1 %v11431_v10, %s8747_s28  ;;  %v5917_v36 = vpack.c.bf16 %v5857_v6, %v5855_v62  ;;  %v11666_v6 = vld [vmem:[#allocation2 + $0xc9] sm:$0xff] }
 0x45a   : > { %4915 = vrot.lane.b32.xlu0 %v11422_v0, %s8747_s28  ;;  %v11630_v35 = vld [vmem:[#allocation2 + $0xf0] sm:$0xff] }
 0x45b   : > { %6115 = vmatmul.mubr.bf16.gmra.mrb[68].mxu0 %v5917_v36  ;;  %v4902_v56 = vpop.permute.xlu1 %4901  ;;  %4431 = vst.msk [vmem:[#allocation3 + $0x140] sm:$0xff] %vm442_vm0, %v11630_v35 }
 0x45c   : > { %8586 = vmatprep.mubr.msk.bf16.mxu0 %vm442_vm0, %v5920_v39  ;;  %4992 = vst.msk [vmem:[#allocation3 + $0x50] sm:$0xff] %vm1173_vm4, %v4902_v56  ;;  %v4900_v54 = vpop.permute.xlu0 %4899  ;;  %v11636_v55 = vld [vmem:[#allocation2 + $0xf8] sm:$0xff] }
 0x45d   : > { %v11638_v10 = vld [vmem:[#allocation2 + $0xfa] sm:$0xff]  ;;  %4991 = vst.msk [vmem:[#allocation3 + $0x40] sm:$0xff] %vm1173_vm4, %v4900_v54  ;;  %5109 = vrot.lane.b32.xlu1 %v11599_v30, %s8748_s15  ;;  %v11645_v0 = vld [vmem:[#allocation2 + $0xf2] sm:$0xff] }
 0x45e   : > { %5107 = vrot.lane.b32.xlu0 %v11601_v16, %s8748_s15  ;;  %5836 = vst.msk [vmem:[#allocation3 + $0x118] sm:$0xff] %vm442_vm0, %v11638_v10  ;;  %4432 = vst.msk [vmem:[#allocation3 + $0x150] sm:$0xff] %vm442_vm0, %v11636_v55 }
 0x45f   : > { %5835 = vst.msk [vmem:[#allocation3 + $0x108] sm:$0xff] %vm442_vm0, %v11645_v0  ;;  %v5094_v37 = vpop.permute.xlu1 %5093 }
 0x460   : > { %5184 = vst.msk [vmem:[#allocation3 + $0x50] sm:$0xff] %vm1366_vm5, %v5094_v37  ;;  %v5092_v33 = vpop.permute.xlu0 %5091 }
 0x461   : > { %5183 = vst.msk [vmem:[#allocation3 + $0x40] sm:$0xff] %vm1366_vm5, %v5092_v33  ;;  %5301 = vrot.lane.b32.xlu1 %v11433_v22, %s8749_s16 }
 0x462   : > { %5299 = vrot.lane.b32.xlu0 %v11440_v4, %s8749_s16 }
 0x463   : > { %v5286_v14 = vpop.permute.xlu1 %5285 }
 0x464   : > { %5376 = vst.msk [vmem:[#allocation3 + $0x50] sm:$0xff] %vm1559_vm6, %v5286_v14  ;;  %v5284_v38 = vpop.permute.xlu0 %5283 }
 0x465   : > { %5375 = vst.msk [vmem:[#allocation3 + $0x40] sm:$0xff] %vm1559_vm6, %v5284_v38  ;;  %5493 = vrot.lane.b32.xlu1 %v11502_v1, %s8750_s24 }
 0x466   : > { %5491 = vrot.lane.b32.xlu0 %v11497_v40, %s8750_s24 }
 0x467   : > { %v5478_v28 = vpop.permute.xlu1 %5477 }
 0x468   : > { %5568 = vst.msk [vmem:[#allocation3 + $0x50] sm:$0xff] %vm1753_vm7, %v5478_v28  ;;  %v5476_v21 = vpop.permute.xlu0 %5475 }
 0x469   : > { %5567 = vst.msk [vmem:[#allocation3 + $0x40] sm:$0xff] %vm1753_vm7, %v5476_v21  ;;  %5685 = vrot.lane.b32.xlu1 %v11666_v6, %s8751_s30 }
 0x46a   : > { %5683 = vrot.lane.b32.xlu0 %v11668_v31, %s8751_s30  ;;  %v4268_v17 = vpop.f32.mrb[40].mxu1 }
 0x46b   : > { %v4269_v48 = vadd.f32 %v11473_v47, %v4268_v17  ;;  %v4270_v62 = vpop.f32.mrb[41].mxu1  ;;  %v5670_v36 = vpop.permute.xlu1 %5669  ;;  %v5866_v17 = vld [vmem:[#allocation3 + $0x78] sm:$0xff] }
 0x46c   : > { %v4271_v39 = vpop.f32.mrb[42].mxu1  ;;  %5760 = vst.msk [vmem:[#allocation3 + $0x50] sm:$0xff] %vm1946_vm8, %v5670_v36  ;;  %v5668_v56 = vpop.permute.xlu0 %5667 }
 0x46d   : > { %v4335_v54 = vmax.f32 %v4269_v48, 0.0  ;;  %v4272_v37 = vadd.f32 %v11473_v47, %v4271_v39  ;;  %5759 = vst.msk [vmem:[#allocation3 + $0x40] sm:$0xff] %vm1946_vm8, %v5668_v56  ;;  %v4273_v33 = vpop.f32.mrb[43].mxu1  ;;  %4537 = vrot.lane.b32.xlu1 %v11599_v30, %s8746_s21 }
 0x46e   : > { %4535 = vrot.lane.b32.xlu0 %v11601_v16, %s8746_s21  ;;  %v5864_v16 = vld [vmem:[#allocation3 + $0x68] sm:$0xff] }
 0x46f   : > { %4367 = vst.msk [vmem:[#allocation2 + $0x109] sm:$0xff] %vm442_vm0, %v4335_v54  ;;  %v4336_v14 = vmax.f32 %v4272_v37, 0.0  ;;  %v4522_v38 = vpop.permute.xlu1 %4521  ;;  %v5922_v36 = vpack.c.bf16 %v5866_v17, %v5864_v16  ;;  %v11735_v16 = vld [vmem:[#allocation2 + $0xd9] sm:$0xff] }
 0x470   : > { %4610 = vst.msk [vmem:[#allocation3 + $0x70] sm:$0xff] %vm787_vm2, %v4522_v38  ;;  %v4520_v28 = vpop.permute.xlu0 %4519 }
 0x471   : > { %4368 = vst.msk [vmem:[#allocation2 + $0x111] sm:$0xff] %vm442_vm0, %v4336_v14  ;;  %4729 = vrot.lane.b32.xlu1 %v11433_v22, %s8745_s20 }
 0x472   : > { %4609 = vst.msk [vmem:[#allocation3 + $0x60] sm:$0xff] %vm787_vm2, %v4520_v28  ;;  %4727 = vrot.lane.b32.xlu0 %v11440_v4, %s8745_s20 }
 0x473   : > { %v4714_v30 = vpop.permute.xlu1 %4713  ;;  %v5861_v21 = vld [vmem:[#allocation3 + $0x50] sm:$0xff] }
 0x474   : > { %4802 = vst.msk [vmem:[#allocation3 + $0x70] sm:$0xff] %vm980_vm3, %v4714_v30  ;;  %v4712_v48 = vpop.permute.xlu0 %4711  ;;  %v5859_v62 = vld [vmem:[#allocation3 + $0x40] sm:$0xff] }
 0x475   : > { %4801 = vst.msk [vmem:[#allocation3 + $0x60] sm:$0xff] %vm980_vm3, %v4712_v48  ;;  %4921 = vrot.lane.b32.xlu1 %v11502_v1, %s8747_s28  ;;  %v5919_v22 = vpack.c.bf16 %v5861_v21, %v5859_v62  ;;  %v11733_v21 = vld [vmem:[#allocation2 + $0xe1] sm:$0xff] }
 0x476   : > { %4919 = vrot.lane.b32.xlu0 %v11497_v40, %s8747_s28  ;;  %v11697_v39 = vld [vmem:[#allocation2 + $0x108] sm:$0xff] }
 0x477   : > { %6123 = vmatmul.mubr.bf16.gmra.mrb[72].mxu0 %v5919_v22  ;;  %v4906_v4 = vpop.permute.xlu1 %4905  ;;  %4433 = vst.msk [vmem:[#allocation3 + $0x160] sm:$0xff] %vm442_vm0, %v11697_v39 }
 0x478   : > { %4994 = vst.msk [vmem:[#allocation3 + $0x70] sm:$0xff] %vm1173_vm4, %v4906_v4  ;;  %8587 = vmatprep.mubr.msk.bf16.mxu0 %vm442_vm0, %v5922_v36  ;;  %v4904_v56 = vpop.permute.xlu0 %4903  ;;  %v11703_v54 = vld [vmem:[#allocation2 + $0x110] sm:$0xff] }
 0x479   : > { %v11705_v1 = vld [vmem:[#allocation2 + $0x112] sm:$0xff]  ;;  %4993 = vst.msk [vmem:[#allocation3 + $0x60] sm:$0xff] %vm1173_vm4, %v4904_v56  ;;  %5113 = vrot.lane.b32.xlu1 %v11666_v6, %s8748_s15  ;;  %v11712_v40 = vld [vmem:[#allocation2 + $0x10a] sm:$0xff] }
 0x47a   : > { %5111 = vrot.lane.b32.xlu0 %v11668_v31, %s8748_s15  ;;  %5838 = vst.msk [vmem:[#allocation3 + $0x138] sm:$0xff] %vm442_vm0, %v11705_v1  ;;  %4434 = vst.msk [vmem:[#allocation3 + $0x170] sm:$0xff] %vm442_vm0, %v11703_v54 }
 0x47b   : > { %5837 = vst.msk [vmem:[#allocation3 + $0x128] sm:$0xff] %vm442_vm0, %v11712_v40  ;;  %v5098_v37 = vpop.permute.xlu1 %5097 }
 0x47c   : > { %5186 = vst.msk [vmem:[#allocation3 + $0x70] sm:$0xff] %vm1366_vm5, %v5098_v37  ;;  %v5096_v33 = vpop.permute.xlu0 %5095 }
 0x47d   : > { %5185 = vst.msk [vmem:[#allocation3 + $0x60] sm:$0xff] %vm1366_vm5, %v5096_v33  ;;  %5305 = vrot.lane.b32.xlu1 %v11504_v57, %s8749_s16 }
 0x47e   : > { %5303 = vrot.lane.b32.xlu0 %v11511_v63, %s8749_s16 }
 0x47f   : > { %v5290_v14 = vpop.permute.xlu1 %5289 }
 0x480   : > { %5378 = vst.msk [vmem:[#allocation3 + $0x70] sm:$0xff] %vm1559_vm6, %v5290_v14  ;;  %v5288_v38 = vpop.permute.xlu0 %5287 }
 0x481   : > { %5377 = vst.msk [vmem:[#allocation3 + $0x60] sm:$0xff] %vm1559_vm6, %v5288_v38  ;;  %5497 = vrot.lane.b32.xlu1 %v11569_v8, %s8750_s24 }
 0x482   : > { %5495 = vrot.lane.b32.xlu0 %v11563_v58, %s8750_s24 }
 0x483   : > { %v5482_v28 = vpop.permute.xlu1 %5481 }
 0x484   : > { %5570 = vst.msk [vmem:[#allocation3 + $0x70] sm:$0xff] %vm1753_vm7, %v5482_v28  ;;  %v5480_v30 = vpop.permute.xlu0 %5479 }
 0x485   : > { %5569 = vst.msk [vmem:[#allocation3 + $0x60] sm:$0xff] %vm1753_vm7, %v5480_v30  ;;  %5689 = vrot.lane.b32.xlu1 %v11733_v21, %s8751_s30 }
 0x486   : > { %5687 = vrot.lane.b32.xlu0 %v11735_v16, %s8751_s30  ;;  %v4276_v17 = vpop.f32.mrb[44].mxu1 }
 0x487   : > { %v4277_v48 = vadd.f32 %v11473_v47, %v4276_v17  ;;  %v4278_v62 = vpop.f32.mrb[45].mxu1  ;;  %v5674_v22 = vpop.permute.xlu1 %5673  ;;  %v5870_v17 = vld [vmem:[#allocation3 + $0x98] sm:$0xff] }
 0x488   : > { %v4279_v36 = vpop.f32.mrb[46].mxu1  ;;  %5762 = vst.msk [vmem:[#allocation3 + $0x70] sm:$0xff] %vm1946_vm8, %v5674_v22  ;;  %v5672_v4 = vpop.permute.xlu0 %5671 }
 0x489   : > { %v4337_v56 = vmax.f32 %v4277_v48, 0.0  ;;  %v4280_v37 = vadd.f32 %v11473_v47, %v4279_v36  ;;  %5761 = vst.msk [vmem:[#allocation3 + $0x60] sm:$0xff] %vm1946_vm8, %v5672_v4  ;;  %v4281_v33 = vpop.f32.mrb[47].mxu1  ;;  %4541 = vrot.lane.b32.xlu1 %v11666_v6, %s8746_s21 }
 0x48a   : > { %4539 = vrot.lane.b32.xlu0 %v11668_v31, %s8746_s21  ;;  %v5868_v31 = vld [vmem:[#allocation3 + $0x88] sm:$0xff] }
 0x48b   : > { %4369 = vst.msk [vmem:[#allocation2 + $0x121] sm:$0xff] %vm442_vm0, %v4337_v56  ;;  %v4338_v14 = vmax.f32 %v4280_v37, 0.0  ;;  %v4526_v38 = vpop.permute.xlu1 %4525  ;;  %v5924_v22 = vpack.c.bf16 %v5870_v17, %v5868_v31  ;;  %v11802_v31 = vld [vmem:[#allocation2 + $0xf1] sm:$0xff] }
 0x48c   : > { %4612 = vst.msk [vmem:[#allocation3 + $0x90] sm:$0xff] %vm787_vm2, %v4526_v38  ;;  %v4524_v28 = vpop.permute.xlu0 %4523 }
 0x48d   : > { %4370 = vst.msk [vmem:[#allocation2 + $0x129] sm:$0xff] %vm442_vm0, %v4338_v14  ;;  %4733 = vrot.lane.b32.xlu1 %v11504_v57, %s8745_s20 }
 0x48e   : > { %4611 = vst.msk [vmem:[#allocation3 + $0x80] sm:$0xff] %vm787_vm2, %v4524_v28  ;;  %4731 = vrot.lane.b32.xlu0 %v11511_v63, %s8745_s20 }
 0x48f   : > { %v4718_v6 = vpop.permute.xlu1 %4717  ;;  %v5865_v30 = vld [vmem:[#allocation3 + $0x70] sm:$0xff] }
 0x490   : > { %4804 = vst.msk [vmem:[#allocation3 + $0x90] sm:$0xff] %vm980_vm3, %v4718_v6  ;;  %v4716_v48 = vpop.permute.xlu0 %4715  ;;  %v5863_v62 = vld [vmem:[#allocation3 + $0x60] sm:$0xff] }
 0x491   : > { %4803 = vst.msk [vmem:[#allocation3 + $0x80] sm:$0xff] %vm980_vm3, %v4716_v48  ;;  %4925 = vrot.lane.b32.xlu1 %v11569_v8, %s8747_s28  ;;  %v5921_v57 = vpack.c.bf16 %v5865_v30, %v5863_v62  ;;  %v11800_v30 = vld [vmem:[#allocation2 + $0xf9] sm:$0xff] }
 0x492   : > { %4923 = vrot.lane.b32.xlu0 %v11563_v58, %s8747_s28  ;;  %v11764_v36 = vld [vmem:[#allocation2 + $0x120] sm:$0xff] }
 0x493   : > { %6131 = vmatmul.mubr.bf16.gmra.mrb[76].mxu0 %v5921_v57  ;;  %v4910_v63 = vpop.permute.xlu1 %4909  ;;  %4435 = vst.msk [vmem:[#allocation3 + $0x180] sm:$0xff] %vm442_vm0, %v11764_v36 }
 0x494   : > { %4996 = vst.msk [vmem:[#allocation3 + $0x90] sm:$0xff] %vm1173_vm4, %v4910_v63  ;;  %v4908_v4 = vpop.permute.xlu0 %4907  ;;  %8588 = vmatprep.mubr.msk.bf16.mxu0 %vm442_vm0, %v5924_v22  ;;  %v11770_v56 = vld [vmem:[#allocation2 + $0x128] sm:$0xff] }
 0x495   : > { %v11772_v8 = vld [vmem:[#allocation2 + $0x12a] sm:$0xff]  ;;  %4995 = vst.msk [vmem:[#allocation3 + $0x80] sm:$0xff] %vm1173_vm4, %v4908_v4  ;;  %5117 = vrot.lane.b32.xlu1 %v11733_v21, %s8748_s15  ;;  %v11779_v58 = vld [vmem:[#allocation2 + $0x122] sm:$0xff] }
 0x496   : > { %5115 = vrot.lane.b32.xlu0 %v11735_v16, %s8748_s15  ;;  %5840 = vst.msk [vmem:[#allocation3 + $0x158] sm:$0xff] %vm442_vm0, %v11772_v8  ;;  %4436 = vst.msk [vmem:[#allocation3 + $0x190] sm:$0xff] %vm442_vm0, %v11770_v56 }
 0x497   : > { %5839 = vst.msk [vmem:[#allocation3 + $0x148] sm:$0xff] %vm442_vm0, %v11779_v58  ;;  %v5102_v37 = vpop.permute.xlu1 %5101 }
 0x498   : > { %5188 = vst.msk [vmem:[#allocation3 + $0x90] sm:$0xff] %vm1366_vm5, %v5102_v37  ;;  %v5100_v33 = vpop.permute.xlu0 %5099 }
 0x499   : > { %5187 = vst.msk [vmem:[#allocation3 + $0x80] sm:$0xff] %vm1366_vm5, %v5100_v33  ;;  %5309 = vrot.lane.b32.xlu1 %v11571_v61, %s8749_s16 }
 0x49a   : > { %5307 = vrot.lane.b32.xlu0 %v11578_v53, %s8749_s16 }
 0x49b   : > { %v5294_v14 = vpop.permute.xlu1 %5293 }
 0x49c   : > { %5380 = vst.msk [vmem:[#allocation3 + $0x90] sm:$0xff] %vm1559_vm6, %v5294_v14  ;;  %v5292_v38 = vpop.permute.xlu0 %5291 }
 0x49d   : > { %5379 = vst.msk [vmem:[#allocation3 + $0x80] sm:$0xff] %vm1559_vm6, %v5292_v38  ;;  %5501 = vrot.lane.b32.xlu1 %v11636_v55, %s8750_s24 }
 0x49e   : > { %5499 = vrot.lane.b32.xlu0 %v11630_v35, %s8750_s24 }
 0x49f   : > { %v5486_v28 = vpop.permute.xlu1 %5485 }
 0x4a0   : > { %5572 = vst.msk [vmem:[#allocation3 + $0x90] sm:$0xff] %vm1753_vm7, %v5486_v28  ;;  %v5484_v6 = vpop.permute.xlu0 %5483 }
 0x4a1   : > { %5571 = vst.msk [vmem:[#allocation3 + $0x80] sm:$0xff] %vm1753_vm7, %v5484_v6  ;;  %5693 = vrot.lane.b32.xlu1 %v11800_v30, %s8751_s30 }
 0x4a2   : > { %5691 = vrot.lane.b32.xlu0 %v11802_v31, %s8751_s30  ;;  %v4284_v17 = vpop.f32.mrb[48].mxu1 }
 0x4a3   : > { %v4285_v48 = vadd.f32 %v11473_v47, %v4284_v17  ;;  %v4286_v62 = vpop.f32.mrb[49].mxu1  ;;  %v5678_v57 = vpop.permute.xlu1 %5677  ;;  %v5874_v17 = vld [vmem:[#allocation3 + $0xb8] sm:$0xff] }
 0x4a4   : > { %v4287_v22 = vpop.f32.mrb[50].mxu1  ;;  %5764 = vst.msk [vmem:[#allocation3 + $0x90] sm:$0xff] %vm1946_vm8, %v5678_v57  ;;  %v5676_v63 = vpop.permute.xlu0 %5675 }
 0x4a5   : > { %v4339_v4 = vmax.f32 %v4285_v48, 0.0  ;;  %v4288_v37 = vadd.f32 %v11473_v47, %v4287_v22  ;;  %5763 = vst.msk [vmem:[#allocation3 + $0x80] sm:$0xff] %vm1946_vm8, %v5676_v63  ;;  %v4289_v33 = vpop.f32.mrb[51].mxu1  ;;  %4545 = vrot.lane.b32.xlu1 %v11733_v21, %s8746_s21 }
 0x4a6   : > { %4543 = vrot.lane.b32.xlu0 %v11735_v16, %s8746_s21  ;;  %v5872_v16 = vld [vmem:[#allocation3 + $0xa8] sm:$0xff] }
 0x4a7   : > { %4371 = vst.msk [vmem:[#allocation2 + $0x139] sm:$0xff] %vm442_vm0, %v4339_v4  ;;  %v4340_v14 = vmax.f32 %v4288_v37, 0.0  ;;  %v4530_v38 = vpop.permute.xlu1 %4529  ;;  %v5926_v57 = vpack.c.bf16 %v5874_v17, %v5872_v16  ;;  %v11869_v16 = vld [vmem:[#allocation2 + $0x109] sm:$0xff] }
 0x4a8   : > { %4614 = vst.msk [vmem:[#allocation3 + $0xb0] sm:$0xff] %vm787_vm2, %v4530_v38  ;;  %v4528_v28 = vpop.permute.xlu0 %4527 }
 0x4a9   : > { %4372 = vst.msk [vmem:[#allocation2 + $0x141] sm:$0xff] %vm442_vm0, %v4340_v14  ;;  %4737 = vrot.lane.b32.xlu1 %v11571_v61, %s8745_s20 }
 0x4aa   : > { %4613 = vst.msk [vmem:[#allocation3 + $0xa0] sm:$0xff] %vm787_vm2, %v4528_v28  ;;  %4735 = vrot.lane.b32.xlu0 %v11578_v53, %s8745_s20 }
 0x4ab   : > { %v4722_v21 = vpop.permute.xlu1 %4721  ;;  %v5869_v6 = vld [vmem:[#allocation3 + $0x90] sm:$0xff] }
 0x4ac   : > { %4806 = vst.msk [vmem:[#allocation3 + $0xb0] sm:$0xff] %vm980_vm3, %v4722_v21  ;;  %v4720_v48 = vpop.permute.xlu0 %4719  ;;  %v5867_v62 = vld [vmem:[#allocation3 + $0x80] sm:$0xff] }
 0x4ad   : > { %4805 = vst.msk [vmem:[#allocation3 + $0xa0] sm:$0xff] %vm980_vm3, %v4720_v48  ;;  %4929 = vrot.lane.b32.xlu1 %v11636_v55, %s8747_s28  ;;  %v5923_v61 = vpack.c.bf16 %v5869_v6, %v5867_v62  ;;  %v11867_v6 = vld [vmem:[#allocation2 + $0x111] sm:$0xff] }
 0x4ae   : > { %4927 = vrot.lane.b32.xlu0 %v11630_v35, %s8747_s28  ;;  %v11831_v22 = vld [vmem:[#allocation2 + $0x138] sm:$0xff] }
 0x4af   : > { %6139 = vmatmul.mubr.bf16.gmra.mrb[80].mxu0 %v5923_v61  ;;  %v4914_v53 = vpop.permute.xlu1 %4913  ;;  %4437 = vst.msk [vmem:[#allocation3 + $0x1a0] sm:$0xff] %vm442_vm0, %v11831_v22 }
 0x4b0   : > { %4998 = vst.msk [vmem:[#allocation3 + $0xb0] sm:$0xff] %vm1173_vm4, %v4914_v53  ;;  %v4912_v63 = vpop.permute.xlu0 %4911  ;;  %8589 = vmatprep.mubr.msk.bf16.mxu0 %vm442_vm0, %v5926_v57  ;;  %v11837_v4 = vld [vmem:[#allocation2 + $0x140] sm:$0xff] }
 0x4b1   : > { %v11839_v55 = vld [vmem:[#allocation2 + $0x142] sm:$0xff]  ;;  %4997 = vst.msk [vmem:[#allocation3 + $0xa0] sm:$0xff] %vm1173_vm4, %v4912_v63  ;;  %5121 = vrot.lane.b32.xlu1 %v11800_v30, %s8748_s15  ;;  %v11846_v35 = vld [vmem:[#allocation2 + $0x13a] sm:$0xff] }
 0x4b2   : > { %5119 = vrot.lane.b32.xlu0 %v11802_v31, %s8748_s15  ;;  %5842 = vst.msk [vmem:[#allocation3 + $0x178] sm:$0xff] %vm442_vm0, %v11839_v55  ;;  %4438 = vst.msk [vmem:[#allocation3 + $0x1b0] sm:$0xff] %vm442_vm0, %v11837_v4 }
 0x4b3   : > { %5841 = vst.msk [vmem:[#allocation3 + $0x168] sm:$0xff] %vm442_vm0, %v11846_v35  ;;  %v5106_v37 = vpop.permute.xlu1 %5105 }
 0x4b4   : > { %5190 = vst.msk [vmem:[#allocation3 + $0xb0] sm:$0xff] %vm1366_vm5, %v5106_v37  ;;  %v5104_v33 = vpop.permute.xlu0 %5103 }
 0x4b5   : > { %5189 = vst.msk [vmem:[#allocation3 + $0xa0] sm:$0xff] %vm1366_vm5, %v5104_v33  ;;  %5313 = vrot.lane.b32.xlu1 %v11638_v10, %s8749_s16 }
 0x4b6   : > { %5311 = vrot.lane.b32.xlu0 %v11645_v0, %s8749_s16 }
 0x4b7   : > { %v5298_v14 = vpop.permute.xlu1 %5297 }
 0x4b8   : > { %5382 = vst.msk [vmem:[#allocation3 + $0xb0] sm:$0xff] %vm1559_vm6, %v5298_v14  ;;  %v5296_v38 = vpop.permute.xlu0 %5295 }
 0x4b9   : > { %5381 = vst.msk [vmem:[#allocation3 + $0xa0] sm:$0xff] %vm1559_vm6, %v5296_v38  ;;  %5505 = vrot.lane.b32.xlu1 %v11703_v54, %s8750_s24 }
 0x4ba   : > { %5503 = vrot.lane.b32.xlu0 %v11697_v39, %s8750_s24 }
 0x4bb   : > { %v5490_v28 = vpop.permute.xlu1 %5489 }
 0x4bc   : > { %5574 = vst.msk [vmem:[#allocation3 + $0xb0] sm:$0xff] %vm1753_vm7, %v5490_v28  ;;  %v5488_v21 = vpop.permute.xlu0 %5487 }
 0x4bd   : > { %5573 = vst.msk [vmem:[#allocation3 + $0xa0] sm:$0xff] %vm1753_vm7, %v5488_v21  ;;  %5697 = vrot.lane.b32.xlu1 %v11867_v6, %s8751_s30 }
 0x4be   : > { %5695 = vrot.lane.b32.xlu0 %v11869_v16, %s8751_s30  ;;  %v4292_v17 = vpop.f32.mrb[52].mxu1 }
 0x4bf   : > { %v4293_v48 = vadd.f32 %v11473_v47, %v4292_v17  ;;  %v4294_v62 = vpop.f32.mrb[53].mxu1  ;;  %v5682_v61 = vpop.permute.xlu1 %5681  ;;  %v5878_v17 = vld [vmem:[#allocation3 + $0xd8] sm:$0xff] }
 0x4c0   : > { %v4295_v57 = vpop.f32.mrb[54].mxu1  ;;  %5766 = vst.msk [vmem:[#allocation3 + $0xb0] sm:$0xff] %vm1946_vm8, %v5682_v61  ;;  %v5680_v53 = vpop.permute.xlu0 %5679 }
 0x4c1   : > { %v4341_v63 = vmax.f32 %v4293_v48, 0.0  ;;  %v4296_v37 = vadd.f32 %v11473_v47, %v4295_v57  ;;  %5765 = vst.msk [vmem:[#allocation3 + $0xa0] sm:$0xff] %vm1946_vm8, %v5680_v53  ;;  %v4297_v33 = vpop.f32.mrb[55].mxu1  ;;  %4549 = vrot.lane.b32.xlu1 %v11800_v30, %s8746_s21 }
 0x4c2   : > { %4547 = vrot.lane.b32.xlu0 %v11802_v31, %s8746_s21  ;;  %v5876_v31 = vld [vmem:[#allocation3 + $0xc8] sm:$0xff] }
 0x4c3   : > { %4373 = vst.msk [vmem:[#allocation2 + $0x151] sm:$0xff] %vm442_vm0, %v4341_v63  ;;  %v4342_v14 = vmax.f32 %v4296_v37, 0.0  ;;  %v4534_v38 = vpop.permute.xlu1 %4533  ;;  %v5928_v61 = vpack.c.bf16 %v5878_v17, %v5876_v31  ;;  %v11936_v31 = vld [vmem:[#allocation2 + $0x121] sm:$0xff] }
 0x4c4   : > { %4616 = vst.msk [vmem:[#allocation3 + $0xd0] sm:$0xff] %vm787_vm2, %v4534_v38  ;;  %v4532_v28 = vpop.permute.xlu0 %4531 }
 0x4c5   : > { %4374 = vst.msk [vmem:[#allocation2 + $0x159] sm:$0xff] %vm442_vm0, %v4342_v14  ;;  %4741 = vrot.lane.b32.xlu1 %v11638_v10, %s8745_s20 }
 0x4c6   : > { %4615 = vst.msk [vmem:[#allocation3 + $0xc0] sm:$0xff] %vm787_vm2, %v4532_v28  ;;  %4739 = vrot.lane.b32.xlu0 %v11645_v0, %s8745_s20 }
 0x4c7   : > { %v4726_v30 = vpop.permute.xlu1 %4725  ;;  %v5873_v21 = vld [vmem:[#allocation3 + $0xb0] sm:$0xff] }
 0x4c8   : > { %4808 = vst.msk [vmem:[#allocation3 + $0xd0] sm:$0xff] %vm980_vm3, %v4726_v30  ;;  %v4724_v48 = vpop.permute.xlu0 %4723  ;;  %v5871_v62 = vld [vmem:[#allocation3 + $0xa0] sm:$0xff] }
 0x4c9   : > { %4807 = vst.msk [vmem:[#allocation3 + $0xc0] sm:$0xff] %vm980_vm3, %v4724_v48  ;;  %4933 = vrot.lane.b32.xlu1 %v11703_v54, %s8747_s28  ;;  %v5925_v10 = vpack.c.bf16 %v5873_v21, %v5871_v62  ;;  %v11934_v21 = vld [vmem:[#allocation2 + $0x129] sm:$0xff] }
 0x4ca   : > { %4931 = vrot.lane.b32.xlu0 %v11697_v39, %s8747_s28  ;;  %v11898_v57 = vld [vmem:[#allocation2 + $0x150] sm:$0xff] }
 0x4cb   : > { %6147 = vmatmul.mubr.bf16.gmra.mrb[84].mxu0 %v5925_v10  ;;  %v4918_v0 = vpop.permute.xlu1 %4917  ;;  %4439 = vst.msk [vmem:[#allocation3 + $0x1c0] sm:$0xff] %vm442_vm0, %v11898_v57 }
 0x4cc   : > { %5000 = vst.msk [vmem:[#allocation3 + $0xd0] sm:$0xff] %vm1173_vm4, %v4918_v0  ;;  %v4916_v53 = vpop.permute.xlu0 %4915  ;;  %8590 = vmatprep.mubr.msk.bf16.mxu0 %vm442_vm0, %v5928_v61  ;;  %v11904_v63 = vld [vmem:[#allocation2 + $0x158] sm:$0xff] }
 0x4cd   : > { %v11906_v54 = vld [vmem:[#allocation2 + $0x15a] sm:$0xff]  ;;  %4999 = vst.msk [vmem:[#allocation3 + $0xc0] sm:$0xff] %vm1173_vm4, %v4916_v53  ;;  %5125 = vrot.lane.b32.xlu1 %v11867_v6, %s8748_s15  ;;  %v11913_v39 = vld [vmem:[#allocation2 + $0x152] sm:$0xff] }
 0x4ce   : > { %5123 = vrot.lane.b32.xlu0 %v11869_v16, %s8748_s15  ;;  %5844 = vst.msk [vmem:[#allocation3 + $0x198] sm:$0xff] %vm442_vm0, %v11906_v54  ;;  %4440 = vst.msk [vmem:[#allocation3 + $0x1d0] sm:$0xff] %vm442_vm0, %v11904_v63 }
 0x4cf   : > { %5843 = vst.msk [vmem:[#allocation3 + $0x188] sm:$0xff] %vm442_vm0, %v11913_v39  ;;  %v5110_v37 = vpop.permute.xlu1 %5109 }
 0x4d0   : > { %5192 = vst.msk [vmem:[#allocation3 + $0xd0] sm:$0xff] %vm1366_vm5, %v5110_v37  ;;  %v5108_v33 = vpop.permute.xlu0 %5107 }
 0x4d1   : > { %5191 = vst.msk [vmem:[#allocation3 + $0xc0] sm:$0xff] %vm1366_vm5, %v5108_v33  ;;  %5317 = vrot.lane.b32.xlu1 %v11705_v1, %s8749_s16 }
 0x4d2   : > { %5315 = vrot.lane.b32.xlu0 %v11712_v40, %s8749_s16 }
 0x4d3   : > { %v5302_v14 = vpop.permute.xlu1 %5301 }
 0x4d4   : > { %5384 = vst.msk [vmem:[#allocation3 + $0xd0] sm:$0xff] %vm1559_vm6, %v5302_v14  ;;  %v5300_v38 = vpop.permute.xlu0 %5299 }
 0x4d5   : > { %5383 = vst.msk [vmem:[#allocation3 + $0xc0] sm:$0xff] %vm1559_vm6, %v5300_v38  ;;  %5509 = vrot.lane.b32.xlu1 %v11770_v56, %s8750_s24 }
 0x4d6   : > { %5507 = vrot.lane.b32.xlu0 %v11764_v36, %s8750_s24 }
 0x4d7   : > { %v5494_v28 = vpop.permute.xlu1 %5493 }
 0x4d8   : > { %5576 = vst.msk [vmem:[#allocation3 + $0xd0] sm:$0xff] %vm1753_vm7, %v5494_v28  ;;  %v5492_v30 = vpop.permute.xlu0 %5491 }
 0x4d9   : > { %5575 = vst.msk [vmem:[#allocation3 + $0xc0] sm:$0xff] %vm1753_vm7, %v5492_v30  ;;  %5701 = vrot.lane.b32.xlu1 %v11934_v21, %s8751_s30  ;;  %v5882_v30 = vld [vmem:[#allocation3 + $0xf8] sm:$0xff] }
 0x4da   : > { %5699 = vrot.lane.b32.xlu0 %v11936_v31, %s8751_s30  ;;  %v4300_v17 = vpop.f32.mrb[56].mxu1 }
 0x4db   : > { %v4301_v48 = vadd.f32 %v11473_v47, %v4300_v17  ;;  %v4302_v62 = vpop.f32.mrb[57].mxu1  ;;  %v5686_v10 = vpop.permute.xlu1 %5685 }
 0x4dc   : > { %v4303_v61 = vpop.f32.mrb[58].mxu1  ;;  %5768 = vst.msk [vmem:[#allocation3 + $0xd0] sm:$0xff] %vm1946_vm8, %v5686_v10  ;;  %v5684_v0 = vpop.permute.xlu0 %5683 }
 0x4dd   : > { %v4343_v53 = vmax.f32 %v4301_v48, 0.0  ;;  %v4304_v37 = vadd.f32 %v11473_v47, %v4303_v61  ;;  %5767 = vst.msk [vmem:[#allocation3 + $0xc0] sm:$0xff] %vm1946_vm8, %v5684_v0  ;;  %v4305_v33 = vpop.f32.mrb[59].mxu1  ;;  %4553 = vrot.lane.b32.xlu1 %v11867_v6, %s8746_s21 }
 0x4de   : > { %4551 = vrot.lane.b32.xlu0 %v11869_v16, %s8746_s21  ;;  %v5880_v16 = vld [vmem:[#allocation3 + $0xe8] sm:$0xff] }
 0x4df   : > { %4375 = vst.msk [vmem:[#allocation2 + $0x169] sm:$0xff] %vm442_vm0, %v4343_v53  ;;  %v4344_v14 = vmax.f32 %v4304_v37, 0.0  ;;  %v4538_v38 = vpop.permute.xlu1 %4537  ;;  %v5930_v62 = vpack.c.bf16 %v5882_v30, %v5880_v16  ;;  %v8734_v30 = vld [vmem:[%s13687_s4] ss:$0 sm:$0xff] }
 0x4e0   : > { %4618 = vst.msk [vmem:[#allocation3 + $0xf0] sm:$0xff] %vm787_vm2, %v4538_v38  ;;  %v4536_v28 = vpop.permute.xlu0 %4535 }
 0x4e1   : > { %4376 = vst.msk [vmem:[#allocation2 + $0x171] sm:$0xff] %vm442_vm0, %v4344_v14  ;;  %4745 = vrot.lane.b32.xlu1 %v11705_v1, %s8745_s20 }
 0x4e2   : > { %4617 = vst.msk [vmem:[#allocation3 + $0xe0] sm:$0xff] %vm787_vm2, %v4536_v28  ;;  %4743 = vrot.lane.b32.xlu0 %v11712_v40, %s8745_s20 }
 0x4e3   : > { %v4730_v47 = vpop.permute.xlu1 %4729  ;;  %v5877_v6 = vld [vmem:[#allocation3 + $0xd0] sm:$0xff] }
 0x4e4   : > { %4810 = vst.msk [vmem:[#allocation3 + $0xf0] sm:$0xff] %vm980_vm3, %v4730_v47  ;;  %v4728_v17 = vpop.permute.xlu0 %4727  ;;  %v5875_v48 = vld [vmem:[#allocation3 + $0xc0] sm:$0xff]  ;;  %v12001_v47 = vld [vmem:[#allocation2 + $0x141] sm:$0xff] }
 0x4e5   : > { %4809 = vst.msk [vmem:[#allocation3 + $0xe0] sm:$0xff] %vm980_vm3, %v4728_v17  ;;  %4937 = vrot.lane.b32.xlu1 %v11770_v56, %s8747_s28  ;;  %v5927_v1 = vpack.c.bf16 %v5877_v6, %v5875_v48  ;;  %v12003_v6 = vld [vmem:[#allocation2 + $0x139] sm:$0xff] }
 0x4e6   : > { %4935 = vrot.lane.b32.xlu0 %v11764_v36, %s8747_s28  ;;  %v11965_v10 = vld [vmem:[#allocation2 + $0x168] sm:$0xff] }
 0x4e7   : > { %6155 = vmatmul.mubr.bf16.gmra.mrb[88].mxu0 %v5927_v1  ;;  %v4922_v40 = vpop.permute.xlu1 %4921  ;;  %4441 = vst.msk [vmem:[#allocation3 + $0x1e0] sm:$0xff] %vm442_vm0, %v11965_v10 }
 0x4e8   : > { %5002 = vst.msk [vmem:[#allocation3 + $0xf0] sm:$0xff] %vm1173_vm4, %v4922_v40  ;;  %v4920_v61 = vpop.permute.xlu0 %4919  ;;  %8591 = vmatprep.mubr.msk.bf16.mxu0 %vm442_vm0, %v5930_v62  ;;  %v11971_v0 = vld [vmem:[#allocation2 + $0x170] sm:$0xff] }
 0x4e9   : > { %v11973_v56 = vld [vmem:[#allocation2 + $0x172] sm:$0xff]  ;;  %5001 = vst.msk [vmem:[#allocation3 + $0xe0] sm:$0xff] %vm1173_vm4, %v4920_v61  ;;  %5129 = vrot.lane.b32.xlu1 %v11934_v21, %s8748_s15  ;;  %v11980_v36 = vld [vmem:[#allocation2 + $0x16a] sm:$0xff] }
 0x4ea   : > { %5127 = vrot.lane.b32.xlu0 %v11936_v31, %s8748_s15  ;;  %5846 = vst.msk [vmem:[#allocation3 + $0x1b8] sm:$0xff] %vm442_vm0, %v11973_v56  ;;  %4442 = vst.msk [vmem:[#allocation3 + $0x1f0] sm:$0xff] %vm442_vm0, %v11971_v0 }
 0x4eb   : > { %5845 = vst.msk [vmem:[#allocation3 + $0x1a8] sm:$0xff] %vm442_vm0, %v11980_v36  ;;  %v5114_v53 = vpop.permute.xlu1 %5113 }
 0x4ec   : > { %5194 = vst.msk [vmem:[#allocation3 + $0xf0] sm:$0xff] %vm1366_vm5, %v5114_v53  ;;  %v5112_v37 = vpop.permute.xlu0 %5111 }
 0x4ed   : > { %5193 = vst.msk [vmem:[#allocation3 + $0xe0] sm:$0xff] %vm1366_vm5, %v5112_v37  ;;  %5321 = vrot.lane.b32.xlu1 %v11772_v8, %s8749_s16 }
 0x4ee   : > { %5319 = vrot.lane.b32.xlu0 %v11779_v58, %s8749_s16 }
 0x4ef   : > { %v5306_v33 = vpop.permute.xlu1 %5305 }
 0x4f0   : > { %5386 = vst.msk [vmem:[#allocation3 + $0xf0] sm:$0xff] %vm1559_vm6, %v5306_v33  ;;  %v5304_v14 = vpop.permute.xlu0 %5303 }
 0x4f1   : > { %5385 = vst.msk [vmem:[#allocation3 + $0xe0] sm:$0xff] %vm1559_vm6, %v5304_v14  ;;  %5513 = vrot.lane.b32.xlu1 %v11837_v4, %s8750_s24 }
 0x4f2   : > { %5511 = vrot.lane.b32.xlu0 %v11831_v22, %s8750_s24 }
 0x4f3   : > { %v5498_v38 = vpop.permute.xlu1 %5497 }
 0x4f4   : > { %5578 = vst.msk [vmem:[#allocation3 + $0xf0] sm:$0xff] %vm1753_vm7, %v5498_v38  ;;  %v5496_v28 = vpop.permute.xlu0 %5495 }
 0x4f5   : > { %5577 = vst.msk [vmem:[#allocation3 + $0xe0] sm:$0xff] %vm1753_vm7, %v5496_v28  ;;  %5705 = vrot.lane.b32.xlu1 %v12001_v47, %s8751_s30 }
 0x4f6   : > { %5703 = vrot.lane.b32.xlu0 %v12003_v6, %s8751_s30  ;;  %v4308_v16 = vpop.f32.mrb[60].mxu1 }
 0x4f7   : > { %v4309_v17 = vadd.f32 %v8734_v30, %v4308_v16  ;;  %v4310_v48 = vpop.f32.mrb[61].mxu1  ;;  %v5690_v1 = vpop.permute.xlu1 %5689  ;;  %v5886_v16 = vld [vmem:[#allocation3 + $0x118] sm:$0xff] }
 0x4f8   : > { %v4311_v62 = vpop.f32.mrb[62].mxu1  ;;  %5770 = vst.msk [vmem:[#allocation3 + $0xf0] sm:$0xff] %vm1946_vm8, %v5690_v1  ;;  %v5688_v40 = vpop.permute.xlu0 %5687 }
 0x4f9   : > { %v4345_v61 = vmax.f32 %v4309_v17, 0.0  ;;  %v4312_v53 = vadd.f32 %v8734_v30, %v4311_v62  ;;  %5769 = vst.msk [vmem:[#allocation3 + $0xe0] sm:$0xff] %vm1946_vm8, %v5688_v40  ;;  %v4313_v37 = vpop.f32.mrb[63].mxu1  ;;  %4557 = vrot.lane.b32.xlu1 %v11934_v21, %s8746_s21 }
 0x4fa   : > { %4555 = vrot.lane.b32.xlu0 %v11936_v31, %s8746_s21  ;;  %v5884_v31 = vld [vmem:[#allocation3 + $0x108] sm:$0xff] }
 0x4fb   : > { %4377 = vst.msk [vmem:[#allocation2 + $0x181] sm:$0xff] %vm442_vm0, %v4345_v61  ;;  %v4346_v33 = vmax.f32 %v4312_v53, 0.0  ;;  %v4542_v14 = vpop.permute.xlu1 %4541  ;;  %v5932_v48 = vpack.c.bf16 %v5886_v16, %v5884_v31 }
 0x4fc   : > { %4620 = vst.msk [vmem:[#allocation3 + $0x110] sm:$0xff] %vm787_vm2, %v4542_v14  ;;  %v4540_v38 = vpop.permute.xlu0 %4539  ;;  %v12061_v14 = vld [vmem:[#allocation2 + $0x159] sm:$0xff] }
 0x4fd   : > { %4378 = vst.msk [vmem:[#allocation2 + $0x189] sm:$0xff] %vm442_vm0, %v4346_v33  ;;  %4749 = vrot.lane.b32.xlu1 %v11772_v8, %s8745_s20 }
 0x4fe   : > { %4619 = vst.msk [vmem:[#allocation3 + $0x100] sm:$0xff] %vm787_vm2, %v4540_v38  ;;  %4747 = vrot.lane.b32.xlu0 %v11779_v58, %s8745_s20  ;;  %v12063_v38 = vld [vmem:[#allocation2 + $0x151] sm:$0xff] }
 0x4ff   : > { %v4734_v21 = vpop.permute.xlu1 %4733  ;;  %v5881_v28 = vld [vmem:[#allocation3 + $0xf0] sm:$0xff] }
 0x500   : > { %4812 = vst.msk [vmem:[#allocation3 + $0x110] sm:$0xff] %vm980_vm3, %v4734_v21  ;;  %v4732_v30 = vpop.permute.xlu0 %4731  ;;  %v5879_v17 = vld [vmem:[#allocation3 + $0xe0] sm:$0xff] }
 0x501   : > { %4811 = vst.msk [vmem:[#allocation3 + $0x100] sm:$0xff] %vm980_vm3, %v4732_v30  ;;  %4941 = vrot.lane.b32.xlu1 %v11837_v4, %s8747_s28  ;;  %v5929_v8 = vpack.c.bf16 %v5881_v28, %v5879_v17 }
 0x502   : > { %4939 = vrot.lane.b32.xlu0 %v11831_v22, %s8747_s28 }
 0x503   : > { %6163 = vmatmul.mubr.bf16.gmra.mrb[92].mxu0 %v5929_v8  ;;  %v4926_v58 = vpop.permute.xlu1 %4925 }
 0x504   : > { %5004 = vst.msk [vmem:[#allocation3 + $0x110] sm:$0xff] %vm1173_vm4, %v4926_v58  ;;  %v4924_v1 = vpop.permute.xlu0 %4923  ;;  %8592 = vmatprep.mubr.msk.bf16.mxu0 %vm442_vm0, %v5932_v48  ;;  %v12035_v62 = vld [vmem:[#allocation2 + $0x18a] sm:$0xff]  ;;  %v12042_v22 = vld [vmem:[#allocation2 + $0x182] sm:$0xff] }
 0x505   : > { %5003 = vst.msk [vmem:[#allocation3 + $0x100] sm:$0xff] %vm1173_vm4, %v4924_v1  ;;  %5133 = vrot.lane.b32.xlu1 %v12001_v47, %s8748_s15 }
 0x506   : > { %5131 = vrot.lane.b32.xlu0 %v12003_v6, %s8748_s15  ;;  %5848 = vst.msk [vmem:[#allocation3 + $0x1d8] sm:$0xff] %vm442_vm0, %v12035_v62  ;;  %5847 = vst.msk [vmem:[#allocation3 + $0x1c8] sm:$0xff] %vm442_vm0, %v12042_v22 }
 0x507   : > { %v5118_v4 = vpop.permute.xlu1 %5117 }
 0x508   : > { %5196 = vst.msk [vmem:[#allocation3 + $0x110] sm:$0xff] %vm1366_vm5, %v5118_v4  ;;  %v5116_v40 = vpop.permute.xlu0 %5115  ;;  %v5888_v4 = vld [vmem:[#allocation3 + $0x128] sm:$0xff] }
 0x509   : > { %5195 = vst.msk [vmem:[#allocation3 + $0x100] sm:$0xff] %vm1366_vm5, %v5116_v40  ;;  %5325 = vrot.lane.b32.xlu1 %v11839_v55, %s8749_s16  ;;  %v5890_v40 = vld [vmem:[#allocation3 + $0x138] sm:$0xff] }
 0x50a   : > { %5323 = vrot.lane.b32.xlu0 %v11846_v35, %s8749_s16 }
 0x50b   : > { %v5310_v61 = vpop.permute.xlu1 %5309 }
 0x50c   : > { %5388 = vst.msk [vmem:[#allocation3 + $0x110] sm:$0xff] %vm1559_vm6, %v5310_v61  ;;  %v5308_v53 = vpop.permute.xlu0 %5307  ;;  %v5934_v61 = vpack.c.bf16 %v5890_v40, %v5888_v4 }
 0x50d   : > { %5387 = vst.msk [vmem:[#allocation3 + $0x100] sm:$0xff] %vm1559_vm6, %v5308_v53  ;;  %5517 = vrot.lane.b32.xlu1 %v11904_v63, %s8750_s24 }
 0x50e   : > { %5515 = vrot.lane.b32.xlu0 %v11898_v57, %s8750_s24 }
 0x50f   : > { %v5502_v37 = vpop.permute.xlu1 %5501 }
 0x510   : > { %5580 = vst.msk [vmem:[#allocation3 + $0x110] sm:$0xff] %vm1753_vm7, %v5502_v37  ;;  %v5500_v33 = vpop.permute.xlu0 %5499 }
 0x511   : > { %5579 = vst.msk [vmem:[#allocation3 + $0x100] sm:$0xff] %vm1753_vm7, %v5500_v33  ;;  %5709 = vrot.lane.b32.xlu1 %v12061_v14, %s8751_s30 }
 0x512   : > { %5707 = vrot.lane.b32.xlu0 %v12063_v38, %s8751_s30  ;;  %v12070_v21 = vpop.f32.mrb[64].mxu0 }
 0x513   : > { %v6110_v28 = vpop.f32.mrb[65].mxu0  ;;  %v5694_v31 = vpop.permute.xlu1 %5693 }
 0x514   : > { %v12072_v16 = vpop.f32.mrb[66].mxu0  ;;  %5772 = vst.msk [vmem:[#allocation3 + $0x110] sm:$0xff] %vm1946_vm8, %v5694_v31  ;;  %v5692_v30 = vpop.permute.xlu0 %5691 }
 0x515   : > { %5771 = vst.msk [vmem:[#allocation3 + $0x100] sm:$0xff] %vm1946_vm8, %v5692_v30  ;;  %v6113_v17 = vpop.f32.mrb[67].mxu0  ;;  %4561 = vrot.lane.b32.xlu1 %v12001_v47, %s8746_s21  ;;  %v12112_v30 = vld [vmem:[#allocation2 + $0x171] sm:$0xff] }
 0x516   : > { %4559 = vrot.lane.b32.xlu0 %v12003_v6, %s8746_s21  ;;  %v12114_v17 = vld [vmem:[#allocation2 + $0x169] sm:$0xff] }
 0x517   : > { %v4546_v8 = vpop.permute.xlu1 %4545 }
 0x518   : > { %4622 = vst.msk [vmem:[#allocation3 + $0x130] sm:$0xff] %vm787_vm2, %v4546_v8  ;;  %v4544_v48 = vpop.permute.xlu0 %4543 }
 0x519   : > { %4621 = vst.msk [vmem:[#allocation3 + $0x120] sm:$0xff] %vm787_vm2, %v4544_v48  ;;  %4753 = vrot.lane.b32.xlu1 %v11839_v55, %s8745_s20 }
 0x51a   : > { %4751 = vrot.lane.b32.xlu0 %v11846_v35, %s8745_s20 }
 0x51b   : > { %v4738_v58 = vpop.permute.xlu1 %4737  ;;  %v5885_v1 = vld [vmem:[#allocation3 + $0x110] sm:$0xff] }
 0x51c   : > { %4814 = vst.msk [vmem:[#allocation3 + $0x130] sm:$0xff] %vm980_vm3, %v4738_v58  ;;  %v4736_v47 = vpop.permute.xlu0 %4735  ;;  %v5883_v6 = vld [vmem:[#allocation3 + $0x100] sm:$0xff] }
 0x51d   : > { %4813 = vst.msk [vmem:[#allocation3 + $0x120] sm:$0xff] %vm980_vm3, %v4736_v47  ;;  %4945 = vrot.lane.b32.xlu1 %v11904_v63, %s8747_s28  ;;  %v5931_v55 = vpack.c.bf16 %v5885_v1, %v5883_v6 }
 0x51e   : > { %4943 = vrot.lane.b32.xlu0 %v11898_v57, %s8747_s28 }
 0x51f   : > { %6171 = vmatmul.mubr.bf16.gmra.mrb[96].mxu0 %v5931_v55  ;;  %v4930_v35 = vpop.permute.xlu1 %4929 }
 0x520   : > { %5006 = vst.msk [vmem:[#allocation3 + $0x130] sm:$0xff] %vm1173_vm4, %v4930_v35  ;;  %v4928_v53 = vpop.permute.xlu0 %4927  ;;  %8593 = vmatprep.mubr.msk.bf16.mxu0 %vm442_vm0, %v5934_v61  ;;  %v5892_v35 = vld [vmem:[#allocation3 + $0x148] sm:$0xff] }
 0x521   : > { %5005 = vst.msk [vmem:[#allocation3 + $0x120] sm:$0xff] %vm1173_vm4, %v4928_v53  ;;  %5137 = vrot.lane.b32.xlu1 %v12061_v14, %s8748_s15  ;;  %v5894_v53 = vld [vmem:[#allocation3 + $0x158] sm:$0xff] }
 0x522   : > { %5135 = vrot.lane.b32.xlu0 %v12063_v38, %s8748_s15 }
 0x523   : > { %v5122_v63 = vpop.permute.xlu1 %5121 }
 0x524   : > { %5198 = vst.msk [vmem:[#allocation3 + $0x130] sm:$0xff] %vm1366_vm5, %v5122_v63  ;;  %v5120_v57 = vpop.permute.xlu0 %5119  ;;  %v5936_v63 = vpack.c.bf16 %v5894_v53, %v5892_v35 }
 0x525   : > { %5197 = vst.msk [vmem:[#allocation3 + $0x120] sm:$0xff] %vm1366_vm5, %v5120_v57  ;;  %5329 = vrot.lane.b32.xlu1 %v11906_v54, %s8749_s16 }
 0x526   : > { %5327 = vrot.lane.b32.xlu0 %v11913_v39, %s8749_s16 }
 0x527   : > { %v5314_v37 = vpop.permute.xlu1 %5313 }
 0x528   : > { %5390 = vst.msk [vmem:[#allocation3 + $0x130] sm:$0xff] %vm1559_vm6, %v5314_v37  ;;  %v5312_v33 = vpop.permute.xlu0 %5311 }
 0x529   : > { %5389 = vst.msk [vmem:[#allocation3 + $0x120] sm:$0xff] %vm1559_vm6, %v5312_v33  ;;  %5521 = vrot.lane.b32.xlu1 %v11971_v0, %s8750_s24 }
 0x52a   : > { %5519 = vrot.lane.b32.xlu0 %v11965_v10, %s8750_s24 }
 0x52b   : > { %v5506_v28 = vpop.permute.xlu1 %5505 }
 0x52c   : > { %5582 = vst.msk [vmem:[#allocation3 + $0x130] sm:$0xff] %vm1753_vm7, %v5506_v28  ;;  %v5504_v31 = vpop.permute.xlu0 %5503  ;;  %v5432_v28 = vld [vmem:[#allocation2 + $0x188] sm:$0xff] }
 0x52d   : > { %5581 = vst.msk [vmem:[#allocation3 + $0x120] sm:$0xff] %vm1753_vm7, %v5504_v31  ;;  %5713 = vrot.lane.b32.xlu1 %v12112_v30, %s8751_s30  ;;  %v5431_v31 = vld [vmem:[#allocation2 + $0x180] sm:$0xff] }
 0x52e   : > { %5711 = vrot.lane.b32.xlu0 %v12114_v17, %s8751_s30  ;;  %v12121_v8 = vpop.f32.mrb[68].mxu0 }
 0x52f   : > { %v6118_v48 = vpop.f32.mrb[69].mxu0  ;;  %v5698_v58 = vpop.permute.xlu1 %5697 }
 0x530   : > { %v12123_v1 = vpop.f32.mrb[70].mxu0  ;;  %5774 = vst.msk [vmem:[#allocation3 + $0x130] sm:$0xff] %vm1946_vm8, %v5698_v58  ;;  %v5696_v4 = vpop.permute.xlu0 %5695 }
 0x531   : > { %5773 = vst.msk [vmem:[#allocation3 + $0x120] sm:$0xff] %vm1946_vm8, %v5696_v4  ;;  %v6121_v40 = vpop.f32.mrb[71].mxu0  ;;  %4565 = vrot.lane.b32.xlu1 %v12061_v14, %s8746_s21  ;;  %v5624_v4 = vld [vmem:[#allocation2 + $0x189] sm:$0xff] }
 0x532   : > { %4563 = vrot.lane.b32.xlu0 %v12063_v38, %s8746_s21  ;;  %v5623_v40 = vld [vmem:[#allocation2 + $0x181] sm:$0xff] }
 0x533   : > { %v4550_v47 = vpop.permute.xlu1 %4549 }
 0x534   : > { %4624 = vst.msk [vmem:[#allocation3 + $0x150] sm:$0xff] %vm787_vm2, %v4550_v47  ;;  %v4548_v6 = vpop.permute.xlu0 %4547 }
 0x535   : > { %4623 = vst.msk [vmem:[#allocation3 + $0x140] sm:$0xff] %vm787_vm2, %v4548_v6  ;;  %4757 = vrot.lane.b32.xlu1 %v11906_v54, %s8745_s20 }
 0x536   : > { %4755 = vrot.lane.b32.xlu0 %v11913_v39, %s8745_s20 }
 0x537   : > { %v4742_v55 = vpop.permute.xlu1 %4741  ;;  %v5889_v61 = vld [vmem:[#allocation3 + $0x130] sm:$0xff] }
 0x538   : > { %4816 = vst.msk [vmem:[#allocation3 + $0x150] sm:$0xff] %vm980_vm3, %v4742_v55  ;;  %v4740_v14 = vpop.permute.xlu0 %4739  ;;  %v5887_v38 = vld [vmem:[#allocation3 + $0x120] sm:$0xff] }
 0x539   : > { %4815 = vst.msk [vmem:[#allocation3 + $0x140] sm:$0xff] %vm980_vm3, %v4740_v14  ;;  %4949 = vrot.lane.b32.xlu1 %v11971_v0, %s8747_s28  ;;  %v5933_v54 = vpack.c.bf16 %v5889_v61, %v5887_v38 }
 0x53a   : > { %4947 = vrot.lane.b32.xlu0 %v11965_v10, %s8747_s28 }
 0x53b   : > { %6179 = vmatmul.mubr.bf16.gmra.mrb[100].mxu0 %v5933_v54  ;;  %v4934_v39 = vpop.permute.xlu1 %4933 }
 0x53c   : > { %5008 = vst.msk [vmem:[#allocation3 + $0x150] sm:$0xff] %vm1173_vm4, %v4934_v39  ;;  %v4932_v57 = vpop.permute.xlu0 %4931  ;;  %8594 = vmatprep.mubr.msk.bf16.mxu0 %vm442_vm0, %v5936_v63  ;;  %v5896_v39 = vld [vmem:[#allocation3 + $0x168] sm:$0xff] }
 0x53d   : > { %5007 = vst.msk [vmem:[#allocation3 + $0x140] sm:$0xff] %vm1173_vm4, %v4932_v57  ;;  %5141 = vrot.lane.b32.xlu1 %v12112_v30, %s8748_s15  ;;  %v5898_v57 = vld [vmem:[#allocation3 + $0x178] sm:$0xff] }
 0x53e   : > { %5139 = vrot.lane.b32.xlu0 %v12114_v17, %s8748_s15 }
 0x53f   : > { %v5126_v0 = vpop.permute.xlu1 %5125 }
 0x540   : > { %5200 = vst.msk [vmem:[#allocation3 + $0x150] sm:$0xff] %vm1366_vm5, %v5126_v0  ;;  %v5124_v10 = vpop.permute.xlu0 %5123 }
 0x541   : > { %5199 = vst.msk [vmem:[#allocation3 + $0x140] sm:$0xff] %vm1366_vm5, %v5124_v10  ;;  %5333 = vrot.lane.b32.xlu1 %v11973_v56, %s8749_s16  ;;  %v5938_v10 = vpack.c.bf16 %v5898_v57, %v5896_v39 }
 0x542   : > { %5331 = vrot.lane.b32.xlu0 %v11980_v36, %s8749_s16 }
 0x543   : > { %v5318_v37 = vpop.permute.xlu1 %5317 }
 0x544   : > { %5392 = vst.msk [vmem:[#allocation3 + $0x150] sm:$0xff] %vm1559_vm6, %v5318_v37  ;;  %v5316_v33 = vpop.permute.xlu0 %5315 }
 0x545   : > { %5391 = vst.msk [vmem:[#allocation3 + $0x140] sm:$0xff] %vm1559_vm6, %v5316_v33  ;;  %5525 = vrot.lane.b32.xlu1 %v5432_v28, %s8750_s24 }
 0x546   : > { %5523 = vrot.lane.b32.xlu0 %v5431_v31, %s8750_s24 }
 0x547   : > { %v5510_v48 = vpop.permute.xlu1 %5509 }
 0x548   : > { %5584 = vst.msk [vmem:[#allocation3 + $0x150] sm:$0xff] %vm1753_vm7, %v5510_v48  ;;  %v5508_v58 = vpop.permute.xlu0 %5507  ;;  %v8007_v48 = vld [vmem:[#allocation2 + $0x19a] sm:$0xff] }
 0x549   : > { %5583 = vst.msk [vmem:[#allocation3 + $0x140] sm:$0xff] %vm1753_vm7, %v5508_v58  ;;  %5717 = vrot.lane.b32.xlu1 %v5624_v4, %s8751_s30 }
 0x54a   : > { %5715 = vrot.lane.b32.xlu0 %v5623_v40, %s8751_s30  ;;  %v12164_v47 = vpop.f32.mrb[72].mxu0 }
 0x54b   : > { %v6126_v6 = vpop.f32.mrb[73].mxu0  ;;  %v5702_v55 = vpop.permute.xlu1 %5701 }
 0x54c   : > { %5776 = vst.msk [vmem:[#allocation3 + $0x150] sm:$0xff] %vm1946_vm8, %v5702_v55  ;;  %v12167_v61 = vpop.f32.mrb[74].mxu0  ;;  %v5700_v35 = vpop.permute.xlu0 %5699  ;;  %v5433_v6 = vld [vmem:[#allocation2 + $0x198] sm:$0xff] }
 0x54d   : > { %5775 = vst.msk [vmem:[#allocation3 + $0x140] sm:$0xff] %vm1946_vm8, %v5700_v35  ;;  %v6129_v53 = vpop.f32.mrb[75].mxu0  ;;  %4569 = vrot.lane.b32.xlu1 %v12112_v30, %s8746_s21 }
 0x54e   : > { %4567 = vrot.lane.b32.xlu0 %v12114_v17, %s8746_s21 }
 0x54f   : > { %v4554_v14 = vpop.permute.xlu1 %4553 }
 0x550   : > { %4626 = vst.msk [vmem:[#allocation3 + $0x170] sm:$0xff] %vm787_vm2, %v4554_v14  ;;  %v4552_v38 = vpop.permute.xlu0 %4551 }
 0x551   : > { %4625 = vst.msk [vmem:[#allocation3 + $0x160] sm:$0xff] %vm787_vm2, %v4552_v38  ;;  %4761 = vrot.lane.b32.xlu1 %v11973_v56, %s8745_s20 }
 0x552   : > { %4759 = vrot.lane.b32.xlu0 %v11980_v36, %s8745_s20 }
 0x553   : > { %v4746_v54 = vpop.permute.xlu1 %4745  ;;  %v5893_v63 = vld [vmem:[#allocation3 + $0x150] sm:$0xff] }
 0x554   : > { %4818 = vst.msk [vmem:[#allocation3 + $0x170] sm:$0xff] %vm980_vm3, %v4746_v54  ;;  %v4744_v30 = vpop.permute.xlu0 %4743  ;;  %v5891_v17 = vld [vmem:[#allocation3 + $0x140] sm:$0xff] }
 0x555   : > { %4817 = vst.msk [vmem:[#allocation3 + $0x160] sm:$0xff] %vm980_vm3, %v4744_v30  ;;  %4953 = vrot.lane.b32.xlu1 %v5432_v28, %s8747_s28  ;;  %v5935_v0 = vpack.c.bf16 %v5893_v63, %v5891_v17  ;;  %v12190_v28 = vld [vmem:[#allocation3 + $0x1e8] sm:$0xff] }
 0x556   : > { %4951 = vrot.lane.b32.xlu0 %v5431_v31, %s8747_s28  ;;  %v12192_v31 = vld [vmem:[#allocation3 + $0x1f8] sm:$0xff]  ;;  %8039 = vst.msk [vmem:[#allocation3 + $0x1e8] sm:$0xff] %vm442_vm0, %v8007_v48 }
 0x557   : > { %6187 = vmatmul.mubr.bf16.gmra.mrb[104].mxu0 %v5935_v0  ;;  %v4938_v56 = vpop.permute.xlu1 %4937  ;;  %v5946_v58 = vpack.c.bf16 %v12192_v31, %v12190_v28 }
 0x558   : > { %5010 = vst.msk [vmem:[#allocation3 + $0x170] sm:$0xff] %vm1173_vm4, %v4938_v56  ;;  %v4936_v36 = vpop.permute.xlu0 %4935  ;;  %8595 = vmatprep.mubr.msk.bf16.mxu0 %vm442_vm0, %v5938_v10 }
 0x559   : > { %5009 = vst.msk [vmem:[#allocation3 + $0x160] sm:$0xff] %vm1173_vm4, %v4936_v36  ;;  %5145 = vrot.lane.b32.xlu1 %v5624_v4, %s8748_s15  ;;  %v8008_v4 = vld [vmem:[#allocation2 + $0x1a2] sm:$0xff]  ;;  %v5900_v36 = vld [vmem:[#allocation3 + $0x188] sm:$0xff] }
 0x55a   : > { %5143 = vrot.lane.b32.xlu0 %v5623_v40, %s8748_s15  ;;  %v5434_v40 = vld [vmem:[#allocation2 + $0x1a0] sm:$0xff]  ;;  %8040 = vst.msk [vmem:[#allocation3 + $0x1f8] sm:$0xff] %vm442_vm0, %v8008_v4 }
 0x55b   : > { %v5130_v37 = vpop.permute.xlu1 %5129 }
 0x55c   : > { %5202 = vst.msk [vmem:[#allocation3 + $0x170] sm:$0xff] %vm1366_vm5, %v5130_v37  ;;  %v5128_v33 = vpop.permute.xlu0 %5127  ;;  %v5902_v37 = vld [vmem:[#allocation3 + $0x198] sm:$0xff] }
 0x55d   : > { %5201 = vst.msk [vmem:[#allocation3 + $0x160] sm:$0xff] %vm1366_vm5, %v5128_v33  ;;  %5337 = vrot.lane.b32.xlu1 %v12035_v62, %s8749_s16  ;;  %v5626_v62 = vld [vmem:[#allocation2 + $0x1a1] sm:$0xff] }
 0x55e   : > { %5335 = vrot.lane.b32.xlu0 %v12042_v22, %s8749_s16  ;;  %v5625_v22 = vld [vmem:[#allocation2 + $0x199] sm:$0xff] }
 0x55f   : > { %v5322_v55 = vpop.permute.xlu1 %5321 }
 0x560   : > { %5394 = vst.msk [vmem:[#allocation3 + $0x170] sm:$0xff] %vm1559_vm6, %v5322_v55  ;;  %v5320_v35 = vpop.permute.xlu0 %5319 }
 0x561   : > { %5393 = vst.msk [vmem:[#allocation3 + $0x160] sm:$0xff] %vm1559_vm6, %v5320_v35  ;;  %5529 = vrot.lane.b32.xlu1 %v5434_v40, %s8750_s24  ;;  %v5940_v40 = vpack.c.bf16 %v5902_v37, %v5900_v36 }
 0x562   : > { %5527 = vrot.lane.b32.xlu0 %v5433_v6, %s8750_s24 }
 0x563   : > { %v5514_v53 = vpop.permute.xlu1 %5513 }
 0x564   : > { %5586 = vst.msk [vmem:[#allocation3 + $0x170] sm:$0xff] %vm1753_vm7, %v5514_v53  ;;  %v5512_v14 = vpop.permute.xlu0 %5511 }
 0x565   : > { %5585 = vst.msk [vmem:[#allocation3 + $0x160] sm:$0xff] %vm1753_vm7, %v5512_v14  ;;  %5721 = vrot.lane.b32.xlu1 %v5626_v62, %s8751_s30 }
 0x566   : > { %5719 = vrot.lane.b32.xlu0 %v5625_v22, %s8751_s30  ;;  %v12211_v38 = vpop.f32.mrb[76].mxu0 }
 0x567   : > { %v6134_v54 = vpop.f32.mrb[77].mxu0  ;;  %v5706_v63 = vpop.permute.xlu1 %5705 }
 0x568   : > { %5778 = vst.msk [vmem:[#allocation3 + $0x170] sm:$0xff] %vm1946_vm8, %v5706_v63  ;;  %v5704_v39 = vpop.permute.xlu0 %5703  ;;  %v12214_v57 = vpop.f32.mrb[78].mxu0 }
 0x569   : > { %5777 = vst.msk [vmem:[#allocation3 + $0x160] sm:$0xff] %vm1946_vm8, %v5704_v39  ;;  %v6137_v30 = vpop.f32.mrb[79].mxu0 }
 0x56b   : > { %v4558_v17 = vpop.permute.xlu1 %4557 }
 0x56c   : > { %4628 = vst.msk [vmem:[#allocation3 + $0x190] sm:$0xff] %vm787_vm2, %v4558_v17  ;;  %v4556_v0 = vpop.permute.xlu0 %4555 }
 0x56d   : > { %4627 = vst.msk [vmem:[#allocation3 + $0x180] sm:$0xff] %vm787_vm2, %v4556_v0 }
 0x56f   : > { %v4750_v10 = vpop.permute.xlu1 %4749  ;;  %v5897_v56 = vld [vmem:[#allocation3 + $0x170] sm:$0xff] }
 0x570   : > { %4820 = vst.msk [vmem:[#allocation3 + $0x190] sm:$0xff] %vm980_vm3, %v4750_v10  ;;  %v4748_v33 = vpop.permute.xlu0 %4747  ;;  %v5895_v48 = vld [vmem:[#allocation3 + $0x160] sm:$0xff] }
 0x571   : > { %4819 = vst.msk [vmem:[#allocation3 + $0x180] sm:$0xff] %vm980_vm3, %v4748_v33  ;;  %v5937_v4 = vpack.c.bf16 %v5897_v56, %v5895_v48  ;;  %v5904_v48 = vld [vmem:[#allocation3 + $0x1a8] sm:$0xff] }
 0x573   : > { %6195 = vmatmul.mubr.bf16.gmra.mrb[108].mxu0 %v5937_v4  ;;  %v4942_v6 = vpop.permute.xlu1 %4941  ;;  %v5906_v4 = vld [vmem:[#allocation3 + $0x1b8] sm:$0xff] }
 0x574   : > { %5012 = vst.msk [vmem:[#allocation3 + $0x190] sm:$0xff] %vm1173_vm4, %v4942_v6  ;;  %v4940_v55 = vpop.permute.xlu0 %4939  ;;  %8596 = vmatprep.mubr.msk.bf16.mxu0 %vm442_vm0, %v5940_v40 }
 0x575   : > { %5011 = vst.msk [vmem:[#allocation3 + $0x180] sm:$0xff] %vm1173_vm4, %v4940_v55 }
 0x577   : > { %v5134_v35 = vpop.permute.xlu1 %5133 }
 0x578   : > { %5204 = vst.msk [vmem:[#allocation3 + $0x190] sm:$0xff] %vm1366_vm5, %v5134_v35  ;;  %v5132_v62 = vpop.permute.xlu0 %5131  ;;  %v5942_v35 = vpack.c.bf16 %v5906_v4, %v5904_v48 }
 0x579   : > { %5203 = vst.msk [vmem:[#allocation3 + $0x180] sm:$0xff] %vm1366_vm5, %v5132_v62 }
 0x57b   : > { %v5326_v22 = vpop.permute.xlu1 %5325 }
 0x57c   : > { %5396 = vst.msk [vmem:[#allocation3 + $0x190] sm:$0xff] %vm1559_vm6, %v5326_v22  ;;  %v5324_v53 = vpop.permute.xlu0 %5323 }
 0x57d   : > { %5395 = vst.msk [vmem:[#allocation3 + $0x180] sm:$0xff] %vm1559_vm6, %v5324_v53 }
 0x57f   : > { %v5518_v14 = vpop.permute.xlu1 %5517 }
 0x580   : > { %5588 = vst.msk [vmem:[#allocation3 + $0x190] sm:$0xff] %vm1753_vm7, %v5518_v14  ;;  %v5516_v54 = vpop.permute.xlu0 %5515 }
 0x581   : > { %5587 = vst.msk [vmem:[#allocation3 + $0x180] sm:$0xff] %vm1753_vm7, %v5516_v54 }
 0x582   : > { %v12230_v63 = vpop.f32.mrb[80].mxu0 }
 0x583   : > { %v6142_v39 = vpop.f32.mrb[81].mxu0  ;;  %v5710_v30 = vpop.permute.xlu1 %5709 }
 0x584   : > { %5780 = vst.msk [vmem:[#allocation3 + $0x190] sm:$0xff] %vm1946_vm8, %v5710_v30  ;;  %v5708_v17 = vpop.permute.xlu0 %5707  ;;  %v12233_v0 = vpop.f32.mrb[82].mxu0 }
 0x585   : > { %5779 = vst.msk [vmem:[#allocation3 + $0x180] sm:$0xff] %vm1946_vm8, %v5708_v17  ;;  %v6145_v10 = vpop.f32.mrb[83].mxu0 }
 0x587   : > { %v4562_v56 = vpop.permute.xlu1 %4561 }
 0x588   : > { %4630 = vst.msk [vmem:[#allocation3 + $0x1b0] sm:$0xff] %vm787_vm2, %v4562_v56  ;;  %v4560_v36 = vpop.permute.xlu0 %4559 }
 0x589   : > { %4629 = vst.msk [vmem:[#allocation3 + $0x1a0] sm:$0xff] %vm787_vm2, %v4560_v36 }
 0x58b   : > { %v4754_v37 = vpop.permute.xlu1 %4753  ;;  %v5901_v33 = vld [vmem:[#allocation3 + $0x190] sm:$0xff] }
 0x58c   : > { %4822 = vst.msk [vmem:[#allocation3 + $0x1b0] sm:$0xff] %vm980_vm3, %v4754_v37  ;;  %v4752_v40 = vpop.permute.xlu0 %4751  ;;  %v5899_v6 = vld [vmem:[#allocation3 + $0x180] sm:$0xff] }
 0x58d   : > { %4821 = vst.msk [vmem:[#allocation3 + $0x1a0] sm:$0xff] %vm980_vm3, %v4752_v40  ;;  %v5939_v55 = vpack.c.bf16 %v5901_v33, %v5899_v6 }
 0x58f   : > { %6203 = vmatmul.mubr.bf16.gmra.mrb[112].mxu0 %v5939_v55  ;;  %v4946_v62 = vpop.permute.xlu1 %4945 }
 0x590   : > { %5014 = vst.msk [vmem:[#allocation3 + $0x1b0] sm:$0xff] %vm1173_vm4, %v4946_v62  ;;  %v4944_v22 = vpop.permute.xlu0 %4943  ;;  %8597 = vmatprep.mubr.msk.bf16.mxu0 %vm442_vm0, %v5942_v35  ;;  %v5908_v35 = vld [vmem:[#allocation3 + $0x1c8] sm:$0xff]  ;;  %v5910_v62 = vld [vmem:[#allocation3 + $0x1d8] sm:$0xff] }
 0x591   : > { %5013 = vst.msk [vmem:[#allocation3 + $0x1a0] sm:$0xff] %vm1173_vm4, %v4944_v22 }
 0x593   : > { %v5138_v53 = vpop.permute.xlu1 %5137 }
 0x594   : > { %5206 = vst.msk [vmem:[#allocation3 + $0x1b0] sm:$0xff] %vm1366_vm5, %v5138_v53  ;;  %v5136_v14 = vpop.permute.xlu0 %5135 }
 0x595   : > { %5205 = vst.msk [vmem:[#allocation3 + $0x1a0] sm:$0xff] %vm1366_vm5, %v5136_v14 }
 0x597   : > { %v5330_v54 = vpop.permute.xlu1 %5329 }
 0x598   : > { %5398 = vst.msk [vmem:[#allocation3 + $0x1b0] sm:$0xff] %vm1559_vm6, %v5330_v54  ;;  %v5328_v39 = vpop.permute.xlu0 %5327  ;;  %v5944_v54 = vpack.c.bf16 %v5910_v62, %v5908_v35 }
 0x599   : > { %5397 = vst.msk [vmem:[#allocation3 + $0x1a0] sm:$0xff] %vm1559_vm6, %v5328_v39 }
 0x59b   : > { %v5522_v30 = vpop.permute.xlu1 %5521 }
 0x59c   : > { %5590 = vst.msk [vmem:[#allocation3 + $0x1b0] sm:$0xff] %vm1753_vm7, %v5522_v30  ;;  %v5520_v17 = vpop.permute.xlu0 %5519 }
 0x59d   : > { %5589 = vst.msk [vmem:[#allocation3 + $0x1a0] sm:$0xff] %vm1753_vm7, %v5520_v17 }
 0x59e   : > { %v12249_v10 = vpop.f32.mrb[84].mxu0 }
 0x59f   : > { %v6150_v56 = vpop.f32.mrb[85].mxu0  ;;  %v5714_v36 = vpop.permute.xlu1 %5713 }
 0x5a0   : > { %5782 = vst.msk [vmem:[#allocation3 + $0x1b0] sm:$0xff] %vm1946_vm8, %v5714_v36  ;;  %v5712_v37 = vpop.permute.xlu0 %5711  ;;  %v12252_v33 = vpop.f32.mrb[86].mxu0 }
 0x5a1   : > { %5781 = vst.msk [vmem:[#allocation3 + $0x1a0] sm:$0xff] %vm1946_vm8, %v5712_v37  ;;  %v6153_v48 = vpop.f32.mrb[87].mxu0 }
 0x5a3   : > { %v4566_v4 = vpop.permute.xlu1 %4565 }
 0x5a4   : > { %4632 = vst.msk [vmem:[#allocation3 + $0x1d0] sm:$0xff] %vm787_vm2, %v4566_v4  ;;  %v4564_v40 = vpop.permute.xlu0 %4563 }
 0x5a5   : > { %4631 = vst.msk [vmem:[#allocation3 + $0x1c0] sm:$0xff] %vm787_vm2, %v4564_v40 }
 0x5a7   : > { %v4758_v6 = vpop.permute.xlu1 %4757  ;;  %v5905_v55 = vld [vmem:[#allocation3 + $0x1b0] sm:$0xff] }
 0x5a8   : > { %4824 = vst.msk [vmem:[#allocation3 + $0x1d0] sm:$0xff] %vm980_vm3, %v4758_v6  ;;  %v4756_v22 = vpop.permute.xlu0 %4755  ;;  %v5903_v53 = vld [vmem:[#allocation3 + $0x1a0] sm:$0xff] }
 0x5a9   : > { %4823 = vst.msk [vmem:[#allocation3 + $0x1c0] sm:$0xff] %vm980_vm3, %v4756_v22  ;;  %v5941_v14 = vpack.c.bf16 %v5905_v55, %v5903_v53 }
 0x5ab   : > { %6211 = vmatmul.mubr.bf16.gmra.mrb[116].mxu0 %v5941_v14  ;;  %v4950_v39 = vpop.permute.xlu1 %4949 }
 0x5ac   : > { %5016 = vst.msk [vmem:[#allocation3 + $0x1d0] sm:$0xff] %vm1173_vm4, %v4950_v39  ;;  %v4948_v30 = vpop.permute.xlu0 %4947  ;;  %8598 = vmatprep.mubr.msk.bf16.mxu0 %vm442_vm0, %v5944_v54 }
 0x5ad   : > { %5015 = vst.msk [vmem:[#allocation3 + $0x1c0] sm:$0xff] %vm1173_vm4, %v4948_v30 }
 0x5af   : > { %v5142_v17 = vpop.permute.xlu1 %5141 }
 0x5b0   : > { %5208 = vst.msk [vmem:[#allocation3 + $0x1d0] sm:$0xff] %vm1366_vm5, %v5142_v17  ;;  %v5140_v56 = vpop.permute.xlu0 %5139 }
 0x5b1   : > { %5207 = vst.msk [vmem:[#allocation3 + $0x1c0] sm:$0xff] %vm1366_vm5, %v5140_v56 }
 0x5b3   : > { %v5334_v36 = vpop.permute.xlu1 %5333 }
 0x5b4   : > { %5400 = vst.msk [vmem:[#allocation3 + $0x1d0] sm:$0xff] %vm1559_vm6, %v5334_v36  ;;  %v5332_v37 = vpop.permute.xlu0 %5331 }
 0x5b5   : > { %5399 = vst.msk [vmem:[#allocation3 + $0x1c0] sm:$0xff] %vm1559_vm6, %v5332_v37 }
 0x5b7   : > { %v5526_v48 = vpop.permute.xlu1 %5525 }
 0x5b8   : > { %5592 = vst.msk [vmem:[#allocation3 + $0x1d0] sm:$0xff] %vm1753_vm7, %v5526_v48  ;;  %v5524_v4 = vpop.permute.xlu0 %5523 }
 0x5b9   : > { %5591 = vst.msk [vmem:[#allocation3 + $0x1c0] sm:$0xff] %vm1753_vm7, %v5524_v4 }
 0x5ba   : > { %v12268_v40 = vpop.f32.mrb[88].mxu0 }
 0x5bb   : > { %v6158_v6 = vpop.f32.mrb[89].mxu0  ;;  %v5718_v55 = vpop.permute.xlu1 %5717 }
 0x5bc   : > { %5784 = vst.msk [vmem:[#allocation3 + $0x1d0] sm:$0xff] %vm1946_vm8, %v5718_v55  ;;  %v5716_v35 = vpop.permute.xlu0 %5715  ;;  %v12271_v62 = vpop.f32.mrb[90].mxu0  ;;  %v6306_v6 = vld [vmem:[%s13690_s7] sm:$0xff]  ;;  %v6307_v55 = vld [vmem:[%s13690_s7 + $0x8] sm:$0xff] }
 0x5bd   : > { %5783 = vst.msk [vmem:[#allocation3 + $0x1c0] sm:$0xff] %vm1946_vm8, %v5716_v35  ;;  %v6161_v22 = vpop.f32.mrb[91].mxu0  ;;  %v8752_v35 = vmov 0.0|0.0   ;;  %v8652_v28 = vpack.c.bf16 %v6307_v55, %v6306_v6 }
 0x5be   : > { %8651 = vmatprep.subr.bf16.mxu1 %v8752_v35  ;;  %v13764_v22 = vmov 0.0  }
 0x5bf   : > { %v4570_v53 = vpop.permute.xlu1 %4569  ;;  %8653 = vmatpush3.bf16.msra.mxu1 %v8652_v28  ;;  %8643 = vmatprep.mubr.msk.f32.mxu1 %vm8753_vm9, %v13764_v22 }
 0x5c0   : > { %4634 = vst.msk [vmem:[#allocation3 + $0x1f0] sm:$0xff] %vm787_vm2, %v4570_v53  ;;  %v4568_v14 = vpop.permute.xlu0 %4567  ;;  %8646 = vmatprep.subr.mxu1 %v13764_v22 }
 0x5c1   : > { %4633 = vst.msk [vmem:[#allocation3 + $0x1e0] sm:$0xff] %vm787_vm2, %v4568_v14 }
 0x5c3   : > { %v4762_v54 = vpop.permute.xlu1 %4761  ;;  %v5909_v39 = vld [vmem:[#allocation3 + $0x1d0] sm:$0xff] }
 0x5c4   : > { %4826 = vst.msk [vmem:[#allocation3 + $0x1f0] sm:$0xff] %vm980_vm3, %v4762_v54  ;;  %v4760_v30 = vpop.permute.xlu0 %4759  ;;  %v5907_v17 = vld [vmem:[#allocation3 + $0x1c0] sm:$0xff] }
 0x5c5   : > { %4825 = vst.msk [vmem:[#allocation3 + $0x1e0] sm:$0xff] %vm980_vm3, %v4760_v30  ;;  %v5943_v56 = vpack.c.bf16 %v5909_v39, %v5907_v17 }
 0x5c7   : > { %6219 = vmatmul.mubr.bf16.gmra.mrb[120].mxu0 %v5943_v56  ;;  %v4954_v36 = vpop.permute.xlu1 %4953 }
 0x5c8   : > { %5018 = vst.msk [vmem:[#allocation3 + $0x1f0] sm:$0xff] %vm1173_vm4, %v4954_v36  ;;  %v4952_v37 = vpop.permute.xlu0 %4951  ;;  %8599 = vmatprep.mubr.msk.bf16.mxu0 %vm442_vm0, %v5946_v58 }
 0x5c9   : > { %5017 = vst.msk [vmem:[#allocation3 + $0x1e0] sm:$0xff] %vm1173_vm4, %v4952_v37 }
 0x5cb   : > { %v5146_v48 = vpop.permute.xlu1 %5145 }
 0x5cc   : > { %5210 = vst.msk [vmem:[#allocation3 + $0x1f0] sm:$0xff] %vm1366_vm5, %v5146_v48  ;;  %v5144_v4 = vpop.permute.xlu0 %5143 }
 0x5cd   : > { %5209 = vst.msk [vmem:[#allocation3 + $0x1e0] sm:$0xff] %vm1366_vm5, %v5144_v4 }
 0x5cf   : > { %v5338_v31 = vpop.permute.xlu1 %5337 }
 0x5d0   : > { %5402 = vst.msk [vmem:[#allocation3 + $0x1f0] sm:$0xff] %vm1559_vm6, %v5338_v31  ;;  %v5336_v58 = vpop.permute.xlu0 %5335 }
 0x5d1   : > { %5401 = vst.msk [vmem:[#allocation3 + $0x1e0] sm:$0xff] %vm1559_vm6, %v5336_v58 }
 0x5d3   : > { %v5530_v53 = vpop.permute.xlu1 %5529 }
 0x5d4   : > { %5594 = vst.msk [vmem:[#allocation3 + $0x1f0] sm:$0xff] %vm1753_vm7, %v5530_v53  ;;  %v5528_v14 = vpop.permute.xlu0 %5527 }
 0x5d5   : > { %5593 = vst.msk [vmem:[#allocation3 + $0x1e0] sm:$0xff] %vm1753_vm7, %v5528_v14 }
 0x5d6   : > { %v12297_v54 = vpop.f32.mrb[92].mxu0 }
 0x5d7   : > { %v6166_v39 = vpop.f32.mrb[93].mxu0  ;;  %v5722_v30 = vpop.permute.xlu1 %5721 }
 0x5d8   : > { %5786 = vst.msk [vmem:[#allocation3 + $0x1f0] sm:$0xff] %vm1946_vm8, %v5722_v30  ;;  %v5720_v17 = vpop.permute.xlu0 %5719  ;;  %v12300_v56 = vpop.f32.mrb[94].mxu0 }
 0x5d9   : > { %5785 = vst.msk [vmem:[#allocation3 + $0x1e0] sm:$0xff] %vm1946_vm8, %v5720_v17  ;;  %v6169_v36 = vpop.f32.mrb[95].mxu0 }
 0x5df   : > { %v5913_v37 = vld [vmem:[#allocation3 + $0x1f0] sm:$0xff] }
 0x5e0   : > { %v5911_v48 = vld [vmem:[#allocation3 + $0x1e0] sm:$0xff] }
 0x5e1   : > { %v5945_v4 = vpack.c.bf16 %v5913_v37, %v5911_v48 }
 0x5e3   : > { %6227 = vmatmul.mubr.bf16.gmra.mrb[124].mxu0 %v5945_v4 }
 0x5f2   : > { %v12303_v6 = vpop.f32.mrb[96].mxu0 }
 0x5f3   : > { %v6174_v55 = vpop.f32.mrb[97].mxu0 }
 0x5f4   : > { %v12305_v35 = vpop.f32.mrb[98].mxu0 }
 0x5f5   : > { %v6177_v28 = vpop.f32.mrb[99].mxu0 }
 0x5f6   : > { %v12324_v28 = vld [vmem:[%s13689_s6] ss:$0 sm:$0xff] }
 0x5f7   : > { %v12348_v45 = vadd.f32 %v12324_v28, %v12123_v1  ;;  %v12362_v1 = vadd.f32 %v12324_v28, %v12167_v61  ;;  %v12378_v61 = vadd.f32 %v12324_v28, %v12230_v63  ;;  %v12410_v18 = vadd.f32 %v12324_v28, %v12271_v62 }
 0x5f8   : > { %v12426_v62 = vadd.f32 %v12324_v28, %v12303_v6 }
 0x5f9   : > { %v6240_v49 = vsel %vm442_vm0, %v12348_v45, 0.0 }
 0x60e   : > { %v12307_v31 = vpop.f32.mrb[100].mxu0 }
 0x60f   : > { %v6182_v58 = vpop.f32.mrb[101].mxu0 }
 0x610   : > { %v12309_v53 = vpop.f32.mrb[102].mxu0  ;;  %v12328_v58 = vadd.f32 %v12324_v28, %v12072_v16 }
 0x611   : > { %v6185_v14 = vpop.f32.mrb[103].mxu0 }
 0x612   : > { %v12332_v14 = vadd.f32 %v12324_v28, %v12070_v21 }
 0x62a   : > { %v12311_v39 = vpop.f32.mrb[104].mxu0 }
 0x62b   : > { %v6190_v30 = vpop.f32.mrb[105].mxu0 }
 0x62c   : > { %v12313_v17 = vpop.f32.mrb[106].mxu0  ;;  %v12336_v30 = vadd.f32 %v12324_v28, %v12121_v8  ;;  %v12354_v8 = vadd.f32 %v12324_v28, %v12164_v47  ;;  %v12374_v47 = vadd.f32 %v12324_v28, %v12214_v57  ;;  %v12390_v57 = vadd.f32 %v12324_v28, %v12249_v10 }
 0x62d   : > { %v6193_v36 = vpop.f32.mrb[107].mxu0 }
 0x62e   : > { %v6236_v36 = vsel %vm442_vm0, %v12328_v58, 0.0  ;;  %v6238_v16 = vsel %vm442_vm0, %v12336_v30, 0.0  ;;  %v6242_v5 = vsel %vm442_vm0, %v12354_v8, 0.0 }
 0x646   : > { %v12315_v37 = vpop.f32.mrb[108].mxu0 }
 0x647   : > { %v6198_v48 = vpop.f32.mrb[109].mxu0 }
 0x648   : > { %v12317_v4 = vpop.f32.mrb[110].mxu0 }
 0x649   : > { %v6201_v55 = vpop.f32.mrb[111].mxu0 }
 0x64a   : > { %v6235_v55 = vsel %vm442_vm0, %v12332_v14, 0.0 }
 0x64b   : > { %v6237_v41 = vadd.f32 %v6236_v36, %v6235_v55  ;;  %v12366_v36 = vadd.f32 %v12324_v28, %v12211_v38  ;;  %v12386_v38 = vadd.f32 %v12324_v28, %v12233_v0  ;;  %v12402_v0 = vadd.f32 %v12324_v28, %v12268_v40 }
 0x64c   : > { %v12414_v40 = vadd.f32 %v12324_v28, %v12297_v54 }
 0x64d   : > { %v6239_v44 = vadd.f32 %v6238_v16, %v6237_v41  ;;  %v6246_v41 = vsel %vm442_vm0, %v12366_v36, 0.0  ;;  %v6252_v63 = vsel %vm442_vm0, %v12386_v38, 0.0  ;;  %v6258_v32 = vsel %vm442_vm0, %v12402_v0, 0.0 }
 0x662   : > { %v12340_v48 = vpop.f32.mrb[112].mxu0 }
 0x663   : > { %v6206_v21 = vpop.f32.mrb[113].mxu0 }
 0x664   : > { %v12350_v13 = vpop.f32.mrb[114].mxu0  ;;  %v6241_v21 = vadd.f32 %v6240_v49, %v6239_v44  ;;  %v6248_v44 = vsel %vm442_vm0, %v12374_v47, 0.0 }
 0x665   : > { %v6209_v15 = vpop.f32.mrb[115].mxu0 }
 0x666   : > { %v6243_v55 = vadd.f32 %v6242_v5, %v6241_v21  ;;  %v6244_v15 = vsel %vm442_vm0, %v12362_v1, 0.0  ;;  %v6250_v5 = vsel %vm442_vm0, %v12378_v61, 0.0 }
 0x668   : > { %v6245_v16 = vadd.f32 %v6244_v15, %v6243_v55  ;;  %v6254_v15 = vsel %vm442_vm0, %v12390_v57, 0.0 }
 0x66a   : > { %v6247_v49 = vadd.f32 %v6246_v41, %v6245_v16  ;;  %v12398_v41 = vadd.f32 %v12324_v28, %v12252_v33 }
 0x66c   : > { %v6249_v21 = vadd.f32 %v6248_v44, %v6247_v49  ;;  %v6256_v10 = vsel %vm442_vm0, %v12398_v41, 0.0 }
 0x66e   : > { %v6251_v55 = vadd.f32 %v6250_v5, %v6249_v21 }
 0x670   : > { %v6253_v16 = vadd.f32 %v6252_v63, %v6251_v55 }
 0x672   : > { %v6255_v49 = vadd.f32 %v6254_v15, %v6253_v16  ;;  %v6260_v15 = vsel %vm442_vm0, %v12410_v18, 0.0  ;;  %v6262_v16 = vsel %vm442_vm0, %v12414_v40, 0.0 }
 0x674   : > { %v6257_v55 = vadd.f32 %v6256_v10, %v6255_v49  ;;  %v12434_v10 = vadd.f32 %v12324_v28, %v12305_v35  ;;  %v12450_v35 = vadd.f32 %v12324_v28, %v12311_v39 }
 0x676   : > { %v6259_v63 = vadd.f32 %v6258_v32, %v6257_v55  ;;  %v6266_v32 = vsel %vm442_vm0, %v12426_v62, 0.0  ;;  %v6268_v6 = vsel %vm442_vm0, %v12434_v10, 0.0 }
 0x678   : > { %v6261_v42 = vadd.f32 %v6260_v15, %v6259_v63  ;;  %v12446_v63 = vadd.f32 %v12324_v28, %v12309_v53  ;;  %v12462_v53 = vadd.f32 %v12324_v28, %v12315_v37 }
 0x67a   : > { %v6263_v49 = vadd.f32 %v6262_v16, %v6261_v42  ;;  %v6278_v50 = vsel %vm442_vm0, %v12462_v53, 0.0 }
 0x67e   : > { %v6212_v44 = vpop.f32.mrb[116].mxu0 }
 0x67f   : > { %v6214_v5 = vpop.f32.mrb[117].mxu0 }
 0x680   : > { %v6215_v21 = vpop.f32.mrb[118].mxu0  ;;  %v12422_v5 = vadd.f32 %v12324_v28, %v12300_v56  ;;  %v12438_v56 = vadd.f32 %v12324_v28, %v12307_v31  ;;  %v6272_v31 = vsel %vm442_vm0, %v12446_v63, 0.0 }
 0x681   : > { %v6217_v33 = vpop.f32.mrb[119].mxu0 }
 0x682   : > { %v6264_v54 = vsel %vm442_vm0, %v12422_v5, 0.0  ;;  %v6270_v42 = vsel %vm442_vm0, %v12438_v56, 0.0 }
 0x683   : > { %v6265_v33 = vadd.f32 %v6264_v54, %v6263_v49  ;;  %v6274_v49 = vsel %vm442_vm0, %v12450_v35, 0.0  ;;  %v12458_v54 = vadd.f32 %v12324_v28, %v12313_v17  ;;  %v12470_v17 = vadd.f32 %v12324_v28, %v12317_v4 }
 0x684   : > { %v12485_v4 = vadd.f32 %v12324_v28, %v6212_v44 }
 0x685   : > { %v6267_v55 = vadd.f32 %v6266_v32, %v6265_v33 }
 0x687   : > { %v6269_v15 = vadd.f32 %v6268_v6, %v6267_v55 }
 0x689   : > { %v6271_v16 = vadd.f32 %v6270_v42, %v6269_v15  ;;  %v6276_v42 = vsel %vm442_vm0, %v12458_v54, 0.0 }
 0x68b   : > { %v6273_v32 = vadd.f32 %v6272_v31, %v6271_v16  ;;  %v12474_v31 = vadd.f32 %v12324_v28, %v12340_v48 }
 0x68d   : > { %v6275_v39 = vadd.f32 %v6274_v49, %v6273_v32  ;;  %v6280_v49 = vsel %vm442_vm0, %v12470_v17, 0.0  ;;  %v6282_v32 = vsel %vm442_vm0, %v12474_v31, 0.0 }
 0x68f   : > { %v6277_v16 = vadd.f32 %v6276_v42, %v6275_v39  ;;  %v12492_v42 = vadd.f32 %v12324_v28, %v6215_v21 }
 0x691   : > { %v6279_v37 = vadd.f32 %v6278_v50, %v6277_v16  ;;  %v6286_v50 = vsel %vm442_vm0, %v12485_v4, 0.0 }
 0x69a   : > { %v6220_v33 = vpop.f32.mrb[120].mxu0 }
 0x69b   : > { %v6222_v55 = vpop.f32.mrb[121].mxu0  ;;  %v12495_v2 = vadd.f32 %v12324_v28, %v6220_v33 }
 0x69c   : > { %v6223_v6 = vpop.f32.mrb[122].mxu0  ;;  %v12482_v55 = vadd.f32 %v12324_v28, %v12350_v13 }
 0x69d   : > { %v6225_v15 = vpop.f32.mrb[123].mxu0  ;;  %v6290_v44 = vsel %vm442_vm0, %v12495_v2, 0.0 }
 0x69e   : > { %v6281_v15 = vadd.f32 %v6280_v49, %v6279_v37  ;;  %v6284_v48 = vsel %vm442_vm0, %v12482_v55, 0.0  ;;  %v6288_v37 = vsel %vm442_vm0, %v12492_v42, 0.0  ;;  %v12502_v49 = vadd.f32 %v12324_v28, %v6223_v6 }
 0x6a0   : > { %v6283_v39 = vadd.f32 %v6282_v32, %v6281_v15  ;;  %v6292_v21 = vsel %vm442_vm0, %v12502_v49, 0.0 }
 0x6a2   : > { %v6285_v16 = vadd.f32 %v6284_v48, %v6283_v39 }
 0x6a4   : > { %v6287_v13 = vadd.f32 %v6286_v50, %v6285_v16 }
 0x6a6   : > { %v6289_v32 = vadd.f32 %v6288_v37, %v6287_v13 }
 0x6a8   : > { %v6291_v15 = vadd.f32 %v6290_v44, %v6289_v32 }
 0x6aa   : > { %v6293_v48 = vadd.f32 %v6292_v21, %v6291_v15  ;;  %v13765_v21 = vmov 0  }
 0x6b6   : > { %v6228_v43 = vpop.f32.mrb[124].mxu0 }
 0x6b7   : > { %v12507_v39 = vadd.f32 %v12324_v28, %v6228_v43  ;;  %v6230_v33 = vpop.f32.mrb[125].mxu0 }
 0x6b8   : > { %v6231_v50 = vpop.f32.mrb[126].mxu0 }
 0x6b9   : > { %v6294_v16 = vsel %vm442_vm0, %v12507_v39, 0.0  ;;  %v12512_v52 = vadd.f32 %v12324_v28, %v6231_v50  ;;  %v6233_v6 = vpop.f32.mrb[127].mxu0  ;;  %v6383_v28 = vld [vmem:[%s13692_s9] sm:$0xf] }
 0x6ba   : > { %v6295_v11 = vadd.f32 %v6294_v16, %v6293_v48  ;;  %v6634_v16 = vld [vmem:[#allocation2 + $0x9] sm:$0xff]  ;;  %v6384_v6 = vld [vmem:[%s13693_s10] sm:$0x1] }
 0x6bb   : > { %v6296_v13 = vsel %vm442_vm0, %v12512_v52, 0.0  ;;  %6699 = vrot.lane.b32.xlu1 %v6634_v16, %s8746_s21 }
 0x6bc   : > { %v6297_v37 = vadd.f32 %v6296_v13, %v6295_v11 }
 0x6be   : > { %v6298_v44 = vrot.slane %v6297_v37, 4 }
 0x6c0   : > { %v6299_v32 = vadd.f32 %v6298_v44, %v6297_v37 }
 0x6c2   : > { %v6300_v25 = vrot.slane %v6299_v32, 2 }
 0x6c4   : > { %v6301_v43 = vadd.f32 %v6300_v25, %v6299_v32  ;;  %v6308_v25 = vld [vmem:[%s13691_s8] sm:$0x1] }
 0x6c6   : > { %v6302_v29 = vrot.slane %v6301_v43, 1 }
 0x6c8   : > { %v6303_v33 = vadd.f32 %v6302_v29, %v6301_v43 }
 0x6ca   : > { %v6305_v15 = vmul.f32 0.00390625, %v6303_v33 }
 0x6cc   : > { %8644 = vmatmul.mubr.msk.f32.vlgmr.msra.gmra.mrb[64].mxu1 %vm442_vm0, %v6305_v15  ;;  %v6469_v15 = vlaneseq }
 0x6cd   : > { %8648 = vmatprep.mubr.msk.f32.mxu1 %vm8753_vm9, %v13764_v22  ;;  %8647 = vmatpush3.msk.msra.mxu1 %vm6389_vm10, %v6383_v28  ;;  %v6633_v22 = vld [vmem:[#allocation2 + $0x1] sm:$0xff] }
 0x6ce   : > { %8654 = vmatprep.subr.bf16.mxu1 %v13765_v21  ;;  %6697 = vrot.lane.b32.xlu0 %v6633_v22, %s8746_s21  ;;  %v6470_v28 = vshrl.u32 %v6469_v15, 7 }
 0x79f   : > { %v6378_v11 = vpop.f32.mrb[64].mxu1 }
 0x7a0   : > { %v6379_v29 = vadd.f32 %v6378_v11, %v6308_v25  ;;  %v8645_v48 = vpop.f32.mrb[65].mxu1  ;;  %v6471_v25 = vsub.s32 0, %v6470_v28 }
 0x7a1   : > { %v6570_v48 = vld [vmem:[#allocation2 + $0x8] sm:$0xff] }
 0x7a2   : > { %v6382_v50 = vmax.f32 %v6379_v29, 0.0  ;;  %6602 = vst.msk [vmem:[#allocation3 + $0x10] sm:$0xff] %vm442_vm0, %v6570_v48  ;;  %v13773_v48 = vld [vmem:[#allocation11_spill] sm:$0xff] }
 0x7a4   : > { %8649 = vmatmul.mubr.msk.f32.vlgmr.msra.gmra.mrb[66].mxu1 %vm6385_vm11, %v6382_v50  ;;  %v6569_v50 = vld [vmem:[#allocation2] sm:$0xff] }
 0x7a5   : > { %6601 = vst.msk [vmem:[#allocation3] sm:$0xff] %vm442_vm0, %v6569_v50 }
 0x877   : > { %v6459_v13 = vpop.f32.mrb[66].mxu1 }
 0x878   : > { %v6460_v37 = vadd.f32 %v6459_v13, %v6384_v6  ;;  %v8650_v44 = vpop.f32.mrb[67].mxu1 }
 0x87a   : > { %v8603_v32 = vmul.f32 -1.442695, %v6460_v37 }
 0x87c   : > { %8727 = vpow2.f32 %v8603_v32 }
 0x886   : > { %v8728_v43 = vpop.eup %8727 }
 0x887   : > { %v6466_v33 = vadd.f32 1.0, %v8728_v43  ;;  %v6700_v43 = vpop.permute.xlu1 %6699 }
 0x888   : > { %6794 = vst.msk [vmem:[#allocation3 + $0x10] sm:$0xff] %vm787_vm2, %v6700_v43 }
 0x889   : > { %8729 = vrcp.f32 %v6466_v33 }
 0x893   : > { %v8730_v11 = vpop.eup %8729 }
 0x894   : > { %v6472_v29 = vrot.slane %v8730_v11, %v6471_v25  ;;  %v13772_v11 = vld [vmem:[#allocation10_spill] sm:$0xff] }
 0x896   : > { %v6473_v16 = vmul.f32 %v6472_v29, %v12332_v14  ;;  %v6474_v22 = vmul.f32 %v6472_v29, %v12328_v58  ;;  %v6475_v21 = vmul.f32 %v6472_v29, %v12336_v30  ;;  %v6476_v6 = vmul.f32 %v6472_v29, %v12348_v45 }
 0x897   : > { %v6477_v13 = vmul.f32 %v6472_v29, %v12354_v8  ;;  %v6478_v37 = vmul.f32 %v6472_v29, %v12362_v1  ;;  %v6479_v44 = vmul.f32 %v6472_v29, %v12366_v36  ;;  %v6480_v32 = vmul.f32 %v6472_v29, %v12374_v47 }
 0x898   : > { %v6481_v14 = vmul.f32 %v6472_v29, %v12378_v61  ;;  %v6482_v58 = vmul.f32 %v6472_v29, %v12386_v38  ;;  %v6483_v30 = vmul.f32 %v6472_v29, %v12390_v57  ;;  %v6484_v45 = vmul.f32 %v6472_v29, %v12398_v41  ;;  %v6698_v57 = vpop.permute.xlu0 %6697 }
 0x899   : > { %v6485_v33 = vmul.f32 %v6472_v29, %v12402_v0  ;;  %v6486_v15 = vmul.f32 %v6472_v29, %v12410_v18  ;;  %v6487_v8 = vmul.f32 %v6472_v29, %v12414_v40  ;;  %v6488_v1 = vmul.f32 %v6472_v29, %v12422_v5  ;;  %6793 = vst.msk [vmem:[#allocation3] sm:$0xff] %vm787_vm2, %v6698_v57 }
 0x89a   : > { %v6489_v36 = vmul.f32 %v6472_v29, %v12426_v62  ;;  %v6490_v47 = vmul.f32 %v6472_v29, %v12434_v10  ;;  %v6491_v61 = vmul.f32 %v6472_v29, %v12438_v56  ;;  %v6492_v38 = vmul.f32 %v6472_v29, %v12446_v63 }
 0x89b   : > { %v6493_v41 = vmul.f32 %v6472_v29, %v12450_v35  ;;  %v6494_v0 = vmul.f32 %v6472_v29, %v12458_v54  ;;  %v6495_v18 = vmul.f32 %v6472_v29, %v12462_v53  ;;  %v6496_v40 = vmul.f32 %v6472_v29, %v12470_v17 }
 0x89c   : > { %v6497_v5 = vmul.f32 %v6472_v29, %v12474_v31  ;;  %v6498_v62 = vmul.f32 %v6472_v29, %v12482_v55  ;;  %v6499_v10 = vmul.f32 %v6472_v29, %v12485_v4  ;;  %v6500_v56 = vmul.f32 %v6472_v29, %v12492_v42 }
 0x89d   : > { %v6501_v63 = vmul.f32 %v6472_v29, %v12495_v2  ;;  %v6502_v35 = vmul.f32 %v6472_v29, %v12502_v49  ;;  %v6503_v54 = vmul.f32 %v6472_v29, %v12507_v39  ;;  %v6504_v53 = vmul.f32 %v6472_v29, %v12512_v52 }
 0x89e   : > { %v6505_v17 = vadd.f32 %v6473_v16, %v9811_v46  ;;  %v6506_v28 = vadd.f32 %v6474_v22, %v9817_v12  ;;  %v6507_v31 = vadd.f32 %v6475_v21, %v9876_v60  ;;  %v6508_v55 = vadd.f32 %v6476_v6, %v9882_v51  ;;  %v13770_v21 = vld [vmem:[#allocation8_spill] sm:$0xff]  ;;  %v13775_v6 = vld [vmem:[#allocation13_spill] sm:$0xff] }
 0x89f   : > { %v6509_v4 = vadd.f32 %v6477_v13, %v9942_v23  ;;  %v6510_v42 = vadd.f32 %v6478_v37, %v9948_v27  ;;  %v6511_v2 = vadd.f32 %v6479_v44, %v10029_v9  ;;  %v6512_v49 = vadd.f32 %v6480_v32, %v10036_v26  ;;  %v13766_v27 = vld [vmem:[#allocation4_spill] sm:$0xff]  ;;  %v13767_v26 = vld [vmem:[#allocation5_spill] sm:$0xff]  ;;  %v13776_v37 = vld [vmem:[#allocation14_spill] sm:$0xff] }
 0x8a0   : > { %v6513_v39 = vadd.f32 %v6481_v14, %v10115_v20  ;;  %v6514_v52 = vadd.f32 %v6482_v58, %v10121_v24  ;;  %v6515_v46 = vadd.f32 %v6483_v30, %v10184_v7  ;;  %v6516_v12 = vadd.f32 %v6484_v45, %v10190_v19  ;;  %6537 = vst.msk [vmem:[#allocation2 + $0x19] sm:$0xff] %vm442_vm0, %v6505_v17  ;;  %v13768_v24 = vld [vmem:[#allocation6_spill] sm:$0xff]  ;;  %v13769_v19 = vld [vmem:[#allocation7_spill] sm:$0xff]  ;;  %v13774_v16 = vld [vmem:[#allocation12_spill] sm:$0xff] }
 0x8a1   : > { %6538 = vst.msk [vmem:[#allocation2 + $0x21] sm:$0xff] %vm442_vm0, %v6506_v28  ;;  %6539 = vst.msk [vmem:[#allocation2 + $0x31] sm:$0xff] %vm442_vm0, %v6507_v31  ;;  %v6517_v60 = vadd.f32 %v6485_v33, %v10257_v59  ;;  %v6518_v51 = vadd.f32 %v6486_v15, %v10263_v3  ;;  %v6519_v23 = vadd.f32 %v6487_v8, %v10338_v34  ;;  %v13771_v34 = vld [vmem:[#allocation9_spill] sm:$0xff]  ;;  %v13777_v32 = vld [vmem:[#allocation15_spill] sm:$0xff] }
 0x8a2   : > { %6540 = vst.msk [vmem:[#allocation2 + $0x39] sm:$0xff] %vm442_vm0, %v6508_v55  ;;  %v6520_v9 = vadd.f32 %v6488_v1, %v13766_v27  ;;  %6541 = vst.msk [vmem:[#allocation2 + $0x49] sm:$0xff] %vm442_vm0, %v6509_v4  ;;  %v6521_v20 = vadd.f32 %v6489_v36, %v13767_v26  ;;  %v6522_v7 = vadd.f32 %v6490_v47, %v13768_v24  ;;  %v13778_v58 = vld [vmem:[#allocation16_spill] sm:$0xff]  ;;  %v13779_v45 = vld [vmem:[#allocation17_spill] sm:$0xff] }
 0x8a3   : > { %6542 = vst.msk [vmem:[#allocation2 + $0x51] sm:$0xff] %vm442_vm0, %v6510_v42  ;;  %6543 = vst.msk [vmem:[#allocation2 + $0x61] sm:$0xff] %vm442_vm0, %v6511_v2  ;;  %v6523_v59 = vadd.f32 %v6491_v61, %v13769_v19  ;;  %v6524_v3 = vadd.f32 %v6492_v38, %v13770_v21  ;;  %v6525_v25 = vadd.f32 %v6493_v41, %v13771_v34  ;;  %v13780_v33 = vld [vmem:[#allocation18_spill] sm:$0xff]  ;;  %v13781_v8 = vld [vmem:[#allocation19_spill] sm:$0xff] }
 0x8a4   : > { %6544 = vst.msk [vmem:[#allocation2 + $0x69] sm:$0xff] %vm442_vm0, %v6512_v49  ;;  %6545 = vst.msk [vmem:[#allocation2 + $0x79] sm:$0xff] %vm442_vm0, %v6513_v39  ;;  %v6526_v29 = vadd.f32 %v6494_v0, %v13772_v11  ;;  %v6527_v50 = vadd.f32 %v6495_v18, %v13773_v48  ;;  %v6528_v22 = vadd.f32 %v6496_v40, %v13774_v16  ;;  %v13782_v36 = vld [vmem:[#allocation20_spill] sm:$0xff] }
 0x8a5   : > { %6546 = vst.msk [vmem:[#allocation2 + $0x81] sm:$0xff] %vm442_vm0, %v6514_v52  ;;  %6547 = vst.msk [vmem:[#allocation2 + $0x91] sm:$0xff] %vm442_vm0, %v6515_v46  ;;  %v6529_v13 = vadd.f32 %v6497_v5, %v13775_v6  ;;  %v6530_v44 = vadd.f32 %v6498_v62, %v13776_v37  ;;  %v6531_v14 = vadd.f32 %v6499_v10, %v13777_v32 }
 0x8a6   : > { %6548 = vst.msk [vmem:[#allocation2 + $0x99] sm:$0xff] %vm442_vm0, %v6516_v12  ;;  %6549 = vst.msk [vmem:[#allocation2 + $0xa9] sm:$0xff] %vm442_vm0, %v6517_v60  ;;  %v6532_v30 = vadd.f32 %v6500_v56, %v13778_v58  ;;  %v6533_v43 = vadd.f32 %v6501_v63, %v13779_v45  ;;  %v6534_v15 = vadd.f32 %v6502_v35, %v13780_v33 }
 0x8a7   : > { %6550 = vst.msk [vmem:[#allocation2 + $0xb1] sm:$0xff] %vm442_vm0, %v6518_v51  ;;  %6551 = vst.msk [vmem:[#allocation2 + $0xc1] sm:$0xff] %vm442_vm0, %v6519_v23  ;;  %v6535_v1 = vadd.f32 %v6503_v54, %v13781_v8  ;;  %v6536_v47 = vadd.f32 %v6504_v53, %v13782_v36  ;;  %v6635_v38 = vld [vmem:[#allocation2 + $0x19] sm:$0xff] }
 0x8a8   : > { %6552 = vst.msk [vmem:[#allocation2 + $0xc9] sm:$0xff] %vm442_vm0, %v6520_v9  ;;  %6553 = vst.msk [vmem:[#allocation2 + $0xd9] sm:$0xff] %vm442_vm0, %v6521_v20  ;;  %v6636_v61 = vld [vmem:[#allocation2 + $0x21] sm:$0xff]  ;;  %6701 = vrot.lane.b32.xlu0 %v6635_v38, %s8746_s21  ;;  %v6637_v5 = vld [vmem:[#allocation2 + $0x31] sm:$0xff] }
 0x8a9   : > { %6554 = vst.msk [vmem:[#allocation2 + $0xe1] sm:$0xff] %vm442_vm0, %v6522_v7  ;;  %6555 = vst.msk [vmem:[#allocation2 + $0xf1] sm:$0xff] %vm442_vm0, %v6523_v59  ;;  %6703 = vrot.lane.b32.xlu1 %v6636_v61, %s8746_s21  ;;  %v12633_v57 = vld [vmem:[#allocation2 + $0x32] sm:$0xff]  ;;  %v12635_v41 = vld [vmem:[#allocation2 + $0x3a] sm:$0xff] }
 0x8aa   : > { %6556 = vst.msk [vmem:[#allocation2 + $0xf9] sm:$0xff] %vm442_vm0, %v6524_v3  ;;  %6557 = vst.msk [vmem:[#allocation2 + $0x109] sm:$0xff] %vm442_vm0, %v6525_v25  ;;  %v6638_v40 = vld [vmem:[#allocation2 + $0x39] sm:$0xff]  ;;  %v12651_v62 = vld [vmem:[#allocation2 + $0x51] sm:$0xff] }
 0x8ab   : > { %6558 = vst.msk [vmem:[#allocation2 + $0x111] sm:$0xff] %vm442_vm0, %v6526_v29  ;;  %6559 = vst.msk [vmem:[#allocation2 + $0x121] sm:$0xff] %vm442_vm0, %v6527_v50  ;;  %v12637_v0 = vld [vmem:[#allocation2 + $0x62] sm:$0xff]  ;;  %v12643_v18 = vld [vmem:[#allocation2 + $0x6a] sm:$0xff] }
 0x8ac   : > { %6560 = vst.msk [vmem:[#allocation2 + $0x129] sm:$0xff] %vm442_vm0, %v6528_v22  ;;  %6561 = vst.msk [vmem:[#allocation2 + $0x139] sm:$0xff] %vm442_vm0, %v6529_v13  ;;  %6705 = vrot.lane.b32.xlu0 %v6637_v5, %s8746_s21  ;;  %v12653_v10 = vld [vmem:[#allocation2 + $0x49] sm:$0xff]  ;;  %v12665_v4 = vld [vmem:[#allocation2 + $0x61] sm:$0xff] }
 0x8ad   : > { %6562 = vst.msk [vmem:[#allocation2 + $0x141] sm:$0xff] %vm442_vm0, %v6530_v44  ;;  %6563 = vst.msk [vmem:[#allocation2 + $0x151] sm:$0xff] %vm442_vm0, %v6531_v14  ;;  %6707 = vrot.lane.b32.xlu1 %v6638_v40, %s8746_s21  ;;  %v12659_v17 = vld [vmem:[#allocation2 + $0x50] sm:$0xff]  ;;  %v12661_v28 = vld [vmem:[#allocation2 + $0x48] sm:$0xff] }
 0x8ae   : > { %6564 = vst.msk [vmem:[#allocation2 + $0x159] sm:$0xff] %vm442_vm0, %v6532_v30  ;;  %6565 = vst.msk [vmem:[#allocation2 + $0x169] sm:$0xff] %vm442_vm0, %v6533_v43  ;;  %v12663_v55 = vld [vmem:[#allocation2 + $0x69] sm:$0xff]  ;;  %v12676_v2 = vld [vmem:[#allocation2 + $0x60] sm:$0xff] }
 0x8af   : > { %6566 = vst.msk [vmem:[#allocation2 + $0x171] sm:$0xff] %vm442_vm0, %v6534_v15  ;;  %6567 = vst.msk [vmem:[#allocation2 + $0x181] sm:$0xff] %vm442_vm0, %v6535_v1  ;;  %v12667_v42 = vld [vmem:[#allocation2 + $0x68] sm:$0xff]  ;;  %v12678_v49 = vld [vmem:[#allocation2 + $0x80] sm:$0xff] }
 0x8b0   : > { %6568 = vst.msk [vmem:[#allocation2 + $0x189] sm:$0xff] %vm442_vm0, %v6536_v47  ;;  %8009 = vst.msk [vmem:[#allocation3 + $0x8] sm:$0xff] %vm442_vm0, %v12633_v57  ;;  %6709 = vrot.lane.b32.xlu0 %v12653_v10, %s8746_s21  ;;  %v12680_v39 = vld [vmem:[#allocation2 + $0x78] sm:$0xff]  ;;  %v12687_v52 = vld [vmem:[#allocation2 + $0x81] sm:$0xff] }
 0x8b1   : > { %8010 = vst.msk [vmem:[#allocation3 + $0x18] sm:$0xff] %vm442_vm0, %v12635_v41  ;;  %8013 = vst.msk [vmem:[#allocation3 + $0x48] sm:$0xff] %vm442_vm0, %v12637_v0  ;;  %6711 = vrot.lane.b32.xlu1 %v12651_v62, %s8746_s21  ;;  %v12689_v46 = vld [vmem:[#allocation2 + $0x82] sm:$0xff]  ;;  %v12691_v12 = vld [vmem:[#allocation2 + $0x7a] sm:$0xff] }
 0x8b2   : > { %8014 = vst.msk [vmem:[#allocation3 + $0x58] sm:$0xff] %vm442_vm0, %v12643_v18  ;;  %6608 = vst.msk [vmem:[#allocation3 + $0x70] sm:$0xff] %vm442_vm0, %v12659_v17  ;;  %v6572_v60 = vld [vmem:[#allocation2 + $0x20] sm:$0xff]  ;;  %v6571_v23 = vld [vmem:[#allocation2 + $0x18] sm:$0xff] }
 0x8b3   : > { %6607 = vst.msk [vmem:[#allocation3 + $0x60] sm:$0xff] %vm442_vm0, %v12661_v28  ;;  %6610 = vst.msk [vmem:[#allocation3 + $0x90] sm:$0xff] %vm442_vm0, %v12667_v42  ;;  %v12699_v51 = vld [vmem:[#allocation2 + $0x79] sm:$0xff]  ;;  %v12704_v9 = vld [vmem:[#allocation2 + $0x90] sm:$0xff] }
 0x8b4   : > { %6713 = vrot.lane.b32.xlu0 %v12665_v4, %s8746_s21  ;;  %6609 = vst.msk [vmem:[#allocation3 + $0x80] sm:$0xff] %vm442_vm0, %v12676_v2  ;;  %6612 = vst.msk [vmem:[#allocation3 + $0xb0] sm:$0xff] %vm442_vm0, %v12678_v49  ;;  %v12702_v27 = vld [vmem:[#allocation2 + $0x98] sm:$0xff]  ;;  %v6573_v20 = vld [vmem:[#allocation2 + $0x30] sm:$0xff] }
 0x8b5   : > { %6715 = vrot.lane.b32.xlu1 %v12663_v55, %s8746_s21  ;;  %6611 = vst.msk [vmem:[#allocation3 + $0xa0] sm:$0xff] %vm442_vm0, %v12680_v39  ;;  %6604 = vst.msk [vmem:[#allocation3 + $0x30] sm:$0xff] %vm442_vm0, %v6572_v60  ;;  %v6574_v26 = vld [vmem:[#allocation2 + $0x38] sm:$0xff]  ;;  %v12723_v19 = vld [vmem:[#allocation2 + $0xb0] sm:$0xff] }
 0x8b6   : > { %8015 = vst.msk [vmem:[#allocation3 + $0x68] sm:$0xff] %vm442_vm0, %v12691_v12  ;;  %8016 = vst.msk [vmem:[#allocation3 + $0x78] sm:$0xff] %vm442_vm0, %v12689_v46  ;;  %v12715_v24 = vld [vmem:[#allocation2 + $0x9a] sm:$0xff]  ;;  %v12721_v7 = vld [vmem:[#allocation2 + $0x92] sm:$0xff] }
 0x8b7   : > { %v8042_v56 = vld [vmem:[#allocation3 + $0x8] sm:$0xff]  ;;  %6603 = vst.msk [vmem:[#allocation3 + $0x20] sm:$0xff] %vm442_vm0, %v6571_v23  ;;  %6614 = vst.msk [vmem:[#allocation3 + $0xd0] sm:$0xff] %vm442_vm0, %v12702_v27  ;;  %v12725_v59 = vld [vmem:[#allocation2 + $0xa8] sm:$0xff] }
 0x8b8   : > { %v8044_v63 = vld [vmem:[#allocation3 + $0x18] sm:$0xff]  ;;  %v8050_v35 = vld [vmem:[#allocation3 + $0x48] sm:$0xff]  ;;  %6613 = vst.msk [vmem:[#allocation3 + $0xc0] sm:$0xff] %vm442_vm0, %v12704_v9  ;;  %6606 = vst.msk [vmem:[#allocation3 + $0x50] sm:$0xff] %vm442_vm0, %v6574_v26  ;;  %6717 = vrot.lane.b32.xlu0 %v12699_v51, %s8746_s21 }
 0x8b9   : > { %v8106_v54 = vpack.c.bf16 %v8044_v63, %v8042_v56  ;;  %v8052_v53 = vld [vmem:[#allocation3 + $0x58] sm:$0xff]  ;;  %6719 = vrot.lane.b32.xlu1 %v12687_v52, %s8746_s21  ;;  %6605 = vst.msk [vmem:[#allocation3 + $0x40] sm:$0xff] %vm442_vm0, %v6573_v20  ;;  %8018 = vst.msk [vmem:[#allocation3 + $0x98] sm:$0xff] %vm442_vm0, %v12715_v24  ;;  %v12731_v21 = vld [vmem:[#allocation2 + $0x99] sm:$0xff] }
 0x8ba   : > { %v8110_v31 = vpack.c.bf16 %v8052_v53, %v8050_v35  ;;  %6616 = vst.msk [vmem:[#allocation3 + $0xf0] sm:$0xff] %vm442_vm0, %v12723_v19  ;;  %6615 = vst.msk [vmem:[#allocation3 + $0xe0] sm:$0xff] %vm442_vm0, %v12725_v59  ;;  %v12737_v3 = vld [vmem:[#allocation2 + $0xc8] sm:$0xff]  ;;  %v12739_v34 = vld [vmem:[#allocation2 + $0xc0] sm:$0xff] }
 0x8bb   : > { %8614 = vmatprep.mubr.msk.bf16.mxu0 %vm442_vm0, %v8106_v54  ;;  %v12741_v25 = vld [vmem:[#allocation2 + $0xe0] sm:$0xff]  ;;  %8017 = vst.msk [vmem:[#allocation3 + $0x88] sm:$0xff] %vm442_vm0, %v12721_v7  ;;  %v12745_v11 = vld [vmem:[#allocation2 + $0x91] sm:$0xff]  ;;  %6618 = vst.msk [vmem:[#allocation3 + $0x110] sm:$0xff] %vm442_vm0, %v12737_v3 }
 0x8bc   : > { %8616 = vmatprep.mubr.msk.bf16.mxu1 %vm442_vm0, %v8110_v31  ;;  %6617 = vst.msk [vmem:[#allocation3 + $0x100] sm:$0xff] %vm442_vm0, %v12739_v34  ;;  %6620 = vst.msk [vmem:[#allocation3 + $0x130] sm:$0xff] %vm442_vm0, %v12741_v25  ;;  %v12753_v29 = vld [vmem:[#allocation2 + $0xd8] sm:$0xff]  ;;  %v12757_v50 = vld [vmem:[#allocation2 + $0xf0] sm:$0xff]  ;;  %6721 = vrot.lane.b32.xlu0 %v12745_v11, %s8746_s21 }
 0x8bd   : > { %v12755_v48 = vld [vmem:[#allocation2 + $0xf8] sm:$0xff]  ;;  %6619 = vst.msk [vmem:[#allocation3 + $0x120] sm:$0xff] %vm442_vm0, %v12753_v29  ;;  %6621 = vst.msk [vmem:[#allocation3 + $0x140] sm:$0xff] %vm442_vm0, %v12757_v50  ;;  %v12765_v16 = vld [vmem:[#allocation2 + $0x110] sm:$0xff]  ;;  %6723 = vrot.lane.b32.xlu1 %v12731_v21, %s8746_s21 }
 0x8be   : > { %6622 = vst.msk [vmem:[#allocation3 + $0x150] sm:$0xff] %vm442_vm0, %v12755_v48  ;;  %v12767_v22 = vld [vmem:[#allocation2 + $0x108] sm:$0xff]  ;;  %6624 = vst.msk [vmem:[#allocation3 + $0x170] sm:$0xff] %vm442_vm0, %v12765_v16  ;;  %v12779_v13 = vld [vmem:[#allocation2 + $0x120] sm:$0xff] }
 0x8bf   : > { %v12769_v6 = vld [vmem:[#allocation2 + $0x128] sm:$0xff]  ;;  %6623 = vst.msk [vmem:[#allocation3 + $0x160] sm:$0xff] %vm442_vm0, %v12767_v22  ;;  %v12781_v37 = vld [vmem:[#allocation2 + $0xb2] sm:$0xff]  ;;  %6625 = vst.msk [vmem:[#allocation3 + $0x180] sm:$0xff] %vm442_vm0, %v12779_v13 }
 0x8c0   : > { %6626 = vst.msk [vmem:[#allocation3 + $0x190] sm:$0xff] %vm442_vm0, %v12769_v6  ;;  %v12783_v44 = vld [vmem:[#allocation2 + $0xaa] sm:$0xff]  ;;  %v12789_v32 = vld [vmem:[#allocation2 + $0x140] sm:$0xff]  ;;  %v12791_v14 = vld [vmem:[#allocation2 + $0x138] sm:$0xff] }
 0x8c1   : > { %13783 = vst [vmem:[#allocation4_spill] sm:$0xff] %v12789_v32  ;;  %13784 = vst [vmem:[#allocation5_spill] sm:$0xff] %v12791_v14  ;;  %v12793_v58 = vld [vmem:[#allocation2 + $0xca] sm:$0xff]  ;;  %v12803_v30 = vld [vmem:[#allocation2 + $0xc2] sm:$0xff] }
 0x8c2   : > { %8019 = vst.msk [vmem:[#allocation3 + $0xa8] sm:$0xff] %vm442_vm0, %v12783_v44  ;;  %8020 = vst.msk [vmem:[#allocation3 + $0xb8] sm:$0xff] %vm442_vm0, %v12781_v37  ;;  %v12807_v45 = vld [vmem:[#allocation2 + $0xb1] sm:$0xff]  ;;  %v12809_v43 = vld [vmem:[#allocation2 + $0xe2] sm:$0xff] }
 0x8c3   : > { %6628 = vst.msk [vmem:[#allocation3 + $0x1b0] sm:$0xff] %vm442_vm0, %v12789_v32  ;;  %6627 = vst.msk [vmem:[#allocation3 + $0x1a0] sm:$0xff] %vm442_vm0, %v12791_v14  ;;  %v12811_v33 = vld [vmem:[#allocation2 + $0xda] sm:$0xff]  ;;  %6727 = vrot.lane.b32.xlu1 %v12807_v45, %s8746_s21  ;;  %v12817_v15 = vld [vmem:[#allocation2 + $0xa9] sm:$0xff] }
 0x8c4   : > { %8022 = vst.msk [vmem:[#allocation3 + $0xd8] sm:$0xff] %vm442_vm0, %v12793_v58  ;;  %8021 = vst.msk [vmem:[#allocation3 + $0xc8] sm:$0xff] %vm442_vm0, %v12803_v30  ;;  %v12819_v8 = vld [vmem:[#allocation2 + $0xfa] sm:$0xff]  ;;  %v12821_v1 = vld [vmem:[#allocation2 + $0xf2] sm:$0xff]  ;;  %6725 = vrot.lane.b32.xlu0 %v12817_v15, %s8746_s21 }
 0x8c5   : > { %8023 = vst.msk [vmem:[#allocation3 + $0xe8] sm:$0xff] %vm442_vm0, %v12811_v33  ;;  %8024 = vst.msk [vmem:[#allocation3 + $0xf8] sm:$0xff] %vm442_vm0, %v12809_v43  ;;  %v12829_v36 = vld [vmem:[#allocation2 + $0x112] sm:$0xff]  ;;  %v12831_v47 = vld [vmem:[#allocation2 + $0x10a] sm:$0xff] }
 0x8c6   : > { %8025 = vst.msk [vmem:[#allocation3 + $0x108] sm:$0xff] %vm442_vm0, %v12821_v1  ;;  %8026 = vst.msk [vmem:[#allocation3 + $0x118] sm:$0xff] %vm442_vm0, %v12819_v8  ;;  %v12837_v61 = vld [vmem:[#allocation2 + $0x12a] sm:$0xff]  ;;  %v12839_v38 = vld [vmem:[#allocation2 + $0x122] sm:$0xff] }
 0x8c7   : > { %13785 = vst [vmem:[#allocation6_spill] sm:$0xff] %v12837_v61  ;;  %13786 = vst [vmem:[#allocation7_spill] sm:$0xff] %v12839_v38  ;;  %v12845_v40 = vld [vmem:[#allocation2 + $0xc9] sm:$0xff]  ;;  %v12855_v56 = vld [vmem:[#allocation2 + $0xc1] sm:$0xff] }
 0x8c8   : > { %8027 = vst.msk [vmem:[#allocation3 + $0x128] sm:$0xff] %vm442_vm0, %v12831_v47  ;;  %8028 = vst.msk [vmem:[#allocation3 + $0x138] sm:$0xff] %vm442_vm0, %v12829_v36  ;;  %v12847_v5 = vld [vmem:[#allocation2 + $0x142] sm:$0xff]  ;;  %6731 = vrot.lane.b32.xlu1 %v12845_v40, %s8746_s21  ;;  %v12857_v63 = vld [vmem:[#allocation2 + $0x13a] sm:$0xff]  ;;  %6729 = vrot.lane.b32.xlu0 %v12855_v56, %s8746_s21 }
 0x8c9   : > { %13787 = vst [vmem:[#allocation8_spill] sm:$0xff] %v12847_v5  ;;  %8029 = vst.msk [vmem:[#allocation3 + $0x148] sm:$0xff] %vm442_vm0, %v12839_v38  ;;  %v12863_v35 = vld [vmem:[#allocation2 + $0x158] sm:$0xff]  ;;  %v12865_v54 = vld [vmem:[#allocation2 + $0x150] sm:$0xff] }
 0x8ca   : > { %8030 = vst.msk [vmem:[#allocation3 + $0x158] sm:$0xff] %vm442_vm0, %v12837_v61  ;;  %13788 = vst [vmem:[#allocation9_spill] sm:$0xff] %v12857_v63  ;;  %v12873_v53 = vld [vmem:[#allocation2 + $0xe1] sm:$0xff]  ;;  %v12879_v60 = vld [vmem:[#allocation2 + $0xd9] sm:$0xff] }
 0x8cb   : > { %8032 = vst.msk [vmem:[#allocation3 + $0x178] sm:$0xff] %vm442_vm0, %v12847_v5  ;;  %13789 = vst [vmem:[#allocation10_spill] sm:$0xff] %v12863_v35  ;;  %v12875_v31 = vld [vmem:[#allocation2 + $0x15a] sm:$0xff]  ;;  %v12881_v23 = vld [vmem:[#allocation2 + $0x152] sm:$0xff] }
 0x8cc   : > { %13790 = vst [vmem:[#allocation11_spill] sm:$0xff] %v12865_v54  ;;  %8031 = vst.msk [vmem:[#allocation3 + $0x168] sm:$0xff] %vm442_vm0, %v12857_v63  ;;  %6735 = vrot.lane.b32.xlu1 %v12873_v53, %s8746_s21  ;;  %6733 = vrot.lane.b32.xlu0 %v12879_v60, %s8746_s21  ;;  %v8718_v26 = vld [vmem:[%s13694_s11] sm:$0xff]   ;;  %v12890_v20 = vld [vmem:[#allocation2 + $0x170] sm:$0xff]  ;;  %v13795_v63 = vmov 0  }
 0x8cd   : > { %6630 = vst.msk [vmem:[#allocation3 + $0x1d0] sm:$0xff] %vm442_vm0, %v12863_v35  ;;  %6629 = vst.msk [vmem:[#allocation3 + $0x1c0] sm:$0xff] %vm442_vm0, %v12865_v54  ;;  %v12892_v54 = vld [vmem:[#allocation2 + $0x168] sm:$0xff]  ;;  %8663 = vmatpush1.bf16.msra.mxu1 %v8718_v26  ;;  %8265 = vmatpush1.bf16.msra.mxu0 %v8718_v26  ;;  %v12904_v35 = vld [vmem:[#allocation2 + $0xf1] sm:$0xff] }
 0x8ce   : > { %13791 = vst [vmem:[#allocation12_spill] sm:$0xff] %v12875_v31  ;;  %13792 = vst [vmem:[#allocation13_spill] sm:$0xff] %v12881_v23  ;;  %8655 = vmatprep.subr.bf16.mxu1 %v13795_v63  ;;  %8266 = vmatprep.subr.bf16.mxu0 %v13795_v63  ;;  %v12917_v26 = vld [vmem:[#allocation2 + $0x111] sm:$0xff]  ;;  %v12925_v5 = vld [vmem:[#allocation2 + $0x109] sm:$0xff] }
 0x8cf   : > { %8034 = vst.msk [vmem:[#allocation3 + $0x198] sm:$0xff] %vm442_vm0, %v12875_v31  ;;  %13793 = vst [vmem:[#allocation14_spill] sm:$0xff] %v12890_v20  ;;  %v12900_v31 = vld [vmem:[#allocation2 + $0xf9] sm:$0xff]  ;;  %v8720_v14 = vld [vmem:[%s13694_s11 + $0x10] sm:$0xff]  }
 0x8d0   : > { %13794 = vst [vmem:[#allocation15_spill] sm:$0xff] %v12892_v54  ;;  %8033 = vst.msk [vmem:[#allocation3 + $0x188] sm:$0xff] %vm442_vm0, %v12881_v23  ;;  %6739 = vrot.lane.b32.xlu1 %v12900_v31, %s8746_s21  ;;  %6737 = vrot.lane.b32.xlu0 %v12904_v35, %s8746_s21  ;;  %v12915_v23 = vld [vmem:[#allocation2 + $0x16a] sm:$0xff]  ;;  %v12938_v32 = vld [vmem:[#allocation2 + $0x182] sm:$0xff] }
 0x8d1   : > { %6632 = vst.msk [vmem:[#allocation3 + $0x1f0] sm:$0xff] %vm442_vm0, %v12890_v20  ;;  %6631 = vst.msk [vmem:[#allocation3 + $0x1e0] sm:$0xff] %vm442_vm0, %v12892_v54  ;;  %v8719_v20 = vld [vmem:[%s13694_s11 + $0x8] sm:$0xff]   ;;  %v12913_v54 = vld [vmem:[#allocation2 + $0x172] sm:$0xff] }
 0x8d2   : > { %13796 = vst [vmem:[#allocation16_spill] sm:$0xff] %v12913_v54  ;;  %13797 = vst [vmem:[#allocation17_spill] sm:$0xff] %v12915_v23  ;;  %8664 = vmatpush1.bf16.msra.mxu1 %v8719_v20  ;;  %8267 = vmatpush1.bf16.msra.mxu0 %v8719_v20  ;;  %v6657_v20 = vld [vmem:[#allocation2 + $0x121] sm:$0xff]  ;;  %v8721_v38 = vld [vmem:[%s13694_s11 + $0x18] sm:$0xff]  }
 0x8d3   : > { %8035 = vst.msk [vmem:[#allocation3 + $0x1a8] sm:$0xff] %vm442_vm0, %v12915_v23  ;;  %8036 = vst.msk [vmem:[#allocation3 + $0x1b8] sm:$0xff] %vm442_vm0, %v12913_v54  ;;  %8656 = vmatprep.subr.bf16.mxu1 %v13795_v63  ;;  %8268 = vmatprep.subr.bf16.mxu0 %v13795_v63  ;;  %v6658_v23 = vld [vmem:[#allocation2 + $0x129] sm:$0xff]  ;;  %v7980_v61 = vld [vmem:[#allocation2 + $0x52] sm:$0xff] }
 0x8d4   : > { %6743 = vrot.lane.b32.xlu1 %v12917_v26, %s8746_s21  ;;  %6741 = vrot.lane.b32.xlu0 %v12925_v5, %s8746_s21  ;;  %v12936_v54 = vld [vmem:[#allocation2 + $0x18a] sm:$0xff]  ;;  %13798 = vst [vmem:[#allocation18_spill] sm:$0xff] %v12938_v32  ;;  %8037 = vst.msk [vmem:[#allocation3 + $0x1c8] sm:$0xff] %vm442_vm0, %v12938_v32  ;;  %v8722_v32 = vld [vmem:[%s13694_s11 + $0x20] sm:$0xff]  }
 0x8d5   : > { %8038 = vst.msk [vmem:[#allocation3 + $0x1d8] sm:$0xff] %vm442_vm0, %v12936_v54  ;;  %8012 = vst.msk [vmem:[#allocation3 + $0x38] sm:$0xff] %vm442_vm0, %v7980_v61  ;;  %v8723_v61 = vld [vmem:[%s13694_s11 + $0x28] sm:$0xff]  }
 0x8d6   : > { %8665 = vmatpush1.bf16.msra.mxu1 %v8720_v14  ;;  %8269 = vmatpush1.bf16.msra.mxu0 %v8720_v14  ;;  %v6660_v14 = vld [vmem:[#allocation2 + $0x141] sm:$0xff] }
 0x8d7   : > { %8657 = vmatprep.subr.bf16.mxu1 %v13795_v63  ;;  %8270 = vmatprep.subr.bf16.mxu0 %v13795_v63 }
 0x8d8   : > { %6747 = vrot.lane.b32.xlu1 %v6658_v23, %s8746_s21  ;;  %6745 = vrot.lane.b32.xlu0 %v6657_v20, %s8746_s21  ;;  %v7979_v23 = vld [vmem:[#allocation2 + $0x4a] sm:$0xff]  ;;  %v6659_v20 = vld [vmem:[#allocation2 + $0x139] sm:$0xff] }
 0x8d9   : > { %8011 = vst.msk [vmem:[#allocation3 + $0x28] sm:$0xff] %vm442_vm0, %v7979_v23 }
 0x8da   : > { %8666 = vmatpush1.bf16.msra.mxu1 %v8721_v38  ;;  %8271 = vmatpush1.bf16.msra.mxu0 %v8721_v38 }
 0x8db   : > { %8658 = vmatprep.subr.bf16.mxu1 %v13795_v63  ;;  %8272 = vmatprep.subr.bf16.mxu0 %v13795_v63 }
 0x8dc   : > { %6751 = vrot.lane.b32.xlu1 %v6660_v14, %s8746_s21  ;;  %6749 = vrot.lane.b32.xlu0 %v6659_v20, %s8746_s21 }
 0x8de   : > { %8667 = vmatpush1.bf16.msra.mxu1 %v8722_v32  ;;  %8273 = vmatpush1.bf16.msra.mxu0 %v8722_v32 }
 0x8df   : > { %8659 = vmatprep.subr.bf16.mxu1 %v13795_v63  ;;  %8274 = vmatprep.subr.bf16.mxu0 %v13795_v63 }
 0x8e0   : > { %6899 = vrot.lane.b32.xlu1 %v12635_v41, %s8745_s20  ;;  %6897 = vrot.lane.b32.xlu0 %v12633_v57, %s8745_s20  ;;  %v8724_v57 = vld [vmem:[%s13694_s11 + $0x30] sm:$0xff]   ;;  %v8725_v41 = vld [vmem:[%s13694_s11 + $0x38] sm:$0xff]  }
 0x8e2   : > { %8668 = vmatpush1.bf16.msra.mxu1 %v8723_v61  ;;  %8275 = vmatpush1.bf16.msra.mxu0 %v8723_v61 }
 0x8e3   : > { %8660 = vmatprep.subr.bf16.mxu1 %v13795_v63  ;;  %8276 = vmatprep.subr.bf16.mxu0 %v13795_v63 }
 0x8e4   : > { %7091 = vrot.lane.b32.xlu1 %v12659_v17, %s8747_s28  ;;  %7089 = vrot.lane.b32.xlu0 %v12661_v28, %s8747_s28  ;;  %v7406_v17 = vld [vmem:[#allocation2 + $0x52] sm:$0xff]  ;;  %v7405_v28 = vld [vmem:[#allocation2 + $0x4a] sm:$0xff] }
 0x8e6   : > { %8669 = vmatpush1.bf16.msra.mxu1 %v8724_v57  ;;  %8277 = vmatpush1.bf16.msra.mxu0 %v8724_v57 }
 0x8e7   : > { %8661 = vmatprep.subr.bf16.mxu1 %v13795_v63  ;;  %8278 = vmatprep.subr.bf16.mxu0 %v13795_v63 }
 0x8e8   : > { %7283 = vrot.lane.b32.xlu1 %v12651_v62, %s8748_s15  ;;  %7281 = vrot.lane.b32.xlu0 %v12653_v10, %s8748_s15  ;;  %v8726_v62 = vld [vmem:[%s13694_s11 + $0x40] sm:$0xff]  }
 0x8ea   : > { %8670 = vmatpush1.bf16.msra.mxu1 %v8725_v41  ;;  %8279 = vmatpush1.bf16.msra.mxu0 %v8725_v41 }
 0x8eb   : > { %8662 = vmatprep.subr.bf16.mxu1 %v13795_v63  ;;  %8280 = vmatprep.subr.bf16.mxu0 %v13795_v63 }
 0x8ec   : > { %7475 = vrot.lane.b32.xlu1 %v7406_v17, %s8749_s16  ;;  %7473 = vrot.lane.b32.xlu0 %v7405_v28, %s8749_s16 }
 0x8ee   : > { %8671 = vmatpush1.bf16.msra.mxu1 %v8726_v62  ;;  %8281 = vmatpush1.bf16.msra.mxu0 %v8726_v62 }
 0x8f0   : > { %7667 = vrot.lane.b32.xlu1 %v12667_v42, %s8750_s24  ;;  %7665 = vrot.lane.b32.xlu0 %v12676_v2, %s8750_s24 }
 0x8f4   : > { %7859 = vrot.lane.b32.xlu1 %v12663_v55, %s8751_s30  ;;  %7857 = vrot.lane.b32.xlu0 %v12665_v4, %s8751_s30 }
 0x8f8   : > { %6903 = vrot.lane.b32.xlu1 %v7406_v17, %s8745_s20  ;;  %6901 = vrot.lane.b32.xlu0 %v7405_v28, %s8745_s20 }
 0x8fc   : > { %7095 = vrot.lane.b32.xlu1 %v12667_v42, %s8747_s28  ;;  %7093 = vrot.lane.b32.xlu0 %v12676_v2, %s8747_s28 }
 0x900   : > { %7287 = vrot.lane.b32.xlu1 %v12663_v55, %s8748_s15  ;;  %7285 = vrot.lane.b32.xlu0 %v12665_v4, %s8748_s15 }
 0x904   : > { %7479 = vrot.lane.b32.xlu1 %v12643_v18, %s8749_s16  ;;  %7477 = vrot.lane.b32.xlu0 %v12637_v0, %s8749_s16 }
 0x908   : > { %7671 = vrot.lane.b32.xlu1 %v12678_v49, %s8750_s24  ;;  %7669 = vrot.lane.b32.xlu0 %v12680_v39, %s8750_s24 }
 0x90c   : > { %7863 = vrot.lane.b32.xlu1 %v12687_v52, %s8751_s30  ;;  %7861 = vrot.lane.b32.xlu0 %v12699_v51, %s8751_s30 }
 0x910   : > { %6907 = vrot.lane.b32.xlu1 %v12643_v18, %s8745_s20  ;;  %6905 = vrot.lane.b32.xlu0 %v12637_v0, %s8745_s20 }
 0x914   : > { %7099 = vrot.lane.b32.xlu1 %v12678_v49, %s8747_s28  ;;  %7097 = vrot.lane.b32.xlu0 %v12680_v39, %s8747_s28 }
 0x918   : > { %7291 = vrot.lane.b32.xlu1 %v12687_v52, %s8748_s15  ;;  %7289 = vrot.lane.b32.xlu0 %v12699_v51, %s8748_s15 }
 0x91a   : > { %v6702_v0 = vpop.permute.xlu0 %6701 }
 0x91b   : > { %v6704_v18 = vpop.permute.xlu1 %6703  ;;  %6795 = vst.msk [vmem:[#allocation3 + $0x20] sm:$0xff] %vm787_vm2, %v6702_v0  ;;  %v8054_v0 = vld [vmem:[#allocation3 + $0x68] sm:$0xff] }
 0x91c   : > { %7483 = vrot.lane.b32.xlu1 %v12689_v46, %s8749_s16  ;;  %7481 = vrot.lane.b32.xlu0 %v12691_v12, %s8749_s16  ;;  %6796 = vst.msk [vmem:[#allocation3 + $0x30] sm:$0xff] %vm787_vm2, %v6704_v18 }
 0x91e   : > { %v6706_v55 = vpop.permute.xlu0 %6705 }
 0x91f   : > { %v6708_v10 = vpop.permute.xlu1 %6707  ;;  %6797 = vst.msk [vmem:[#allocation3 + $0x40] sm:$0xff] %vm787_vm2, %v6706_v55 }
 0x920   : > { %7675 = vrot.lane.b32.xlu1 %v12702_v27, %s8750_s24  ;;  %7673 = vrot.lane.b32.xlu0 %v12704_v9, %s8750_s24  ;;  %6798 = vst.msk [vmem:[#allocation3 + $0x50] sm:$0xff] %vm787_vm2, %v6708_v10  ;;  %v8056_v10 = vld [vmem:[#allocation3 + $0x78] sm:$0xff] }
 0x922   : > { %v6710_v42 = vpop.permute.xlu0 %6709 }
 0x923   : > { %v6712_v4 = vpop.permute.xlu1 %6711  ;;  %6799 = vst.msk [vmem:[#allocation3 + $0x60] sm:$0xff] %vm787_vm2, %v6710_v42 }
 0x924   : > { %7867 = vrot.lane.b32.xlu1 %v12731_v21, %s8751_s30  ;;  %7865 = vrot.lane.b32.xlu0 %v12745_v11, %s8751_s30  ;;  %6800 = vst.msk [vmem:[#allocation3 + $0x70] sm:$0xff] %vm787_vm2, %v6712_v4 }
 0x926   : > { %v6714_v49 = vpop.permute.xlu0 %6713 }
 0x927   : > { %v6716_v2 = vpop.permute.xlu1 %6715  ;;  %6801 = vst.msk [vmem:[#allocation3 + $0x80] sm:$0xff] %vm787_vm2, %v6714_v49 }
 0x928   : > { %6911 = vrot.lane.b32.xlu1 %v12689_v46, %s8745_s20  ;;  %6909 = vrot.lane.b32.xlu0 %v12691_v12, %s8745_s20  ;;  %6802 = vst.msk [vmem:[#allocation3 + $0x90] sm:$0xff] %vm787_vm2, %v6716_v2  ;;  %v8112_v2 = vpack.c.bf16 %v8056_v10, %v8054_v0 }
 0x92a   : > { %v6718_v52 = vpop.permute.xlu0 %6717 }
 0x92b   : > { %v6720_v39 = vpop.permute.xlu1 %6719  ;;  %6803 = vst.msk [vmem:[#allocation3 + $0xa0] sm:$0xff] %vm787_vm2, %v6718_v52 }
 0x92c   : > { %7103 = vrot.lane.b32.xlu1 %v12702_v27, %s8747_s28  ;;  %7101 = vrot.lane.b32.xlu0 %v12704_v9, %s8747_s28  ;;  %6804 = vst.msk [vmem:[#allocation3 + $0xb0] sm:$0xff] %vm787_vm2, %v6720_v39 }
 0x92e   : > { %v6722_v12 = vpop.permute.xlu0 %6721 }
 0x92f   : > { %v6724_v46 = vpop.permute.xlu1 %6723  ;;  %6805 = vst.msk [vmem:[#allocation3 + $0xc0] sm:$0xff] %vm787_vm2, %v6722_v12 }
 0x930   : > { %7295 = vrot.lane.b32.xlu1 %v12731_v21, %s8748_s15  ;;  %7293 = vrot.lane.b32.xlu0 %v12745_v11, %s8748_s15  ;;  %6806 = vst.msk [vmem:[#allocation3 + $0xd0] sm:$0xff] %vm787_vm2, %v6724_v46 }
 0x934   : > { %7487 = vrot.lane.b32.xlu1 %v12715_v24, %s8749_s16  ;;  %7485 = vrot.lane.b32.xlu0 %v12721_v7, %s8749_s16 }
 0x935   : > { %v6728_v51 = vpop.permute.xlu1 %6727 }
 0x936   : > { %6808 = vst.msk [vmem:[#allocation3 + $0xf0] sm:$0xff] %vm787_vm2, %v6728_v51  ;;  %v6726_v27 = vpop.permute.xlu0 %6725 }
 0x937   : > { %6807 = vst.msk [vmem:[#allocation3 + $0xe0] sm:$0xff] %vm787_vm2, %v6726_v27  ;;  %v8058_v27 = vld [vmem:[#allocation3 + $0x88] sm:$0xff] }
 0x938   : > { %7679 = vrot.lane.b32.xlu1 %v12723_v19, %s8750_s24  ;;  %7677 = vrot.lane.b32.xlu0 %v12725_v59, %s8750_s24 }
 0x93a   : > { %v6732_v9 = vpop.permute.xlu1 %6731  ;;  %v6730_v21 = vpop.permute.xlu0 %6729 }
 0x93b   : > { %6810 = vst.msk [vmem:[#allocation3 + $0x110] sm:$0xff] %vm787_vm2, %v6732_v9  ;;  %6809 = vst.msk [vmem:[#allocation3 + $0x100] sm:$0xff] %vm787_vm2, %v6730_v21  ;;  %v8060_v9 = vld [vmem:[#allocation3 + $0x98] sm:$0xff] }
 0x93c   : > { %7871 = vrot.lane.b32.xlu1 %v12807_v45, %s8751_s30  ;;  %7869 = vrot.lane.b32.xlu0 %v12817_v15, %s8751_s30 }
 0x93e   : > { %v6736_v11 = vpop.permute.xlu1 %6735  ;;  %v6734_v32 = vpop.permute.xlu0 %6733 }
 0x93f   : > { %6812 = vst.msk [vmem:[#allocation3 + $0x130] sm:$0xff] %vm787_vm2, %v6736_v11  ;;  %6811 = vst.msk [vmem:[#allocation3 + $0x120] sm:$0xff] %vm787_vm2, %v6734_v32 }
 0x940   : > { %6915 = vrot.lane.b32.xlu1 %v12715_v24, %s8745_s20  ;;  %6913 = vrot.lane.b32.xlu0 %v12721_v7, %s8745_s20 }
 0x942   : > { %v6740_v38 = vpop.permute.xlu1 %6739  ;;  %v6738_v63 = vpop.permute.xlu0 %6737 }
 0x943   : > { %6814 = vst.msk [vmem:[#allocation3 + $0x150] sm:$0xff] %vm787_vm2, %v6740_v38  ;;  %6813 = vst.msk [vmem:[#allocation3 + $0x140] sm:$0xff] %vm787_vm2, %v6738_v63  ;;  %v8114_v38 = vpack.c.bf16 %v8060_v9, %v8058_v27  ;;  %v8072_v27 = vld [vmem:[#allocation3 + $0xf8] sm:$0xff] }
 0x944   : > { %7107 = vrot.lane.b32.xlu1 %v12723_v19, %s8747_s28  ;;  %7105 = vrot.lane.b32.xlu0 %v12725_v59, %s8747_s28 }
 0x946   : > { %v6744_v14 = vpop.permute.xlu1 %6743  ;;  %v6742_v23 = vpop.permute.xlu0 %6741 }
 0x947   : > { %6816 = vst.msk [vmem:[#allocation3 + $0x170] sm:$0xff] %vm787_vm2, %v6744_v14  ;;  %6815 = vst.msk [vmem:[#allocation3 + $0x160] sm:$0xff] %vm787_vm2, %v6742_v23 }
 0x948   : > { %7299 = vrot.lane.b32.xlu1 %v12807_v45, %s8748_s15  ;;  %7297 = vrot.lane.b32.xlu0 %v12817_v15, %s8748_s15 }
 0x94a   : > { %v6748_v24 = vpop.permute.xlu1 %6747  ;;  %v6746_v7 = vpop.permute.xlu0 %6745 }
 0x94b   : > { %6818 = vst.msk [vmem:[#allocation3 + $0x190] sm:$0xff] %vm787_vm2, %v6748_v24  ;;  %6817 = vst.msk [vmem:[#allocation3 + $0x180] sm:$0xff] %vm787_vm2, %v6746_v7 }
 0x94c   : > { %7491 = vrot.lane.b32.xlu1 %v12781_v37, %s8749_s16  ;;  %7489 = vrot.lane.b32.xlu0 %v12783_v44, %s8749_s16 }
 0x94e   : > { %v6752_v19 = vpop.permute.xlu1 %6751  ;;  %v6750_v59 = vpop.permute.xlu0 %6749 }
 0x94f   : > { %6820 = vst.msk [vmem:[#allocation3 + $0x1b0] sm:$0xff] %vm787_vm2, %v6752_v19  ;;  %6819 = vst.msk [vmem:[#allocation3 + $0x1a0] sm:$0xff] %vm787_vm2, %v6750_v59  ;;  %v8062_v59 = vld [vmem:[#allocation3 + $0xa8] sm:$0xff] }
 0x950   : > { %7683 = vrot.lane.b32.xlu1 %v12737_v3, %s8750_s24  ;;  %7681 = vrot.lane.b32.xlu0 %v12739_v34, %s8750_s24 }
 0x952   : > { %v6900_v45 = vpop.permute.xlu1 %6899  ;;  %v6898_v15 = vpop.permute.xlu0 %6897 }
 0x953   : > { %6990 = vst.msk [vmem:[#allocation3 + $0x50] sm:$0xff] %vm980_vm3, %v6900_v45  ;;  %6989 = vst.msk [vmem:[#allocation3 + $0x40] sm:$0xff] %vm980_vm3, %v6898_v15  ;;  %v8064_v45 = vld [vmem:[#allocation3 + $0xb8] sm:$0xff] }
 0x954   : > { %7875 = vrot.lane.b32.xlu1 %v12845_v40, %s8751_s30  ;;  %7873 = vrot.lane.b32.xlu0 %v12855_v56, %s8751_s30 }
 0x956   : > { %v7092_v20 = vpop.permute.xlu1 %7091  ;;  %v7090_v61 = vpop.permute.xlu0 %7089 }
 0x957   : > { %7182 = vst.msk [vmem:[#allocation3 + $0x50] sm:$0xff] %vm1173_vm4, %v7092_v20  ;;  %7181 = vst.msk [vmem:[#allocation3 + $0x40] sm:$0xff] %vm1173_vm4, %v7090_v61 }
 0x958   : > { %6919 = vrot.lane.b32.xlu1 %v12781_v37, %s8745_s20  ;;  %6917 = vrot.lane.b32.xlu0 %v12783_v44, %s8745_s20 }
 0x95a   : > { %v7284_v57 = vpop.permute.xlu1 %7283  ;;  %v7282_v41 = vpop.permute.xlu0 %7281 }
 0x95b   : > { %7374 = vst.msk [vmem:[#allocation3 + $0x50] sm:$0xff] %vm1366_vm5, %v7284_v57  ;;  %7373 = vst.msk [vmem:[#allocation3 + $0x40] sm:$0xff] %vm1366_vm5, %v7282_v41  ;;  %v8116_v57 = vpack.c.bf16 %v8064_v45, %v8062_v59  ;;  %v7810_v45 = vld [vmem:[#allocation2 + $0x159] sm:$0xff] }
 0x95c   : > { %7111 = vrot.lane.b32.xlu1 %v12737_v3, %s8747_s28  ;;  %7109 = vrot.lane.b32.xlu0 %v12739_v34, %s8747_s28 }
 0x95e   : > { %v7476_v17 = vpop.permute.xlu1 %7475  ;;  %v7474_v28 = vpop.permute.xlu0 %7473 }
 0x95f   : > { %7566 = vst.msk [vmem:[#allocation3 + $0x50] sm:$0xff] %vm1559_vm6, %v7476_v17  ;;  %7565 = vst.msk [vmem:[#allocation3 + $0x40] sm:$0xff] %vm1559_vm6, %v7474_v28 }
 0x960   : > { %7303 = vrot.lane.b32.xlu1 %v12845_v40, %s8748_s15  ;;  %7301 = vrot.lane.b32.xlu0 %v12855_v56, %s8748_s15 }
 0x962   : > { %v7668_v37 = vpop.permute.xlu1 %7667  ;;  %v7666_v44 = vpop.permute.xlu0 %7665 }
 0x963   : > { %7758 = vst.msk [vmem:[#allocation3 + $0x50] sm:$0xff] %vm1753_vm7, %v7668_v37  ;;  %7757 = vst.msk [vmem:[#allocation3 + $0x40] sm:$0xff] %vm1753_vm7, %v7666_v44  ;;  %v7806_v44 = vld [vmem:[#allocation2 + $0x129] sm:$0xff] }
 0x964   : > { %7495 = vrot.lane.b32.xlu1 %v12793_v58, %s8749_s16  ;;  %7493 = vrot.lane.b32.xlu0 %v12803_v30, %s8749_s16 }
 0x966   : > { %v7860_v3 = vpop.permute.xlu1 %7859  ;;  %v7858_v34 = vpop.permute.xlu0 %7857 }
 0x967   : > { %7950 = vst.msk [vmem:[#allocation3 + $0x50] sm:$0xff] %vm1946_vm8, %v7860_v3  ;;  %7949 = vst.msk [vmem:[#allocation3 + $0x40] sm:$0xff] %vm1946_vm8, %v7858_v34  ;;  %v7805_v3 = vld [vmem:[#allocation2 + $0x121] sm:$0xff] }
 0x968   : > { %7687 = vrot.lane.b32.xlu1 %v12741_v25, %s8750_s24  ;;  %7685 = vrot.lane.b32.xlu0 %v12753_v29, %s8750_s24 }
 0x96a   : > { %v6904_v40 = vpop.permute.xlu1 %6903  ;;  %v6902_v56 = vpop.permute.xlu0 %6901 }
 0x96b   : > { %6992 = vst.msk [vmem:[#allocation3 + $0x70] sm:$0xff] %vm980_vm3, %v6904_v40  ;;  %6991 = vst.msk [vmem:[#allocation3 + $0x60] sm:$0xff] %vm980_vm3, %v6902_v56  ;;  %v8066_v56 = vld [vmem:[#allocation3 + $0xc8] sm:$0xff] }
 0x96c   : > { %7879 = vrot.lane.b32.xlu1 %v12873_v53, %s8751_s30  ;;  %7877 = vrot.lane.b32.xlu0 %v12879_v60, %s8751_s30 }
 0x96e   : > { %v7096_v62 = vpop.permute.xlu1 %7095  ;;  %v8051_v18 = vld [vmem:[#allocation3 + $0x50] sm:$0xff]  ;;  %v7094_v55 = vpop.permute.xlu0 %7093  ;;  %v8049_v4 = vld [vmem:[#allocation3 + $0x40] sm:$0xff] }
 0x96f   : > { %7184 = vst.msk [vmem:[#allocation3 + $0x70] sm:$0xff] %vm1173_vm4, %v7096_v62  ;;  %7183 = vst.msk [vmem:[#allocation3 + $0x60] sm:$0xff] %vm1173_vm4, %v7094_v55  ;;  %v8109_v42 = vpack.c.bf16 %v8051_v18, %v8049_v4  ;;  %v8068_v62 = vld [vmem:[#allocation3 + $0xd8] sm:$0xff] }
 0x970   : > { %6923 = vrot.lane.b32.xlu1 %v12793_v58, %s8745_s20  ;;  %6921 = vrot.lane.b32.xlu0 %v12803_v30, %s8745_s20  ;;  %v8118_v55 = vpack.c.bf16 %v8068_v62, %v8066_v56  ;;  %v13809_v62 = vld [vmem:[#allocation14_spill] sm:$0xff] }
 0x971   : > { %8313 = vmatmul.mubr.bf16.vlgmr.msra.gmra.mrb[68].mxu1 %v8109_v42 }
 0x972   : > { %v7288_v49 = vpop.permute.xlu1 %7287  ;;  %8617 = vmatprep.mubr.msk.bf16.mxu1 %vm442_vm0, %v8112_v2  ;;  %v7286_v39 = vpop.permute.xlu0 %7285 }
 0x973   : > { %7376 = vst.msk [vmem:[#allocation3 + $0x70] sm:$0xff] %vm1366_vm5, %v7288_v49  ;;  %7375 = vst.msk [vmem:[#allocation3 + $0x60] sm:$0xff] %vm1366_vm5, %v7286_v39 }
 0x974   : > { %7115 = vrot.lane.b32.xlu1 %v12741_v25, %s8747_s28  ;;  %7113 = vrot.lane.b32.xlu0 %v12753_v29, %s8747_s28 }
 0x976   : > { %v7480_v58 = vpop.permute.xlu1 %7479  ;;  %v7478_v30 = vpop.permute.xlu0 %7477 }
 0x977   : > { %7568 = vst.msk [vmem:[#allocation3 + $0x70] sm:$0xff] %vm1559_vm6, %v7480_v58  ;;  %7567 = vst.msk [vmem:[#allocation3 + $0x60] sm:$0xff] %vm1559_vm6, %v7478_v30  ;;  %v13801_v30 = vld [vmem:[#allocation4_spill] sm:$0xff] }
 0x978   : > { %7307 = vrot.lane.b32.xlu1 %v12873_v53, %s8748_s15  ;;  %7305 = vrot.lane.b32.xlu0 %v12879_v60, %s8748_s15 }
 0x97a   : > { %v7672_v52 = vpop.permute.xlu1 %7671  ;;  %v7670_v46 = vpop.permute.xlu0 %7669 }
 0x97b   : > { %7760 = vst.msk [vmem:[#allocation3 + $0x70] sm:$0xff] %vm1753_vm7, %v7672_v52  ;;  %7759 = vst.msk [vmem:[#allocation3 + $0x60] sm:$0xff] %vm1753_vm7, %v7670_v46  ;;  %v13802_v52 = vld [vmem:[#allocation5_spill] sm:$0xff] }
 0x97c   : > { %7499 = vrot.lane.b32.xlu1 %v12809_v43, %s8749_s16  ;;  %7497 = vrot.lane.b32.xlu0 %v12811_v33, %s8749_s16 }
 0x97e   : > { %v7864_v25 = vpop.permute.xlu1 %7863  ;;  %v7862_v29 = vpop.permute.xlu0 %7861 }
 0x97f   : > { %7952 = vst.msk [vmem:[#allocation3 + $0x70] sm:$0xff] %vm1946_vm8, %v7864_v25  ;;  %7951 = vst.msk [vmem:[#allocation3 + $0x60] sm:$0xff] %vm1946_vm8, %v7862_v29  ;;  %v7808_v29 = vld [vmem:[#allocation2 + $0x141] sm:$0xff] }
 0x980   : > { %7691 = vrot.lane.b32.xlu1 %v12755_v48, %s8750_s24  ;;  %7689 = vrot.lane.b32.xlu0 %v12757_v50, %s8750_s24 }
 0x982   : > { %v6908_v53 = vpop.permute.xlu1 %6907  ;;  %v6906_v60 = vpop.permute.xlu0 %6905 }
 0x983   : > { %6994 = vst.msk [vmem:[#allocation3 + $0x90] sm:$0xff] %vm980_vm3, %v6908_v53  ;;  %6993 = vst.msk [vmem:[#allocation3 + $0x80] sm:$0xff] %vm980_vm3, %v6906_v60  ;;  %v7807_v53 = vld [vmem:[#allocation2 + $0x139] sm:$0xff] }
 0x984   : > { %7883 = vrot.lane.b32.xlu1 %v12900_v31, %s8751_s30  ;;  %7881 = vrot.lane.b32.xlu0 %v12904_v35, %s8751_s30 }
 0x986   : > { %v7100_v12 = vpop.permute.xlu1 %7099  ;;  %v8055_v51 = vld [vmem:[#allocation3 + $0x70] sm:$0xff]  ;;  %v7098_v21 = vpop.permute.xlu0 %7097  ;;  %v8053_v11 = vld [vmem:[#allocation3 + $0x60] sm:$0xff] }
 0x987   : > { %7186 = vst.msk [vmem:[#allocation3 + $0x90] sm:$0xff] %vm1173_vm4, %v7100_v12  ;;  %7185 = vst.msk [vmem:[#allocation3 + $0x80] sm:$0xff] %vm1173_vm4, %v7098_v21  ;;  %v8111_v32 = vpack.c.bf16 %v8055_v51, %v8053_v11  ;;  %v8070_v51 = vld [vmem:[#allocation3 + $0xe8] sm:$0xff] }
 0x988   : > { %6927 = vrot.lane.b32.xlu1 %v12809_v43, %s8745_s20  ;;  %6925 = vrot.lane.b32.xlu0 %v12811_v33, %s8745_s20 }
 0x989   : > { %8321 = vmatmul.mubr.bf16.gmra.mrb[72].mxu1 %v8111_v32  ;;  %v8120_v32 = vpack.c.bf16 %v8072_v27, %v8070_v51  ;;  %v7017_v51 = vld [vmem:[#allocation2 + $0x18] sm:$0xff] }
 0x98a   : > { %v7292_v63 = vpop.permute.xlu1 %7291  ;;  %8618 = vmatprep.mubr.msk.bf16.mxu1 %vm442_vm0, %v8114_v38  ;;  %v7290_v14 = vpop.permute.xlu0 %7289 }
 0x98b   : > { %7378 = vst.msk [vmem:[#allocation3 + $0x90] sm:$0xff] %vm1366_vm5, %v7292_v63  ;;  %7377 = vst.msk [vmem:[#allocation3 + $0x80] sm:$0xff] %vm1366_vm5, %v7290_v14 }
 0x98c   : > { %7119 = vrot.lane.b32.xlu1 %v12755_v48, %s8747_s28  ;;  %7117 = vrot.lane.b32.xlu0 %v12757_v50, %s8747_s28 }
 0x98e   : > { %v7484_v43 = vpop.permute.xlu1 %7483  ;;  %v7482_v33 = vpop.permute.xlu0 %7481 }
 0x98f   : > { %7570 = vst.msk [vmem:[#allocation3 + $0x90] sm:$0xff] %vm1559_vm6, %v7484_v43  ;;  %7569 = vst.msk [vmem:[#allocation3 + $0x80] sm:$0xff] %vm1559_vm6, %v7482_v33 }
 0x990   : > { %7311 = vrot.lane.b32.xlu1 %v12900_v31, %s8748_s15  ;;  %7309 = vrot.lane.b32.xlu0 %v12904_v35, %s8748_s15 }
 0x992   : > { %v7676_v23 = vpop.permute.xlu1 %7675  ;;  %v7674_v24 = vpop.permute.xlu0 %7673 }
 0x993   : > { %7762 = vst.msk [vmem:[#allocation3 + $0x90] sm:$0xff] %vm1753_vm7, %v7676_v23  ;;  %7761 = vst.msk [vmem:[#allocation3 + $0x80] sm:$0xff] %vm1753_vm7, %v7674_v24  ;;  %v13803_v24 = vld [vmem:[#allocation8_spill] sm:$0xff] }
 0x994   : > { %7503 = vrot.lane.b32.xlu1 %v12819_v8, %s8749_s16  ;;  %7501 = vrot.lane.b32.xlu0 %v12821_v1, %s8749_s16 }
 0x996   : > { %v7868_v48 = vpop.permute.xlu1 %7867  ;;  %v7866_v50 = vpop.permute.xlu0 %7865 }
 0x997   : > { %7954 = vst.msk [vmem:[#allocation3 + $0x90] sm:$0xff] %vm1946_vm8, %v7868_v48  ;;  %7953 = vst.msk [vmem:[#allocation3 + $0x80] sm:$0xff] %vm1946_vm8, %v7866_v50  ;;  %v13804_v48 = vld [vmem:[#allocation9_spill] sm:$0xff] }
 0x998   : > { %7695 = vrot.lane.b32.xlu1 %v12765_v16, %s8750_s24  ;;  %7693 = vrot.lane.b32.xlu0 %v12767_v22, %s8750_s24 }
 0x99a   : > { %v6912_v35 = vpop.permute.xlu1 %6911  ;;  %v6910_v31 = vpop.permute.xlu0 %6909 }
 0x99b   : > { %6996 = vst.msk [vmem:[#allocation3 + $0xb0] sm:$0xff] %vm980_vm3, %v6912_v35  ;;  %6995 = vst.msk [vmem:[#allocation3 + $0xa0] sm:$0xff] %vm980_vm3, %v6910_v31  ;;  %v13805_v31 = vld [vmem:[#allocation10_spill] sm:$0xff] }
 0x99c   : > { %7887 = vrot.lane.b32.xlu1 %v12917_v26, %s8751_s30  ;;  %7885 = vrot.lane.b32.xlu0 %v12925_v5, %s8751_s30 }
 0x99e   : > { %v7104_v7 = vpop.permute.xlu1 %7103  ;;  %v8059_v19 = vld [vmem:[#allocation3 + $0x90] sm:$0xff]  ;;  %v7102_v15 = vpop.permute.xlu0 %7101  ;;  %v8057_v20 = vld [vmem:[#allocation3 + $0x80] sm:$0xff] }
 0x99f   : > { %7188 = vst.msk [vmem:[#allocation3 + $0xb0] sm:$0xff] %vm1173_vm4, %v7104_v7  ;;  %7187 = vst.msk [vmem:[#allocation3 + $0xa0] sm:$0xff] %vm1173_vm4, %v7102_v15  ;;  %v8113_v61 = vpack.c.bf16 %v8059_v19, %v8057_v20  ;;  %v13806_v7 = vld [vmem:[#allocation11_spill] sm:$0xff]  ;;  %v7809_v15 = vld [vmem:[#allocation2 + $0x151] sm:$0xff] }
 0x9a0   : > { %6931 = vrot.lane.b32.xlu1 %v12819_v8, %s8745_s20  ;;  %6929 = vrot.lane.b32.xlu0 %v12821_v1, %s8745_s20 }
 0x9a1   : > { %8329 = vmatmul.mubr.bf16.gmra.mrb[76].mxu1 %v8113_v61 }
 0x9a2   : > { %v7296_v41 = vpop.permute.xlu1 %7295  ;;  %8619 = vmatprep.mubr.msk.bf16.mxu1 %vm442_vm0, %v8116_v57  ;;  %v7294_v17 = vpop.permute.xlu0 %7293  ;;  %v8074_v57 = vld [vmem:[#allocation3 + $0x108] sm:$0xff] }
 0x9a3   : > { %7380 = vst.msk [vmem:[#allocation3 + $0xb0] sm:$0xff] %vm1366_vm5, %v7296_v41  ;;  %7379 = vst.msk [vmem:[#allocation3 + $0xa0] sm:$0xff] %vm1366_vm5, %v7294_v17  ;;  %v8076_v41 = vld [vmem:[#allocation3 + $0x118] sm:$0xff] }
 0x9a4   : > { %7123 = vrot.lane.b32.xlu1 %v12765_v16, %s8747_s28  ;;  %7121 = vrot.lane.b32.xlu0 %v12767_v22, %s8747_s28 }
 0x9a6   : > { %v7488_v8 = vpop.permute.xlu1 %7487  ;;  %v7486_v1 = vpop.permute.xlu0 %7485 }
 0x9a7   : > { %7572 = vst.msk [vmem:[#allocation3 + $0xb0] sm:$0xff] %vm1559_vm6, %v7488_v8  ;;  %7571 = vst.msk [vmem:[#allocation3 + $0xa0] sm:$0xff] %vm1559_vm6, %v7486_v1 }
 0x9a8   : > { %7315 = vrot.lane.b32.xlu1 %v12917_v26, %s8748_s15  ;;  %7313 = vrot.lane.b32.xlu0 %v12925_v5, %s8748_s15 }
 0x9aa   : > { %v7680_v28 = vpop.permute.xlu1 %7679  ;;  %v7678_v37 = vpop.permute.xlu0 %7677 }
 0x9ab   : > { %7764 = vst.msk [vmem:[#allocation3 + $0xb0] sm:$0xff] %vm1753_vm7, %v7680_v28  ;;  %7763 = vst.msk [vmem:[#allocation3 + $0xa0] sm:$0xff] %vm1753_vm7, %v7678_v37  ;;  %v8122_v28 = vpack.c.bf16 %v8076_v41, %v8074_v57  ;;  %v7594_v41 = vld [vmem:[#allocation2 + $0x38] sm:$0xff] }
 0x9ac   : > { %7507 = vrot.lane.b32.xlu1 %v12829_v36, %s8749_s16  ;;  %7505 = vrot.lane.b32.xlu0 %v12831_v47, %s8749_s16 }
 0x9ae   : > { %v7872_v16 = vpop.permute.xlu1 %7871  ;;  %v7870_v22 = vpop.permute.xlu0 %7869 }
 0x9af   : > { %7956 = vst.msk [vmem:[#allocation3 + $0xb0] sm:$0xff] %vm1946_vm8, %v7872_v16  ;;  %7955 = vst.msk [vmem:[#allocation3 + $0xa0] sm:$0xff] %vm1946_vm8, %v7870_v22 }
 0x9b0   : > { %7699 = vrot.lane.b32.xlu1 %v12769_v6, %s8750_s24  ;;  %7697 = vrot.lane.b32.xlu0 %v12779_v13, %s8750_s24 }
 0x9b2   : > { %v6916_v5 = vpop.permute.xlu1 %6915  ;;  %v6914_v26 = vpop.permute.xlu0 %6913 }
 0x9b3   : > { %6998 = vst.msk [vmem:[#allocation3 + $0xd0] sm:$0xff] %vm980_vm3, %v6916_v5  ;;  %6997 = vst.msk [vmem:[#allocation3 + $0xc0] sm:$0xff] %vm980_vm3, %v6914_v26 }
 0x9b4   : > { %7891 = vrot.lane.b32.xlu1 %v7806_v44, %s8751_s30  ;;  %7889 = vrot.lane.b32.xlu0 %v7805_v3, %s8751_s30 }
 0x9b6   : > { %v7108_v34 = vpop.permute.xlu1 %7107  ;;  %v8063_v40 = vld [vmem:[#allocation3 + $0xb0] sm:$0xff]  ;;  %v7106_v18 = vpop.permute.xlu0 %7105  ;;  %v8061_v0 = vld [vmem:[#allocation3 + $0xa0] sm:$0xff] }
 0x9b7   : > { %7190 = vst.msk [vmem:[#allocation3 + $0xd0] sm:$0xff] %vm1173_vm4, %v7108_v34  ;;  %7189 = vst.msk [vmem:[#allocation3 + $0xc0] sm:$0xff] %vm1173_vm4, %v7106_v18  ;;  %v8115_v10 = vpack.c.bf16 %v8063_v40, %v8061_v0  ;;  %v13808_v34 = vld [vmem:[#allocation13_spill] sm:$0xff]  ;;  %v13810_v18 = vld [vmem:[#allocation15_spill] sm:$0xff] }
 0x9b8   : > { %6935 = vrot.lane.b32.xlu1 %v12829_v36, %s8745_s20  ;;  %6933 = vrot.lane.b32.xlu0 %v12831_v47, %s8745_s20 }
 0x9b9   : > { %8337 = vmatmul.mubr.bf16.gmra.mrb[80].mxu1 %v8115_v10 }
 0x9ba   : > { %v7300_v4 = vpop.permute.xlu1 %7299  ;;  %8620 = vmatprep.mubr.msk.bf16.mxu1 %vm442_vm0, %v8118_v55  ;;  %v7298_v42 = vpop.permute.xlu0 %7297  ;;  %v13363_v55 = vld [vmem:[#allocation2 + $0x171] sm:$0xff] }
 0x9bb   : > { %7382 = vst.msk [vmem:[#allocation3 + $0xd0] sm:$0xff] %vm1366_vm5, %v7300_v4  ;;  %7381 = vst.msk [vmem:[#allocation3 + $0xc0] sm:$0xff] %vm1366_vm5, %v7298_v42  ;;  %v13368_v4 = vld [vmem:[#allocation2 + $0x169] sm:$0xff] }
 0x9bc   : > { %7127 = vrot.lane.b32.xlu1 %v12769_v6, %s8747_s28  ;;  %7125 = vrot.lane.b32.xlu0 %v12779_v13, %s8747_s28  ;;  %v13799_v6 = vld [vmem:[#allocation6_spill] sm:$0xff]  ;;  %v13800_v13 = vld [vmem:[#allocation7_spill] sm:$0xff] }
 0x9be   : > { %v7492_v36 = vpop.permute.xlu1 %7491  ;;  %v7490_v47 = vpop.permute.xlu0 %7489 }
 0x9bf   : > { %7574 = vst.msk [vmem:[#allocation3 + $0xd0] sm:$0xff] %vm1559_vm6, %v7492_v36  ;;  %7573 = vst.msk [vmem:[#allocation3 + $0xc0] sm:$0xff] %vm1559_vm6, %v7490_v47  ;;  %v8078_v47 = vld [vmem:[#allocation3 + $0x128] sm:$0xff] }
 0x9c0   : > { %7319 = vrot.lane.b32.xlu1 %v7806_v44, %s8748_s15  ;;  %7317 = vrot.lane.b32.xlu0 %v7805_v3, %s8748_s15  ;;  %v13807_v3 = vld [vmem:[#allocation12_spill] sm:$0xff] }
 0x9c2   : > { %v7684_v2 = vpop.permute.xlu1 %7683  ;;  %v7682_v49 = vpop.permute.xlu0 %7681 }
 0x9c3   : > { %7766 = vst.msk [vmem:[#allocation3 + $0xd0] sm:$0xff] %vm1753_vm7, %v7684_v2  ;;  %7765 = vst.msk [vmem:[#allocation3 + $0xc0] sm:$0xff] %vm1753_vm7, %v7682_v49  ;;  %v8080_v2 = vld [vmem:[#allocation3 + $0x138] sm:$0xff] }
 0x9c4   : > { %7511 = vrot.lane.b32.xlu1 %v13799_v6, %s8749_s16  ;;  %7509 = vrot.lane.b32.xlu0 %v13800_v13, %s8749_s16 }
 0x9c6   : > { %v7876_v39 = vpop.permute.xlu1 %7875  ;;  %v7874_v58 = vpop.permute.xlu0 %7873 }
 0x9c7   : > { %7958 = vst.msk [vmem:[#allocation3 + $0xd0] sm:$0xff] %vm1946_vm8, %v7876_v39  ;;  %7957 = vst.msk [vmem:[#allocation3 + $0xc0] sm:$0xff] %vm1946_vm8, %v7874_v58  ;;  %v8124_v39 = vpack.c.bf16 %v8080_v2, %v8078_v47  ;;  %v6826_v58 = vld [vmem:[#allocation2 + $0xa] sm:$0xff] }
 0x9c8   : > { %7703 = vrot.lane.b32.xlu1 %v13801_v30, %s8750_s24  ;;  %7701 = vrot.lane.b32.xlu0 %v13802_v52, %s8750_s24 }
 0x9ca   : > { %v6920_v46 = vpop.permute.xlu1 %6919  ;;  %v6918_v25 = vpop.permute.xlu0 %6917 }
 0x9cb   : > { %7000 = vst.msk [vmem:[#allocation3 + $0xf0] sm:$0xff] %vm980_vm3, %v6920_v46  ;;  %6999 = vst.msk [vmem:[#allocation3 + $0xe0] sm:$0xff] %vm980_vm3, %v6918_v25 }
 0x9cc   : > { %7895 = vrot.lane.b32.xlu1 %v7808_v29, %s8751_s30  ;;  %7893 = vrot.lane.b32.xlu0 %v7807_v53, %s8751_s30 }
 0x9ce   : > { %v7112_v60 = vpop.permute.xlu1 %7111  ;;  %v8067_v12 = vld [vmem:[#allocation3 + $0xd0] sm:$0xff]  ;;  %v7110_v9 = vpop.permute.xlu0 %7109  ;;  %v8065_v21 = vld [vmem:[#allocation3 + $0xc0] sm:$0xff] }
 0x9cf   : > { %7192 = vst.msk [vmem:[#allocation3 + $0xf0] sm:$0xff] %vm1173_vm4, %v7112_v60  ;;  %7191 = vst.msk [vmem:[#allocation3 + $0xe0] sm:$0xff] %vm1173_vm4, %v7110_v9  ;;  %v8117_v11 = vpack.c.bf16 %v8067_v12, %v8065_v21  ;;  %v7018_v12 = vld [vmem:[#allocation2 + $0x20] sm:$0xff] }
 0x9d0   : > { %6939 = vrot.lane.b32.xlu1 %v13799_v6, %s8745_s20  ;;  %6937 = vrot.lane.b32.xlu0 %v13800_v13, %s8745_s20 }
 0x9d1   : > { %8345 = vmatmul.mubr.bf16.gmra.mrb[84].mxu1 %v8117_v11 }
 0x9d2   : > { %v7304_v38 = vpop.permute.xlu1 %7303  ;;  %8621 = vmatprep.mubr.msk.bf16.mxu1 %vm442_vm0, %v8120_v32  ;;  %v7302_v63 = vpop.permute.xlu0 %7301  ;;  %v7210_v32 = vld [vmem:[#allocation2 + $0x21] sm:$0xff] }
 0x9d3   : > { %7384 = vst.msk [vmem:[#allocation3 + $0xf0] sm:$0xff] %vm1366_vm5, %v7304_v38  ;;  %7383 = vst.msk [vmem:[#allocation3 + $0xe0] sm:$0xff] %vm1366_vm5, %v7302_v63  ;;  %v7209_v38 = vld [vmem:[#allocation2 + $0x19] sm:$0xff] }
 0x9d4   : > { %7131 = vrot.lane.b32.xlu1 %v13801_v30, %s8747_s28  ;;  %7129 = vrot.lane.b32.xlu0 %v13802_v52, %s8747_s28  ;;  %v6825_v52 = vld [vmem:[#allocation2 + $0x2] sm:$0xff] }
 0x9d6   : > { %v7496_v14 = vpop.permute.xlu1 %7495  ;;  %v7494_v43 = vpop.permute.xlu0 %7493 }
 0x9d7   : > { %7576 = vst.msk [vmem:[#allocation3 + $0xf0] sm:$0xff] %vm1559_vm6, %v7496_v14  ;;  %7575 = vst.msk [vmem:[#allocation3 + $0xe0] sm:$0xff] %vm1559_vm6, %v7494_v43  ;;  %v8082_v43 = vld [vmem:[#allocation3 + $0x148] sm:$0xff] }
 0x9d8   : > { %7323 = vrot.lane.b32.xlu1 %v7808_v29, %s8748_s15  ;;  %7321 = vrot.lane.b32.xlu0 %v7807_v53, %s8748_s15 }
 0x9da   : > { %v7688_v33 = vpop.permute.xlu1 %7687  ;;  %v7686_v23 = vpop.permute.xlu0 %7685 }
 0x9db   : > { %7768 = vst.msk [vmem:[#allocation3 + $0xf0] sm:$0xff] %vm1753_vm7, %v7688_v33  ;;  %7767 = vst.msk [vmem:[#allocation3 + $0xe0] sm:$0xff] %vm1753_vm7, %v7686_v23  ;;  %v8084_v33 = vld [vmem:[#allocation3 + $0x158] sm:$0xff] }
 0x9dc   : > { %7515 = vrot.lane.b32.xlu1 %v13803_v24, %s8749_s16  ;;  %7513 = vrot.lane.b32.xlu0 %v13804_v48, %s8749_s16 }
 0x9de   : > { %v7880_v50 = vpop.permute.xlu1 %7879  ;;  %v7878_v35 = vpop.permute.xlu0 %7877 }
 0x9df   : > { %7960 = vst.msk [vmem:[#allocation3 + $0xf0] sm:$0xff] %vm1946_vm8, %v7880_v50  ;;  %7959 = vst.msk [vmem:[#allocation3 + $0xe0] sm:$0xff] %vm1946_vm8, %v7878_v35  ;;  %v8126_v50 = vpack.c.bf16 %v8084_v33, %v8082_v43 }
 0x9e0   : > { %7707 = vrot.lane.b32.xlu1 %v13805_v31, %s8750_s24  ;;  %7705 = vrot.lane.b32.xlu0 %v13806_v7, %s8750_s24 }
 0x9e2   : > { %v6924_v19 = vpop.permute.xlu1 %6923  ;;  %v6922_v59 = vpop.permute.xlu0 %6921 }
 0x9e3   : > { %7002 = vst.msk [vmem:[#allocation3 + $0x110] sm:$0xff] %vm980_vm3, %v6924_v19  ;;  %7001 = vst.msk [vmem:[#allocation3 + $0x100] sm:$0xff] %vm980_vm3, %v6922_v59  ;;  %v7401_v19 = vld [vmem:[#allocation2 + $0x1a] sm:$0xff] }
 0x9e4   : > { %7899 = vrot.lane.b32.xlu1 %v7810_v45, %s8751_s30  ;;  %7897 = vrot.lane.b32.xlu0 %v7809_v15, %s8751_s30 }
 0x9e6   : > { %v7116_v20 = vpop.permute.xlu1 %7115  ;;  %v8071_v61 = vld [vmem:[#allocation3 + $0xf0] sm:$0xff]  ;;  %v7114_v17 = vpop.permute.xlu0 %7113  ;;  %v8069_v8 = vld [vmem:[#allocation3 + $0xe0] sm:$0xff] }
 0x9e7   : > { %7194 = vst.msk [vmem:[#allocation3 + $0x110] sm:$0xff] %vm1173_vm4, %v7116_v20  ;;  %7193 = vst.msk [vmem:[#allocation3 + $0x100] sm:$0xff] %vm1173_vm4, %v7114_v17  ;;  %v8119_v1 = vpack.c.bf16 %v8071_v61, %v8069_v8  ;;  %v13812_v20 = vld [vmem:[#allocation17_spill] sm:$0xff]  ;;  %v7593_v17 = vld [vmem:[#allocation2 + $0x30] sm:$0xff] }
 0x9e8   : > { %6943 = vrot.lane.b32.xlu1 %v13803_v24, %s8745_s20  ;;  %6941 = vrot.lane.b32.xlu0 %v13804_v48, %s8745_s20 }
 0x9e9   : > { %8353 = vmatmul.mubr.bf16.gmra.mrb[88].mxu1 %v8119_v1 }
 0x9ea   : > { %v7308_v37 = vpop.permute.xlu1 %7307  ;;  %8622 = vmatprep.mubr.msk.bf16.mxu1 %vm442_vm0, %v8122_v28  ;;  %v7306_v16 = vpop.permute.xlu0 %7305  ;;  %v7622_v28 = vld [vmem:[#allocation2 + $0x188] sm:$0xff] }
 0x9eb   : > { %7386 = vst.msk [vmem:[#allocation3 + $0x110] sm:$0xff] %vm1366_vm5, %v7308_v37  ;;  %7385 = vst.msk [vmem:[#allocation3 + $0x100] sm:$0xff] %vm1366_vm5, %v7306_v16  ;;  %v7621_v37 = vld [vmem:[#allocation2 + $0x180] sm:$0xff] }
 0x9ec   : > { %7135 = vrot.lane.b32.xlu1 %v13805_v31, %s8747_s28  ;;  %7133 = vrot.lane.b32.xlu0 %v13806_v7, %s8747_s28  ;;  %v7402_v7 = vld [vmem:[#allocation2 + $0x22] sm:$0xff] }
 0x9ee   : > { %v7500_v22 = vpop.permute.xlu1 %7499  ;;  %v7498_v5 = vpop.permute.xlu0 %7497 }
 0x9ef   : > { %7578 = vst.msk [vmem:[#allocation3 + $0x110] sm:$0xff] %vm1559_vm6, %v7500_v22  ;;  %7577 = vst.msk [vmem:[#allocation3 + $0x100] sm:$0xff] %vm1559_vm6, %v7498_v5  ;;  %v13427_v5 = vld [vmem:[#allocation2 + $0x39] sm:$0xff] }
 0x9f0   : > { %7327 = vrot.lane.b32.xlu1 %v7810_v45, %s8748_s15  ;;  %7325 = vrot.lane.b32.xlu0 %v7809_v15, %s8748_s15 }
 0x9f2   : > { %v7692_v26 = vpop.permute.xlu1 %7691  ;;  %v7690_v44 = vpop.permute.xlu0 %7689 }
 0x9f3   : > { %7770 = vst.msk [vmem:[#allocation3 + $0x110] sm:$0xff] %vm1753_vm7, %v7692_v26  ;;  %7769 = vst.msk [vmem:[#allocation3 + $0x100] sm:$0xff] %vm1753_vm7, %v7690_v44  ;;  %v13432_v26 = vld [vmem:[#allocation2 + $0x31] sm:$0xff] }
 0x9f4   : > { %7519 = vrot.lane.b32.xlu1 %v13807_v3, %s8749_s16  ;;  %7517 = vrot.lane.b32.xlu0 %v13808_v34, %s8749_s16 }
 0x9f6   : > { %v7884_v40 = vpop.permute.xlu1 %7883  ;;  %v7882_v56 = vpop.permute.xlu0 %7881 }
 0x9f7   : > { %7962 = vst.msk [vmem:[#allocation3 + $0x110] sm:$0xff] %vm1946_vm8, %v7884_v40  ;;  %7961 = vst.msk [vmem:[#allocation3 + $0x100] sm:$0xff] %vm1946_vm8, %v7882_v56  ;;  %v8088_v40 = vld [vmem:[#allocation3 + $0x178] sm:$0xff] }
 0x9f8   : > { %7711 = vrot.lane.b32.xlu1 %v13809_v62, %s8750_s24  ;;  %7709 = vrot.lane.b32.xlu0 %v13810_v18, %s8750_s24 }
 0x9fa   : > { %v6928_v0 = vpop.permute.xlu1 %6927  ;;  %v6926_v10 = vpop.permute.xlu0 %6925 }
 0x9fb   : > { %7004 = vst.msk [vmem:[#allocation3 + $0x130] sm:$0xff] %vm980_vm3, %v6928_v0  ;;  %7003 = vst.msk [vmem:[#allocation3 + $0x120] sm:$0xff] %vm980_vm3, %v6926_v10  ;;  %v13442_v0 = vld [vmem:[#allocation2 + $0x181] sm:$0xff] }
 0x9fc   : > { %7903 = vrot.lane.b32.xlu1 %v13363_v55, %s8751_s30  ;;  %7901 = vrot.lane.b32.xlu0 %v13368_v4, %s8751_s30 }
 0x9fe   : > { %v7120_v42 = vpop.permute.xlu1 %7119  ;;  %v8075_v36 = vld [vmem:[#allocation3 + $0x110] sm:$0xff]  ;;  %v7118_v49 = vpop.permute.xlu0 %7117  ;;  %v8073_v6 = vld [vmem:[#allocation3 + $0x100] sm:$0xff] }
 0x9ff   : > { %7196 = vst.msk [vmem:[#allocation3 + $0x130] sm:$0xff] %vm1173_vm4, %v7120_v42  ;;  %7195 = vst.msk [vmem:[#allocation3 + $0x120] sm:$0xff] %vm1173_vm4, %v7118_v49  ;;  %v8121_v13 = vpack.c.bf16 %v8075_v36, %v8073_v6 }
 0xa00   : > { %6755 = vrot.lane.b32.xlu1 %v7810_v45, %s8746_s21  ;;  %6753 = vrot.lane.b32.xlu0 %v7809_v15, %s8746_s21  ;;  %v13811_v15 = vld [vmem:[#allocation16_spill] sm:$0xff] }
 0xa01   : > { %8361 = vmatmul.mubr.bf16.gmra.mrb[92].mxu1 %v8121_v13 }
 0xa02   : > { %v7312_v30 = vpop.permute.xlu1 %7311  ;;  %8623 = vmatprep.mubr.msk.bf16.mxu1 %vm442_vm0, %v8124_v39  ;;  %v7310_v46 = vpop.permute.xlu0 %7309 }
 0xa03   : > { %7388 = vst.msk [vmem:[#allocation3 + $0x130] sm:$0xff] %vm1366_vm5, %v7312_v30  ;;  %7387 = vst.msk [vmem:[#allocation3 + $0x120] sm:$0xff] %vm1366_vm5, %v7310_v46  ;;  %v13471_v30 = vld [vmem:[%s13695_s12] ss:$0 sm:$0xff] }
 0xa04   : > { %6891 = vrot.lane.b32.xlu1 %v6826_v58, %s8745_s20  ;;  %6889 = vrot.lane.b32.xlu0 %v6825_v52, %s8745_s20 }
 0xa06   : > { %v7504_v25 = vpop.permute.xlu1 %7503  ;;  %v7502_v29 = vpop.permute.xlu0 %7501 }
 0xa07   : > { %7580 = vst.msk [vmem:[#allocation3 + $0x130] sm:$0xff] %vm1559_vm6, %v7504_v25  ;;  %7579 = vst.msk [vmem:[#allocation3 + $0x120] sm:$0xff] %vm1559_vm6, %v7502_v29 }
 0xa08   : > { %6947 = vrot.lane.b32.xlu1 %v13807_v3, %s8745_s20  ;;  %6945 = vrot.lane.b32.xlu0 %v13808_v34, %s8745_s20  ;;  %v8086_v34 = vld [vmem:[#allocation3 + $0x168] sm:$0xff] }
 0xa09   : > { %v8128_v42 = vpack.c.bf16 %v8088_v40, %v8086_v34 }
 0xa0a   : > { %v7696_v53 = vpop.permute.xlu1 %7695  ;;  %v7694_v60 = vpop.permute.xlu0 %7693 }
 0xa0b   : > { %7772 = vst.msk [vmem:[#allocation3 + $0x130] sm:$0xff] %vm1753_vm7, %v7696_v53  ;;  %7771 = vst.msk [vmem:[#allocation3 + $0x120] sm:$0xff] %vm1753_vm7, %v7694_v60  ;;  %v8090_v60 = vld [vmem:[#allocation3 + $0x188] sm:$0xff] }
 0xa0c   : > { %7083 = vrot.lane.b32.xlu1 %v7018_v12, %s8747_s28  ;;  %7081 = vrot.lane.b32.xlu0 %v7017_v51, %s8747_s28  ;;  %v8092_v12 = vld [vmem:[#allocation3 + $0x198] sm:$0xff] }
 0xa0e   : > { %v7888_v27 = vpop.permute.xlu1 %7887  ;;  %v7886_v9 = vpop.permute.xlu0 %7885 }
 0xa0f   : > { %7964 = vst.msk [vmem:[#allocation3 + $0x130] sm:$0xff] %vm1946_vm8, %v7888_v27  ;;  %7963 = vst.msk [vmem:[#allocation3 + $0x120] sm:$0xff] %vm1946_vm8, %v7886_v9 }
 0xa10   : > { %7139 = vrot.lane.b32.xlu1 %v13809_v62, %s8747_s28  ;;  %7137 = vrot.lane.b32.xlu0 %v13810_v18, %s8747_s28  ;;  %v13437_v62 = vld [vmem:[#allocation2 + $0x189] sm:$0xff] }
 0xa12   : > { %v6932_v21 = vpop.permute.xlu1 %6931  ;;  %v6930_v11 = vpop.permute.xlu0 %6929 }
 0xa13   : > { %7006 = vst.msk [vmem:[#allocation3 + $0x150] sm:$0xff] %vm980_vm3, %v6932_v21  ;;  %7005 = vst.msk [vmem:[#allocation3 + $0x140] sm:$0xff] %vm980_vm3, %v6930_v11 }
 0xa14   : > { %7275 = vrot.lane.b32.xlu1 %v7210_v32, %s8748_s15  ;;  %7273 = vrot.lane.b32.xlu0 %v7209_v38, %s8748_s15  ;;  %v8130_v38 = vpack.c.bf16 %v8092_v12, %v8090_v60 }
 0xa16   : > { %v7124_v63 = vpop.permute.xlu1 %7123  ;;  %v8079_v14 = vld [vmem:[#allocation3 + $0x130] sm:$0xff]  ;;  %v7122_v23 = vpop.permute.xlu0 %7121  ;;  %v8077_v24 = vld [vmem:[#allocation3 + $0x120] sm:$0xff] }
 0xa17   : > { %7198 = vst.msk [vmem:[#allocation3 + $0x150] sm:$0xff] %vm1173_vm4, %v7124_v63  ;;  %7197 = vst.msk [vmem:[#allocation3 + $0x140] sm:$0xff] %vm1173_vm4, %v7122_v23  ;;  %v8123_v48 = vpack.c.bf16 %v8079_v14, %v8077_v24  ;;  %v7404_v23 = vld [vmem:[#allocation2 + $0x3a] sm:$0xff]  ;;  %v7403_v24 = vld [vmem:[#allocation2 + $0x32] sm:$0xff] }
 0xa18   : > { %7331 = vrot.lane.b32.xlu1 %v13363_v55, %s8748_s15  ;;  %7329 = vrot.lane.b32.xlu0 %v13368_v4, %s8748_s15 }
 0xa19   : > { %8369 = vmatmul.mubr.bf16.gmra.mrb[96].mxu1 %v8123_v48 }
 0xa1a   : > { %v7316_v35 = vpop.permute.xlu1 %7315  ;;  %8624 = vmatprep.mubr.msk.bf16.mxu1 %vm442_vm0, %v8126_v50  ;;  %v7314_v31 = vpop.permute.xlu0 %7313 }
 0xa1b   : > { %7390 = vst.msk [vmem:[#allocation3 + $0x150] sm:$0xff] %vm1366_vm5, %v7316_v35  ;;  %7389 = vst.msk [vmem:[#allocation3 + $0x140] sm:$0xff] %vm1366_vm5, %v7314_v31  ;;  %v13813_v35 = vld [vmem:[#allocation18_spill] sm:$0xff] }
 0xa1c   : > { %7467 = vrot.lane.b32.xlu1 %v7402_v7, %s8749_s16  ;;  %7465 = vrot.lane.b32.xlu0 %v7401_v19, %s8749_s16 }
 0xa1e   : > { %v7508_v59 = vpop.permute.xlu1 %7507  ;;  %v7506_v45 = vpop.permute.xlu0 %7505 }
 0xa1f   : > { %7582 = vst.msk [vmem:[#allocation3 + $0x150] sm:$0xff] %vm1559_vm6, %v7508_v59  ;;  %7581 = vst.msk [vmem:[#allocation3 + $0x140] sm:$0xff] %vm1559_vm6, %v7506_v45  ;;  %v7595_v59 = vld [vmem:[#allocation2 + $0x48] sm:$0xff]  ;;  %v7624_v45 = vld [vmem:[#allocation2 + $0x1a0] sm:$0xff] }
 0xa20   : > { %7523 = vrot.lane.b32.xlu1 %v13811_v15, %s8749_s16  ;;  %7521 = vrot.lane.b32.xlu0 %v13812_v20, %s8749_s16 }
 0xa22   : > { %v7700_v61 = vpop.permute.xlu1 %7699  ;;  %v7698_v57 = vpop.permute.xlu0 %7697 }
 0xa23   : > { %7774 = vst.msk [vmem:[#allocation3 + $0x150] sm:$0xff] %vm1753_vm7, %v7700_v61  ;;  %7773 = vst.msk [vmem:[#allocation3 + $0x140] sm:$0xff] %vm1753_vm7, %v7698_v57 }
 0xa24   : > { %7659 = vrot.lane.b32.xlu1 %v7594_v41, %s8750_s24  ;;  %7657 = vrot.lane.b32.xlu0 %v7593_v17, %s8750_s24 }
 0xa26   : > { %v7892_v8 = vpop.permute.xlu1 %7891  ;;  %v7890_v1 = vpop.permute.xlu0 %7889 }
 0xa27   : > { %7966 = vst.msk [vmem:[#allocation3 + $0x150] sm:$0xff] %vm1946_vm8, %v7892_v8  ;;  %7965 = vst.msk [vmem:[#allocation3 + $0x140] sm:$0xff] %vm1946_vm8, %v7890_v1  ;;  %v8094_v1 = vld [vmem:[#allocation3 + $0x1a8] sm:$0xff] }
 0xa28   : > { %7715 = vrot.lane.b32.xlu1 %v7622_v28, %s8750_s24  ;;  %7713 = vrot.lane.b32.xlu0 %v7621_v37, %s8750_s24 }
 0xa2a   : > { %v6936_v16 = vpop.permute.xlu1 %6935  ;;  %v6934_v22 = vpop.permute.xlu0 %6933 }
 0xa2b   : > { %7008 = vst.msk [vmem:[#allocation3 + $0x170] sm:$0xff] %vm980_vm3, %v6936_v16  ;;  %7007 = vst.msk [vmem:[#allocation3 + $0x160] sm:$0xff] %vm980_vm3, %v6934_v22  ;;  %v7788_v22 = vld [vmem:[#allocation2 + $0x51] sm:$0xff] }
 0xa2c   : > { %7851 = vrot.lane.b32.xlu1 %v13427_v5, %s8751_s30  ;;  %7849 = vrot.lane.b32.xlu0 %v13432_v26, %s8751_s30 }
 0xa2e   : > { %v7128_v44 = vpop.permute.xlu1 %7127  ;;  %v8083_v3 = vld [vmem:[#allocation3 + $0x150] sm:$0xff]  ;;  %v7126_v56 = vpop.permute.xlu0 %7125  ;;  %v8081_v18 = vld [vmem:[#allocation3 + $0x140] sm:$0xff] }
 0xa2f   : > { %7200 = vst.msk [vmem:[#allocation3 + $0x170] sm:$0xff] %vm1173_vm4, %v7128_v44  ;;  %7199 = vst.msk [vmem:[#allocation3 + $0x160] sm:$0xff] %vm1173_vm4, %v7126_v56  ;;  %v8125_v10 = vpack.c.bf16 %v8083_v3, %v8081_v18  ;;  %v7787_v3 = vld [vmem:[#allocation2 + $0x49] sm:$0xff]  ;;  %v7816_v56 = vld [vmem:[#allocation2 + $0x1a1] sm:$0xff] }
 0xa30   : > { %7907 = vrot.lane.b32.xlu1 %v13437_v62, %s8751_s30  ;;  %7905 = vrot.lane.b32.xlu0 %v13442_v0, %s8751_s30  ;;  %v7815_v18 = vld [vmem:[#allocation2 + $0x199] sm:$0xff] }
 0xa31   : > { %8377 = vmatmul.mubr.bf16.gmra.mrb[100].mxu1 %v8125_v10 }
 0xa32   : > { %v7320_v36 = vpop.permute.xlu1 %7319  ;;  %8625 = vmatprep.mubr.msk.bf16.mxu1 %vm442_vm0, %v8128_v42  ;;  %v7318_v47 = vpop.permute.xlu0 %7317 }
 0xa33   : > { %7392 = vst.msk [vmem:[#allocation3 + $0x170] sm:$0xff] %vm1366_vm5, %v7320_v36  ;;  %7391 = vst.msk [vmem:[#allocation3 + $0x160] sm:$0xff] %vm1366_vm5, %v7318_v47 }
 0xa34   : > { %6759 = vrot.lane.b32.xlu1 %v13363_v55, %s8746_s21  ;;  %6757 = vrot.lane.b32.xlu0 %v13368_v4, %s8746_s21 }
 0xa36   : > { %v7512_v2 = vpop.permute.xlu1 %7511  ;;  %v7510_v49 = vpop.permute.xlu0 %7509 }
 0xa37   : > { %7584 = vst.msk [vmem:[#allocation3 + $0x170] sm:$0xff] %vm1559_vm6, %v7512_v2  ;;  %7583 = vst.msk [vmem:[#allocation3 + $0x160] sm:$0xff] %vm1559_vm6, %v7510_v49 }
 0xa38   : > { %6895 = vrot.lane.b32.xlu1 %v7402_v7, %s8745_s20  ;;  %6893 = vrot.lane.b32.xlu0 %v7401_v19, %s8745_s20  ;;  %v7596_v19 = vld [vmem:[#allocation2 + $0x50] sm:$0xff] }
 0xa3a   : > { %v7704_v6 = vpop.permute.xlu1 %7703  ;;  %v7702_v13 = vpop.permute.xlu0 %7701 }
 0xa3b   : > { %7776 = vst.msk [vmem:[#allocation3 + $0x170] sm:$0xff] %vm1753_vm7, %v7704_v6  ;;  %7775 = vst.msk [vmem:[#allocation3 + $0x160] sm:$0xff] %vm1753_vm7, %v7702_v13 }
 0xa3c   : > { %6951 = vrot.lane.b32.xlu1 %v13811_v15, %s8745_s20  ;;  %6949 = vrot.lane.b32.xlu0 %v13812_v20, %s8745_s20  ;;  %v7623_v20 = vld [vmem:[#allocation2 + $0x198] sm:$0xff] }
 0xa3e   : > { %v7896_v55 = vpop.permute.xlu1 %7895  ;;  %v7894_v4 = vpop.permute.xlu0 %7893 }
 0xa3f   : > { %7968 = vst.msk [vmem:[#allocation3 + $0x170] sm:$0xff] %vm1946_vm8, %v7896_v55  ;;  %7967 = vst.msk [vmem:[#allocation3 + $0x160] sm:$0xff] %vm1946_vm8, %v7894_v4 }
 0xa40   : > { %7087 = vrot.lane.b32.xlu1 %v7594_v41, %s8747_s28  ;;  %7085 = vrot.lane.b32.xlu0 %v7593_v17, %s8747_s28 }
 0xa42   : > { %v6940_v39 = vpop.permute.xlu1 %6939  ;;  %v6938_v58 = vpop.permute.xlu0 %6937 }
 0xa43   : > { %7010 = vst.msk [vmem:[#allocation3 + $0x190] sm:$0xff] %vm980_vm3, %v6940_v39  ;;  %7009 = vst.msk [vmem:[#allocation3 + $0x180] sm:$0xff] %vm980_vm3, %v6938_v58 }
 0xa44   : > { %7143 = vrot.lane.b32.xlu1 %v7622_v28, %s8747_s28  ;;  %7141 = vrot.lane.b32.xlu0 %v7621_v37, %s8747_s28  ;;  %v8314_v52 = vpop.f32.mrb[68].mxu1  ;;  %v8096_v28 = vld [vmem:[#allocation3 + $0x1b8] sm:$0xff] }
 0xa45   : > { %v8315_v46 = vadd.f32 %v13471_v30, %v8314_v52  ;;  %v8316_v25 = vpop.f32.mrb[69].mxu1  ;;  %v8132_v40 = vpack.c.bf16 %v8096_v28, %v8094_v1 }
 0xa46   : > { %v7132_v29 = vpop.permute.xlu1 %7131  ;;  %v8087_v53 = vld [vmem:[#allocation3 + $0x170] sm:$0xff]  ;;  %v7130_v51 = vpop.permute.xlu0 %7129  ;;  %v8085_v9 = vld [vmem:[#allocation3 + $0x160] sm:$0xff]  ;;  %v8100_v25 = vld [vmem:[#allocation3 + $0x1d8] sm:$0xff] }
 0xa47   : > { %7202 = vst.msk [vmem:[#allocation3 + $0x190] sm:$0xff] %vm1173_vm4, %v7132_v29  ;;  %v8317_v27 = vpop.f32.mrb[70].mxu1  ;;  %7201 = vst.msk [vmem:[#allocation3 + $0x180] sm:$0xff] %vm1173_vm4, %v7130_v51  ;;  %v8127_v32 = vpack.c.bf16 %v8087_v53, %v8085_v9 }
 0xa48   : > { %8430 = vst.msk [vmem:[%s13481_s22 + $0x20] sm:$0xff] %vm8425_vm12, %v8315_v46  ;;  %v8318_v21 = vadd.f32 %v13471_v30, %v8317_v27  ;;  %v8319_v11 = vpop.f32.mrb[71].mxu1  ;;  %7279 = vrot.lane.b32.xlu1 %v13427_v5, %s8748_s15  ;;  %7277 = vrot.lane.b32.xlu0 %v13432_v26, %s8748_s15  ;;  %v8098_v46 = vld [vmem:[#allocation3 + $0x1c8] sm:$0xff] }
 0xa49   : > { %8385 = vmatmul.mubr.bf16.gmra.mrb[104].mxu1 %v8127_v32  ;;  %v8134_v9 = vpack.c.bf16 %v8100_v25, %v8098_v46 }
 0xa4a   : > { %8431 = vst.msk [vmem:[%s13481_s22 + $0x28] sm:$0xff] %vm8425_vm12, %v8318_v21  ;;  %v7324_v63 = vpop.permute.xlu1 %7323  ;;  %8626 = vmatprep.mubr.msk.bf16.mxu1 %vm442_vm0, %v8130_v38  ;;  %v7322_v14 = vpop.permute.xlu0 %7321 }
 0xa4b   : > { %7394 = vst.msk [vmem:[#allocation3 + $0x190] sm:$0xff] %vm1366_vm5, %v7324_v63  ;;  %7393 = vst.msk [vmem:[#allocation3 + $0x180] sm:$0xff] %vm1366_vm5, %v7322_v14 }
 0xa4c   : > { %7335 = vrot.lane.b32.xlu1 %v13437_v62, %s8748_s15  ;;  %7333 = vrot.lane.b32.xlu0 %v13442_v0, %s8748_s15 }
 0xa4e   : > { %v7516_v43 = vpop.permute.xlu1 %7515  ;;  %v7514_v33 = vpop.permute.xlu0 %7513 }
 0xa4f   : > { %7586 = vst.msk [vmem:[#allocation3 + $0x190] sm:$0xff] %vm1559_vm6, %v7516_v43  ;;  %7585 = vst.msk [vmem:[#allocation3 + $0x180] sm:$0xff] %vm1559_vm6, %v7514_v33 }
 0xa50   : > { %7471 = vrot.lane.b32.xlu1 %v7404_v23, %s8749_s16  ;;  %7469 = vrot.lane.b32.xlu0 %v7403_v24, %s8749_s16 }
 0xa52   : > { %v7708_v48 = vpop.permute.xlu1 %7707  ;;  %v7706_v50 = vpop.permute.xlu0 %7705 }
 0xa53   : > { %7778 = vst.msk [vmem:[#allocation3 + $0x190] sm:$0xff] %vm1753_vm7, %v7708_v48  ;;  %7777 = vst.msk [vmem:[#allocation3 + $0x180] sm:$0xff] %vm1753_vm7, %v7706_v50 }
 0xa54   : > { %7527 = vrot.lane.b32.xlu1 %v12936_v54, %s8749_s16  ;;  %7525 = vrot.lane.b32.xlu0 %v13813_v35, %s8749_s16 }
 0xa56   : > { %v7900_v31 = vpop.permute.xlu1 %7899  ;;  %v7898_v7 = vpop.permute.xlu0 %7897 }
 0xa57   : > { %7970 = vst.msk [vmem:[#allocation3 + $0x190] sm:$0xff] %vm1946_vm8, %v7900_v31  ;;  %7969 = vst.msk [vmem:[#allocation3 + $0x180] sm:$0xff] %vm1946_vm8, %v7898_v7 }
 0xa58   : > { %7663 = vrot.lane.b32.xlu1 %v7596_v19, %s8750_s24  ;;  %7661 = vrot.lane.b32.xlu0 %v7595_v59, %s8750_s24 }
 0xa5a   : > { %v6944_v15 = vpop.permute.xlu1 %6943  ;;  %v6942_v54 = vpop.permute.xlu0 %6941 }
 0xa5b   : > { %7012 = vst.msk [vmem:[#allocation3 + $0x1b0] sm:$0xff] %vm980_vm3, %v6944_v15  ;;  %7011 = vst.msk [vmem:[#allocation3 + $0x1a0] sm:$0xff] %vm980_vm3, %v6942_v54 }
 0xa5c   : > { %7719 = vrot.lane.b32.xlu1 %v7624_v45, %s8750_s24  ;;  %7717 = vrot.lane.b32.xlu0 %v7623_v20, %s8750_s24  ;;  %v8322_v61 = vpop.f32.mrb[72].mxu1 }
 0xa5d   : > { %v8323_v57 = vadd.f32 %v13471_v30, %v8322_v61  ;;  %v8324_v41 = vpop.f32.mrb[73].mxu1 }
 0xa5e   : > { %v7136_v17 = vpop.permute.xlu1 %7135  ;;  %v8091_v8 = vld [vmem:[#allocation3 + $0x190] sm:$0xff]  ;;  %v7134_v37 = vpop.permute.xlu0 %7133  ;;  %v8089_v5 = vld [vmem:[#allocation3 + $0x180] sm:$0xff] }
 0xa5f   : > { %7204 = vst.msk [vmem:[#allocation3 + $0x1b0] sm:$0xff] %vm1173_vm4, %v7136_v17  ;;  %v8325_v16 = vpop.f32.mrb[74].mxu1  ;;  %7203 = vst.msk [vmem:[#allocation3 + $0x1a0] sm:$0xff] %vm1173_vm4, %v7134_v37  ;;  %v8129_v34 = vpack.c.bf16 %v8091_v8, %v8089_v5 }
 0xa60   : > { %8432 = vst.msk [vmem:[%s13481_s22 + $0x30] sm:$0xff] %vm8425_vm12, %v8323_v57  ;;  %v8326_v26 = vadd.f32 %v13471_v30, %v8325_v16  ;;  %v8327_v44 = vpop.f32.mrb[75].mxu1  ;;  %7855 = vrot.lane.b32.xlu1 %v7788_v22, %s8751_s30  ;;  %7853 = vrot.lane.b32.xlu0 %v7787_v3, %s8751_s30  ;;  %v8048_v3 = vld [vmem:[#allocation3 + $0x38] sm:$0xff] }
 0xa61   : > { %8393 = vmatmul.mubr.bf16.gmra.mrb[108].mxu1 %v8129_v34  ;;  %v8046_v44 = vld [vmem:[#allocation3 + $0x28] sm:$0xff] }
 0xa62   : > { %8433 = vst.msk [vmem:[%s13481_s22 + $0x38] sm:$0xff] %vm8425_vm12, %v8326_v26  ;;  %v7328_v62 = vpop.permute.xlu1 %7327  ;;  %8627 = vmatprep.mubr.msk.bf16.mxu1 %vm442_vm0, %v8132_v40  ;;  %v7326_v0 = vpop.permute.xlu0 %7325 }
 0xa63   : > { %7396 = vst.msk [vmem:[#allocation3 + $0x1b0] sm:$0xff] %vm1366_vm5, %v7328_v62  ;;  %7395 = vst.msk [vmem:[#allocation3 + $0x1a0] sm:$0xff] %vm1366_vm5, %v7326_v0 }
 0xa64   : > { %7911 = vrot.lane.b32.xlu1 %v7816_v56, %s8751_s30  ;;  %7909 = vrot.lane.b32.xlu0 %v7815_v18, %s8751_s30 }
 0xa66   : > { %v7520_v10 = vpop.permute.xlu1 %7519  ;;  %v7518_v42 = vpop.permute.xlu0 %7517 }
 0xa67   : > { %7588 = vst.msk [vmem:[#allocation3 + $0x1b0] sm:$0xff] %vm1559_vm6, %v7520_v10  ;;  %7587 = vst.msk [vmem:[#allocation3 + $0x1a0] sm:$0xff] %vm1559_vm6, %v7518_v42  ;;  %v8102_v10 = vld [vmem:[#allocation3 + $0x1e8] sm:$0xff]  ;;  %v8104_v42 = vld [vmem:[#allocation3 + $0x1f8] sm:$0xff] }
 0xa6a   : > { %v7712_v36 = vpop.permute.xlu1 %7711  ;;  %v7710_v47 = vpop.permute.xlu0 %7709 }
 0xa6b   : > { %7780 = vst.msk [vmem:[#allocation3 + $0x1b0] sm:$0xff] %vm1753_vm7, %v7712_v36  ;;  %7779 = vst.msk [vmem:[#allocation3 + $0x1a0] sm:$0xff] %vm1753_vm7, %v7710_v47  ;;  %v8108_v36 = vpack.c.bf16 %v8048_v3, %v8046_v44 }
 0xa6e   : > { %v7904_v2 = vpop.permute.xlu1 %7903  ;;  %v7902_v49 = vpop.permute.xlu0 %7901 }
 0xa6f   : > { %7972 = vst.msk [vmem:[#allocation3 + $0x1b0] sm:$0xff] %vm1946_vm8, %v7904_v2  ;;  %7971 = vst.msk [vmem:[#allocation3 + $0x1a0] sm:$0xff] %vm1946_vm8, %v7902_v49 }
 0xa72   : > { %v6756_v6 = vpop.permute.xlu1 %6755  ;;  %v6754_v13 = vpop.permute.xlu0 %6753 }
 0xa73   : > { %6822 = vst.msk [vmem:[#allocation3 + $0x1d0] sm:$0xff] %vm787_vm2, %v6756_v6  ;;  %6821 = vst.msk [vmem:[#allocation3 + $0x1c0] sm:$0xff] %vm787_vm2, %v6754_v13  ;;  %v8136_v13 = vpack.c.bf16 %v8104_v42, %v8102_v10 }
 0xa74   : > { %v8330_v55 = vpop.f32.mrb[76].mxu1 }
 0xa75   : > { %v8331_v4 = vadd.f32 %v13471_v30, %v8330_v55  ;;  %v8332_v39 = vpop.f32.mrb[77].mxu1 }
 0xa76   : > { %v6892_v58 = vpop.permute.xlu1 %6891  ;;  %v8095_v52 = vld [vmem:[#allocation3 + $0x1b0] sm:$0xff]  ;;  %v6890_v29 = vpop.permute.xlu0 %6889  ;;  %v8093_v60 = vld [vmem:[#allocation3 + $0x1a0] sm:$0xff] }
 0xa77   : > { %6986 = vst.msk [vmem:[#allocation3 + $0x10] sm:$0xff] %vm980_vm3, %v6892_v58  ;;  %v8333_v53 = vpop.f32.mrb[78].mxu1  ;;  %6985 = vst.msk [vmem:[#allocation3] sm:$0xff] %vm980_vm3, %v6890_v29  ;;  %v8131_v27 = vpack.c.bf16 %v8095_v52, %v8093_v60 }
 0xa78   : > { %8434 = vst.msk [vmem:[%s13481_s22 + $0x40] sm:$0xff] %vm8425_vm12, %v8331_v4  ;;  %v8334_v12 = vadd.f32 %v13471_v30, %v8333_v53  ;;  %v8335_v51 = vpop.f32.mrb[79].mxu1 }
 0xa79   : > { %8401 = vmatmul.mubr.bf16.gmra.mrb[112].mxu1 %v8131_v27 }
 0xa7a   : > { %8435 = vst.msk [vmem:[%s13481_s22 + $0x48] sm:$0xff] %vm8425_vm12, %v8334_v12  ;;  %v6948_v21 = vpop.permute.xlu1 %6947  ;;  %8628 = vmatprep.mubr.msk.bf16.mxu1 %vm442_vm0, %v8134_v9  ;;  %v6946_v11 = vpop.permute.xlu0 %6945 }
 0xa7b   : > { %7014 = vst.msk [vmem:[#allocation3 + $0x1d0] sm:$0xff] %vm980_vm3, %v6948_v21  ;;  %7013 = vst.msk [vmem:[#allocation3 + $0x1c0] sm:$0xff] %vm980_vm3, %v6946_v11 }
 0xa7e   : > { %v7084_v32 = vpop.permute.xlu1 %7083  ;;  %v7082_v38 = vpop.permute.xlu0 %7081 }
 0xa7f   : > { %7178 = vst.msk [vmem:[#allocation3 + $0x10] sm:$0xff] %vm1173_vm4, %v7084_v32  ;;  %7177 = vst.msk [vmem:[#allocation3] sm:$0xff] %vm1173_vm4, %v7082_v38 }
 0xa82   : > { %v7140_v63 = vpop.permute.xlu1 %7139  ;;  %v7138_v14 = vpop.permute.xlu0 %7137 }
 0xa83   : > { %7206 = vst.msk [vmem:[#allocation3 + $0x1d0] sm:$0xff] %vm1173_vm4, %v7140_v63  ;;  %7205 = vst.msk [vmem:[#allocation3 + $0x1c0] sm:$0xff] %vm1173_vm4, %v7138_v14 }
 0xa86   : > { %v7276_v43 = vpop.permute.xlu1 %7275  ;;  %v7274_v33 = vpop.permute.xlu0 %7273 }
 0xa87   : > { %7370 = vst.msk [vmem:[#allocation3 + $0x10] sm:$0xff] %vm1366_vm5, %v7276_v43  ;;  %7369 = vst.msk [vmem:[#allocation3] sm:$0xff] %vm1366_vm5, %v7274_v33 }
 0xa8a   : > { %v7332_v23 = vpop.permute.xlu1 %7331  ;;  %v7330_v24 = vpop.permute.xlu0 %7329 }
 0xa8b   : > { %7398 = vst.msk [vmem:[#allocation3 + $0x1d0] sm:$0xff] %vm1366_vm5, %v7332_v23  ;;  %7397 = vst.msk [vmem:[#allocation3 + $0x1c0] sm:$0xff] %vm1366_vm5, %v7330_v24 }
 0xa8c   : > { %v8338_v48 = vpop.f32.mrb[80].mxu1 }
 0xa8d   : > { %v8339_v50 = vadd.f32 %v13471_v30, %v8338_v48  ;;  %v8340_v35 = vpop.f32.mrb[81].mxu1 }
 0xa8e   : > { %v7468_v31 = vpop.permute.xlu1 %7467  ;;  %v7466_v7 = vpop.permute.xlu0 %7465 }
 0xa8f   : > { %7562 = vst.msk [vmem:[#allocation3 + $0x10] sm:$0xff] %vm1559_vm6, %v7468_v31  ;;  %v8341_v19 = vpop.f32.mrb[82].mxu1  ;;  %7561 = vst.msk [vmem:[#allocation3] sm:$0xff] %vm1559_vm6, %v7466_v7 }
 0xa90   : > { %8436 = vst.msk [vmem:[%s13481_s22 + $0x50] sm:$0xff] %vm8425_vm12, %v8339_v50  ;;  %v8342_v59 = vadd.f32 %v13471_v30, %v8341_v19  ;;  %v8343_v45 = vpop.f32.mrb[83].mxu1 }
 0xa92   : > { %8437 = vst.msk [vmem:[%s13481_s22 + $0x58] sm:$0xff] %vm8425_vm12, %v8342_v59  ;;  %v7524_v15 = vpop.permute.xlu1 %7523  ;;  %v7522_v20 = vpop.permute.xlu0 %7521 }
 0xa93   : > { %7590 = vst.msk [vmem:[#allocation3 + $0x1d0] sm:$0xff] %vm1559_vm6, %v7524_v15  ;;  %7589 = vst.msk [vmem:[#allocation3 + $0x1c0] sm:$0xff] %vm1559_vm6, %v7522_v20 }
 0xa96   : > { %v7660_v54 = vpop.permute.xlu1 %7659  ;;  %v7658_v61 = vpop.permute.xlu0 %7657 }
 0xa97   : > { %7754 = vst.msk [vmem:[#allocation3 + $0x10] sm:$0xff] %vm1753_vm7, %v7660_v54  ;;  %7753 = vst.msk [vmem:[#allocation3] sm:$0xff] %vm1753_vm7, %v7658_v61 }
 0xa9a   : > { %v7716_v57 = vpop.permute.xlu1 %7715  ;;  %v7714_v41 = vpop.permute.xlu0 %7713 }
 0xa9b   : > { %7782 = vst.msk [vmem:[#allocation3 + $0x1d0] sm:$0xff] %vm1753_vm7, %v7716_v57  ;;  %7781 = vst.msk [vmem:[#allocation3 + $0x1c0] sm:$0xff] %vm1753_vm7, %v7714_v41 }
 0xa9e   : > { %v7852_v17 = vpop.permute.xlu1 %7851  ;;  %v7850_v8 = vpop.permute.xlu0 %7849 }
 0xa9f   : > { %7946 = vst.msk [vmem:[#allocation3 + $0x10] sm:$0xff] %vm1946_vm8, %v7852_v17  ;;  %7945 = vst.msk [vmem:[#allocation3] sm:$0xff] %vm1946_vm8, %v7850_v8 }
 0xaa2   : > { %v7908_v1 = vpop.permute.xlu1 %7907  ;;  %v7906_v28 = vpop.permute.xlu0 %7905 }
 0xaa3   : > { %7974 = vst.msk [vmem:[#allocation3 + $0x1d0] sm:$0xff] %vm1946_vm8, %v7908_v1  ;;  %7973 = vst.msk [vmem:[#allocation3 + $0x1c0] sm:$0xff] %vm1946_vm8, %v7906_v28 }
 0xaa4   : > { %v8346_v37 = vpop.f32.mrb[84].mxu1 }
 0xaa5   : > { %v8347_v16 = vadd.f32 %v13471_v30, %v8346_v37  ;;  %v8348_v22 = vpop.f32.mrb[85].mxu1 }
 0xaa6   : > { %v6760_v5 = vpop.permute.xlu1 %6759  ;;  %v8043_v26 = vld [vmem:[#allocation3 + $0x10] sm:$0xff]  ;;  %v6758_v34 = vpop.permute.xlu0 %6757  ;;  %v8041_v56 = vld [vmem:[#allocation3] sm:$0xff] }
 0xaa7   : > { %6824 = vst.msk [vmem:[#allocation3 + $0x1f0] sm:$0xff] %vm787_vm2, %v6760_v5  ;;  %v8349_v40 = vpop.f32.mrb[86].mxu1  ;;  %6823 = vst.msk [vmem:[#allocation3 + $0x1e0] sm:$0xff] %vm787_vm2, %v6758_v34  ;;  %v8105_v0 = vpack.c.bf16 %v8043_v26, %v8041_v56 }
 0xaa8   : > { %8438 = vst.msk [vmem:[%s13481_s22 + $0x60] sm:$0xff] %vm8425_vm12, %v8347_v16  ;;  %v8350_v62 = vadd.f32 %v13471_v30, %v8349_v40  ;;  %v8351_v18 = vpop.f32.mrb[87].mxu1 }
 0xaa9   : > { %8297 = vmatmul.mubr.bf16.vlgmr.msra.gmra.mrb[128].mxu0 %v8105_v0 }
 0xaaa   : > { %8439 = vst.msk [vmem:[%s13481_s22 + $0x68] sm:$0xff] %vm8425_vm12, %v8350_v62  ;;  %v6896_v47 = vpop.permute.xlu1 %6895  ;;  %v8099_v2 = vld [vmem:[#allocation3 + $0x1d0] sm:$0xff]  ;;  %8615 = vmatprep.mubr.msk.bf16.mxu0 %vm442_vm0, %v8108_v36  ;;  %v6894_v49 = vpop.permute.xlu0 %6893  ;;  %v8097_v6 = vld [vmem:[#allocation3 + $0x1c0] sm:$0xff] }
 0xaab   : > { %6988 = vst.msk [vmem:[#allocation3 + $0x30] sm:$0xff] %vm980_vm3, %v6896_v47  ;;  %6987 = vst.msk [vmem:[#allocation3 + $0x20] sm:$0xff] %vm980_vm3, %v6894_v49  ;;  %v8133_v55 = vpack.c.bf16 %v8099_v2, %v8097_v6 }
 0xaad   : > { %8409 = vmatmul.mubr.bf16.gmra.mrb[116].mxu1 %v8133_v55 }
 0xaae   : > { %v6952_v4 = vpop.permute.xlu1 %6951  ;;  %v6950_v39 = vpop.permute.xlu0 %6949  ;;  %8629 = vmatprep.mubr.msk.bf16.mxu1 %vm442_vm0, %v8136_v13 }
 0xaaf   : > { %7016 = vst.msk [vmem:[#allocation3 + $0x1f0] sm:$0xff] %vm980_vm3, %v6952_v4  ;;  %7015 = vst.msk [vmem:[#allocation3 + $0x1e0] sm:$0xff] %vm980_vm3, %v6950_v39 }
 0xab2   : > { %v7088_v58 = vpop.permute.xlu1 %7087  ;;  %v7086_v52 = vpop.permute.xlu0 %7085 }
 0xab3   : > { %7180 = vst.msk [vmem:[#allocation3 + $0x30] sm:$0xff] %vm1173_vm4, %v7088_v58  ;;  %7179 = vst.msk [vmem:[#allocation3 + $0x20] sm:$0xff] %vm1173_vm4, %v7086_v52 }
 0xab6   : > { %v7144_v46 = vpop.permute.xlu1 %7143  ;;  %v7142_v25 = vpop.permute.xlu0 %7141 }
 0xab7   : > { %7208 = vst.msk [vmem:[#allocation3 + $0x1f0] sm:$0xff] %vm1173_vm4, %v7144_v46  ;;  %7207 = vst.msk [vmem:[#allocation3 + $0x1e0] sm:$0xff] %vm1173_vm4, %v7142_v25 }
 0xaba   : > { %v7280_v29 = vpop.permute.xlu1 %7279  ;;  %v7278_v53 = vpop.permute.xlu0 %7277 }
 0xabb   : > { %7372 = vst.msk [vmem:[#allocation3 + $0x30] sm:$0xff] %vm1366_vm5, %v7280_v29  ;;  %7371 = vst.msk [vmem:[#allocation3 + $0x20] sm:$0xff] %vm1366_vm5, %v7278_v53 }
 0xabc   : > { %v8354_v60 = vpop.f32.mrb[88].mxu1 }
 0xabd   : > { %v8355_v12 = vadd.f32 %v13471_v30, %v8354_v60  ;;  %v8356_v51 = vpop.f32.mrb[89].mxu1 }
 0xabe   : > { %v7336_v27 = vpop.permute.xlu1 %7335  ;;  %v7334_v9 = vpop.permute.xlu0 %7333 }
 0xabf   : > { %7400 = vst.msk [vmem:[#allocation3 + $0x1f0] sm:$0xff] %vm1366_vm5, %v7336_v27  ;;  %v8357_v21 = vpop.f32.mrb[90].mxu1  ;;  %7399 = vst.msk [vmem:[#allocation3 + $0x1e0] sm:$0xff] %vm1366_vm5, %v7334_v9 }
 0xac0   : > { %8440 = vst.msk [vmem:[%s13481_s22 + $0x70] sm:$0xff] %vm8425_vm12, %v8355_v12  ;;  %v8358_v11 = vadd.f32 %v13471_v30, %v8357_v21  ;;  %v8359_v32 = vpop.f32.mrb[91].mxu1 }
 0xac2   : > { %8441 = vst.msk [vmem:[%s13481_s22 + $0x78] sm:$0xff] %vm8425_vm12, %v8358_v11  ;;  %v7472_v38 = vpop.permute.xlu1 %7471  ;;  %v7470_v63 = vpop.permute.xlu0 %7469 }
 0xac3   : > { %7564 = vst.msk [vmem:[#allocation3 + $0x30] sm:$0xff] %vm1559_vm6, %v7472_v38  ;;  %7563 = vst.msk [vmem:[#allocation3 + $0x20] sm:$0xff] %vm1559_vm6, %v7470_v63 }
 0xac6   : > { %v7528_v14 = vpop.permute.xlu1 %7527  ;;  %v7526_v43 = vpop.permute.xlu0 %7525 }
 0xac7   : > { %7592 = vst.msk [vmem:[#allocation3 + $0x1f0] sm:$0xff] %vm1559_vm6, %v7528_v14  ;;  %7591 = vst.msk [vmem:[#allocation3 + $0x1e0] sm:$0xff] %vm1559_vm6, %v7526_v43 }
 0xaca   : > { %v7664_v33 = vpop.permute.xlu1 %7663  ;;  %v7662_v23 = vpop.permute.xlu0 %7661 }
 0xacb   : > { %7756 = vst.msk [vmem:[#allocation3 + $0x30] sm:$0xff] %vm1753_vm7, %v7664_v33  ;;  %7755 = vst.msk [vmem:[#allocation3 + $0x20] sm:$0xff] %vm1753_vm7, %v7662_v23 }
 0xace   : > { %v7720_v24 = vpop.permute.xlu1 %7719  ;;  %v7718_v48 = vpop.permute.xlu0 %7717 }
 0xacf   : > { %7784 = vst.msk [vmem:[#allocation3 + $0x1f0] sm:$0xff] %vm1753_vm7, %v7720_v24  ;;  %7783 = vst.msk [vmem:[#allocation3 + $0x1e0] sm:$0xff] %vm1753_vm7, %v7718_v48 }
 0xad2   : > { %v7856_v50 = vpop.permute.xlu1 %7855  ;;  %v7854_v35 = vpop.permute.xlu0 %7853 }
 0xad3   : > { %7948 = vst.msk [vmem:[#allocation3 + $0x30] sm:$0xff] %vm1946_vm8, %v7856_v50  ;;  %7947 = vst.msk [vmem:[#allocation3 + $0x20] sm:$0xff] %vm1946_vm8, %v7854_v35 }
 0xad4   : > { %v8362_v31 = vpop.f32.mrb[92].mxu1 }
 0xad5   : > { %v8363_v7 = vadd.f32 %v13471_v30, %v8362_v31  ;;  %v8364_v19 = vpop.f32.mrb[93].mxu1 }
 0xad6   : > { %v7912_v59 = vpop.permute.xlu1 %7911  ;;  %v7910_v45 = vpop.permute.xlu0 %7909 }
 0xad7   : > { %7976 = vst.msk [vmem:[#allocation3 + $0x1f0] sm:$0xff] %vm1946_vm8, %v7912_v59  ;;  %v8365_v15 = vpop.f32.mrb[94].mxu1  ;;  %7975 = vst.msk [vmem:[#allocation3 + $0x1e0] sm:$0xff] %vm1946_vm8, %v7910_v45 }
 0xad8   : > { %8442 = vst.msk [vmem:[%s13481_s22 + $0x80] sm:$0xff] %vm8425_vm12, %v8363_v7  ;;  %v8366_v20 = vadd.f32 %v13471_v30, %v8365_v15  ;;  %v8367_v54 = vpop.f32.mrb[95].mxu1 }
 0xada   : > { %8443 = vst.msk [vmem:[%s13481_s22 + $0x88] sm:$0xff] %vm8425_vm12, %v8366_v20  ;;  %v8047_v61 = vld [vmem:[#allocation3 + $0x30] sm:$0xff]  ;;  %v8045_v57 = vld [vmem:[#allocation3 + $0x20] sm:$0xff] }
 0xadb   : > { %v8107_v41 = vpack.c.bf16 %v8047_v61, %v8045_v57 }
 0xadd   : > { %8305 = vmatmul.mubr.bf16.gmra.mrb[132].mxu0 %v8107_v41 }
 0xade   : > { %v8103_v17 = vld [vmem:[#allocation3 + $0x1f0] sm:$0xff]  ;;  %v8101_v8 = vld [vmem:[#allocation3 + $0x1e0] sm:$0xff] }
 0xadf   : > { %v8135_v1 = vpack.c.bf16 %v8103_v17, %v8101_v8 }
 0xae1   : > { %8417 = vmatmul.mubr.bf16.gmra.mrb[120].mxu1 %v8135_v1 }
 0xaec   : > { %v8370_v28 = vpop.f32.mrb[96].mxu1 }
 0xaed   : > { %v8371_v37 = vadd.f32 %v13471_v30, %v8370_v28  ;;  %v8372_v16 = vpop.f32.mrb[97].mxu1 }
 0xaee   : > { %v8373_v22 = vpop.f32.mrb[98].mxu1 }
 0xaef   : > { %8444 = vst.msk [vmem:[%s13481_s22 + $0x90] sm:$0xff] %vm8425_vm12, %v8371_v37  ;;  %v8374_v5 = vadd.f32 %v13471_v30, %v8373_v22  ;;  %v8375_v26 = vpop.f32.mrb[99].mxu1 }
 0xaf1   : > { %8445 = vst.msk [vmem:[%s13481_s22 + $0x98] sm:$0xff] %vm8425_vm12, %v8374_v5 }
 0xb04   : > { %v8378_v44 = vpop.f32.mrb[100].mxu1 }
 0xb05   : > { %v8379_v3 = vadd.f32 %v13471_v30, %v8378_v44  ;;  %v8380_v34 = vpop.f32.mrb[101].mxu1 }
 0xb06   : > { %v8381_v40 = vpop.f32.mrb[102].mxu1 }
 0xb07   : > { %8446 = vst.msk [vmem:[%s13481_s22 + $0xa0] sm:$0xff] %vm8425_vm12, %v8379_v3  ;;  %v8382_v56 = vadd.f32 %v13471_v30, %v8381_v40  ;;  %v8383_v62 = vpop.f32.mrb[103].mxu1 }
 0xb09   : > { %8447 = vst.msk [vmem:[%s13481_s22 + $0xa8] sm:$0xff] %vm8425_vm12, %v8382_v56 }
 0xb1c   : > { %v8386_v18 = vpop.f32.mrb[104].mxu1 }
 0xb1d   : > { %v8387_v0 = vadd.f32 %v13471_v30, %v8386_v18  ;;  %v8388_v10 = vpop.f32.mrb[105].mxu1 }
 0xb1e   : > { %v8389_v42 = vpop.f32.mrb[106].mxu1 }
 0xb1f   : > { %8448 = vst.msk [vmem:[%s13481_s22 + $0xb0] sm:$0xff] %vm8425_vm12, %v8387_v0  ;;  %v8390_v36 = vadd.f32 %v13471_v30, %v8389_v42  ;;  %v8391_v47 = vpop.f32.mrb[107].mxu1 }
 0xb21   : > { %8449 = vst.msk [vmem:[%s13481_s22 + $0xb8] sm:$0xff] %vm8425_vm12, %v8390_v36 }
 0xb34   : > { %v8394_v2 = vpop.f32.mrb[108].mxu1 }
 0xb35   : > { %v8395_v49 = vadd.f32 %v13471_v30, %v8394_v2  ;;  %v8396_v6 = vpop.f32.mrb[109].mxu1 }
 0xb36   : > { %v8397_v13 = vpop.f32.mrb[110].mxu1 }
 0xb37   : > { %8450 = vst.msk [vmem:[%s13481_s22 + $0xc0] sm:$0xff] %vm8425_vm12, %v8395_v49  ;;  %v8398_v55 = vadd.f32 %v13471_v30, %v8397_v13  ;;  %v8399_v4 = vpop.f32.mrb[111].mxu1 }
 0xb39   : > { %8451 = vst.msk [vmem:[%s13481_s22 + $0xc8] sm:$0xff] %vm8425_vm12, %v8398_v55 }
 0xb4c   : > { %v8402_v39 = vpop.f32.mrb[112].mxu1 }
 0xb4d   : > { %v8403_v58 = vadd.f32 %v13471_v30, %v8402_v39  ;;  %v8404_v52 = vpop.f32.mrb[113].mxu1 }
 0xb4e   : > { %v8405_v46 = vpop.f32.mrb[114].mxu1 }
 0xb4f   : > { %8452 = vst.msk [vmem:[%s13481_s22 + $0xd0] sm:$0xff] %vm8425_vm12, %v8403_v58  ;;  %v8406_v25 = vadd.f32 %v13471_v30, %v8405_v46  ;;  %v8407_v29 = vpop.f32.mrb[115].mxu1 }
 0xb51   : > { %8453 = vst.msk [vmem:[%s13481_s22 + $0xd8] sm:$0xff] %vm8425_vm12, %v8406_v25 }
 0xb7c   : > { %v8298_v53 = vpop.f32.mrb[128].mxu0 }
 0xb7d   : > { %v8299_v60 = vadd.f32 %v13471_v30, %v8298_v53  ;;  %v8300_v12 = vpop.f32.mrb[129].mxu0 }
 0xb7e   : > { %v8301_v51 = vpop.f32.mrb[130].mxu0 }
 0xb7f   : > { %8426 = vst.msk [vmem:[%s13481_s22] sm:$0xff] %vm8425_vm12, %v8299_v60  ;;  %v8302_v27 = vadd.f32 %v13471_v30, %v8301_v51  ;;  %v8303_v9 = vpop.f32.mrb[131].mxu0 }
 0xb80   : > { %v8410_v21 = vpop.f32.mrb[116].mxu1 }
 0xb81   : > { %8427 = vst.msk [vmem:[%s13481_s22 + $0x8] sm:$0xff] %vm8425_vm12, %v8302_v27  ;;  %v8411_v11 = vadd.f32 %v13471_v30, %v8410_v21  ;;  %v8412_v32 = vpop.f32.mrb[117].mxu1 }
 0xb82   : > { %v8413_v38 = vpop.f32.mrb[118].mxu1 }
 0xb83   : > { %8454 = vst.msk [vmem:[%s13481_s22 + $0xe0] sm:$0xff] %vm8425_vm12, %v8411_v11  ;;  %v8414_v63 = vadd.f32 %v13471_v30, %v8413_v38  ;;  %v8415_v14 = vpop.f32.mrb[119].mxu1 }
 0xb85   : > { %8455 = vst.msk [vmem:[%s13481_s22 + $0xe8] sm:$0xff] %vm8425_vm12, %v8414_v63 }
 0xbb0   : > { %v8306_v43 = vpop.f32.mrb[132].mxu0 }
 0xbb1   : > { %v8307_v33 = vadd.f32 %v13471_v30, %v8306_v43  ;;  %v8308_v23 = vpop.f32.mrb[133].mxu0 }
 0xbb2   : > { %v8309_v24 = vpop.f32.mrb[134].mxu0 }
 0xbb3   : > { %8428 = vst.msk [vmem:[%s13481_s22 + $0x10] sm:$0xff] %vm8425_vm12, %v8307_v33  ;;  %v8310_v48 = vadd.f32 %v13471_v30, %v8309_v24  ;;  %v8311_v50 = vpop.f32.mrb[135].mxu0 }
 0xbb4   : > { %v8418_v35 = vpop.f32.mrb[120].mxu1 }
 0xbb5   : > { %8429 = vst.msk [vmem:[%s13481_s22 + $0x18] sm:$0xff] %vm8425_vm12, %v8310_v48  ;;  %v8419_v31 = vadd.f32 %v13471_v30, %v8418_v35  ;;  %v8420_v7 = vpop.f32.mrb[121].mxu1 }
 0xbb6   : > { %v8421_v19 = vpop.f32.mrb[122].mxu1 }
 0xbb7   : > { %8456 = vst.msk [vmem:[%s13481_s22 + $0xf0] sm:$0xff] %vm8425_vm12, %v8419_v31  ;;  %v8422_v59 = vadd.f32 %v13471_v30, %v8421_v19  ;;  %v8423_v45 = vpop.f32.mrb[123].mxu1 }
 0xbb9   : > { %8457 = vst.msk [vmem:[%s13481_s22 + $0xf8] sm:$0xff] %vm8425_vm12, %v8422_v59 }
 0xbba PF: > { %s23_s25 = sadd.s32 1, %s8741_s25  }
 0xbbb   : > { %p20_p4 = scmp.ge.s32.totalorder %s23_s25, 4  }
 0xbbd   :  { %22 = sbr.rel (!%p20_p4) target bundleno = 1 (0x1), region = 104 }

</bundles_post_ra>
